<compile_context>
chip_gen: v6e
topology: v6e:2x2x1
jax: 0.10.0
libtpu: 0.0.40
codegen_flags: <defaults>
</compile_context>

<pallas_src>
import functools

import jax
import jax.numpy as jnp
from jax.experimental import pallas as pl
from jax.experimental.pallas import tpu as pltpu

HIDDEN = 64
LEAKY_LEAKER = 0.2
NB_IMAGE_CHANNEL = 1
BN_EPS = 1e-5

_LAYER_CHANNELS = [
    (NB_IMAGE_CHANNEL, HIDDEN),
    (HIDDEN, HIDDEN * 2),
    (HIDDEN * 2, HIDDEN * 4),
    (HIDDEN * 4, HIDDEN * 8),
    (HIDDEN * 8, 1),
]
_STRIDES = [2, 2, 2, 2, 1]
_PADS = [1, 1, 1, 1, 0]
_USE_BN = [False, True, True, True, False]
_ACTS = ["leaky", "leaky", "leaky", "leaky", "sigmoid"]

_TM_MAX = 512           # row-tile cap (near HBM roofline, small VMEM footprint)
_TARGET_ROWS = 512      # target conv-output rows per grid step (fused layers)
_L1_PACK = 8            # output positions packed per matmul row in layer 1 (8*16=128)
_VMEM_BUDGET = 14 << 20  # stay under v5e's 16 MiB default scoped VMEM


# --------------------------------- tiling ---------------------------------- #
def _round_up(x, m):
    return (x + m - 1) // m * m


def _pow2_floor16(x):
    p = 16
    while p * 2 <= x:
        p *= 2
    return p


def _tile_rows(m, cap=_TM_MAX):
    """Row tile: <= cap, multiple of 16, >= 2 tiles whenever possible (megacore)."""
    cap = max(16, cap)
    tm = min(cap, _round_up(m, 16))
    if m >= 32 and _round_up(m, 16) <= cap:
        tm = _round_up(pl.cdiv(m, 2), 16)
    mp = _round_up(m, tm)
    return tm, mp


def _tile_rows_budget(m, k, c):
    """Row tile for (tm,k)x(k,c) matmul blocks that fits the scoped-VMEM budget."""
    fixed = 2 * k * c * 2                       # double-buffered bf16 weight block
    per_row = 2 * (k + c) * 2                   # double-buffered bf16 patch + out row
    cap = max(16, (_VMEM_BUDGET - fixed) // per_row)
    cap = min(_TM_MAX, _pow2_floor16(cap))
    return _tile_rows(m, cap=cap)


def _batch_tile(n, ho, wo, kin):
    """Images per grid step for the fused space-to-depth conv layers."""
    per_img = (ho + 1) * (wo + 1) * kin * 2          # bf16 bytes of one s2d image
    bt = max(1, _TARGET_ROWS // (ho * wo))           # ~512 output rows per tile
    bt = min(bt, max(1, (2 << 20) // per_img))       # <= 2 MiB input block
    bt = min(bt, max(1, n // 2))                     # >= 2 grid tiles when n >= 2
    return bt


# ----------------------------- Pallas kernels ------------------------------ #
def _matmul_leaky_kernel(p_ref, w_ref, o_ref):
    """Lane-dense (tm, 128) x (128, 512) MXU tile + LeakyReLU (layer 1, packed)."""
    x = jnp.dot(p_ref[...], w_ref[...], preferred_element_type=jnp.float32)
    o_ref[...] = jnp.where(x >= 0, x, LEAKY_LEAKER * x).astype(o_ref.dtype)


def _s2d_conv_stats_kernel(s_ref, w_ref, o_ref, stats_ref, *, ho, wo):
    """Fused 4x4/stride-2 conv on a space-to-depth block + BatchNorm partials.

    s_ref:     (bt, ho+1, wo+1, 4*cin)  bf16  padded, space-to-depth input
    w_ref:     (4, 4*cin, cout)         bf16  per-tap weight matrices
    o_ref:     (bt*ho*wo, cout)         bf16  conv output rows (image-major)
    stats_ref: (1, 2, cout)             f32   per-tile sum / sum-of-squares
    """
    bt = s_ref.shape[0]
    kin = s_ref.shape[3]
    cout = w_ref.shape[2]
    acc = jnp.zeros((bt * ho * wo, cout), jnp.float32)
    for t, (bi, bj) in enumerate(((0, 0), (0, 1), (1, 0), (1, 1))):
        tap = s_ref[:, bi:bi + ho, bj:bj + wo, :]          # (bt, ho, wo, kin)
        tap = tap.reshape(bt * ho * wo, kin)
        acc = acc + jnp.dot(tap, w_ref[t], preferred_element_type=jnp.float32)
    o_ref[...] = acc.astype(o_ref.dtype)
    s1 = jnp.sum(acc, axis=0, keepdims=True)               # (1, cout)
    s2 = jnp.sum(acc * acc, axis=0, keepdims=True)         # (1, cout)
    stats_ref[...] = jnp.concatenate([s1, s2], axis=0)[None]


def _matmul_stats_kernel(p_ref, w_ref, o_ref, stats_ref):
    """im2col matmul tile + BatchNorm partials (layer 4)."""
    x = jnp.dot(p_ref[...], w_ref[...], preferred_element_type=jnp.float32)
    o_ref[...] = x.astype(o_ref.dtype)
    s1 = jnp.sum(x, axis=0, keepdims=True)
    s2 = jnp.sum(x * x, axis=0, keepdims=True)
    stats_ref[...] = jnp.concatenate([s1, s2], axis=0)[None]


def _bn_leaky_kernel(x_ref, scale_ref, shift_ref, o_ref):
    """Apply precomputed BatchNorm scale/shift + LeakyReLU on one bf16 row tile."""
    x = x_ref[...].astype(jnp.float32) * scale_ref[...] + shift_ref[...]
    o_ref[...] = jnp.where(x >= 0, x, LEAKY_LEAKER * x).astype(o_ref.dtype)


def _logit_sigmoid_kernel(x_ref, w_ref, o_ref):
    """Final (tm, 8192) . (8192,) matvec as a VPU multiply + row-sum + sigmoid."""
    x = x_ref[...].astype(jnp.float32)
    w = w_ref[...].astype(jnp.float32)                 # (1, K), broadcast over rows
    z = jnp.sum(x * w, axis=1, keepdims=True)          # (tm, 1)
    o_ref[...] = jax.nn.sigmoid(z)


# --------------------------- pallas_call wrappers --------------------------- #
def conv1_leaky(patches_packed, w_packed):
    m, k = patches_packed.shape
    c = w_packed.shape[1]
    tm, mp = _tile_rows(m)
    if mp != m:
        patches_packed = jnp.pad(patches_packed, ((0, mp - m), (0, 0)))
    return pl.pallas_call(
        _matmul_leaky_kernel,
        grid=(mp // tm,),
        in_specs=[pl.BlockSpec((tm, k), lambda i: (i, 0)),
                  pl.BlockSpec((k, c), lambda i: (0, 0))],
        out_specs=pl.BlockSpec((tm, c), lambda i: (i, 0)),
        out_shape=jax.ShapeDtypeStruct((mp, c), jnp.bfloat16),
        compiler_params=pltpu.CompilerParams(dimension_semantics=("parallel",)),
    )(patches_packed, w_packed)


def s2d_conv_stats(s, w2, bt):
    n_pad, hop, wop, kin = s.shape
    ho, wo = hop - 1, wop - 1
    cout = w2.shape[2]
    nt = n_pad // bt
    rows = bt * ho * wo
    kern = functools.partial(_s2d_conv_stats_kernel, ho=ho, wo=wo)
    return pl.pallas_call(
        kern,
        grid=(nt,),
        in_specs=[pl.BlockSpec((bt, hop, wop, kin), lambda g: (g, 0, 0, 0)),
                  pl.BlockSpec((4, kin, cout), lambda g: (0, 0, 0))],
        out_specs=[pl.BlockSpec((rows, cout), lambda g: (g, 0)),
                   pl.BlockSpec((1, 2, cout), lambda g: (g, 0, 0))],
        out_shape=[jax.ShapeDtypeStruct((n_pad * ho * wo, cout), jnp.bfloat16),
                   jax.ShapeDtypeStruct((nt, 2, cout), jnp.float32)],
        compiler_params=pltpu.CompilerParams(dimension_semantics=("parallel",)),
    )(s, w2)


def matmul_stats(patches, w_mat):
    m, k = patches.shape
    c = w_mat.shape[1]
    tm, mp = _tile_rows_budget(m, k, c)
    if mp != m:
        # Padded zero rows add 0 to sum / sum-of-squares; stats divide by true M.
        patches = jnp.pad(patches, ((0, mp - m), (0, 0)))
    nt = mp // tm
    out, stats = pl.pallas_call(
        _matmul_stats_kernel,
        grid=(nt,),
        in_specs=[pl.BlockSpec((tm, k), lambda i: (i, 0)),
                  pl.BlockSpec((k, c), lambda i: (0, 0))],
        out_specs=[pl.BlockSpec((tm, c), lambda i: (i, 0)),
                   pl.BlockSpec((1, 2, c), lambda i: (i, 0, 0))],
        out_shape=[jax.ShapeDtypeStruct((mp, c), jnp.bfloat16),
                   jax.ShapeDtypeStruct((nt, 2, c), jnp.float32)],
        compiler_params=pltpu.CompilerParams(dimension_semantics=("parallel",)),
    )(patches, w_mat)
    return out, stats, tm


def bn_leaky_apply(conv_out, scale, shift, rows_per_tile):
    r, c = conv_out.shape
    assert r % rows_per_tile == 0
    return pl.pallas_call(
        _bn_leaky_kernel,
        grid=(r // rows_per_tile,),
        in_specs=[pl.BlockSpec((rows_per_tile, c), lambda i: (i, 0)),
                  pl.BlockSpec((1, c), lambda i: (0, 0)),
                  pl.BlockSpec((1, c), lambda i: (0, 0))],
        out_specs=pl.BlockSpec((rows_per_tile, c), lambda i: (i, 0)),
        out_shape=jax.ShapeDtypeStruct((r, c), jnp.bfloat16),
        compiler_params=pltpu.CompilerParams(dimension_semantics=("parallel",)),
    )(conv_out, scale, shift)


def logit_sigmoid(x_flat, w_vec):
    n, k = x_flat.shape
    tm = 8
    n_pad = _round_up(n, tm)
    if n_pad != n:
        x_flat = jnp.pad(x_flat, ((0, n_pad - n), (0, 0)))
    out = pl.pallas_call(
        _logit_sigmoid_kernel,
        grid=(n_pad // tm,),
        in_specs=[pl.BlockSpec((tm, k), lambda i: (i, 0)),
                  pl.BlockSpec((1, k), lambda i: (0, 0))],
        out_specs=pl.BlockSpec((tm, 1), lambda i: (i, 0)),
        out_shape=jax.ShapeDtypeStruct((n_pad, 1), jnp.float32),
        compiler_params=pltpu.CompilerParams(dimension_semantics=("parallel",)),
    )(x_flat, w_vec)
    return out[:n, 0]


# ------------------------------- glue (JAX) --------------------------------- #
def im2col_nhwc(x, k, s, p):
    """x: (N, H, W, C) -> patches (N*Ho*Wo, k*k*C); column order (kh, kw, ci)."""
    n, h, w, c = x.shape
    ho = (h + 2 * p - k) // s + 1
    wo = (w + 2 * p - k) // s + 1
    xp = jnp.pad(x, ((0, 0), (p, p), (p, p), (0, 0)))
    taps = []
    for kh in range(k):
        for kw in range(k):
            taps.append(xp[:, kh:kh + s * ho:s, kw:kw + s * wo:s, :])
    patches = jnp.concatenate(taps, axis=-1)
    return patches.reshape(n * ho * wo, k * k * c), ho, wo


def _space_to_depth_pad(x):
    """NHWC (n,h,w,c) -> padded space-to-depth (n, h/2+1, w/2+1, 4c), order (dr,dc,c)."""
    n, h, w, c = x.shape
    ho, wo = h // 2, w // 2
    xp = jnp.pad(x, ((0, 0), (1, 1), (1, 1), (0, 0)))
    s = xp.reshape(n, ho + 1, 2, wo + 1, 2, c)
    s = jnp.transpose(s, (0, 1, 3, 2, 4, 5))
    return s.reshape(n, ho + 1, wo + 1, 4 * c)


def _bn_scale_shift(stats, count, gamma, beta):
    """Finalize BatchNorm over the true row count; tiny (C,)-sized XLA work."""
    s1 = jnp.sum(stats[:, 0, :], axis=0)
    s2 = jnp.sum(stats[:, 1, :], axis=0)
    mean = s1 / count
    var = s2 / count - mean * mean              # biased train-mode variance
    inv = gamma * jax.lax.rsqrt(var + BN_EPS)
    scale = inv.reshape(1, -1)
    shift = (beta - mean * inv).reshape(1, -1)
    return scale, shift


def init_params(key):
    """Deterministic synthetic weights (DCGAN-style init: N(0, 0.02)) + prepped forms."""
    params = []
    for idx, (cin, cout) in enumerate(_LAYER_CHANNELS):
        key, wk, gk = jax.random.split(key, 3)
        w = 0.02 * jax.random.normal(wk, (cout, cin, 4, 4), jnp.float32)   # OIHW
        gamma = 1.0 + 0.02 * jax.random.normal(gk, (cout,), jnp.float32)
        beta = jnp.zeros((cout,), jnp.float32)
        p = {"w": w, "gamma": gamma, "beta": beta}
        wt = jnp.transpose(w, (2, 3, 1, 0))                                # (kh,kw,ci,co)
        if idx == 0:
            # Block-diagonal packed weight: 8 output positions per matmul row.
            wm = wt.reshape(16 * cin, cout).astype(jnp.bfloat16)
            wp = jnp.zeros((_L1_PACK * 16 * cin, _L1_PACK * cout), jnp.bfloat16)
            for q in range(_L1_PACK):
                wp = wp.at[q * 16 * cin:(q + 1) * 16 * cin,
                           q * cout:(q + 1) * cout].set(wm)
            p["w_pack"] = wp
        elif idx in (1, 2):
            # Per-tap (bi,bj) space-to-depth weights: (4, 4*cin, cout), f = (dr,dc,ci).
            w6 = wt.reshape(2, 2, 2, 2, cin, cout)        # (bi, dr, bj, dc, ci, co)
            w6 = jnp.transpose(w6, (0, 2, 1, 3, 4, 5))    # (bi, bj, dr, dc, ci, co)
            p["w_s2d"] = w6.reshape(4, 4 * cin, cout).astype(jnp.bfloat16)
        elif idx == 3:
            p["w_mat"] = wt.reshape(16 * cin, cout).astype(jnp.bfloat16)
        else:
            p["w_vec"] = jnp.transpose(wt.reshape(16 * cin, cout)).astype(jnp.bfloat16)
        params.append(p)
    return params


def discriminator_forward(x, params):
    """Pallas implementation of Discriminator.forward (input NCHW, like PyTorch)."""
    n = x.shape[0]
    cur = jnp.transpose(x, (0, 2, 3, 1)).astype(jnp.bfloat16)   # NHWC bf16

    # --- layer 1: conv(1->64, 4, s2, p1) + LeakyReLU (packed lane-dense matmul).
    p1 = params[0]
    patches, ho, wo = im2col_nhwc(cur, 4, 2, 1)                 # (M, 16)
    m = patches.shape[0]
    pk = patches.reshape(m // _L1_PACK, 16 * _L1_PACK)          # (M/8, 128)
    out = conv1_leaky(pk, p1["w_pack"])                         # (Mp/8, 512) bf16
    out = out[: m // _L1_PACK].reshape(m, HIDDEN)
    cur = out.reshape(n, ho, wo, HIDDEN)

    # --- layers 2-4: conv + BatchNorm (train-mode, two-pass) + LeakyReLU.
    for li in (1, 2, 3):
        p = params[li]
        cout = p["gamma"].shape[0]
        hi = cur.shape[1]
        ho = wo = hi // 2
        m_true = n * ho * wo
        if li in (1, 2):
            # Fused space-to-depth conv kernel (no im2col materialization).
            kin = 4 * cur.shape[-1]
            bt = _batch_tile(n, ho, wo, kin)
            n_pad = _round_up(n, bt)
            xin = cur if n_pad == n else jnp.pad(
                cur, ((0, n_pad - n), (0, 0), (0, 0), (0, 0)))
            s = _space_to_depth_pad(xin)
            conv_out, stats = s2d_conv_stats(s, p["w_s2d"], bt)
            rows_tile = bt * ho * wo
        else:
            # Layer 4: tiny spatial extent; keep the im2col matmul path.
            patches, ho, wo = im2col_nhwc(cur, 4, 2, 1)
            conv_out, stats, rows_tile = matmul_stats(patches, p["w_mat"])
        scale, shift = _bn_scale_shift(stats, m_true, p["gamma"], p["beta"])
        out = bn_leaky_apply(conv_out, scale, shift, rows_tile)
        cur = out[:m_true].reshape(n, ho, wo, cout)

    # --- layer 5: conv(512->1, 4, s1, p0) on a 4x4 map == matvec over 8192 feats.
    p5 = params[4]
    logits_in = cur.reshape(n, 4 * 4 * HIDDEN * 8)
    out = logit_sigmoid(logits_in, p5["w_vec"])
    # final feature map is (N, 1, 1, 1): .view(-1, 1).squeeze(1) -> (N,)
    return out.astype(jnp.float32)


# ---------------------------- pure-JAX reference ----------------------------- #
def reference_forward(x, params):
    cur = x
    for p, s, pad, bn, act in zip(params, _STRIDES, _PADS, _USE_BN, _ACTS):
        cur = jax.lax.conv_general_dilated(
            cur, p["w"], (s, s), [(pad, pad), (pad, pad)],
            dimension_numbers=("NCHW", "OIHW", "NCHW"))
        if bn:
            mu = jnp.mean(cur, axis=(0, 2, 3), keepdims=True)
            var = jnp.mean(jnp.square(cur - mu), axis=(0, 2, 3), keepdims=True)
            cur = (cur - mu) * jax.lax.rsqrt(var + BN_EPS)
            cur = cur * p["gamma"].reshape(1, -1, 1, 1) + p["beta"].reshape(1, -1, 1, 1)
        if act == "leaky":
            cur = jnp.where(cur >= 0, cur, LEAKY_LEAKER * cur)
        else:
            cur = jax.nn.sigmoid(cur)
    return cur.reshape(-1, 1).squeeze(1)


if __name__ == "__main__":
    key = jax.random.PRNGKey(0)
    kx, kp = jax.random.split(key)
    # DCGAN discriminator requires 64x64 spatial input (64 -> 32 -> 16 -> 8 -> 4 -> 1).
    x = jax.random.normal(kx, (2, NB_IMAGE_CHANNEL, 64, 64), jnp.float32)
    params = init_params(kp)

    fwd = jax.jit(discriminator_forward)
    ref_fwd = jax.jit(reference_forward)

    out = jax.block_until_ready(fwd(x, params))
    ref = jax.block_until_ready(ref_fwd(x, params))

    assert out.shape == (2,), out.shape
    # bf16 activations/weights (f32 accumulation) -> relaxed tolerance vs f32 reference.
    assert jnp.allclose(out, ref, atol=5e-2, rtol=5e-2), (out, ref)
    print("KERNEL_OK")
</pallas_src>

<mosaic_0001>
module attributes {stable_mosaic.version = 11 : i64} {
  func.func @_matmul_leaky_kernel(%arg0: i32, %arg1: memref<128x128xbf16, #tpu.memory_space<vmem>>, %arg2: memref<128x512xbf16, #tpu.memory_space<vmem>>, %arg3: memref<128x512xbf16, #tpu.memory_space<vmem>>) attributes {dimension_semantics = [#tpu.dimension_semantics<parallel>], iteration_bounds = array<i64: 2>, scalar_prefetch = 0 : i64, scratch_operands = 0 : i64, tpu.core_type = #tpu.core_type<tc>, window_params = [{transform_indices = @transform_0, window_bounds = array<i64: 128, 128>}, {pipeline_mode = #tpu.pipeline_mode<synchronous>, transform_indices = @transform_1, window_bounds = array<i64: 128, 512>}, {transform_indices = @transform_2, window_bounds = array<i64: 128, 512>}]} {
    %c0 = arith.constant 0 : index
    %c0_0 = arith.constant 0 : index
    %0 = vector.load %arg1[%c0, %c0_0] : memref<128x128xbf16, #tpu.memory_space<vmem>>, vector<128x128xbf16>
    %c0_1 = arith.constant 0 : index
    %c0_2 = arith.constant 0 : index
    %1 = vector.load %arg2[%c0_1, %c0_2] : memref<128x512xbf16, #tpu.memory_space<vmem>>, vector<128x512xbf16>
    %cst = arith.constant dense<0.000000e+00> : vector<128x512xf32>
    %2 = tpu.matmul %0, %1, %cst {dimension_numbers = #tpu.dot_dimension_numbers<[1], [0], [0], [1], [0, 0, 1, 1], [], []>} : vector<128x128xbf16>, vector<128x512xbf16>, vector<128x512xf32> -> vector<128x512xf32>
    %cst_3 = arith.constant 0.000000e+00 : f32
    %3 = vector.broadcast %cst_3 : f32 to vector<128x512xf32>
    %4 = arith.cmpf oge, %2, %3 : vector<128x512xf32>
    %cst_4 = arith.constant 2.000000e-01 : f32
    %5 = vector.broadcast %cst_4 : f32 to vector<128x512xf32>
    %6 = arith.mulf %5, %2 : vector<128x512xf32>
    %7 = arith.select %4, %2, %6 : vector<128x512xi1>, vector<128x512xf32>
    %8 = arith.truncf %7 : vector<128x512xf32> to vector<128x512xbf16>
    %c0_5 = arith.constant 0 : index
    %c0_6 = arith.constant 0 : index
    %9 = vector.load %arg3[%c0_5, %c0_6] : memref<128x512xbf16, #tpu.memory_space<vmem>>, vector<128x512xbf16>
    tpu.vector_store %arg3[%c0_5, %c0_6], %8 {strides = array<i32>} : memref<128x512xbf16, #tpu.memory_space<vmem>>, vector<128x512xbf16>,
    return
  }
  func.func @transform_0(%arg0: i32) -> (i32, i32) {
    %c0_i32 = arith.constant 0 : i32
    %c0_i32_0 = arith.constant 0 : i32
    return %arg0, %c0_i32 : i32, i32
  }
  func.func @transform_1(%arg0: i32) -> (i32, i32) {
    %c0_i32 = arith.constant 0 : i32
    %c0_i32_0 = arith.constant 0 : i32
    %c0_i32_1 = arith.constant 0 : i32
    return %c0_i32, %c0_i32_0 : i32, i32
  }
  func.func @transform_2(%arg0: i32) -> (i32, i32) {
    %c0_i32 = arith.constant 0 : i32
    %c0_i32_0 = arith.constant 0 : i32
    return %arg0, %c0_i32 : i32, i32
  }
}

module attributes {stable_mosaic.version = 11 : i64} {
  func.func @_s2d_conv_stats_kernel(%arg0: i32, %arg1: memref<1x17x17x256xbf16, #tpu.memory_space<vmem>>, %arg2: memref<4x256x128xbf16, #tpu.memory_space<vmem>>, %arg3: memref<256x128xbf16, #tpu.memory_space<vmem>>, %arg4: memref<1x2x128xf32, #tpu.memory_space<vmem>>) attributes {dimension_semantics = [#tpu.dimension_semantics<parallel>], iteration_bounds = array<i64: 2>, scalar_prefetch = 0 : i64, scratch_operands = 0 : i64, tpu.core_type = #tpu.core_type<tc>, window_params = [{transform_indices = @transform_0, window_bounds = array<i64: 1, 17, 17, 256>}, {pipeline_mode = #tpu.pipeline_mode<synchronous>, transform_indices = @transform_1, window_bounds = array<i64: 4, 256, 128>}, {transform_indices = @transform_2, window_bounds = array<i64: 256, 128>}, {transform_indices = @transform_3, window_bounds = array<i64: 1, 2, 128>}]} {
    %cst = arith.constant 0.000000e+00 : f32
    %0 = vector.broadcast %cst : f32 to vector<256x128xf32>
    %c0 = arith.constant 0 : index
    %c0_0 = arith.constant 0 : index
    %c0_1 = arith.constant 0 : index
    %c0_2 = arith.constant 0 : index
    %1 = vector.load %arg1[%c0, %c0_0, %c0_1, %c0_2] : memref<1x17x17x256xbf16, #tpu.memory_space<vmem>>, vector<1x16x16x256xbf16>
    %2 = vector.shape_cast %1 : vector<1x16x16x256xbf16> to vector<256x256xbf16>
    %c0_3 = arith.constant 0 : index
    %c0_4 = arith.constant 0 : index
    %c0_5 = arith.constant 0 : index
    %3 = vector.load %arg2[%c0_3, %c0_4, %c0_5] : memref<4x256x128xbf16, #tpu.memory_space<vmem>>, vector<1x256x128xbf16>
    %4 = vector.shape_cast %3 : vector<1x256x128xbf16> to vector<256x128xbf16>
    %cst_6 = arith.constant dense<0.000000e+00> : vector<256x128xf32>
    %5 = tpu.matmul %2, %4, %cst_6 {dimension_numbers = #tpu.dot_dimension_numbers<[1], [0], [0], [1], [0, 0, 1, 1], [], []>} : vector<256x256xbf16>, vector<256x128xbf16>, vector<256x128xf32> -> vector<256x128xf32>
    %6 = arith.addf %0, %5 : vector<256x128xf32>
    %c0_7 = arith.constant 0 : index
    %c0_8 = arith.constant 0 : index
    %c1 = arith.constant 1 : index
    %c0_9 = arith.constant 0 : index
    %7 = vector.load %arg1[%c0_7, %c0_8, %c1, %c0_9] : memref<1x17x17x256xbf16, #tpu.memory_space<vmem>>, vector<1x16x16x256xbf16>
    %8 = vector.shape_cast %7 : vector<1x16x16x256xbf16> to vector<256x256xbf16>
    %c1_10 = arith.constant 1 : index
    %c0_11 = arith.constant 0 : index
    %c0_12 = arith.constant 0 : index
    %9 = vector.load %arg2[%c1_10, %c0_11, %c0_12] : memref<4x256x128xbf16, #tpu.memory_space<vmem>>, vector<1x256x128xbf16>
    %10 = vector.shape_cast %9 : vector<1x256x128xbf16> to vector<256x128xbf16>
    %cst_13 = arith.constant dense<0.000000e+00> : vector<256x128xf32>
    %11 = tpu.matmul %8, %10, %cst_13 {dimension_numbers = #tpu.dot_dimension_numbers<[1], [0], [0], [1], [0, 0, 1, 1], [], []>} : vector<256x256xbf16>, vector<256x128xbf16>, vector<256x128xf32> -> vector<256x128xf32>
    %12 = arith.addf %6, %11 : vector<256x128xf32>
    %c0_14 = arith.constant 0 : index
    %c1_15 = arith.constant 1 : index
    %c0_16 = arith.constant 0 : index
    %c0_17 = arith.constant 0 : index
    %13 = vector.load %arg1[%c0_14, %c1_15, %c0_16, %c0_17] : memref<1x17x17x256xbf16, #tpu.memory_space<vmem>>, vector<1x16x16x256xbf16>
    %14 = vector.shape_cast %13 : vector<1x16x16x256xbf16> to vector<256x256xbf16>
    %c2 = arith.constant 2 : index
    %c0_18 = arith.constant 0 : index
    %c0_19 = arith.constant 0 : index
    %15 = vector.load %arg2[%c2, %c0_18, %c0_19] : memref<4x256x128xbf16, #tpu.memory_space<vmem>>, vector<1x256x128xbf16>
    %16 = vector.shape_cast %15 : vector<1x256x128xbf16> to vector<256x128xbf16>
    %cst_20 = arith.constant dense<0.000000e+00> : vector<256x128xf32>
    %17 = tpu.matmul %14, %16, %cst_20 {dimension_numbers = #tpu.dot_dimension_numbers<[1], [0], [0], [1], [0, 0, 1, 1], [], []>} : vector<256x256xbf16>, vector<256x128xbf16>, vector<256x128xf32> -> vector<256x128xf32>
    %18 = arith.addf %12, %17 : vector<256x128xf32>
    %c0_21 = arith.constant 0 : index
    %c1_22 = arith.constant 1 : index
    %c1_23 = arith.constant 1 : index
    %c0_24 = arith.constant 0 : index
    %19 = vector.load %arg1[%c0_21, %c1_22, %c1_23, %c0_24] : memref<1x17x17x256xbf16, #tpu.memory_space<vmem>>, vector<1x16x16x256xbf16>
    %20 = vector.shape_cast %19 : vector<1x16x16x256xbf16> to vector<256x256xbf16>
    %c3 = arith.constant 3 : index
    %c0_25 = arith.constant 0 : index
    %c0_26 = arith.constant 0 : index
    %21 = vector.load %arg2[%c3, %c0_25, %c0_26] : memref<4x256x128xbf16, #tpu.memory_space<vmem>>, vector<1x256x128xbf16>
    %22 = vector.shape_cast %21 : vector<1x256x128xbf16> to vector<256x128xbf16>
    %cst_27 = arith.constant dense<0.000000e+00> : vector<256x128xf32>
    %23 = tpu.matmul %20, %22, %cst_27 {dimension_numbers = #tpu.dot_dimension_numbers<[1], [0], [0], [1], [0, 0, 1, 1], [], []>} : vector<256x256xbf16>, vector<256x128xbf16>, vector<256x128xf32> -> vector<256x128xf32>
    %24 = arith.addf %18, %23 : vector<256x128xf32>
    %25 = arith.truncf %24 : vector<256x128xf32> to vector<256x128xbf16>
    %c0_28 = arith.constant 0 : index
    %c0_29 = arith.constant 0 : index
    %26 = vector.load %arg3[%c0_28, %c0_29] : memref<256x128xbf16, #tpu.memory_space<vmem>>, vector<256x128xbf16>
    tpu.vector_store %arg3[%c0_28, %c0_29], %25 {strides = array<i32>} : memref<256x128xbf16, #tpu.memory_space<vmem>>, vector<256x128xbf16>,
    %cst_30 = arith.constant dense<0.000000e+00> : vector<128xf32>
    %27 = vector.multi_reduction <add>, %24, %cst_30 [0] : vector<256x128xf32> to vector<128xf32>
    %28 = vector.shape_cast %27 : vector<128xf32> to vector<1x128xf32>
    %29 = arith.mulf %24, %24 : vector<256x128xf32>
    %cst_31 = arith.constant dense<0.000000e+00> : vector<128xf32>
    %30 = vector.multi_reduction <add>, %29, %cst_31 [0] : vector<256x128xf32> to vector<128xf32>
    %31 = vector.shape_cast %30 : vector<128xf32> to vector<1x128xf32>
    %32 = tpu.concatenate %28, %31 in 0 : vector<1x128xf32>, vector<1x128xf32> -> vector<2x128xf32>
    %33 = vector.shape_cast %32 : vector<2x128xf32> to vector<1x2x128xf32>
    %c0_32 = arith.constant 0 : index
    %c0_33 = arith.constant 0 : index
    %c0_34 = arith.constant 0 : index
    %34 = vector.load %arg4[%c0_32, %c0_33, %c0_34] : memref<1x2x128xf32, #tpu.memory_space<vmem>>, vector<1x2x128xf32>
    tpu.vector_store %arg4[%c0_32, %c0_33, %c0_34], %33 {strides = array<i32>} : memref<1x2x128xf32, #tpu.memory_space<vmem>>, vector<1x2x128xf32>,
    return
  }
  func.func @transform_0(%arg0: i32) -> (i32, i32, i32, i32) {
    %c0_i32 = arith.constant 0 : i32
    %c0_i32_0 = arith.constant 0 : i32
    %c0_i32_1 = arith.constant 0 : i32
    %c0_i32_2 = arith.constant 0 : i32
    return %arg0, %c0_i32, %c0_i32_0, %c0_i32_1 : i32, i32, i32, i32
  }
  func.func @transform_1(%arg0: i32) -> (i32, i32, i32) {
    %c0_i32 = arith.constant 0 : i32
    %c0_i32_0 = arith.constant 0 : i32
    %c0_i32_1 = arith.constant 0 : i32
    %c0_i32_2 = arith.constant 0 : i32
    return %c0_i32, %c0_i32_0, %c0_i32_1 : i32, i32, i32
  }
  func.func @transform_2(%arg0: i32) -> (i32, i32) {
    %c0_i32 = arith.constant 0 : i32
    %c0_i32_0 = arith.constant 0 : i32
    return %arg0, %c0_i32 : i32, i32
  }
  func.func @transform_3(%arg0: i32) -> (i32, i32, i32) {
    %c0_i32 = arith.constant 0 : i32
    %c0_i32_0 = arith.constant 0 : i32
    %c0_i32_1 = arith.constant 0 : i32
    return %arg0, %c0_i32, %c0_i32_0 : i32, i32, i32
  }
}

module attributes {stable_mosaic.version = 11 : i64} {
  func.func @_bn_leaky_kernel(%arg0: i32, %arg1: memref<256x128xbf16, #tpu.memory_space<vmem>>, %arg2: memref<1x128xf32, #tpu.memory_space<vmem>>, %arg3: memref<1x128xf32, #tpu.memory_space<vmem>>, %arg4: memref<256x128xbf16, #tpu.memory_space<vmem>>) attributes {dimension_semantics = [#tpu.dimension_semantics<parallel>], iteration_bounds = array<i64: 2>, scalar_prefetch = 0 : i64, scratch_operands = 0 : i64, tpu.core_type = #tpu.core_type<tc>, window_params = [{transform_indices = @transform_0, window_bounds = array<i64: 256, 128>}, {pipeline_mode = #tpu.pipeline_mode<synchronous>, transform_indices = @transform_1, window_bounds = array<i64: 1, 128>}, {pipeline_mode = #tpu.pipeline_mode<synchronous>, transform_indices = @transform_2, window_bounds = array<i64: 1, 128>}, {transform_indices = @transform_3, window_bounds = array<i64: 256, 128>}]} {
    %c0 = arith.constant 0 : index
    %c0_0 = arith.constant 0 : index
    %0 = vector.load %arg1[%c0, %c0_0] : memref<256x128xbf16, #tpu.memory_space<vmem>>, vector<256x128xbf16>
    %1 = arith.extf %0 : vector<256x128xbf16> to vector<256x128xf32>
    %c0_1 = arith.constant 0 : index
    %c0_2 = arith.constant 0 : index
    %2 = vector.load %arg2[%c0_1, %c0_2] : memref<1x128xf32, #tpu.memory_space<vmem>>, vector<1x128xf32>
    %3 = vector.broadcast %2 : vector<1x128xf32> to vector<256x128xf32>
    %4 = arith.mulf %1, %3 : vector<256x128xf32>
    %c0_3 = arith.constant 0 : index
    %c0_4 = arith.constant 0 : index
    %5 = vector.load %arg3[%c0_3, %c0_4] : memref<1x128xf32, #tpu.memory_space<vmem>>, vector<1x128xf32>
    %6 = vector.broadcast %5 : vector<1x128xf32> to vector<256x128xf32>
    %7 = arith.addf %4, %6 : vector<256x128xf32>
    %cst = arith.constant 0.000000e+00 : f32
    %8 = vector.broadcast %cst : f32 to vector<256x128xf32>
    %9 = arith.cmpf oge, %7, %8 : vector<256x128xf32>
    %cst_5 = arith.constant 2.000000e-01 : f32
    %10 = vector.broadcast %cst_5 : f32 to vector<256x128xf32>
    %11 = arith.mulf %10, %7 : vector<256x128xf32>
    %12 = arith.select %9, %7, %11 : vector<256x128xi1>, vector<256x128xf32>
    %13 = arith.truncf %12 : vector<256x128xf32> to vector<256x128xbf16>
    %c0_6 = arith.constant 0 : index
    %c0_7 = arith.constant 0 : index
    %14 = vector.load %arg4[%c0_6, %c0_7] : memref<256x128xbf16, #tpu.memory_space<vmem>>, vector<256x128xbf16>
    tpu.vector_store %arg4[%c0_6, %c0_7], %13 {strides = array<i32>} : memref<256x128xbf16, #tpu.memory_space<vmem>>, vector<256x128xbf16>,
    return
  }
  func.func @transform_0(%arg0: i32) -> (i32, i32) {
    %c0_i32 = arith.constant 0 : i32
    %c0_i32_0 = arith.constant 0 : i32
    return %arg0, %c0_i32 : i32, i32
  }
  func.func @transform_1(%arg0: i32) -> (i32, i32) {
    %c0_i32 = arith.constant 0 : i32
    %c0_i32_0 = arith.constant 0 : i32
    %c0_i32_1 = arith.constant 0 : i32
    return %c0_i32, %c0_i32_0 : i32, i32
  }
  func.func @transform_2(%arg0: i32) -> (i32, i32) {
    %c0_i32 = arith.constant 0 : i32
    %c0_i32_0 = arith.constant 0 : i32
    %c0_i32_1 = arith.constant 0 : i32
    return %c0_i32, %c0_i32_0 : i32, i32
  }
  func.func @transform_3(%arg0: i32) -> (i32, i32) {
    %c0_i32 = arith.constant 0 : i32
    %c0_i32_0 = arith.constant 0 : i32
    return %arg0, %c0_i32 : i32, i32
  }
}

module attributes {stable_mosaic.version = 11 : i64} {
  func.func @_s2d_conv_stats_kernel(%arg0: i32, %arg1: memref<1x9x9x512xbf16, #tpu.memory_space<vmem>>, %arg2: memref<4x512x256xbf16, #tpu.memory_space<vmem>>, %arg3: memref<64x256xbf16, #tpu.memory_space<vmem>>, %arg4: memref<1x2x256xf32, #tpu.memory_space<vmem>>) attributes {dimension_semantics = [#tpu.dimension_semantics<parallel>], iteration_bounds = array<i64: 2>, scalar_prefetch = 0 : i64, scratch_operands = 0 : i64, tpu.core_type = #tpu.core_type<tc>, window_params = [{transform_indices = @transform_0, window_bounds = array<i64: 1, 9, 9, 512>}, {pipeline_mode = #tpu.pipeline_mode<synchronous>, transform_indices = @transform_1, window_bounds = array<i64: 4, 512, 256>}, {transform_indices = @transform_2, window_bounds = array<i64: 64, 256>}, {transform_indices = @transform_3, window_bounds = array<i64: 1, 2, 256>}]} {
    %cst = arith.constant 0.000000e+00 : f32
    %0 = vector.broadcast %cst : f32 to vector<64x256xf32>
    %c0 = arith.constant 0 : index
    %c0_0 = arith.constant 0 : index
    %c0_1 = arith.constant 0 : index
    %c0_2 = arith.constant 0 : index
    %1 = vector.load %arg1[%c0, %c0_0, %c0_1, %c0_2] : memref<1x9x9x512xbf16, #tpu.memory_space<vmem>>, vector<1x8x8x512xbf16>
    %2 = vector.shape_cast %1 : vector<1x8x8x512xbf16> to vector<64x512xbf16>
    %c0_3 = arith.constant 0 : index
    %c0_4 = arith.constant 0 : index
    %c0_5 = arith.constant 0 : index
    %3 = vector.load %arg2[%c0_3, %c0_4, %c0_5] : memref<4x512x256xbf16, #tpu.memory_space<vmem>>, vector<1x512x256xbf16>
    %4 = vector.shape_cast %3 : vector<1x512x256xbf16> to vector<512x256xbf16>
    %cst_6 = arith.constant dense<0.000000e+00> : vector<64x256xf32>
    %5 = tpu.matmul %2, %4, %cst_6 {dimension_numbers = #tpu.dot_dimension_numbers<[1], [0], [0], [1], [0, 0, 1, 1], [], []>} : vector<64x512xbf16>, vector<512x256xbf16>, vector<64x256xf32> -> vector<64x256xf32>
    %6 = arith.addf %0, %5 : vector<64x256xf32>
    %c0_7 = arith.constant 0 : index
    %c0_8 = arith.constant 0 : index
    %c1 = arith.constant 1 : index
    %c0_9 = arith.constant 0 : index
    %7 = vector.load %arg1[%c0_7, %c0_8, %c1, %c0_9] : memref<1x9x9x512xbf16, #tpu.memory_space<vmem>>, vector<1x8x8x512xbf16>
    %8 = vector.shape_cast %7 : vector<1x8x8x512xbf16> to vector<64x512xbf16>
    %c1_10 = arith.constant 1 : index
    %c0_11 = arith.constant 0 : index
    %c0_12 = arith.constant 0 : index
    %9 = vector.load %arg2[%c1_10, %c0_11, %c0_12] : memref<4x512x256xbf16, #tpu.memory_space<vmem>>, vector<1x512x256xbf16>
    %10 = vector.shape_cast %9 : vector<1x512x256xbf16> to vector<512x256xbf16>
    %cst_13 = arith.constant dense<0.000000e+00> : vector<64x256xf32>
    %11 = tpu.matmul %8, %10, %cst_13 {dimension_numbers = #tpu.dot_dimension_numbers<[1], [0], [0], [1], [0, 0, 1, 1], [], []>} : vector<64x512xbf16>, vector<512x256xbf16>, vector<64x256xf32> -> vector<64x256xf32>
    %12 = arith.addf %6, %11 : vector<64x256xf32>
    %c0_14 = arith.constant 0 : index
    %c1_15 = arith.constant 1 : index
    %c0_16 = arith.constant 0 : index
    %c0_17 = arith.constant 0 : index
    %13 = vector.load %arg1[%c0_14, %c1_15, %c0_16, %c0_17] : memref<1x9x9x512xbf16, #tpu.memory_space<vmem>>, vector<1x8x8x512xbf16>
    %14 = vector.shape_cast %13 : vector<1x8x8x512xbf16> to vector<64x512xbf16>
    %c2 = arith.constant 2 : index
    %c0_18 = arith.constant 0 : index
    %c0_19 = arith.constant 0 : index
    %15 = vector.load %arg2[%c2, %c0_18, %c0_19] : memref<4x512x256xbf16, #tpu.memory_space<vmem>>, vector<1x512x256xbf16>
    %16 = vector.shape_cast %15 : vector<1x512x256xbf16> to vector<512x256xbf16>
    %cst_20 = arith.constant dense<0.000000e+00> : vector<64x256xf32>
    %17 = tpu.matmul %14, %16, %cst_20 {dimension_numbers = #tpu.dot_dimension_numbers<[1], [0], [0], [1], [0, 0, 1, 1], [], []>} : vector<64x512xbf16>, vector<512x256xbf16>, vector<64x256xf32> -> vector<64x256xf32>
    %18 = arith.addf %12, %17 : vector<64x256xf32>
    %c0_21 = arith.constant 0 : index
    %c1_22 = arith.constant 1 : index
    %c1_23 = arith.constant 1 : index
    %c0_24 = arith.constant 0 : index
    %19 = vector.load %arg1[%c0_21, %c1_22, %c1_23, %c0_24] : memref<1x9x9x512xbf16, #tpu.memory_space<vmem>>, vector<1x8x8x512xbf16>
    %20 = vector.shape_cast %19 : vector<1x8x8x512xbf16> to vector<64x512xbf16>
    %c3 = arith.constant 3 : index
    %c0_25 = arith.constant 0 : index
    %c0_26 = arith.constant 0 : index
    %21 = vector.load %arg2[%c3, %c0_25, %c0_26] : memref<4x512x256xbf16, #tpu.memory_space<vmem>>, vector<1x512x256xbf16>
    %22 = vector.shape_cast %21 : vector<1x512x256xbf16> to vector<512x256xbf16>
    %cst_27 = arith.constant dense<0.000000e+00> : vector<64x256xf32>
    %23 = tpu.matmul %20, %22, %cst_27 {dimension_numbers = #tpu.dot_dimension_numbers<[1], [0], [0], [1], [0, 0, 1, 1], [], []>} : vector<64x512xbf16>, vector<512x256xbf16>, vector<64x256xf32> -> vector<64x256xf32>
    %24 = arith.addf %18, %23 : vector<64x256xf32>
    %25 = arith.truncf %24 : vector<64x256xf32> to vector<64x256xbf16>
    %c0_28 = arith.constant 0 : index
    %c0_29 = arith.constant 0 : index
    %26 = vector.load %arg3[%c0_28, %c0_29] : memref<64x256xbf16, #tpu.memory_space<vmem>>, vector<64x256xbf16>
    tpu.vector_store %arg3[%c0_28, %c0_29], %25 {strides = array<i32>} : memref<64x256xbf16, #tpu.memory_space<vmem>>, vector<64x256xbf16>,
    %cst_30 = arith.constant dense<0.000000e+00> : vector<256xf32>
    %27 = vector.multi_reduction <add>, %24, %cst_30 [0] : vector<64x256xf32> to vector<256xf32>
    %28 = vector.shape_cast %27 : vector<256xf32> to vector<1x256xf32>
    %29 = arith.mulf %24, %24 : vector<64x256xf32>
    %cst_31 = arith.constant dense<0.000000e+00> : vector<256xf32>
    %30 = vector.multi_reduction <add>, %29, %cst_31 [0] : vector<64x256xf32> to vector<256xf32>
    %31 = vector.shape_cast %30 : vector<256xf32> to vector<1x256xf32>
    %32 = tpu.concatenate %28, %31 in 0 : vector<1x256xf32>, vector<1x256xf32> -> vector<2x256xf32>
    %33 = vector.shape_cast %32 : vector<2x256xf32> to vector<1x2x256xf32>
    %c0_32 = arith.constant 0 : index
    %c0_33 = arith.constant 0 : index
    %c0_34 = arith.constant 0 : index
    %34 = vector.load %arg4[%c0_32, %c0_33, %c0_34] : memref<1x2x256xf32, #tpu.memory_space<vmem>>, vector<1x2x256xf32>
    tpu.vector_store %arg4[%c0_32, %c0_33, %c0_34], %33 {strides = array<i32>} : memref<1x2x256xf32, #tpu.memory_space<vmem>>, vector<1x2x256xf32>,
    return
  }
  func.func @transform_0(%arg0: i32) -> (i32, i32, i32, i32) {
    %c0_i32 = arith.constant 0 : i32
    %c0_i32_0 = arith.constant 0 : i32
    %c0_i32_1 = arith.constant 0 : i32
    %c0_i32_2 = arith.constant 0 : i32
    return %arg0, %c0_i32, %c0_i32_0, %c0_i32_1 : i32, i32, i32, i32
  }
  func.func @transform_1(%arg0: i32) -> (i32, i32, i32) {
    %c0_i32 = arith.constant 0 : i32
    %c0_i32_0 = arith.constant 0 : i32
    %c0_i32_1 = arith.constant 0 : i32
    %c0_i32_2 = arith.constant 0 : i32
    return %c0_i32, %c0_i32_0, %c0_i32_1 : i32, i32, i32
  }
  func.func @transform_2(%arg0: i32) -> (i32, i32) {
    %c0_i32 = arith.constant 0 : i32
    %c0_i32_0 = arith.constant 0 : i32
    return %arg0, %c0_i32 : i32, i32
  }
  func.func @transform_3(%arg0: i32) -> (i32, i32, i32) {
    %c0_i32 = arith.constant 0 : i32
    %c0_i32_0 = arith.constant 0 : i32
    %c0_i32_1 = arith.constant 0 : i32
    return %arg0, %c0_i32, %c0_i32_0 : i32, i32, i32
  }
}

module attributes {stable_mosaic.version = 11 : i64} {
  func.func @_bn_leaky_kernel(%arg0: i32, %arg1: memref<64x256xbf16, #tpu.memory_space<vmem>>, %arg2: memref<1x256xf32, #tpu.memory_space<vmem>>, %arg3: memref<1x256xf32, #tpu.memory_space<vmem>>, %arg4: memref<64x256xbf16, #tpu.memory_space<vmem>>) attributes {dimension_semantics = [#tpu.dimension_semantics<parallel>], iteration_bounds = array<i64: 2>, scalar_prefetch = 0 : i64, scratch_operands = 0 : i64, tpu.core_type = #tpu.core_type<tc>, window_params = [{transform_indices = @transform_0, window_bounds = array<i64: 64, 256>}, {pipeline_mode = #tpu.pipeline_mode<synchronous>, transform_indices = @transform_1, window_bounds = array<i64: 1, 256>}, {pipeline_mode = #tpu.pipeline_mode<synchronous>, transform_indices = @transform_2, window_bounds = array<i64: 1, 256>}, {transform_indices = @transform_3, window_bounds = array<i64: 64, 256>}]} {
    %c0 = arith.constant 0 : index
    %c0_0 = arith.constant 0 : index
    %0 = vector.load %arg1[%c0, %c0_0] : memref<64x256xbf16, #tpu.memory_space<vmem>>, vector<64x256xbf16>
    %1 = arith.extf %0 : vector<64x256xbf16> to vector<64x256xf32>
    %c0_1 = arith.constant 0 : index
    %c0_2 = arith.constant 0 : index
    %2 = vector.load %arg2[%c0_1, %c0_2] : memref<1x256xf32, #tpu.memory_space<vmem>>, vector<1x256xf32>
    %3 = vector.broadcast %2 : vector<1x256xf32> to vector<64x256xf32>
    %4 = arith.mulf %1, %3 : vector<64x256xf32>
    %c0_3 = arith.constant 0 : index
    %c0_4 = arith.constant 0 : index
    %5 = vector.load %arg3[%c0_3, %c0_4] : memref<1x256xf32, #tpu.memory_space<vmem>>, vector<1x256xf32>
    %6 = vector.broadcast %5 : vector<1x256xf32> to vector<64x256xf32>
    %7 = arith.addf %4, %6 : vector<64x256xf32>
    %cst = arith.constant 0.000000e+00 : f32
    %8 = vector.broadcast %cst : f32 to vector<64x256xf32>
    %9 = arith.cmpf oge, %7, %8 : vector<64x256xf32>
    %cst_5 = arith.constant 2.000000e-01 : f32
    %10 = vector.broadcast %cst_5 : f32 to vector<64x256xf32>
    %11 = arith.mulf %10, %7 : vector<64x256xf32>
    %12 = arith.select %9, %7, %11 : vector<64x256xi1>, vector<64x256xf32>
    %13 = arith.truncf %12 : vector<64x256xf32> to vector<64x256xbf16>
    %c0_6 = arith.constant 0 : index
    %c0_7 = arith.constant 0 : index
    %14 = vector.load %arg4[%c0_6, %c0_7] : memref<64x256xbf16, #tpu.memory_space<vmem>>, vector<64x256xbf16>
    tpu.vector_store %arg4[%c0_6, %c0_7], %13 {strides = array<i32>} : memref<64x256xbf16, #tpu.memory_space<vmem>>, vector<64x256xbf16>,
    return
  }
  func.func @transform_0(%arg0: i32) -> (i32, i32) {
    %c0_i32 = arith.constant 0 : i32
    %c0_i32_0 = arith.constant 0 : i32
    return %arg0, %c0_i32 : i32, i32
  }
  func.func @transform_1(%arg0: i32) -> (i32, i32) {
    %c0_i32 = arith.constant 0 : i32
    %c0_i32_0 = arith.constant 0 : i32
    %c0_i32_1 = arith.constant 0 : i32
    return %c0_i32, %c0_i32_0 : i32, i32
  }
  func.func @transform_2(%arg0: i32) -> (i32, i32) {
    %c0_i32 = arith.constant 0 : i32
    %c0_i32_0 = arith.constant 0 : i32
    %c0_i32_1 = arith.constant 0 : i32
    return %c0_i32, %c0_i32_0 : i32, i32
  }
  func.func @transform_3(%arg0: i32) -> (i32, i32) {
    %c0_i32 = arith.constant 0 : i32
    %c0_i32_0 = arith.constant 0 : i32
    return %arg0, %c0_i32 : i32, i32
  }
}

module attributes {stable_mosaic.version = 11 : i64} {
  func.func @_matmul_stats_kernel(%arg0: i32, %arg1: memref<16x4096xbf16, #tpu.memory_space<vmem>>, %arg2: memref<4096x512xbf16, #tpu.memory_space<vmem>>, %arg3: memref<16x512xbf16, #tpu.memory_space<vmem>>, %arg4: memref<1x2x512xf32, #tpu.memory_space<vmem>>) attributes {dimension_semantics = [#tpu.dimension_semantics<parallel>], iteration_bounds = array<i64: 2>, scalar_prefetch = 0 : i64, scratch_operands = 0 : i64, tpu.core_type = #tpu.core_type<tc>, window_params = [{transform_indices = @transform_0, window_bounds = array<i64: 16, 4096>}, {pipeline_mode = #tpu.pipeline_mode<synchronous>, transform_indices = @transform_1, window_bounds = array<i64: 4096, 512>}, {transform_indices = @transform_2, window_bounds = array<i64: 16, 512>}, {transform_indices = @transform_3, window_bounds = array<i64: 1, 2, 512>}]} {
    %c0 = arith.constant 0 : index
    %c0_0 = arith.constant 0 : index
    %0 = vector.load %arg1[%c0, %c0_0] : memref<16x4096xbf16, #tpu.memory_space<vmem>>, vector<16x4096xbf16>
    %c0_1 = arith.constant 0 : index
    %c0_2 = arith.constant 0 : index
    %1 = vector.load %arg2[%c0_1, %c0_2] : memref<4096x512xbf16, #tpu.memory_space<vmem>>, vector<4096x512xbf16>
    %cst = arith.constant dense<0.000000e+00> : vector<16x512xf32>
    %2 = tpu.matmul %0, %1, %cst {dimension_numbers = #tpu.dot_dimension_numbers<[1], [0], [0], [1], [0, 0, 1, 1], [], []>} : vector<16x4096xbf16>, vector<4096x512xbf16>, vector<16x512xf32> -> vector<16x512xf32>
    %3 = arith.truncf %2 : vector<16x512xf32> to vector<16x512xbf16>
    %c0_3 = arith.constant 0 : index
    %c0_4 = arith.constant 0 : index
    %4 = vector.load %arg3[%c0_3, %c0_4] : memref<16x512xbf16, #tpu.memory_space<vmem>>, vector<16x512xbf16>
    tpu.vector_store %arg3[%c0_3, %c0_4], %3 {strides = array<i32>} : memref<16x512xbf16, #tpu.memory_space<vmem>>, vector<16x512xbf16>,
    %cst_5 = arith.constant dense<0.000000e+00> : vector<512xf32>
    %5 = vector.multi_reduction <add>, %2, %cst_5 [0] : vector<16x512xf32> to vector<512xf32>
    %6 = vector.shape_cast %5 : vector<512xf32> to vector<1x512xf32>
    %7 = arith.mulf %2, %2 : vector<16x512xf32>
    %cst_6 = arith.constant dense<0.000000e+00> : vector<512xf32>
    %8 = vector.multi_reduction <add>, %7, %cst_6 [0] : vector<16x512xf32> to vector<512xf32>
    %9 = vector.shape_cast %8 : vector<512xf32> to vector<1x512xf32>
    %10 = tpu.concatenate %6, %9 in 0 : vector<1x512xf32>, vector<1x512xf32> -> vector<2x512xf32>
    %11 = vector.shape_cast %10 : vector<2x512xf32> to vector<1x2x512xf32>
    %c0_7 = arith.constant 0 : index
    %c0_8 = arith.constant 0 : index
    %c0_9 = arith.constant 0 : index
    %12 = vector.load %arg4[%c0_7, %c0_8, %c0_9] : memref<1x2x512xf32, #tpu.memory_space<vmem>>, vector<1x2x512xf32>
    tpu.vector_store %arg4[%c0_7, %c0_8, %c0_9], %11 {strides = array<i32>} : memref<1x2x512xf32, #tpu.memory_space<vmem>>, vector<1x2x512xf32>,
    return
  }
  func.func @transform_0(%arg0: i32) -> (i32, i32) {
    %c0_i32 = arith.constant 0 : i32
    %c0_i32_0 = arith.constant 0 : i32
    return %arg0, %c0_i32 : i32, i32
  }
  func.func @transform_1(%arg0: i32) -> (i32, i32) {
    %c0_i32 = arith.constant 0 : i32
    %c0_i32_0 = arith.constant 0 : i32
    %c0_i32_1 = arith.constant 0 : i32
    return %c0_i32, %c0_i32_0 : i32, i32
  }
  func.func @transform_2(%arg0: i32) -> (i32, i32) {
    %c0_i32 = arith.constant 0 : i32
    %c0_i32_0 = arith.constant 0 : i32
    return %arg0, %c0_i32 : i32, i32
  }
  func.func @transform_3(%arg0: i32) -> (i32, i32, i32) {
    %c0_i32 = arith.constant 0 : i32
    %c0_i32_0 = arith.constant 0 : i32
    %c0_i32_1 = arith.constant 0 : i32
    return %arg0, %c0_i32, %c0_i32_0 : i32, i32, i32
  }
}

module attributes {stable_mosaic.version = 11 : i64} {
  func.func @_bn_leaky_kernel(%arg0: i32, %arg1: memref<16x512xbf16, #tpu.memory_space<vmem>>, %arg2: memref<1x512xf32, #tpu.memory_space<vmem>>, %arg3: memref<1x512xf32, #tpu.memory_space<vmem>>, %arg4: memref<16x512xbf16, #tpu.memory_space<vmem>>) attributes {dimension_semantics = [#tpu.dimension_semantics<parallel>], iteration_bounds = array<i64: 2>, scalar_prefetch = 0 : i64, scratch_operands = 0 : i64, tpu.core_type = #tpu.core_type<tc>, window_params = [{transform_indices = @transform_0, window_bounds = array<i64: 16, 512>}, {pipeline_mode = #tpu.pipeline_mode<synchronous>, transform_indices = @transform_1, window_bounds = array<i64: 1, 512>}, {pipeline_mode = #tpu.pipeline_mode<synchronous>, transform_indices = @transform_2, window_bounds = array<i64: 1, 512>}, {transform_indices = @transform_3, window_bounds = array<i64: 16, 512>}]} {
    %c0 = arith.constant 0 : index
    %c0_0 = arith.constant 0 : index
    %0 = vector.load %arg1[%c0, %c0_0] : memref<16x512xbf16, #tpu.memory_space<vmem>>, vector<16x512xbf16>
    %1 = arith.extf %0 : vector<16x512xbf16> to vector<16x512xf32>
    %c0_1 = arith.constant 0 : index
    %c0_2 = arith.constant 0 : index
    %2 = vector.load %arg2[%c0_1, %c0_2] : memref<1x512xf32, #tpu.memory_space<vmem>>, vector<1x512xf32>
    %3 = vector.broadcast %2 : vector<1x512xf32> to vector<16x512xf32>
    %4 = arith.mulf %1, %3 : vector<16x512xf32>
    %c0_3 = arith.constant 0 : index
    %c0_4 = arith.constant 0 : index
    %5 = vector.load %arg3[%c0_3, %c0_4] : memref<1x512xf32, #tpu.memory_space<vmem>>, vector<1x512xf32>
    %6 = vector.broadcast %5 : vector<1x512xf32> to vector<16x512xf32>
    %7 = arith.addf %4, %6 : vector<16x512xf32>
    %cst = arith.constant 0.000000e+00 : f32
    %8 = vector.broadcast %cst : f32 to vector<16x512xf32>
    %9 = arith.cmpf oge, %7, %8 : vector<16x512xf32>
    %cst_5 = arith.constant 2.000000e-01 : f32
    %10 = vector.broadcast %cst_5 : f32 to vector<16x512xf32>
    %11 = arith.mulf %10, %7 : vector<16x512xf32>
    %12 = arith.select %9, %7, %11 : vector<16x512xi1>, vector<16x512xf32>
    %13 = arith.truncf %12 : vector<16x512xf32> to vector<16x512xbf16>
    %c0_6 = arith.constant 0 : index
    %c0_7 = arith.constant 0 : index
    %14 = vector.load %arg4[%c0_6, %c0_7] : memref<16x512xbf16, #tpu.memory_space<vmem>>, vector<16x512xbf16>
    tpu.vector_store %arg4[%c0_6, %c0_7], %13 {strides = array<i32>} : memref<16x512xbf16, #tpu.memory_space<vmem>>, vector<16x512xbf16>,
    return
  }
  func.func @transform_0(%arg0: i32) -> (i32, i32) {
    %c0_i32 = arith.constant 0 : i32
    %c0_i32_0 = arith.constant 0 : i32
    return %arg0, %c0_i32 : i32, i32
  }
  func.func @transform_1(%arg0: i32) -> (i32, i32) {
    %c0_i32 = arith.constant 0 : i32
    %c0_i32_0 = arith.constant 0 : i32
    %c0_i32_1 = arith.constant 0 : i32
    return %c0_i32, %c0_i32_0 : i32, i32
  }
  func.func @transform_2(%arg0: i32) -> (i32, i32) {
    %c0_i32 = arith.constant 0 : i32
    %c0_i32_0 = arith.constant 0 : i32
    %c0_i32_1 = arith.constant 0 : i32
    return %c0_i32, %c0_i32_0 : i32, i32
  }
  func.func @transform_3(%arg0: i32) -> (i32, i32) {
    %c0_i32 = arith.constant 0 : i32
    %c0_i32_0 = arith.constant 0 : i32
    return %arg0, %c0_i32 : i32, i32
  }
}

module attributes {stable_mosaic.version = 11 : i64} {
  func.func @_logit_sigmoid_kernel(%arg0: i32, %arg1: memref<8x8192xbf16, #tpu.memory_space<vmem>>, %arg2: memref<1x8192xbf16, #tpu.memory_space<vmem>>, %arg3: memref<8x1xf32, #tpu.memory_space<vmem>>) attributes {dimension_semantics = [#tpu.dimension_semantics<parallel>], iteration_bounds = array<i64: 1>, scalar_prefetch = 0 : i64, scratch_operands = 0 : i64, tpu.core_type = #tpu.core_type<tc>, window_params = [{transform_indices = @transform_0, window_bounds = array<i64: 8, 8192>}, {pipeline_mode = #tpu.pipeline_mode<synchronous>, transform_indices = @transform_1, window_bounds = array<i64: 1, 8192>}, {transform_indices = @transform_2, window_bounds = array<i64: 8, 1>}]} {
    %c0 = arith.constant 0 : index
    %c0_0 = arith.constant 0 : index
    %0 = vector.load %arg1[%c0, %c0_0] : memref<8x8192xbf16, #tpu.memory_space<vmem>>, vector<8x8192xbf16>
    %1 = arith.extf %0 : vector<8x8192xbf16> to vector<8x8192xf32>
    %c0_1 = arith.constant 0 : index
    %c0_2 = arith.constant 0 : index
    %2 = vector.load %arg2[%c0_1, %c0_2] : memref<1x8192xbf16, #tpu.memory_space<vmem>>, vector<1x8192xbf16>
    %3 = arith.extf %2 : vector<1x8192xbf16> to vector<1x8192xf32>
    %4 = vector.broadcast %3 : vector<1x8192xf32> to vector<8x8192xf32>
    %5 = arith.mulf %1, %4 : vector<8x8192xf32>
    %cst = arith.constant dense<0.000000e+00> : vector<8xf32>
    %6 = vector.multi_reduction <add>, %5, %cst [1] : vector<8x8192xf32> to vector<8xf32>
    %7 = vector.shape_cast %6 : vector<8xf32> to vector<8x1xf32>
    %8 = arith.negf %7 : vector<8x1xf32>
    %9 = math.exp %8 : vector<8x1xf32>
    %cst_3 = arith.constant 1.000000e+00 : f32
    %10 = vector.broadcast %cst_3 : f32 to vector<8x1xf32>
    %11 = arith.addf %10, %9 : vector<8x1xf32>
    %12 = arith.divf %10, %11 : vector<8x1xf32>
    %c0_4 = arith.constant 0 : index
    %c0_5 = arith.constant 0 : index
    %13 = vector.load %arg3[%c0_4, %c0_5] : memref<8x1xf32, #tpu.memory_space<vmem>>, vector<8x1xf32>
    tpu.vector_store %arg3[%c0_4, %c0_5], %12 {strides = array<i32>} : memref<8x1xf32, #tpu.memory_space<vmem>>, vector<8x1xf32>,
    return
  }
  func.func @transform_0(%arg0: i32) -> (i32, i32) {
    %c0_i32 = arith.constant 0 : i32
    %c0_i32_0 = arith.constant 0 : i32
    return %arg0, %c0_i32 : i32, i32
  }
  func.func @transform_1(%arg0: i32) -> (i32, i32) {
    %c0_i32 = arith.constant 0 : i32
    %c0_i32_0 = arith.constant 0 : i32
    %c0_i32_1 = arith.constant 0 : i32
    return %c0_i32, %c0_i32_0 : i32, i32
  }
  func.func @transform_2(%arg0: i32) -> (i32, i32) {
    %c0_i32 = arith.constant 0 : i32
    %c0_i32_0 = arith.constant 0 : i32
    return %arg0, %c0_i32 : i32, i32
  }
}

</mosaic_0001>

<bundles_post_ra>
// kernel: discriminator_forward.8
= control target key start
LH: loop header
LB: loop body
LE: loop exit
PB: predicated region body
PF: predicated region fallthrough
CT: control target
= control target key end

     0   :  { %7 = vsyncpa [#allocation3], 0  ;;  %s1387_s9 = smov 0   ;;  %s1494_s0 = inlined_call_operand.vmem [shape: bf16[256,128], index: 0, kind: input, shape index: {}]   ;;  %s1495_s1 = inlined_call_operand.hbm [shape: bf16[128,512], index: 1, kind: input, shape index: {}]   ;;  %s1496_s2 = inlined_call_operand.vmem [shape: bf16[256,512], index: 2, kind: output, shape index: {}]  }
   0x1 LB: > { %s1133_s10 = sadd.s32 4294967295, %s1366_s9   ;;  %p1135_p0 = scmp.ge.s32.totalorder %s1366_s9, 1  ;;  %s1366_s9 = sphi %s1387_s9, %s13_s9  }
   0x2   : > { %p91_p1 = scmp.lt.s32.totalorder %s1366_s9, 3  ;;  %s1368_s11 = smov [#allocation2]  }
   0x3   : > { %s103_s12 = sshll.u32 %s1368_s11, 4  ;;  %p1401_p3 = scmp.eq.s32.totalorder %s1133_s10, 0  ;;  %s104_s12 = int_to_ptr.vmem [resolvable:$true] %s103_s12 }
   0x4   : > { %p1395_p2 = pnand %p1135_p0, %p91_p1  ;;  %s1341_s15 = scalar_lea.vmem %s104_s12, 4096 }
   0x5   : > { %p1342_p7 = scmp.ne.s32.totalorder %s104_s12, %s1341_s15  ;;  %p1349_p10 = scmp.lt.s32.totalorder %s104_s12, %s104_s12 }
   0x6   : > { %p1256_p4 = pneg %p1395_p2  ;;  %p1350_p11 = scmp.lt.s32.totalorder %s1341_s15, %s1341_s15 }
   0x8   : > { %p1257_p5 = pnand %p1401_p3, %p1256_p4  ;;  %p1351_p12 = por %p1350_p11, %p1349_p10 }
   0xa   : > { %p1332_p6 = pneg %p1257_p5 }
   0xc   : > { %p1344_p8 = pnand %p1342_p7, %p1332_p6 }
   0xe   : > { %p1345_p9 = pneg %p1344_p8 }
  0x10   : > { %p1352_p13 = pnand %p1351_p12, %p1345_p9 }
  0x12   : > { %1355 = shalt.err (!%p1352_p13)
}
  0x13   : > { %s1369_s16 = smov 256   ;;  %s1370_s17 = smov 16  }
  0x14   : > { %1259 = dma.hbm_to_vmem [thread:$0]  (!%p1257_p5), %s1495_s1, 4096, %s104_s12, [#allocation3], %s1369_s16, %s1369_s16, %s1370_s17  }
  0x15   : > { %128 = sbr.rel (%p1395_p2) target bundleno = 323 (0x143), region = 28 }
  0x1a   : > { %1361 = dma.done.wait (%p1401_p3), [#allocation3], 4096  }
  0x1b   : > { %1363 = vsyncadd (%p1401_p3), [#allocation3], 4294963200  ;;  %v1371_v0 = vmov 0   ;;  %v1274_v1 = vld [vmem:[#allocation2 + $0xe4] ss:$16 sps:$4 sm:$0xff]   ;;  %s1140_s20 = sshll.u32 %s1133_s10, 4 }
  0x1c   : > { %453 = vmatprep.mubr.bf16.mxu0 %v1371_v0  ;;  %566 = vmatprep.mubr.bf16.mxu1 %v1371_v0  ;;  %v1276_v2 = vld [vmem:[#allocation2 + $0xec] ss:$16 sps:$4 sm:$0xff]   ;;  %v1278_v3 = vld [vmem:[#allocation2 + $0xe0] ss:$16 sps:$4 sm:$0xff]   ;;  %v1279_v4 = vld [vmem:[#allocation2 + $0xe8] ss:$16 sps:$4 sm:$0xff]  }
  0x1d   : > { %421 = vmatprep.subr.bf16.mxu0 %v1274_v1  ;;  %534 = vmatprep.subr.bf16.mxu1 %v1276_v2  ;;  %v1280_v5 = vld [vmem:[#allocation2 + $0xc4] ss:$16 sps:$4 sm:$0xff]   ;;  %v1282_v6 = vld [vmem:[#allocation2 + $0xcc] ss:$16 sps:$4 sm:$0xff]   ;;  %v1284_v7 = vld [vmem:[#allocation2 + $0xc0] ss:$16 sps:$4 sm:$0xff]  }
  0x1e   : > { %422 = vmatpush1.bf16.msra.mxu0 %v1278_v3  ;;  %535 = vmatpush1.bf16.msra.mxu1 %v1279_v4  ;;  %v1285_v8 = vld [vmem:[#allocation2 + $0xc8] ss:$16 sps:$4 sm:$0xff]   ;;  %v1286_v9 = vld [vmem:[#allocation2 + $0xa4] ss:$16 sps:$4 sm:$0xff]   ;;  %v1288_v10 = vld [vmem:[#allocation2 + $0xac] ss:$16 sps:$4 sm:$0xff]  }
  0x1f   : > { %423 = vmatprep.subr.bf16.mxu0 %v1280_v5  ;;  %536 = vmatprep.subr.bf16.mxu1 %v1282_v6  ;;  %v1290_v11 = vld [vmem:[#allocation2 + $0xa0] ss:$16 sps:$4 sm:$0xff]   ;;  %v1291_v12 = vld [vmem:[#allocation2 + $0xa8] ss:$16 sps:$4 sm:$0xff]   ;;  %v1292_v13 = vld [vmem:[#allocation2 + $0x84] ss:$16 sps:$4 sm:$0xff]  }
  0x20   : > { %v1294_v14 = vld [vmem:[#allocation2 + $0x8c] ss:$16 sps:$4 sm:$0xff]   ;;  %p152_p0 = scmp.lt.s32.totalorder %s1140_s20, 31  ;;  %v1296_v15 = vld [vmem:[#allocation2 + $0x80] ss:$16 sps:$4 sm:$0xff]  }
  0x21   : > { %v1297_v16 = vld [vmem:[#allocation2 + $0x88] ss:$16 sps:$4 sm:$0xff]   ;;  %v1298_v17 = vld [vmem:[#allocation2 + $0x64] ss:$16 sps:$4 sm:$0xff]   ;;  %v1300_v18 = vld [vmem:[#allocation2 + $0x6c] ss:$16 sps:$4 sm:$0xff]  }
  0x22   : > { %424 = vmatpush1.bf16.msra.mxu0 %v1284_v7  ;;  %537 = vmatpush1.bf16.msra.mxu1 %v1285_v8  ;;  %s1500_s20 = smov (!%p152_p0, %s1140_s20), 31  ;;  %v1302_v19 = vld [vmem:[#allocation2 + $0x60] ss:$16 sps:$4 sm:$0xff]   ;;  %v1303_v20 = vld [vmem:[#allocation2 + $0x68] ss:$16 sps:$4 sm:$0xff]  }
  0x23   : > { %425 = vmatprep.subr.bf16.mxu0 %v1286_v9  ;;  %538 = vmatprep.subr.bf16.mxu1 %v1288_v10  ;;  %v1304_v21 = vld [vmem:[#allocation2 + $0x44] ss:$16 sps:$4 sm:$0xff]   ;;  %v1306_v22 = vld [vmem:[#allocation2 + $0x4c] ss:$16 sps:$4 sm:$0xff]   ;;  %s1141_s21 = sshll.u32 %s1500_s20, 2  ;;  %s1219_s25 = sshll.u32 %s1500_s20, 4 }
  0x24   : > { %v1308_v23 = vld [vmem:[#allocation2 + $0x40] ss:$16 sps:$4 sm:$0xff]   ;;  %v1309_v24 = vld [vmem:[#allocation2 + $0x48] ss:$16 sps:$4 sm:$0xff]   ;;  %v1310_v25 = vld [vmem:[#allocation2 + $0x24] ss:$16 sps:$4 sm:$0xff]   ;;  %s1428_s24 = scalar_lea.vmem %s1494_s0, %s1141_s21  ;;  %s1456_s28 = scalar_lea.vmem %s1496_s2, %s1219_s25 }
  0x25   : > { %v1312_v26 = vld [vmem:[#allocation2 + $0x2c] ss:$16 sps:$4 sm:$0xff]   ;;  %v1314_v27 = vld [vmem:[#allocation2 + $0x20] ss:$16 sps:$4 sm:$0xff]   ;;  %v1315_v28 = vld [vmem:[#allocation2 + $0x28] ss:$16 sps:$4 sm:$0xff]  }
  0x26   : > { %426 = vmatpush1.bf16.msra.mxu0 %v1290_v11  ;;  %539 = vmatpush1.bf16.msra.mxu1 %v1291_v12  ;;  %v1316_v29 = vld [vmem:[#allocation2 + $0x4] ss:$16 sps:$4 sm:$0xff]   ;;  %v1318_v30 = vld [vmem:[#allocation2 + $0xc] ss:$16 sps:$4 sm:$0xff]   ;;  %v1320_v31 = vld [vmem:[#allocation2] ss:$16 sps:$4 sm:$0xff]  }
  0x27   : > { %427 = vmatprep.subr.bf16.mxu0 %v1292_v13  ;;  %540 = vmatprep.subr.bf16.mxu1 %v1294_v14  ;;  %v1321_v32 = vld [vmem:[#allocation2 + $0x8] ss:$16 sps:$4 sm:$0xff]   ;;  %v1322_v33 = vld [vmem:[%s1428_s24] sm:$0xff]   ;;  %v1324_v35 = vld [vmem:[%s1428_s24 + $0x10] sm:$0xff]  }
  0x28   : > { %v1323_v34 = vld [vmem:[%s1428_s24 + $0x8] sm:$0xff]   ;;  %v1325_v36 = vld [vmem:[%s1428_s24 + $0x18] sm:$0xff]   ;;  %v1326_v37 = vld [vmem:[%s1428_s24 + $0x20] sm:$0xff]  }
  0x29   : > { %v1327_v38 = vld [vmem:[%s1428_s24 + $0x28] sm:$0xff]   ;;  %v1328_v39 = vld [vmem:[%s1428_s24 + $0x30] sm:$0xff]   ;;  %v1329_v40 = vld [vmem:[%s1428_s24 + $0x38] sm:$0xff]  }
  0x2a   : > { %428 = vmatpush1.bf16.msra.mxu0 %v1296_v15  ;;  %541 = vmatpush1.bf16.msra.mxu1 %v1297_v16 }
  0x2b   : > { %429 = vmatprep.subr.bf16.mxu0 %v1298_v17  ;;  %542 = vmatprep.subr.bf16.mxu1 %v1300_v18 }
  0x2e   : > { %430 = vmatpush1.bf16.msra.mxu0 %v1302_v19  ;;  %543 = vmatpush1.bf16.msra.mxu1 %v1303_v20 }
  0x2f   : > { %431 = vmatprep.subr.bf16.mxu0 %v1304_v21  ;;  %544 = vmatprep.subr.bf16.mxu1 %v1306_v22 }
  0x32   : > { %432 = vmatpush1.bf16.msra.mxu0 %v1308_v23  ;;  %545 = vmatpush1.bf16.msra.mxu1 %v1309_v24 }
  0x33   : > { %433 = vmatprep.subr.bf16.mxu0 %v1310_v25  ;;  %546 = vmatprep.subr.bf16.mxu1 %v1312_v26 }
  0x36   : > { %434 = vmatpush1.bf16.msra.mxu0 %v1314_v27  ;;  %547 = vmatpush1.bf16.msra.mxu1 %v1315_v28 }
  0x37   : > { %435 = vmatprep.subr.bf16.mxu0 %v1316_v29  ;;  %548 = vmatprep.subr.bf16.mxu1 %v1318_v30 }
  0x3a   : > { %436 = vmatpush1.bf16.msra.mxu0 %v1320_v31  ;;  %549 = vmatpush1.bf16.msra.mxu1 %v1321_v32 }
  0x3d   : > { %454 = vmatmul.mubr.bf16.vlgmr.msra.gmra.mxu0 %v1322_v33  ;;  %567 = vmatmul.mubr.bf16.vlgmr.msra.gmra.mxu1 %v1322_v33 }
  0x3e   : > { %463 = vmatprep.mubr.bf16.mxu0 %v1371_v0  ;;  %576 = vmatprep.mubr.bf16.mxu1 %v1371_v0 }
  0x45   : > { %464 = vmatmul.mubr.bf16.gmra.mxu0 %v1323_v34  ;;  %577 = vmatmul.mubr.bf16.gmra.mxu1 %v1323_v34 }
  0x46   : > { %473 = vmatprep.mubr.bf16.mxu0 %v1371_v0  ;;  %586 = vmatprep.mubr.bf16.mxu1 %v1371_v0 }
  0x4d   : > { %474 = vmatmul.mubr.bf16.gmra.mxu0 %v1324_v35  ;;  %587 = vmatmul.mubr.bf16.gmra.mxu1 %v1324_v35 }
  0x4e   : > { %483 = vmatprep.mubr.bf16.mxu0 %v1371_v0  ;;  %596 = vmatprep.mubr.bf16.mxu1 %v1371_v0 }
  0x55   : > { %484 = vmatmul.mubr.bf16.gmra.mxu0 %v1325_v36  ;;  %597 = vmatmul.mubr.bf16.gmra.mxu1 %v1325_v36 }
  0x56   : > { %493 = vmatprep.mubr.bf16.mxu0 %v1371_v0  ;;  %606 = vmatprep.mubr.bf16.mxu1 %v1371_v0 }
  0x5d   : > { %494 = vmatmul.mubr.bf16.gmra.mxu0 %v1326_v37  ;;  %607 = vmatmul.mubr.bf16.gmra.mxu1 %v1326_v37 }
  0x5e   : > { %503 = vmatprep.mubr.bf16.mxu0 %v1371_v0  ;;  %616 = vmatprep.mubr.bf16.mxu1 %v1371_v0 }
  0x65   : > { %504 = vmatmul.mubr.bf16.gmra.mxu0 %v1327_v38  ;;  %617 = vmatmul.mubr.bf16.gmra.mxu1 %v1327_v38 }
  0x66   : > { %513 = vmatprep.mubr.bf16.mxu0 %v1371_v0  ;;  %626 = vmatprep.mubr.bf16.mxu1 %v1371_v0 }
  0x6d   : > { %514 = vmatmul.mubr.bf16.gmra.mxu0 %v1328_v39  ;;  %627 = vmatmul.mubr.bf16.gmra.mxu1 %v1328_v39 }
  0x6e   : > { %523 = vmatprep.mubr.bf16.mxu0 %v1371_v0  ;;  %636 = vmatprep.mubr.bf16.mxu1 %v1371_v0 }
  0x75   : > { %524 = vmatmul.mubr.bf16.gmra.mxu0 %v1329_v40  ;;  %637 = vmatmul.mubr.bf16.gmra.mxu1 %v1329_v40 }
  0xfd   : > { %v455_v41 = vpop.f32.mrf.mxu0  ;;  %v568_v42 = vpop.f32.mrf.mxu1 }
  0xfe   : > { %vm647_vm0 = vcmp.ge.f32.partialorder %v455_v41, 0.0  ;;  %v711_v43 = vmul.f32 0.2, %v455_v41  ;;  %v713_v44 = vmul.f32 0.2, %v568_v42  ;;  %vm649_vm1 = vcmp.ge.f32.partialorder %v568_v42, 0.0 }
  0xff   : > { %v457_v45 = vpop.f32.mrf.mxu0  ;;  %v570_v46 = vpop.f32.mrf.mxu1 }
 0x100   : > { %vm648_vm2 = vcmp.ge.f32.partialorder %v457_v45, 0.0  ;;  %v712_v47 = vmul.f32 0.2, %v457_v45  ;;  %v775_v48 = vsel %vm647_vm0, %v455_v41, %v711_v43  ;;  %vm650_vm3 = vcmp.ge.f32.partialorder %v570_v46, 0.0 }
 0x101   : > { %v714_v49 = vmul.f32 0.2, %v570_v46  ;;  %v459_v50 = vpop.f32.mrf.mxu0  ;;  %v572_v51 = vpop.f32.mrf.mxu1  ;;  %v777_v52 = vsel %vm649_vm1, %v568_v42, %v713_v44 }
 0x102   : > { %v776_v53 = vsel %vm648_vm2, %v457_v45, %v712_v47  ;;  %vm651_vm4 = vcmp.ge.f32.partialorder %v459_v50, 0.0  ;;  %v715_v54 = vmul.f32 0.2, %v459_v50  ;;  %vm653_vm5 = vcmp.ge.f32.partialorder %v572_v51, 0.0 }
 0x103   : > { %v1220_v55 = vpack.c.bf16 %v776_v53, %v775_v48  ;;  %v778_v56 = vsel %vm650_vm3, %v570_v46, %v714_v49  ;;  %v717_v57 = vmul.f32 0.2, %v572_v51  ;;  %v461_v58 = vpop.f32.mrf.mxu0  ;;  %v574_v59 = vpop.f32.mrf.mxu1 }
 0x104   : > { %v1221_v60 = vpack.c.bf16 %v778_v56, %v777_v52  ;;  %vm652_vm6 = vcmp.ge.f32.partialorder %v461_v58, 0.0  ;;  %v716_v61 = vmul.f32 0.2, %v461_v58  ;;  %v779_v62 = vsel %vm651_vm4, %v459_v50, %v715_v54 }
 0x105   : > { %1031 = vst [vmem:[%s1456_s28] sm:$0xff] %v1220_v55  ;;  %vm654_vm7 = vcmp.ge.f32.partialorder %v574_v59, 0.0  ;;  %v718_v63 = vmul.f32 0.2, %v574_v59  ;;  %v465_v0 = vpop.f32.mrf.mxu0  ;;  %v578_v1 = vpop.f32.mrf.mxu1  ;;  %v781_v2 = vsel %vm653_vm5, %v572_v51, %v717_v57 }
 0x106   : > { %1032 = vst [vmem:[%s1456_s28 + $0x8] sm:$0xff] %v1221_v60  ;;  %v780_v3 = vsel %vm652_vm6, %v461_v58, %v716_v61  ;;  %vm655_vm8 = vcmp.ge.f32.partialorder %v465_v0, 0.0  ;;  %v719_v4 = vmul.f32 0.2, %v465_v0  ;;  %vm657_vm9 = vcmp.ge.f32.partialorder %v578_v1, 0.0 }
 0x107   : > { %v1222_v5 = vpack.c.bf16 %v780_v3, %v779_v62  ;;  %v782_v6 = vsel %vm654_vm7, %v574_v59, %v718_v63  ;;  %v721_v7 = vmul.f32 0.2, %v578_v1  ;;  %v467_v8 = vpop.f32.mrf.mxu0  ;;  %v580_v9 = vpop.f32.mrf.mxu1 }
 0x108   : > { %v1223_v10 = vpack.c.bf16 %v782_v6, %v781_v2  ;;  %vm656_vm10 = vcmp.ge.f32.partialorder %v467_v8, 0.0  ;;  %v720_v11 = vmul.f32 0.2, %v467_v8  ;;  %v783_v12 = vsel %vm655_vm8, %v465_v0, %v719_v4 }
 0x109   : > { %1033 = vst [vmem:[%s1456_s28 + $0x10] sm:$0xff] %v1222_v5  ;;  %vm658_vm11 = vcmp.ge.f32.partialorder %v580_v9, 0.0  ;;  %v722_v13 = vmul.f32 0.2, %v580_v9  ;;  %v469_v14 = vpop.f32.mrf.mxu0  ;;  %v582_v15 = vpop.f32.mrf.mxu1  ;;  %v785_v16 = vsel %vm657_vm9, %v578_v1, %v721_v7 }
 0x10a   : > { %1034 = vst [vmem:[%s1456_s28 + $0x18] sm:$0xff] %v1223_v10  ;;  %v784_v17 = vsel %vm656_vm10, %v467_v8, %v720_v11  ;;  %vm659_vm12 = vcmp.ge.f32.partialorder %v469_v14, 0.0  ;;  %v723_v18 = vmul.f32 0.2, %v469_v14  ;;  %vm661_vm13 = vcmp.ge.f32.partialorder %v582_v15, 0.0 }
 0x10b   : > { %v1224_v19 = vpack.c.bf16 %v784_v17, %v783_v12  ;;  %v786_v20 = vsel %vm658_vm11, %v580_v9, %v722_v13  ;;  %v725_v21 = vmul.f32 0.2, %v582_v15  ;;  %v471_v22 = vpop.f32.mrf.mxu0  ;;  %v584_v23 = vpop.f32.mrf.mxu1 }
 0x10c   : > { %v1225_v24 = vpack.c.bf16 %v786_v20, %v785_v16  ;;  %vm660_vm14 = vcmp.ge.f32.partialorder %v471_v22, 0.0  ;;  %v724_v25 = vmul.f32 0.2, %v471_v22  ;;  %v787_v26 = vsel %vm659_vm12, %v469_v14, %v723_v18 }
 0x10d   : > { %1035 = vst [vmem:[%s1456_s28 + $0x20] sm:$0xff] %v1224_v19  ;;  %vm662_vm15 = vcmp.ge.f32.partialorder %v584_v23, 0.0  ;;  %v726_v27 = vmul.f32 0.2, %v584_v23  ;;  %v475_v28 = vpop.f32.mrf.mxu0  ;;  %v588_v29 = vpop.f32.mrf.mxu1  ;;  %v789_v30 = vsel %vm661_vm13, %v582_v15, %v725_v21 }
 0x10e   : > { %1036 = vst [vmem:[%s1456_s28 + $0x28] sm:$0xff] %v1225_v24  ;;  %v788_v31 = vsel %vm660_vm14, %v471_v22, %v724_v25  ;;  %vm663_vm0 = vcmp.ge.f32.partialorder %v475_v28, 0.0  ;;  %v727_v32 = vmul.f32 0.2, %v475_v28  ;;  %vm665_vm1 = vcmp.ge.f32.partialorder %v588_v29, 0.0 }
 0x10f   : > { %v1226_v33 = vpack.c.bf16 %v788_v31, %v787_v26  ;;  %v790_v34 = vsel %vm662_vm15, %v584_v23, %v726_v27  ;;  %v729_v35 = vmul.f32 0.2, %v588_v29  ;;  %v477_v36 = vpop.f32.mrf.mxu0  ;;  %v590_v37 = vpop.f32.mrf.mxu1 }
 0x110   : > { %v1227_v38 = vpack.c.bf16 %v790_v34, %v789_v30  ;;  %vm664_vm2 = vcmp.ge.f32.partialorder %v477_v36, 0.0  ;;  %v728_v39 = vmul.f32 0.2, %v477_v36  ;;  %v791_v40 = vsel %vm663_vm0, %v475_v28, %v727_v32 }
 0x111   : > { %1037 = vst [vmem:[%s1456_s28 + $0x30] sm:$0xff] %v1226_v33  ;;  %vm666_vm3 = vcmp.ge.f32.partialorder %v590_v37, 0.0  ;;  %v730_v41 = vmul.f32 0.2, %v590_v37  ;;  %v479_v42 = vpop.f32.mrf.mxu0  ;;  %v592_v43 = vpop.f32.mrf.mxu1  ;;  %v793_v44 = vsel %vm665_vm1, %v588_v29, %v729_v35 }
 0x112   : > { %1038 = vst [vmem:[%s1456_s28 + $0x38] sm:$0xff] %v1227_v38  ;;  %v792_v45 = vsel %vm664_vm2, %v477_v36, %v728_v39  ;;  %vm667_vm4 = vcmp.ge.f32.partialorder %v479_v42, 0.0  ;;  %v731_v46 = vmul.f32 0.2, %v479_v42  ;;  %vm669_vm5 = vcmp.ge.f32.partialorder %v592_v43, 0.0 }
 0x113   : > { %v1228_v47 = vpack.c.bf16 %v792_v45, %v791_v40  ;;  %v794_v48 = vsel %vm666_vm3, %v590_v37, %v730_v41  ;;  %v733_v49 = vmul.f32 0.2, %v592_v43  ;;  %v481_v50 = vpop.f32.mrf.mxu0  ;;  %v594_v51 = vpop.f32.mrf.mxu1 }
 0x114   : > { %v1229_v52 = vpack.c.bf16 %v794_v48, %v793_v44  ;;  %vm668_vm6 = vcmp.ge.f32.partialorder %v481_v50, 0.0  ;;  %v732_v53 = vmul.f32 0.2, %v481_v50  ;;  %v795_v54 = vsel %vm667_vm4, %v479_v42, %v731_v46 }
 0x115   : > { %1039 = vst [vmem:[%s1456_s28 + $0x40] sm:$0xff] %v1228_v47  ;;  %vm670_vm7 = vcmp.ge.f32.partialorder %v594_v51, 0.0  ;;  %v734_v55 = vmul.f32 0.2, %v594_v51  ;;  %v485_v56 = vpop.f32.mrf.mxu0  ;;  %v598_v57 = vpop.f32.mrf.mxu1  ;;  %v797_v58 = vsel %vm669_vm5, %v592_v43, %v733_v49 }
 0x116   : > { %1040 = vst [vmem:[%s1456_s28 + $0x48] sm:$0xff] %v1229_v52  ;;  %v796_v59 = vsel %vm668_vm6, %v481_v50, %v732_v53  ;;  %vm671_vm8 = vcmp.ge.f32.partialorder %v485_v56, 0.0  ;;  %v735_v60 = vmul.f32 0.2, %v485_v56  ;;  %vm673_vm9 = vcmp.ge.f32.partialorder %v598_v57, 0.0 }
 0x117   : > { %v1230_v61 = vpack.c.bf16 %v796_v59, %v795_v54  ;;  %v798_v62 = vsel %vm670_vm7, %v594_v51, %v734_v55  ;;  %v737_v63 = vmul.f32 0.2, %v598_v57  ;;  %v487_v0 = vpop.f32.mrf.mxu0  ;;  %v600_v1 = vpop.f32.mrf.mxu1 }
 0x118   : > { %v1231_v2 = vpack.c.bf16 %v798_v62, %v797_v58  ;;  %vm672_vm10 = vcmp.ge.f32.partialorder %v487_v0, 0.0  ;;  %v736_v3 = vmul.f32 0.2, %v487_v0  ;;  %v799_v4 = vsel %vm671_vm8, %v485_v56, %v735_v60 }
 0x119   : > { %1041 = vst [vmem:[%s1456_s28 + $0x50] sm:$0xff] %v1230_v61  ;;  %vm674_vm11 = vcmp.ge.f32.partialorder %v600_v1, 0.0  ;;  %v738_v5 = vmul.f32 0.2, %v600_v1  ;;  %v489_v6 = vpop.f32.mrf.mxu0  ;;  %v602_v7 = vpop.f32.mrf.mxu1  ;;  %v801_v8 = vsel %vm673_vm9, %v598_v57, %v737_v63 }
 0x11a   : > { %1042 = vst [vmem:[%s1456_s28 + $0x58] sm:$0xff] %v1231_v2  ;;  %v800_v9 = vsel %vm672_vm10, %v487_v0, %v736_v3  ;;  %vm675_vm12 = vcmp.ge.f32.partialorder %v489_v6, 0.0  ;;  %v739_v10 = vmul.f32 0.2, %v489_v6  ;;  %vm677_vm13 = vcmp.ge.f32.partialorder %v602_v7, 0.0 }
 0x11b   : > { %v1232_v11 = vpack.c.bf16 %v800_v9, %v799_v4  ;;  %v802_v12 = vsel %vm674_vm11, %v600_v1, %v738_v5  ;;  %v741_v13 = vmul.f32 0.2, %v602_v7  ;;  %v491_v14 = vpop.f32.mrf.mxu0  ;;  %v604_v15 = vpop.f32.mrf.mxu1 }
 0x11c   : > { %v1233_v16 = vpack.c.bf16 %v802_v12, %v801_v8  ;;  %vm676_vm14 = vcmp.ge.f32.partialorder %v491_v14, 0.0  ;;  %v740_v17 = vmul.f32 0.2, %v491_v14  ;;  %v803_v18 = vsel %vm675_vm12, %v489_v6, %v739_v10 }
 0x11d   : > { %1043 = vst [vmem:[%s1456_s28 + $0x60] sm:$0xff] %v1232_v11  ;;  %vm678_vm15 = vcmp.ge.f32.partialorder %v604_v15, 0.0  ;;  %v742_v19 = vmul.f32 0.2, %v604_v15  ;;  %v495_v20 = vpop.f32.mrf.mxu0  ;;  %v608_v21 = vpop.f32.mrf.mxu1  ;;  %v805_v22 = vsel %vm677_vm13, %v602_v7, %v741_v13 }
 0x11e   : > { %1044 = vst [vmem:[%s1456_s28 + $0x68] sm:$0xff] %v1233_v16  ;;  %v804_v23 = vsel %vm676_vm14, %v491_v14, %v740_v17  ;;  %vm679_vm0 = vcmp.ge.f32.partialorder %v495_v20, 0.0  ;;  %v743_v24 = vmul.f32 0.2, %v495_v20  ;;  %vm681_vm1 = vcmp.ge.f32.partialorder %v608_v21, 0.0 }
 0x11f   : > { %v1234_v25 = vpack.c.bf16 %v804_v23, %v803_v18  ;;  %v806_v26 = vsel %vm678_vm15, %v604_v15, %v742_v19  ;;  %v745_v27 = vmul.f32 0.2, %v608_v21  ;;  %v497_v28 = vpop.f32.mrf.mxu0  ;;  %v610_v29 = vpop.f32.mrf.mxu1 }
 0x120   : > { %v1235_v30 = vpack.c.bf16 %v806_v26, %v805_v22  ;;  %vm680_vm2 = vcmp.ge.f32.partialorder %v497_v28, 0.0  ;;  %v744_v31 = vmul.f32 0.2, %v497_v28  ;;  %v807_v32 = vsel %vm679_vm0, %v495_v20, %v743_v24 }
 0x121   : > { %1045 = vst [vmem:[%s1456_s28 + $0x70] sm:$0xff] %v1234_v25  ;;  %vm682_vm3 = vcmp.ge.f32.partialorder %v610_v29, 0.0  ;;  %v746_v33 = vmul.f32 0.2, %v610_v29  ;;  %v499_v34 = vpop.f32.mrf.mxu0  ;;  %v612_v35 = vpop.f32.mrf.mxu1  ;;  %v809_v36 = vsel %vm681_vm1, %v608_v21, %v745_v27 }
 0x122   : > { %1046 = vst [vmem:[%s1456_s28 + $0x78] sm:$0xff] %v1235_v30  ;;  %v808_v37 = vsel %vm680_vm2, %v497_v28, %v744_v31  ;;  %vm683_vm4 = vcmp.ge.f32.partialorder %v499_v34, 0.0  ;;  %v747_v38 = vmul.f32 0.2, %v499_v34  ;;  %vm685_vm5 = vcmp.ge.f32.partialorder %v612_v35, 0.0 }
 0x123   : > { %v1236_v39 = vpack.c.bf16 %v808_v37, %v807_v32  ;;  %v810_v40 = vsel %vm682_vm3, %v610_v29, %v746_v33  ;;  %v749_v41 = vmul.f32 0.2, %v612_v35  ;;  %v501_v42 = vpop.f32.mrf.mxu0  ;;  %v614_v43 = vpop.f32.mrf.mxu1 }
 0x124   : > { %v1237_v44 = vpack.c.bf16 %v810_v40, %v809_v36  ;;  %vm684_vm6 = vcmp.ge.f32.partialorder %v501_v42, 0.0  ;;  %v748_v45 = vmul.f32 0.2, %v501_v42  ;;  %v811_v46 = vsel %vm683_vm4, %v499_v34, %v747_v38 }
 0x125   : > { %1047 = vst [vmem:[%s1456_s28 + $0x80] sm:$0xff] %v1236_v39  ;;  %vm686_vm7 = vcmp.ge.f32.partialorder %v614_v43, 0.0  ;;  %v750_v47 = vmul.f32 0.2, %v614_v43  ;;  %v505_v48 = vpop.f32.mrf.mxu0  ;;  %v618_v49 = vpop.f32.mrf.mxu1  ;;  %v813_v50 = vsel %vm685_vm5, %v612_v35, %v749_v41 }
 0x126   : > { %1048 = vst [vmem:[%s1456_s28 + $0x88] sm:$0xff] %v1237_v44  ;;  %v812_v51 = vsel %vm684_vm6, %v501_v42, %v748_v45  ;;  %vm687_vm8 = vcmp.ge.f32.partialorder %v505_v48, 0.0  ;;  %v751_v52 = vmul.f32 0.2, %v505_v48  ;;  %vm689_vm9 = vcmp.ge.f32.partialorder %v618_v49, 0.0 }
 0x127   : > { %v1238_v53 = vpack.c.bf16 %v812_v51, %v811_v46  ;;  %v814_v54 = vsel %vm686_vm7, %v614_v43, %v750_v47  ;;  %v753_v55 = vmul.f32 0.2, %v618_v49  ;;  %v507_v56 = vpop.f32.mrf.mxu0  ;;  %v620_v57 = vpop.f32.mrf.mxu1 }
 0x128   : > { %v1239_v58 = vpack.c.bf16 %v814_v54, %v813_v50  ;;  %vm688_vm10 = vcmp.ge.f32.partialorder %v507_v56, 0.0  ;;  %v752_v59 = vmul.f32 0.2, %v507_v56  ;;  %v815_v60 = vsel %vm687_vm8, %v505_v48, %v751_v52 }
 0x129   : > { %1049 = vst [vmem:[%s1456_s28 + $0x90] sm:$0xff] %v1238_v53  ;;  %vm690_vm11 = vcmp.ge.f32.partialorder %v620_v57, 0.0  ;;  %v754_v61 = vmul.f32 0.2, %v620_v57  ;;  %v509_v62 = vpop.f32.mrf.mxu0  ;;  %v622_v63 = vpop.f32.mrf.mxu1  ;;  %v817_v0 = vsel %vm689_vm9, %v618_v49, %v753_v55 }
 0x12a   : > { %1050 = vst [vmem:[%s1456_s28 + $0x98] sm:$0xff] %v1239_v58  ;;  %v816_v1 = vsel %vm688_vm10, %v507_v56, %v752_v59  ;;  %vm691_vm12 = vcmp.ge.f32.partialorder %v509_v62, 0.0  ;;  %v755_v2 = vmul.f32 0.2, %v509_v62  ;;  %vm693_vm13 = vcmp.ge.f32.partialorder %v622_v63, 0.0 }
 0x12b   : > { %v1240_v3 = vpack.c.bf16 %v816_v1, %v815_v60  ;;  %v818_v4 = vsel %vm690_vm11, %v620_v57, %v754_v61  ;;  %v757_v5 = vmul.f32 0.2, %v622_v63  ;;  %v511_v6 = vpop.f32.mrf.mxu0  ;;  %v624_v7 = vpop.f32.mrf.mxu1 }
 0x12c   : > { %v1241_v8 = vpack.c.bf16 %v818_v4, %v817_v0  ;;  %vm692_vm14 = vcmp.ge.f32.partialorder %v511_v6, 0.0  ;;  %v756_v9 = vmul.f32 0.2, %v511_v6  ;;  %v819_v10 = vsel %vm691_vm12, %v509_v62, %v755_v2 }
 0x12d   : > { %1051 = vst [vmem:[%s1456_s28 + $0xa0] sm:$0xff] %v1240_v3  ;;  %vm694_vm15 = vcmp.ge.f32.partialorder %v624_v7, 0.0  ;;  %v758_v11 = vmul.f32 0.2, %v624_v7  ;;  %v515_v12 = vpop.f32.mrf.mxu0  ;;  %v628_v13 = vpop.f32.mrf.mxu1  ;;  %v821_v14 = vsel %vm693_vm13, %v622_v63, %v757_v5 }
 0x12e   : > { %1052 = vst [vmem:[%s1456_s28 + $0xa8] sm:$0xff] %v1241_v8  ;;  %v820_v15 = vsel %vm692_vm14, %v511_v6, %v756_v9  ;;  %vm695_vm0 = vcmp.ge.f32.partialorder %v515_v12, 0.0  ;;  %v759_v16 = vmul.f32 0.2, %v515_v12  ;;  %vm697_vm1 = vcmp.ge.f32.partialorder %v628_v13, 0.0 }
 0x12f   : > { %v1242_v17 = vpack.c.bf16 %v820_v15, %v819_v10  ;;  %v822_v18 = vsel %vm694_vm15, %v624_v7, %v758_v11  ;;  %v761_v19 = vmul.f32 0.2, %v628_v13  ;;  %v517_v20 = vpop.f32.mrf.mxu0  ;;  %v630_v21 = vpop.f32.mrf.mxu1 }
 0x130   : > { %v1243_v22 = vpack.c.bf16 %v822_v18, %v821_v14  ;;  %vm696_vm2 = vcmp.ge.f32.partialorder %v517_v20, 0.0  ;;  %v760_v23 = vmul.f32 0.2, %v517_v20  ;;  %v823_v24 = vsel %vm695_vm0, %v515_v12, %v759_v16 }
 0x131   : > { %1053 = vst [vmem:[%s1456_s28 + $0xb0] sm:$0xff] %v1242_v17  ;;  %vm698_vm3 = vcmp.ge.f32.partialorder %v630_v21, 0.0  ;;  %v762_v25 = vmul.f32 0.2, %v630_v21  ;;  %v519_v26 = vpop.f32.mrf.mxu0  ;;  %v632_v27 = vpop.f32.mrf.mxu1  ;;  %v825_v28 = vsel %vm697_vm1, %v628_v13, %v761_v19 }
 0x132   : > { %1054 = vst [vmem:[%s1456_s28 + $0xb8] sm:$0xff] %v1243_v22  ;;  %v824_v29 = vsel %vm696_vm2, %v517_v20, %v760_v23  ;;  %vm699_vm4 = vcmp.ge.f32.partialorder %v519_v26, 0.0  ;;  %v763_v30 = vmul.f32 0.2, %v519_v26  ;;  %vm701_vm5 = vcmp.ge.f32.partialorder %v632_v27, 0.0 }
 0x133   : > { %v1244_v31 = vpack.c.bf16 %v824_v29, %v823_v24  ;;  %v826_v32 = vsel %vm698_vm3, %v630_v21, %v762_v25  ;;  %v765_v33 = vmul.f32 0.2, %v632_v27  ;;  %v521_v34 = vpop.f32.mrf.mxu0  ;;  %v634_v35 = vpop.f32.mrf.mxu1 }
 0x134   : > { %v1245_v36 = vpack.c.bf16 %v826_v32, %v825_v28  ;;  %vm700_vm6 = vcmp.ge.f32.partialorder %v521_v34, 0.0  ;;  %v764_v37 = vmul.f32 0.2, %v521_v34  ;;  %v827_v38 = vsel %vm699_vm4, %v519_v26, %v763_v30 }
 0x135   : > { %1055 = vst [vmem:[%s1456_s28 + $0xc0] sm:$0xff] %v1244_v31  ;;  %vm702_vm7 = vcmp.ge.f32.partialorder %v634_v35, 0.0  ;;  %v766_v39 = vmul.f32 0.2, %v634_v35  ;;  %v525_v40 = vpop.f32.mrf.mxu0  ;;  %v638_v41 = vpop.f32.mrf.mxu1  ;;  %v829_v42 = vsel %vm701_vm5, %v632_v27, %v765_v33 }
 0x136   : > { %1056 = vst [vmem:[%s1456_s28 + $0xc8] sm:$0xff] %v1245_v36  ;;  %v828_v43 = vsel %vm700_vm6, %v521_v34, %v764_v37  ;;  %vm703_vm8 = vcmp.ge.f32.partialorder %v525_v40, 0.0  ;;  %v767_v44 = vmul.f32 0.2, %v525_v40  ;;  %vm705_vm9 = vcmp.ge.f32.partialorder %v638_v41, 0.0 }
 0x137   : > { %v1246_v45 = vpack.c.bf16 %v828_v43, %v827_v38  ;;  %v830_v46 = vsel %vm702_vm7, %v634_v35, %v766_v39  ;;  %v769_v47 = vmul.f32 0.2, %v638_v41  ;;  %v527_v48 = vpop.f32.mrf.mxu0  ;;  %v640_v49 = vpop.f32.mrf.mxu1 }
 0x138   : > { %v1247_v50 = vpack.c.bf16 %v830_v46, %v829_v42  ;;  %vm704_vm10 = vcmp.ge.f32.partialorder %v527_v48, 0.0  ;;  %v768_v51 = vmul.f32 0.2, %v527_v48  ;;  %vm706_vm11 = vcmp.ge.f32.partialorder %v640_v49, 0.0 }
 0x139   : > { %1057 = vst [vmem:[%s1456_s28 + $0xd0] sm:$0xff] %v1246_v45  ;;  %v770_v52 = vmul.f32 0.2, %v640_v49  ;;  %v529_v53 = vpop.f32.mrf.mxu0  ;;  %v642_v54 = vpop.f32.mrf.mxu1  ;;  %v831_v55 = vsel %vm703_vm8, %v525_v40, %v767_v44  ;;  %v833_v56 = vsel %vm705_vm9, %v638_v41, %v769_v47 }
 0x13a   : > { %1058 = vst [vmem:[%s1456_s28 + $0xd8] sm:$0xff] %v1247_v50  ;;  %v832_v57 = vsel %vm704_vm10, %v527_v48, %v768_v51  ;;  %v771_v58 = vmul.f32 0.2, %v529_v53  ;;  %vm707_vm12 = vcmp.ge.f32.partialorder %v529_v53, 0.0  ;;  %v773_v61 = vmul.f32 0.2, %v642_v54 }
 0x13b   : > { %v1248_v59 = vpack.c.bf16 %v832_v57, %v831_v55  ;;  %v834_v60 = vsel %vm706_vm11, %v640_v49, %v770_v52  ;;  %v531_v62 = vpop.f32.mrf.mxu0  ;;  %v644_v63 = vpop.f32.mrf.mxu1  ;;  %vm709_vm13 = vcmp.ge.f32.partialorder %v642_v54, 0.0 }
 0x13c   : > { %v1249_v0 = vpack.c.bf16 %v834_v60, %v833_v56  ;;  %vm708_vm14 = vcmp.ge.f32.partialorder %v531_v62, 0.0  ;;  %v772_v1 = vmul.f32 0.2, %v531_v62  ;;  %vm710_vm15 = vcmp.ge.f32.partialorder %v644_v63, 0.0 }
 0x13d   : > { %1059 = vst [vmem:[%s1456_s28 + $0xe0] sm:$0xff] %v1248_v59  ;;  %v774_v2 = vmul.f32 0.2, %v644_v63  ;;  %v835_v3 = vsel %vm707_vm12, %v529_v53, %v771_v58  ;;  %v837_v5 = vsel %vm709_vm13, %v642_v54, %v773_v61 }
 0x13e   : > { %1060 = vst [vmem:[%s1456_s28 + $0xe8] sm:$0xff] %v1249_v0  ;;  %v836_v4 = vsel %vm708_vm14, %v531_v62, %v772_v1 }
 0x13f   : > { %v1250_v6 = vpack.c.bf16 %v836_v4, %v835_v3  ;;  %v838_v7 = vsel %vm710_vm15, %v644_v63, %v774_v2 }
 0x140   : > { %v1251_v8 = vpack.c.bf16 %v838_v7, %v837_v5 }
 0x141   : > { %1061 = vst [vmem:[%s1456_s28 + $0xf0] sm:$0xff] %v1250_v6 }
 0x142   : > { %1062 = vst [vmem:[%s1456_s28 + $0xf8] sm:$0xff] %v1251_v8 }
 0x143 PF: > { %s13_s9 = sadd.s32 1, %s1366_s9  }
 0x144   : > { %p10_p1 = scmp.ge.s32.totalorder %s13_s9, 4  }
 0x146   :  { %12 = sbr.rel (!%p10_p1) target bundleno = 1 (0x1), region = 63 }
 0x14b   :  { %1087 = vsyncpa [#allocation3], 1 }
 0x14c   :  { %1089 = vsyncpa [#allocation3 + $0x1], 1 }

// kernel: discriminator_forward.10
= control target key start
LH: loop header
LB: loop body
LE: loop exit
PB: predicated region body
PF: predicated region fallthrough
CT: control target
= control target key end

     0   :  { %s915_s12 = smov 0   ;;  %s1050_s0 = inlined_call_operand.vmem [shape: bf16[512,128], index: 0, kind: input, shape index: {}]   ;;  %s1051_s1 = inlined_call_operand.vmem [shape: f32[1,128], index: 1, kind: input, shape index: {}]   ;;  %s1052_s2 = inlined_call_operand.vmem [shape: f32[1,128], index: 2, kind: input, shape index: {}]   ;;  %s1053_s3 = inlined_call_operand.vmem [shape: bf16[512,128], index: 3, kind: output, shape index: {}]  }
   0x1 LB: > { %s628_s13 = sadd.s32 4294967295, %s893_s12   ;;  %p632_p0 = scmp.ge.s32.totalorder %s893_s12, 1  ;;  %s893_s12 = sphi %s915_s12, %s13_s12  }
   0x2   : > { %p138_p1 = scmp.lt.s32.totalorder %s893_s12, 3 }
   0x4   : > { %p139_p2 = pnand %p632_p0, %p138_p1 }
   0x5   : > { %s633_s14 = sshll.u32 (!%p139_p2), %s628_s13, 5 }
   0x6   : > { %142 = sbr.rel (%p139_p2) target bundleno = 74 (0x4a), region = 32  ;;  %p163_p3 = scmp.lt.s32.totalorder (!%p139_p2), %s633_s14, 63 }
   0xb   : > { %s1055_s14 = smov (!%p163_p3, %s633_s14), 63  ;;  %v936_v0 = vld [vmem:[%s1051_s1] ss:$0 sm:$0xff] }
   0xc   : > { %s634_s15 = sshll.u32 %s1055_s14, 2  ;;  %v945_v9 = vld [vmem:[%s1052_s2] ss:$0 sm:$0xff] }
   0xd   : > { %s931_s18 = scalar_lea.vmem %s1050_s0, %s634_s15  ;;  %s968_s25 = scalar_lea.vmem %s1053_s3, %s634_s15 }
   0xe   : > { %v706_v1 = vld [vmem:[%s931_s18] sm:$0xff]   ;;  %v849_v2 = vld [vmem:[%s931_s18 + $0x8] sm:$0xff]   ;;  %v850_v3 = vld [vmem:[%s931_s18 + $0x10] sm:$0xff]  }
   0xf   : > { %v707_v4 = vunpack.c.l.bf16 %v706_v1  ;;  %v708_v5 = vunpack.c.h.bf16 %v706_v1  ;;  %v711_v6 = vunpack.c.l.bf16 %v849_v2  ;;  %v712_v7 = vunpack.c.h.bf16 %v849_v2  ;;  %v851_v8 = vld [vmem:[%s931_s18 + $0x18] sm:$0xff]   ;;  %v852_v36 = vld [vmem:[%s931_s18 + $0x20] sm:$0xff]   ;;  %v853_v41 = vld [vmem:[%s931_s18 + $0x28] sm:$0xff]  }
  0x10   : > { %v715_v10 = vunpack.c.l.bf16 %v850_v3  ;;  %v716_v11 = vunpack.c.h.bf16 %v850_v3  ;;  %v719_v12 = vunpack.c.l.bf16 %v851_v8  ;;  %v720_v13 = vunpack.c.h.bf16 %v851_v8  ;;  %v854_v52 = vld [vmem:[%s931_s18 + $0x30] sm:$0xff]   ;;  %v855_v53 = vld [vmem:[%s931_s18 + $0x38] sm:$0xff]  }
  0x11   : > { %v245_v14 = vmul.f32 %v707_v4, %v936_v0  ;;  %v246_v15 = vmul.f32 %v708_v5, %v936_v0  ;;  %v247_v16 = vmul.f32 %v711_v6, %v936_v0  ;;  %v248_v17 = vmul.f32 %v712_v7, %v936_v0 }
  0x12   : > { %v249_v18 = vmul.f32 %v715_v10, %v936_v0  ;;  %v250_v19 = vmul.f32 %v716_v11, %v936_v0  ;;  %v251_v20 = vmul.f32 %v719_v12, %v936_v0  ;;  %v252_v21 = vmul.f32 %v720_v13, %v936_v0 }
  0x13   : > { %v284_v22 = vadd.f32 %v945_v9, %v245_v14  ;;  %v285_v23 = vadd.f32 %v945_v9, %v246_v15  ;;  %v286_v24 = vadd.f32 %v945_v9, %v247_v16  ;;  %v287_v25 = vadd.f32 %v945_v9, %v248_v17 }
  0x14   : > { %v288_v26 = vadd.f32 %v945_v9, %v249_v18  ;;  %v289_v27 = vadd.f32 %v945_v9, %v250_v19  ;;  %v290_v28 = vadd.f32 %v945_v9, %v251_v20  ;;  %v291_v29 = vadd.f32 %v945_v9, %v252_v21  ;;  %v856_v20 = vld [vmem:[%s931_s18 + $0x40] sm:$0xff]  }
  0x15   : > { %vm316_vm0 = vcmp.ge.f32.partialorder %v284_v22, 0.0  ;;  %vm317_vm1 = vcmp.ge.f32.partialorder %v285_v23, 0.0  ;;  %v348_v30 = vmul.f32 0.2, %v284_v22  ;;  %v349_v31 = vmul.f32 0.2, %v285_v23 }
  0x16   : > { %vm318_vm2 = vcmp.ge.f32.partialorder %v286_v24, 0.0  ;;  %vm319_vm3 = vcmp.ge.f32.partialorder %v287_v25, 0.0  ;;  %v350_v32 = vmul.f32 0.2, %v286_v24  ;;  %v351_v33 = vmul.f32 0.2, %v287_v25 }
  0x17   : > { %v380_v34 = vsel %vm316_vm0, %v284_v22, %v348_v30  ;;  %v381_v35 = vsel %vm317_vm1, %v285_v23, %v349_v31  ;;  %vm320_vm4 = vcmp.ge.f32.partialorder %v288_v26, 0.0  ;;  %vm321_vm5 = vcmp.ge.f32.partialorder %v289_v27, 0.0 }
  0x18   : > { %v772_v37 = vpack.c.bf16 %v381_v35, %v380_v34  ;;  %v382_v38 = vsel %vm318_vm2, %v286_v24, %v350_v32  ;;  %v383_v39 = vsel %vm319_vm3, %v287_v25, %v351_v33  ;;  %v352_v40 = vmul.f32 0.2, %v288_v26  ;;  %v857_v24 = vld [vmem:[%s931_s18 + $0x48] sm:$0xff]  }
  0x19   : > { %v777_v42 = vpack.c.bf16 %v383_v39, %v382_v38  ;;  %v353_v43 = vmul.f32 0.2, %v289_v27  ;;  %vm322_vm6 = vcmp.ge.f32.partialorder %v290_v28, 0.0  ;;  %vm323_vm7 = vcmp.ge.f32.partialorder %v291_v29, 0.0 }
  0x1a   : > { %773 = vst [vmem:[%s968_s25] sm:$0xff] %v772_v37   ;;  %v384_v44 = vsel %vm320_vm4, %v288_v26, %v352_v40  ;;  %v354_v45 = vmul.f32 0.2, %v290_v28  ;;  %v355_v46 = vmul.f32 0.2, %v291_v29  ;;  %v723_v47 = vunpack.c.l.bf16 %v852_v36 }
  0x1b   : > { %864 = vst [vmem:[%s968_s25 + $0x8] sm:$0xff] %v777_v42   ;;  %v385_v48 = vsel %vm321_vm5, %v289_v27, %v353_v43  ;;  %v724_v49 = vunpack.c.h.bf16 %v852_v36  ;;  %v727_v50 = vunpack.c.l.bf16 %v853_v41  ;;  %v728_v51 = vunpack.c.h.bf16 %v853_v41  ;;  %v858_v36 = vld [vmem:[%s931_s18 + $0x50] sm:$0xff]  }
  0x1c   : > { %v782_v54 = vpack.c.bf16 %v385_v48, %v384_v44  ;;  %v386_v55 = vsel %vm322_vm6, %v290_v28, %v354_v45  ;;  %v387_v56 = vsel %vm323_vm7, %v291_v29, %v355_v46  ;;  %v253_v57 = vmul.f32 %v723_v47, %v936_v0 }
  0x1d   : > { %v787_v58 = vpack.c.bf16 %v387_v56, %v386_v55  ;;  %v254_v59 = vmul.f32 %v724_v49, %v936_v0  ;;  %v255_v60 = vmul.f32 %v727_v50, %v936_v0  ;;  %v256_v61 = vmul.f32 %v728_v51, %v936_v0  ;;  %v859_v55 = vld [vmem:[%s931_s18 + $0x58] sm:$0xff]  }
  0x1e   : > { %865 = vst [vmem:[%s968_s25 + $0x10] sm:$0xff] %v782_v54   ;;  %v292_v62 = vadd.f32 %v945_v9, %v253_v57  ;;  %v731_v63 = vunpack.c.l.bf16 %v854_v52  ;;  %v732_v1 = vunpack.c.h.bf16 %v854_v52  ;;  %v735_v2 = vunpack.c.l.bf16 %v855_v53 }
  0x1f   : > { %866 = vst [vmem:[%s968_s25 + $0x18] sm:$0xff] %v787_v58   ;;  %v293_v3 = vadd.f32 %v945_v9, %v254_v59  ;;  %v294_v4 = vadd.f32 %v945_v9, %v255_v60  ;;  %v295_v5 = vadd.f32 %v945_v9, %v256_v61  ;;  %v736_v6 = vunpack.c.h.bf16 %v855_v53 }
  0x20   : > { %vm324_vm8 = vcmp.ge.f32.partialorder %v292_v62, 0.0  ;;  %v356_v7 = vmul.f32 0.2, %v292_v62  ;;  %v257_v8 = vmul.f32 %v731_v63, %v936_v0  ;;  %v258_v10 = vmul.f32 %v732_v1, %v936_v0  ;;  %v860_v1 = vld [vmem:[%s931_s18 + $0x60] sm:$0xff]  }
  0x21   : > { %vm325_vm9 = vcmp.ge.f32.partialorder %v293_v3, 0.0  ;;  %v357_v11 = vmul.f32 0.2, %v293_v3  ;;  %vm326_vm10 = vcmp.ge.f32.partialorder %v294_v4, 0.0  ;;  %vm327_vm11 = vcmp.ge.f32.partialorder %v295_v5, 0.0 }
  0x22   : > { %v388_v12 = vsel %vm324_vm8, %v292_v62, %v356_v7  ;;  %v358_v13 = vmul.f32 0.2, %v294_v4  ;;  %v359_v14 = vmul.f32 0.2, %v295_v5  ;;  %v296_v15 = vadd.f32 %v945_v9, %v257_v8 }
  0x23   : > { %v389_v16 = vsel %vm325_vm9, %v293_v3, %v357_v11  ;;  %v297_v17 = vadd.f32 %v945_v9, %v258_v10  ;;  %v259_v18 = vmul.f32 %v735_v2, %v936_v0  ;;  %v260_v19 = vmul.f32 %v736_v6, %v936_v0  ;;  %v861_v6 = vld [vmem:[%s931_s18 + $0x68] sm:$0xff]  }
  0x24   : > { %v792_v21 = vpack.c.bf16 %v389_v16, %v388_v12  ;;  %v390_v22 = vsel %vm326_vm10, %v294_v4, %v358_v13  ;;  %v391_v23 = vsel %vm327_vm11, %v295_v5, %v359_v14  ;;  %vm328_vm12 = vcmp.ge.f32.partialorder %v296_v15, 0.0 }
  0x25   : > { %v797_v25 = vpack.c.bf16 %v391_v23, %v390_v22  ;;  %vm329_vm13 = vcmp.ge.f32.partialorder %v297_v17, 0.0  ;;  %v360_v26 = vmul.f32 0.2, %v296_v15  ;;  %v361_v27 = vmul.f32 0.2, %v297_v17  ;;  %v862_v22 = vld [vmem:[%s931_s18 + $0x70] sm:$0xff]  }
  0x26   : > { %867 = vst [vmem:[%s968_s25 + $0x20] sm:$0xff] %v792_v21   ;;  %v298_v28 = vadd.f32 %v945_v9, %v259_v18  ;;  %v299_v29 = vadd.f32 %v945_v9, %v260_v19  ;;  %v739_v30 = vunpack.c.l.bf16 %v856_v20  ;;  %v740_v31 = vunpack.c.h.bf16 %v856_v20 }
  0x27   : > { %868 = vst [vmem:[%s968_s25 + $0x28] sm:$0xff] %v797_v25   ;;  %v392_v32 = vsel %vm328_vm12, %v296_v15, %v360_v26  ;;  %v393_v33 = vsel %vm329_vm13, %v297_v17, %v361_v27  ;;  %v743_v34 = vunpack.c.l.bf16 %v857_v24  ;;  %v744_v35 = vunpack.c.h.bf16 %v857_v24 }
  0x28   : > { %v802_v37 = vpack.c.bf16 %v393_v33, %v392_v32  ;;  %vm330_vm14 = vcmp.ge.f32.partialorder %v298_v28, 0.0  ;;  %vm331_vm15 = vcmp.ge.f32.partialorder %v299_v29, 0.0  ;;  %v362_v38 = vmul.f32 0.2, %v298_v28 }
  0x29   : > { %v363_v39 = vmul.f32 0.2, %v299_v29  ;;  %v261_v40 = vmul.f32 %v739_v30, %v936_v0  ;;  %v262_v41 = vmul.f32 %v740_v31, %v936_v0  ;;  %v263_v42 = vmul.f32 %v743_v34, %v936_v0 }
  0x2a   : > { %869 = vst [vmem:[%s968_s25 + $0x30] sm:$0xff] %v802_v37   ;;  %v394_v43 = vsel %vm330_vm14, %v298_v28, %v362_v38  ;;  %v264_v44 = vmul.f32 %v744_v35, %v936_v0  ;;  %v747_v45 = vunpack.c.l.bf16 %v858_v36  ;;  %v748_v46 = vunpack.c.h.bf16 %v858_v36 }
  0x2b   : > { %v395_v47 = vsel %vm331_vm15, %v299_v29, %v363_v39  ;;  %v300_v48 = vadd.f32 %v945_v9, %v261_v40  ;;  %v301_v49 = vadd.f32 %v945_v9, %v262_v41  ;;  %v302_v50 = vadd.f32 %v945_v9, %v263_v42  ;;  %v863_v41 = vld [vmem:[%s931_s18 + $0x78] sm:$0xff]  }
  0x2c   : > { %v807_v51 = vpack.c.bf16 %v395_v47, %v394_v43  ;;  %v303_v52 = vadd.f32 %v945_v9, %v264_v44  ;;  %v265_v53 = vmul.f32 %v747_v45, %v936_v0  ;;  %v266_v54 = vmul.f32 %v748_v46, %v936_v0 }
  0x2d   : > { %vm332_vm0 = vcmp.ge.f32.partialorder %v300_v48, 0.0  ;;  %vm333_vm1 = vcmp.ge.f32.partialorder %v301_v49, 0.0  ;;  %v364_v56 = vmul.f32 0.2, %v300_v48  ;;  %v365_v57 = vmul.f32 0.2, %v301_v49 }
  0x2e   : > { %870 = vst [vmem:[%s968_s25 + $0x38] sm:$0xff] %v807_v51   ;;  %vm334_vm2 = vcmp.ge.f32.partialorder %v302_v50, 0.0  ;;  %vm335_vm3 = vcmp.ge.f32.partialorder %v303_v52, 0.0  ;;  %v366_v58 = vmul.f32 0.2, %v302_v50  ;;  %v304_v62 = vadd.f32 %v945_v9, %v265_v53 }
  0x2f   : > { %v367_v59 = vmul.f32 0.2, %v303_v52  ;;  %v396_v60 = vsel %vm332_vm0, %v300_v48, %v364_v56  ;;  %v397_v61 = vsel %vm333_vm1, %v301_v49, %v365_v57  ;;  %v305_v63 = vadd.f32 %v945_v9, %v266_v54 }
  0x30   : > { %v812_v2 = vpack.c.bf16 %v397_v61, %v396_v60  ;;  %v398_v3 = vsel %vm334_vm2, %v302_v50, %v366_v58  ;;  %v751_v5 = vunpack.c.l.bf16 %v859_v55  ;;  %vm336_vm4 = vcmp.ge.f32.partialorder %v304_v62, 0.0 }
  0x31   : > { %v399_v4 = vsel %vm335_vm3, %v303_v52, %v367_v59  ;;  %vm337_vm5 = vcmp.ge.f32.partialorder %v305_v63, 0.0  ;;  %v368_v8 = vmul.f32 0.2, %v304_v62  ;;  %v369_v10 = vmul.f32 0.2, %v305_v63 }
  0x32   : > { %v817_v7 = vpack.c.bf16 %v399_v4, %v398_v3  ;;  %871 = vst [vmem:[%s968_s25 + $0x40] sm:$0xff] %v812_v2   ;;  %v752_v11 = vunpack.c.h.bf16 %v859_v55  ;;  %v267_v12 = vmul.f32 %v751_v5, %v936_v0  ;;  %v755_v13 = vunpack.c.l.bf16 %v860_v1 }
  0x33   : > { %v400_v14 = vsel %vm336_vm4, %v304_v62, %v368_v8  ;;  %v756_v15 = vunpack.c.h.bf16 %v860_v1  ;;  %v759_v16 = vunpack.c.l.bf16 %v861_v6  ;;  %v760_v17 = vunpack.c.h.bf16 %v861_v6 }
  0x34   : > { %872 = vst [vmem:[%s968_s25 + $0x48] sm:$0xff] %v817_v7   ;;  %v401_v18 = vsel %vm337_vm5, %v305_v63, %v369_v10  ;;  %v268_v19 = vmul.f32 %v752_v11, %v936_v0  ;;  %v306_v20 = vadd.f32 %v945_v9, %v267_v12  ;;  %v269_v21 = vmul.f32 %v755_v13, %v936_v0 }
  0x35   : > { %v822_v23 = vpack.c.bf16 %v401_v18, %v400_v14  ;;  %v270_v24 = vmul.f32 %v756_v15, %v936_v0  ;;  %v271_v25 = vmul.f32 %v759_v16, %v936_v0  ;;  %v272_v26 = vmul.f32 %v760_v17, %v936_v0 }
  0x36   : > { %v307_v27 = vadd.f32 %v945_v9, %v268_v19  ;;  %vm338_vm6 = vcmp.ge.f32.partialorder %v306_v20, 0.0  ;;  %v370_v28 = vmul.f32 0.2, %v306_v20  ;;  %v308_v29 = vadd.f32 %v945_v9, %v269_v21 }
  0x37   : > { %873 = vst [vmem:[%s968_s25 + $0x50] sm:$0xff] %v822_v23   ;;  %v309_v30 = vadd.f32 %v945_v9, %v270_v24  ;;  %v310_v31 = vadd.f32 %v945_v9, %v271_v25  ;;  %v311_v32 = vadd.f32 %v945_v9, %v272_v26  ;;  %v763_v33 = vunpack.c.l.bf16 %v862_v22 }
  0x38   : > { %vm339_vm7 = vcmp.ge.f32.partialorder %v307_v27, 0.0  ;;  %v371_v34 = vmul.f32 0.2, %v307_v27  ;;  %v402_v35 = vsel %vm338_vm6, %v306_v20, %v370_v28  ;;  %vm340_vm8 = vcmp.ge.f32.partialorder %v308_v29, 0.0 }
  0x39   : > { %vm341_vm9 = vcmp.ge.f32.partialorder %v309_v30, 0.0  ;;  %v372_v36 = vmul.f32 0.2, %v308_v29  ;;  %v373_v37 = vmul.f32 0.2, %v309_v30  ;;  %vm342_vm10 = vcmp.ge.f32.partialorder %v310_v31, 0.0 }
  0x3a   : > { %v403_v38 = vsel %vm339_vm7, %v307_v27, %v371_v34  ;;  %vm343_vm11 = vcmp.ge.f32.partialorder %v311_v32, 0.0  ;;  %v374_v39 = vmul.f32 0.2, %v310_v31  ;;  %v375_v40 = vmul.f32 0.2, %v311_v32 }
  0x3b   : > { %v827_v42 = vpack.c.bf16 %v403_v38, %v402_v35  ;;  %v404_v43 = vsel %vm340_vm8, %v308_v29, %v372_v36  ;;  %v405_v44 = vsel %vm341_vm9, %v309_v30, %v373_v37  ;;  %v764_v45 = vunpack.c.h.bf16 %v862_v22 }
  0x3c   : > { %v832_v46 = vpack.c.bf16 %v405_v44, %v404_v43  ;;  %v406_v47 = vsel %vm342_vm10, %v310_v31, %v374_v39  ;;  %v407_v48 = vsel %vm343_vm11, %v311_v32, %v375_v40  ;;  %v273_v49 = vmul.f32 %v763_v33, %v936_v0 }
  0x3d   : > { %874 = vst [vmem:[%s968_s25 + $0x58] sm:$0xff] %v827_v42   ;;  %v837_v50 = vpack.c.bf16 %v407_v48, %v406_v47  ;;  %v274_v51 = vmul.f32 %v764_v45, %v936_v0  ;;  %v767_v52 = vunpack.c.l.bf16 %v863_v41  ;;  %v768_v53 = vunpack.c.h.bf16 %v863_v41 }
  0x3e   : > { %875 = vst [vmem:[%s968_s25 + $0x60] sm:$0xff] %v832_v46   ;;  %v312_v54 = vadd.f32 %v945_v9, %v273_v49 }
  0x3f   : > { %876 = vst [vmem:[%s968_s25 + $0x68] sm:$0xff] %v837_v50   ;;  %v313_v55 = vadd.f32 %v945_v9, %v274_v51  ;;  %v275_v56 = vmul.f32 %v767_v52, %v936_v0  ;;  %v276_v57 = vmul.f32 %v768_v53, %v936_v0 }
  0x40   : > { %vm344_vm12 = vcmp.ge.f32.partialorder %v312_v54, 0.0  ;;  %v376_v58 = vmul.f32 0.2, %v312_v54 }
  0x41   : > { %vm345_vm13 = vcmp.ge.f32.partialorder %v313_v55, 0.0  ;;  %v377_v59 = vmul.f32 0.2, %v313_v55  ;;  %v314_v60 = vadd.f32 %v945_v9, %v275_v56  ;;  %v315_v61 = vadd.f32 %v945_v9, %v276_v57 }
  0x42   : > { %v408_v62 = vsel %vm344_vm12, %v312_v54, %v376_v58 }
  0x43   : > { %v409_v63 = vsel %vm345_vm13, %v313_v55, %v377_v59  ;;  %vm346_vm14 = vcmp.ge.f32.partialorder %v314_v60, 0.0  ;;  %vm347_vm15 = vcmp.ge.f32.partialorder %v315_v61, 0.0  ;;  %v378_v1 = vmul.f32 0.2, %v314_v60 }
  0x44   : > { %v842_v2 = vpack.c.bf16 %v409_v63, %v408_v62  ;;  %v379_v3 = vmul.f32 0.2, %v315_v61 }
  0x45   : > { %v410_v4 = vsel %vm346_vm14, %v314_v60, %v378_v1 }
  0x46   : > { %877 = vst [vmem:[%s968_s25 + $0x70] sm:$0xff] %v842_v2   ;;  %v411_v5 = vsel %vm347_vm15, %v315_v61, %v379_v3 }
  0x47   : > { %v847_v0 = vpack.c.bf16 %v411_v5, %v410_v4 }
  0x49   : > { %878 = vst [vmem:[%s968_s25 + $0x78] sm:$0xff] %v847_v0  }
  0x4a PF: > { %s13_s12 = sadd.s32 1, %s893_s12  }
  0x4b   : > { %p10_p4 = scmp.ge.s32.totalorder %s13_s12, 4  }
  0x4d   :  { %12 = sbr.rel (!%p10_p4) target bundleno = 1 (0x1), region = 62 }

// kernel: discriminator_forward.9
= control target key start
LH: loop header
LB: loop body
LE: loop exit
PB: predicated region body
PF: predicated region fallthrough
CT: control target
= control target key end

     0   :  { %s4368_s12 = smov 0   ;;  %s5453_s0 = inlined_call_operand.vmem [shape: bf16[2,17,17,256], index: 0, kind: input, shape index: {}]   ;;  %s5454_s1 = inlined_call_operand.vmem [shape: bf16[4,256,128], index: 1, kind: input, shape index: {}]   ;;  %s5455_s2 = inlined_call_operand.vmem [shape: bf16[512,128], index: 2, kind: output, shape index: {0}]   ;;  %s5456_s3 = inlined_call_operand.vmem [shape: f32[2,2,128], index: 3, kind: output, shape index: {1}]  }
   0x1 LB: > { %s4374_s13 = sadd.s32 4294967295, %s4346_s12   ;;  %p3243_p0 = scmp.ge.s32.totalorder %s4346_s12, 1  ;;  %s4346_s12 = sphi %s4368_s12, %s14_s12  }
   0x2   : > { %p140_p1 = scmp.lt.s32.totalorder %s4346_s12, 3 }
   0x4   : > { %p141_p2 = pnand %p3243_p0, %p140_p1 }
   0x6   : > { %144 = sbr.rel (%p141_p2) target bundleno = 516 (0x204), region = 28 }
   0xb   : > { %v4234_v0 = vld [vmem:[%s5454_s1 + $0xf8] sm:$0xff]   ;;  %v4238_v4 = vld [vmem:[%s5454_s1 + $0xf0] sm:$0xff]   ;;  %v4242_v8 = vld [vmem:[%s5454_s1 + $0xe8] sm:$0xff]   ;;  %p168_p3 = scmp.lt.s32.totalorder %s4374_s13, 1  ;;  %vm264_vm0 = vsmask.f32 3328 }
   0xc   : > { %v4235_v1 = vld [vmem:[%s5454_s1 + $0x78] sm:$0xff]   ;;  %3777 = vmatprep.subr.bf16.mxu0 %v4234_v0  ;;  %v4239_v5 = vld [vmem:[%s5454_s1 + $0x70] sm:$0xff]   ;;  %v4243_v9 = vld [vmem:[%s5454_s1 + $0x68] sm:$0xff]   ;;  %vm265_vm1 = vsmask.f32 7440  ;;  %vm3149_vm3 = vcmask 1040384  }
   0xd   : > { %v4236_v2 = vld [vmem:[%s5454_s1 + $0xb8] sm:$0xff]   ;;  %3889 = vmatprep.subr.bf16.mxu1 %v4235_v1  ;;  %v4240_v6 = vld [vmem:[%s5454_s1 + $0xb0] sm:$0xff]   ;;  %v4244_v10 = vld [vmem:[%s5454_s1 + $0xa8] sm:$0xff]   ;;  %s4446_s6 = scalar_select %p168_p3, %s4374_s13, 1 }
   0xe   : > { %v4237_v3 = vld [vmem:[%s5454_s1 + $0x38] sm:$0xff]   ;;  %3778 = vmatpush3.bf16.msra.mxu0 %v4236_v2  ;;  %v4241_v7 = vld [vmem:[%s5454_s1 + $0x30] sm:$0xff]   ;;  %v4245_v11 = vld [vmem:[%s5454_s1 + $0x28] sm:$0xff]  }
   0xf   : > { %3890 = vmatpush3.bf16.msra.mxu1 %v4237_v3  ;;  %3779 = vmatprep.subr.bf16.mxu0 %v4238_v4  ;;  %v4246_v12 = vld [vmem:[%s5454_s1 + $0xe0] sm:$0xff]   ;;  %v4250_v16 = vld [vmem:[%s5454_s1 + $0xd8] sm:$0xff]   ;;  %v4254_v20 = vld [vmem:[%s5454_s1 + $0xd0] sm:$0xff]   ;;  %s4225_s17 = smul.u32 408, %s4446_s6  ;;  %s3247_s4 = sshll.u32 %s4446_s6, 1 }
  0x10   : > { %3891 = vmatprep.subr.bf16.mxu1 %v4239_v5  ;;  %v4247_v13 = vld [vmem:[%s5454_s1 + $0x60] sm:$0xff]   ;;  %v4251_v17 = vld [vmem:[%s5454_s1 + $0x58] sm:$0xff]   ;;  %v4255_v21 = vld [vmem:[%s5454_s1 + $0x50] sm:$0xff]   ;;  %s182_s8 = scalar_lea.vmem %s5456_s3, %s3247_s4 }
  0x11   : > { %v4248_v14 = vld [vmem:[%s5454_s1 + $0xa0] sm:$0xff]   ;;  %v4252_v18 = vld [vmem:[%s5454_s1 + $0x98] sm:$0xff]   ;;  %v4256_v22 = vld [vmem:[%s5454_s1 + $0x90] sm:$0xff]   ;;  %s4476_s28 = scalar_lea.vmem %s5453_s0, %s4225_s17 }
  0x12   : > { %3780 = vmatpush3.bf16.msra.mxu0 %v4240_v6  ;;  %v4249_v15 = vld [vmem:[%s5454_s1 + $0x20] sm:$0xff]   ;;  %v4253_v19 = vld [vmem:[%s5454_s1 + $0x18] sm:$0xff]   ;;  %v4257_v23 = vld [vmem:[%s5454_s1 + $0x10] sm:$0xff]  }
  0x13   : > { %3892 = vmatpush3.bf16.msra.mxu1 %v4241_v7  ;;  %3781 = vmatprep.subr.bf16.mxu0 %v4242_v8  ;;  %v4258_v24 = vld [vmem:[%s5454_s1 + $0xc8] sm:$0xff]   ;;  %v4262_v28 = vld [vmem:[%s5454_s1 + $0xc0] sm:$0xff]   ;;  %v248_v34 = vld [vmem:[%s4476_s28 + $0x10] sm:$0x11] }
  0x14   : > { %3893 = vmatprep.subr.bf16.mxu1 %v4243_v9  ;;  %v4259_v25 = vld [vmem:[%s5454_s1 + $0x48] sm:$0xff]   ;;  %v4263_v29 = vld [vmem:[%s5454_s1 + $0x40] sm:$0xff]   ;;  %v4268_v38 = vld [vmem:[%s5454_s1 + $0x178] sm:$0xff]   ;;  %v287_v40 = vshll.u32 %v248_v34, 16 }
  0x15   : > { %v4260_v26 = vld [vmem:[%s5454_s1 + $0x88] sm:$0xff]   ;;  %v4264_v30 = vld [vmem:[%s5454_s1 + $0x80] sm:$0xff]   ;;  %vm4491_vm2 = vmor %vm264_vm0, %vm265_vm1 }
  0x16   : > { %3782 = vmatpush3.bf16.msra.mxu0 %v4244_v10  ;;  %v4261_v27 = vld [vmem:[%s5454_s1 + $0x8] sm:$0xff]   ;;  %v4265_v31 = vld [vmem:[%s5454_s1] sm:$0xff]   ;;  %v4270_v49 = vld [vmem:[%s5454_s1 + $0x1f8] sm:$0xff]   ;;  %v289_v51 = vrot.slane %v287_v40, 5 }
  0x17   : > { %3894 = vmatpush3.bf16.msra.mxu1 %v4245_v11  ;;  %3783 = vmatprep.subr.bf16.mxu0 %v4246_v12  ;;  %v184_v32 = vld [vmem:[%s4476_s28] sm:$0xff]  ;;  %v185_v33 = vld [vmem:[%s4476_s28 + $0x8] sm:$0xff]  ;;  %v4271_v52 = vld [vmem:[%s5454_s1 + $0x1b8] sm:$0xff]  }
  0x18   : > { %3895 = vmatprep.subr.bf16.mxu1 %v4247_v13  ;;  %v268_v35 = vshrl.u32 %v184_v32, 16  ;;  %v271_v36 = vshll.u32 %v184_v32, 16  ;;  %v277_v37 = vshll.u32 %v185_v33, 16  ;;  %v281_v39 = vshrl.u32 %v185_v33, 16  ;;  %v186_v53 = vld [vmem:[%s4476_s28 + $0x18] sm:$0xff]  ;;  %v187_v55 = vld [vmem:[%s4476_s28 + $0x20] sm:$0xff] }
  0x19   : > { %v3329_v41 = vcombine.high %v184_v32, %v185_v33  ;;  %v3328_v42 = vcombine.low %v184_v32, %v185_v33  ;;  %v249_v56 = vld [vmem:[%s4476_s28 + $0x28] sm:$0x11]  ;;  %v292_v57 = vshrl.u32 %v186_v53, 16  ;;  %v295_v58 = vshll.u32 %v186_v53, 16  ;;  %v4505_v63 = vld [vmem:[%s4476_s28 + $0x30] sm:$0xff]  ;;  %v4508_v0 = vld [vmem:[%s4476_s28 + $0x38] sm:$0xff] }
  0x1a   : > { %3784 = vmatpush3.bf16.msra.mxu0 %v4248_v14  ;;  %v270_v43 = vrot.slane %v268_v35, 4  ;;  %v273_v44 = vrot.slane %v271_v36, 5  ;;  %v279_v45 = vrot.slane %v277_v37, 5  ;;  %v283_v47 = vrot.slane %v281_v39, 4  ;;  %v250_v5 = vld [vmem:[%s4476_s28 + $0x40] sm:$0x11] }
  0x1b   : > { %3896 = vmatpush3.bf16.msra.mxu1 %v4249_v15  ;;  %3785 = vmatprep.subr.bf16.mxu0 %v4250_v16  ;;  %v301_v60 = vshll.u32 %v187_v55, 16  ;;  %v305_v61 = vshrl.u32 %v187_v55, 16  ;;  %v311_v62 = vshll.u32 %v249_v56, 16  ;;  %v294_v2 = vrot.slane %v292_v57, 4  ;;  %v4269_v7 = vld [vmem:[%s5454_s1 + $0x138] sm:$0xff]   ;;  %v4276_v15 = vld [vmem:[%s5454_s1 + $0x170] sm:$0xff]  }
  0x1c   : > { %3897 = vmatprep.subr.bf16.mxu1 %v4251_v17  ;;  %1357 = vmatprep.mubr.bf16.mxu1 %v3329_v41  ;;  %v274_v48 = vor.u32 %v273_v44, %v270_v43  ;;  %v284_v50 = vor.u32 %v283_v47, %v279_v45  ;;  %v297_v3 = vrot.slane %v295_v58, 5  ;;  %v3331_v4 = vcombine.high %v186_v53, %v187_v55  ;;  %v190_v35 = vld [vmem:[%s4476_s28 + $0x48] sm:$0xff]  ;;  %v191_v36 = vld [vmem:[%s4476_s28 + $0x50] sm:$0xff]  ;;  %v251_v39 = vld [vmem:[%s4476_s28 + $0x58] sm:$0x11] }
  0x1d   : > { %v303_v8 = vrot.slane %v301_v60, 5  ;;  %v307_v9 = vrot.slane %v305_v61, 4  ;;  %v313_v10 = vrot.slane %v311_v62, 5  ;;  %v3330_v14 = vcombine.low %v186_v53, %v187_v55  ;;  %v4546_v47 = vld [vmem:[%s4476_s28 + $0x60] sm:$0xff]  ;;  %v4552_v53 = vld [vmem:[%s4476_s28 + $0x68] sm:$0xff] }
  0x1e   : > { %3786 = vmatpush3.bf16.msra.mxu0 %v4252_v18  ;;  %v275_v54 = vrot.slane %v274_v48, 4  ;;  %v285_v59 = vrot.slane %v284_v50, 4  ;;  %v298_v13 = vor.u32 %v297_v3, %v294_v2  ;;  %v316_v17 = vshrl.u32 %v4505_v63, 16  ;;  %v4284_v48 = vld [vmem:[%s5454_s1 + $0x168] sm:$0xff]   ;;  %v252_v58 = vld [vmem:[%s4476_s28 + $0x70] sm:$0x11] }
  0x1f   : > { %3898 = vmatpush3.bf16.msra.mxu1 %v4253_v19  ;;  %3787 = vmatprep.subr.bf16.mxu0 %v4254_v20  ;;  %v308_v16 = vor.u32 %v307_v9, %v303_v8  ;;  %v319_v18 = vshll.u32 %v4505_v63, 16  ;;  %v325_v19 = vshll.u32 %v4508_v0, 16  ;;  %v4278_v20 = vld [vmem:[%s5454_s1 + $0x1f0] sm:$0xff]   ;;  %v3332_v34 = vcombine.low %v4505_v63, %v4508_v0 }
  0x20   : > { %3899 = vmatprep.subr.bf16.mxu1 %v4255_v21  ;;  %v280_v1 = vsel %vm4491_vm2, %v275_v54, %v279_v45  ;;  %v290_v6 = vsel %vm4491_vm2, %v285_v59, %v289_v51  ;;  %v299_v21 = vrot.slane %v298_v13, 4  ;;  %v340_v40 = vshrl.u32 %v190_v35, 16  ;;  %v4285_v59 = vld [vmem:[%s5454_s1 + $0x128] sm:$0xff]   ;;  %v4578_v13 = vld [vmem:[%s4476_s28 + $0x78] sm:$0xff] }
  0x21   : > { %v3280_v11 = vcombine.low %v280_v1, %v290_v6  ;;  %v3281_v12 = vcombine.high %v280_v1, %v290_v6  ;;  %v343_v41 = vshll.u32 %v190_v35, 16  ;;  %v349_v45 = vshll.u32 %v191_v36, 16 }
  0x22   : > { %3788 = vmatpush3.bf16.msra.mxu0 %v4256_v22  ;;  %v329_v22 = vshrl.u32 %v4508_v0, 16  ;;  %v342_v50 = vrot.slane %v340_v40, 4  ;;  %v359_v56 = vshll.u32 %v251_v39, 16  ;;  %v4554_v57 = vcombine.high %v190_v35, %v191_v36 }
  0x23   : > { %3900 = vmatpush3.bf16.msra.mxu1 %v4257_v23  ;;  %3789 = vmatprep.subr.bf16.mxu0 %v4258_v24  ;;  %v335_v23 = vshll.u32 %v250_v5, 16  ;;  %v3333_v24 = vcombine.high %v4505_v63, %v4508_v0  ;;  %v345_v51 = vrot.slane %v343_v41, 5  ;;  %v351_v55 = vrot.slane %v349_v45, 5  ;;  %v4286_v63 = vld [vmem:[%s5454_s1 + $0x1e8] sm:$0xff]   ;;  %v4295_v45 = vld [vmem:[%s5454_s1 + $0x1a0] sm:$0xff]  }
  0x24   : > { %3901 = vmatprep.subr.bf16.mxu1 %v4259_v25  ;;  %940 = vmatprep.mubr.bf16.mxu0 %v3281_v12  ;;  %v4277_v25 = vld [vmem:[%s5454_s1 + $0x130] sm:$0xff]   ;;  %v331_v32 = vrot.slane %v329_v22, 4  ;;  %v4567_v1 = vcombine.low %v190_v35, %v191_v36  ;;  %v364_v2 = vshrl.u32 %v4546_v47, 16  ;;  %v367_v3 = vshll.u32 %v4546_v47, 16 }
  0x25   : > { %v337_v33 = vrot.slane %v335_v23, 5  ;;  %v346_v61 = vor.u32 %v345_v51, %v342_v50  ;;  %v377_v12 = vshrl.u32 %v4552_v53, 16  ;;  %v4594_v23 = vcombine.high %v4546_v47, %v4552_v53 }
  0x26   : > { %3790 = vmatpush3.bf16.msra.mxu0 %v4260_v26  ;;  %v4279_v26 = vld [vmem:[%s5454_s1 + $0x1b0] sm:$0xff]   ;;  %v366_v9 = vrot.slane %v364_v2, 4 }
  0x27   : > { %3902 = vmatpush3.bf16.msra.mxu1 %v4261_v27  ;;  %3791 = vmatprep.subr.bf16.mxu0 %v4262_v28  ;;  %v309_v27 = vrot.slane %v308_v16, 4  ;;  %v318_v28 = vrot.slane %v316_v17, 4  ;;  %v347_v6 = vrot.slane %v346_v61, 4  ;;  %v383_v17 = vshll.u32 %v252_v58, 16  ;;  %5479 = vst [vmem:[#allocation2_spill] sm:$0xff] %v4594_v23  ;;  %v4651_v2 = vld [vmem:[%s4476_s28 + $0xb0] sm:$0xff] }
  0x28   : > { %3903 = vmatprep.subr.bf16.mxu1 %v4263_v29  ;;  %v321_v29 = vrot.slane %v319_v18, 5  ;;  %v4587_v18 = vld [vmem:[%s4476_s28 + $0x80] sm:$0xff]  ;;  %v379_v22 = vrot.slane %v377_v12, 4 }
  0x29   : > { %v314_v37 = vsel %vm4491_vm2, %v309_v27, %v313_v10  ;;  %v369_v10 = vrot.slane %v367_v3, 5  ;;  %v388_v27 = vshrl.u32 %v4578_v13, 16 }
  0x2a   : > { %3792 = vmatpush3.bf16.msra.mxu0 %v4264_v30  ;;  %v327_v30 = vrot.slane %v325_v19, 5  ;;  %v4292_v19 = vld [vmem:[%s5454_s1 + $0x160] sm:$0xff]  }
  0x2b   : > { %3904 = vmatpush3.bf16.msra.mxu1 %v4265_v31  ;;  %4001 = vmatprep.subr.bf16.mxu0 %v4268_v38  ;;  %v304_v31 = vsel %vm4491_vm2, %v299_v21, %v303_v8  ;;  %v322_v38 = vor.u32 %v321_v29, %v318_v28  ;;  %v361_v8 = vrot.slane %v359_v56, 5  ;;  %v391_v28 = vshll.u32 %v4578_v13, 16  ;;  %v4603_v29 = vld [vmem:[%s4476_s28 + $0x90] sm:$0xff] }
  0x2c   : > { %4113 = vmatprep.subr.bf16.mxu1 %v4270_v49  ;;  %v3282_v43 = vcombine.low %v304_v31, %v314_v37  ;;  %v332_v44 = vor.u32 %v331_v32, %v327_v30  ;;  %v390_v35 = vrot.slane %v388_v27, 4 }
  0x2d   : > { %941 = vmatmul.mubr.bf16.vlgmr.msra.gmra.mxu0 %v3280_v11  ;;  %v323_v49 = vrot.slane %v322_v38, 4  ;;  %v373_v11 = vshll.u32 %v4552_v53, 16  ;;  %v401_v38 = vshrl.u32 %v4587_v18, 16 }
  0x2e   : > { %1358 = vmatmul.mubr.bf16.vlgmr.msra.gmra.mxu1 %v3328_v42  ;;  %4002 = vmatpush3.bf16.msra.mxu0 %v4269_v7  ;;  %v3283_v42 = vcombine.high %v304_v31, %v314_v37  ;;  %v333_v54 = vrot.slane %v332_v44, 4  ;;  %v397_v37 = vshll.u32 %v4587_v18, 16  ;;  %v4619_v44 = vld [vmem:[%s4476_s28 + $0x98] sm:$0xff] }
  0x2f   : > { %4114 = vmatpush3.bf16.msra.mxu1 %v4271_v52  ;;  %1365 = vmatprep.mubr.bf16.mxu1 %v3331_v4  ;;  %v353_v52 = vshrl.u32 %v191_v36, 16  ;;  %v328_v60 = vsel %vm4491_vm2, %v323_v49, %v327_v30  ;;  %v4287_v4 = vld [vmem:[%s5454_s1 + $0x1a8] sm:$0xff]   ;;  %v375_v21 = vrot.slane %v373_v11, 5  ;;  %v4293_v30 = vld [vmem:[%s5454_s1 + $0x120] sm:$0xff]   ;;  %v393_v36 = vrot.slane %v391_v28, 5  ;;  %v4303_v11 = vld [vmem:[%s5454_s1 + $0x198] sm:$0xff]  }
  0x30   : > { %4115 = vmatprep.subr.bf16.mxu1 %v4278_v20  ;;  %4003 = vmatprep.subr.bf16.mxu0 %v4276_v15  ;;  %v338_v0 = vsel %vm4491_vm2, %v333_v54, %v337_v33  ;;  %v4582_v15 = vsel %vm4491_vm2, %v347_v6, %v351_v55  ;;  %v370_v20 = vor.u32 %v369_v10, %v366_v9  ;;  %v415_v49 = vshll.u32 %v4603_v29, 16  ;;  %v4302_v9 = vld [vmem:[%s5454_s1 + $0x1d8] sm:$0xff]   ;;  %v4688_v28 = vld [vmem:[%s4476_s28 + $0xc0] sm:$0xff] }
  0x31   : > { %948 = vmatprep.mubr.bf16.mxu0 %v3283_v42  ;;  %v355_v62 = vrot.slane %v353_v52, 4  ;;  %v3285_v5 = vcombine.high %v328_v60, %v338_v0  ;;  %v380_v33 = vor.u32 %v379_v22, %v375_v21  ;;  %v394_v41 = vor.u32 %v393_v36, %v390_v35  ;;  %v4704_v36 = vld [vmem:[%s4476_s28 + $0xc8] sm:$0xff] }
  0x32   : > { %4004 = vmatpush3.bf16.msra.mxu0 %v4277_v25  ;;  %v371_v32 = vrot.slane %v370_v20, 4  ;;  %v399_v42 = vrot.slane %v397_v37, 5  ;;  %v4637_v54 = vcombine.low %v4546_v47, %v4552_v53  ;;  %v421_v56 = vshll.u32 %v4619_v44, 16  ;;  %v4300_v47 = vld [vmem:[%s5454_s1 + $0x158] sm:$0xff]  }
  0x33   : > { %4116 = vmatpush3.bf16.msra.mxu1 %v4279_v26  ;;  %4005 = vmatprep.subr.bf16.mxu0 %v4284_v48  ;;  %v356_v7 = vor.u32 %v355_v62, %v351_v55  ;;  %v385_v26 = vrot.slane %v383_v17, 5  ;;  %v4615_v39 = vrot.slane %v380_v33, 4  ;;  %v412_v48 = vshrl.u32 %v4603_v29, 16  ;;  %v4301_v53 = vld [vmem:[%s5454_s1 + $0x118] sm:$0xff]  }
  0x34   : > { %4117 = vmatprep.subr.bf16.mxu1 %v4286_v63  ;;  %v4628_v50 = vsel %vm4491_vm2, %v371_v32, %v375_v21  ;;  %5480 = vst [vmem:[#allocation3_spill] sm:$0xff] %v4637_v54  ;;  %v425_v58 = vshrl.u32 %v4619_v44, 16  ;;  %v395_v61 = vrot.slane %v394_v41, 4  ;;  %v4647_v62 = vcombine.high %v4578_v13, %v4587_v18  ;;  %v254_v63 = vld [vmem:[%s4476_s28 + $0xa0] sm:$0x11] }
  0x35   : > { %949 = vmatmul.mubr.bf16.gmra.mxu0 %v3282_v43  ;;  %v4584_v16 = vrot.slane %v356_v7, 4  ;;  %v403_v43 = vrot.slane %v401_v38, 4  ;;  %v4633_v51 = vsel %vm4491_vm2, %v4615_v39, %v385_v26  ;;  %v423_v6 = vrot.slane %v421_v56, 5 }
  0x36   : > { %1366 = vmatmul.mubr.bf16.gmra.mxu1 %v3330_v14  ;;  %4006 = vmatpush3.bf16.msra.mxu0 %v4285_v59  ;;  %v3284_v14 = vcombine.low %v328_v60, %v338_v0  ;;  %v4642_v59 = vld [vmem:[%s4476_s28 + $0xa8] sm:$0xff]  ;;  %5481 = vst [vmem:[#allocation4_spill] sm:$0xff] %v4647_v62  ;;  %v414_v0 = vrot.slane %v412_v48, 4  ;;  %v3289_v3 = vcombine.high %v4628_v50, %v4633_v51  ;;  %v427_v7 = vrot.slane %v425_v58, 4 }
  0x37   : > { %1373 = vmatprep.mubr.bf16.mxu1 %v3333_v24  ;;  %956 = vmatprep.mubr.bf16.mxu0 %v3285_v5  ;;  %v253_v24 = vld [vmem:[%s4476_s28 + $0x88] sm:$0x11]  ;;  %v362_v25 = vsel %vm4491_vm2, %v4584_v16, %v361_v8  ;;  %v404_v52 = vor.u32 %v403_v43, %v399_v42  ;;  %v417_v5 = vrot.slane %v415_v49, 5  ;;  %v436_v8 = vshrl.u32 %v4642_v59, 16  ;;  %v4311_v43 = vld [vmem:[%s5454_s1 + $0x190] sm:$0xff]  }
  0x38   : > { %4118 = vmatpush3.bf16.msra.mxu1 %v4287_v4  ;;  %4007 = vmatprep.subr.bf16.mxu0 %v4292_v19  ;;  %v3287_v31 = vcombine.high %v4582_v15, %v362_v25  ;;  %v407_v40 = vshll.u32 %v253_v24, 16  ;;  %v3286_v60 = vcombine.low %v4582_v15, %v362_v25  ;;  %v439_v10 = vshll.u32 %v4642_v59, 16  ;;  %v255_v24 = vld [vmem:[%s4476_s28 + $0xb8] sm:$0x11]  ;;  %v4316_v58 = vld [vmem:[%s5454_s1 + $0x148] sm:$0xff]  }
  0x39   : > { %v4661_v4 = vrot.slane %v404_v52, 4  ;;  %v431_v12 = vshll.u32 %v254_v63, 16  ;;  %v449_v17 = vshrl.u32 %v4651_v2, 16  ;;  %v4677_v19 = vsel %vm4491_vm2, %v395_v61, %v399_v42  ;;  %v4310_v42 = vld [vmem:[%s5454_s1 + $0x1d0] sm:$0xff]  }
  0x3a   : > { %4008 = vmatpush3.bf16.msra.mxu0 %v4293_v30  ;;  %v409_v55 = vrot.slane %v407_v40, 5  ;;  %v418_v21 = vor.u32 %v417_v5, %v414_v0  ;;  %v428_v22 = vor.u32 %v427_v7, %v423_v6  ;;  %v4685_v25 = vcombine.low %v4578_v13, %v4587_v18  ;;  %v4308_v30 = vld [vmem:[%s5454_s1 + $0x150] sm:$0xff]   ;;  %v4735_v0 = vld [vmem:[%s4476_s28 + $0xd8] sm:$0xff] }
  0x3b   : > { %4009 = vmatprep.subr.bf16.mxu0 %v4300_v47  ;;  %v438_v26 = vrot.slane %v436_v8, 4  ;;  %v441_v27 = vrot.slane %v439_v10, 5  ;;  %v4697_v32 = vcombine.high %v4603_v29, %v4619_v44  ;;  %v4309_v13 = vld [vmem:[%s5454_s1 + $0x110] sm:$0xff]   ;;  %v433_v33 = vrot.slane %v431_v12, 5  ;;  %v4738_v47 = vld [vmem:[%s4476_s28 + $0xe0] sm:$0xff]  ;;  %v4317_v10 = vld [vmem:[%s5454_s1 + $0x108] sm:$0xff]  }
  0x3c   : > { %v410_v20 = vsel %vm4491_vm2, %v4661_v4, %v409_v55  ;;  %5482 = vst [vmem:[#allocation5_spill] sm:$0xff] %v4685_v25  ;;  %v451_v35 = vrot.slane %v449_v17, 4  ;;  %v419_v37 = vrot.slane %v418_v21, 4  ;;  %v4706_v38 = vrot.slane %v428_v22, 4  ;;  %v256_v5 = vld [vmem:[%s4476_s28 + $0xd0] sm:$0x11] }
  0x3d   : > { %957 = vmatmul.mubr.bf16.gmra.mxu0 %v3284_v14  ;;  %v445_v14 = vshll.u32 %v4651_v2, 16  ;;  %5483 = vst [vmem:[#allocation6_spill] sm:$0xff] %v4697_v32  ;;  %v3291_v18 = vcombine.high %v4677_v19, %v410_v20  ;;  %v442_v40 = vor.u32 %v441_v27, %v438_v26  ;;  %v455_v41 = vshll.u32 %v255_v24, 16  ;;  %v4318_v12 = vld [vmem:[%s5454_s1 + $0x1c8] sm:$0xff]  }
  0x3e   : > { %1374 = vmatmul.mubr.bf16.gmra.mxu1 %v3332_v34  ;;  %v4294_v34 = vld [vmem:[%s5454_s1 + $0x1e0] sm:$0xff]   ;;  %964 = vmatprep.mubr.bf16.mxu0 %v3287_v31  ;;  %v3288_v31 = vcombine.low %v4628_v50, %v4633_v51  ;;  %v463_v48 = vshll.u32 %v4688_v28, 16  ;;  %v469_v51 = vshll.u32 %v4704_v36, 16  ;;  %v473_v52 = vshrl.u32 %v4704_v36, 16  ;;  %v4319_v21 = vld [vmem:[%s5454_s1 + $0x188] sm:$0xff]  }
  0x3f   : > { %1381 = vmatprep.mubr.bf16.mxu1 %v4554_v57  ;;  %4119 = vmatprep.subr.bf16.mxu1 %v4294_v34  ;;  %v447_v34 = vrot.slane %v445_v14, 5  ;;  %v4722_v55 = vsel %vm4491_vm2, %v419_v37, %v423_v6  ;;  %v434_v56 = vsel %vm4491_vm2, %v4706_v38, %v433_v33  ;;  %v443_v61 = vrot.slane %v442_v40, 4 }
  0x40   : > { %4120 = vmatpush3.bf16.msra.mxu1 %v4295_v45  ;;  %4010 = vmatpush3.bf16.msra.mxu0 %v4301_v53  ;;  %v460_v45 = vshrl.u32 %v4688_v28, 16  ;;  %v457_v63 = vrot.slane %v455_v41, 5  ;;  %v3290_v53 = vcombine.low %v4677_v19, %v410_v20  ;;  %v465_v7 = vrot.slane %v463_v48, 5  ;;  %v4326_v48 = vld [vmem:[%s5454_s1 + $0x1c0] sm:$0xff]  }
  0x41   : > { %4121 = vmatprep.subr.bf16.mxu1 %v4302_v9  ;;  %4011 = vmatprep.subr.bf16.mxu0 %v4308_v30  ;;  %v452_v49 = vor.u32 %v451_v35, %v447_v34  ;;  %v3293_v8 = vcombine.high %v4722_v55, %v434_v56  ;;  %v475_v9 = vrot.slane %v473_v52, 4  ;;  %v487_v14 = vshll.u32 %v4735_v0, 16 }
  0x42   : > { %v462_v6 = vrot.slane %v460_v45, 4  ;;  %v493_v17 = vshll.u32 %v4738_v47, 16  ;;  %v497_v20 = vshrl.u32 %v4738_v47, 16  ;;  %v4766_v22 = vsel %vm4491_vm2, %v443_v61, %v447_v34  ;;  %v4324_v34 = vld [vmem:[%s5454_s1 + $0x140] sm:$0xff]  }
  0x43   : > { %v479_v24 = vshll.u32 %v256_v5, 16  ;;  %v489_v33 = vrot.slane %v487_v14, 5  ;;  %v3292_v35 = vcombine.low %v4722_v55, %v434_v56  ;;  %v4782_v37 = vcombine.high %v4688_v28, %v4704_v36  ;;  %v4325_v45 = vld [vmem:[%s5454_s1 + $0x100] sm:$0xff]  }
  0x44   : > { %4122 = vmatpush3.bf16.msra.mxu1 %v4303_v11  ;;  %4012 = vmatpush3.bf16.msra.mxu0 %v4309_v13  ;;  %v484_v11 = vshrl.u32 %v4735_v0, 16  ;;  %v466_v27 = vor.u32 %v465_v7, %v462_v6  ;;  %v4773_v13 = vcombine.low %v4642_v59, %v4651_v2  ;;  %v495_v40 = vrot.slane %v493_v17, 5  ;;  %v4327_v56 = vld [vmem:[%s5454_s1 + $0x180] sm:$0xff]  }
  0x45   : > { %965 = vmatmul.mubr.bf16.gmra.mxu0 %v3286_v60  ;;  %4123 = vmatprep.subr.bf16.mxu1 %v4310_v42  ;;  %v4732_v60 = vcombine.low %v4603_v29, %v4619_v44  ;;  %v4747_v29 = vrot.slane %v452_v49, 4  ;;  %v471_v44 = vrot.slane %v469_v51, 5  ;;  %5487 = vst [vmem:[#allocation10_spill] sm:$0xff] %v4782_v37  ;;  %v499_v41 = vrot.slane %v497_v20, 4  ;;  %v4785_v42 = vld [vmem:[%s4476_s28 + $0xf0] sm:$0xff] }
  0x46   : > { %1382 = vmatmul.mubr.bf16.gmra.mxu1 %v4567_v1  ;;  %972 = vmatprep.mubr.bf16.mxu0 %v3289_v3  ;;  %v4743_v3 = vcombine.high %v4642_v59, %v4651_v2  ;;  %5486 = vst [vmem:[#allocation9_spill] sm:$0xff] %v4773_v13  ;;  %v481_v2 = vrot.slane %v479_v24, 5  ;;  %v467_v49 = vrot.slane %v466_v27, 4  ;;  %v258_v24 = vld [vmem:[%s4476_s28 + $0x100] sm:$0x11] }
  0x47   : > { %1389 = vmatprep.mubr.bf16.mxu1 %v4594_v23  ;;  %5484 = vst [vmem:[#allocation7_spill] sm:$0xff] %v4732_v60  ;;  %4013 = vmatprep.subr.bf16.mxu0 %v4316_v58  ;;  %v458_v26 = vsel %vm4491_vm2, %v4747_v29, %v457_v63  ;;  %v476_v30 = vor.u32 %v475_v9, %v471_v44  ;;  %v508_v63 = vshrl.u32 %v4785_v42, 16 }
  0x48   : > { %4124 = vmatpush3.bf16.msra.mxu1 %v4311_v43  ;;  %5485 = vst [vmem:[#allocation8_spill] sm:$0xff] %v4743_v3  ;;  %4014 = vmatpush3.bf16.msra.mxu0 %v4317_v10  ;;  %v4788_v43 = vld [vmem:[%s4476_s28 + $0xf8] sm:$0xff]  ;;  %v3295_v59 = vcombine.high %v4766_v22, %v458_v26  ;;  %v500_v58 = vor.u32 %v499_v41, %v495_v40  ;;  %v4850_v41 = vld [vmem:[%s4476_s28 + $0x128] sm:$0xff] }
  0x49   : > { %4125 = vmatprep.subr.bf16.mxu1 %v4318_v12  ;;  %4015 = vmatprep.subr.bf16.mxu0 %v4324_v34  ;;  %v4797_v51 = vrot.slane %v476_v30, 4  ;;  %v517_v5 = vshll.u32 %v4788_v43, 16  ;;  %v521_v6 = vshrl.u32 %v4788_v43, 16  ;;  %v4810_v7 = vsel %vm4491_vm2, %v467_v49, %v471_v44  ;;  %v4829_v30 = vld [vmem:[%s4476_s28 + $0x108] sm:$0xff] }
  0x4a   : > { %v3294_v9 = vcombine.low %v4766_v22, %v458_v26  ;;  %v4818_v10 = vcombine.low %v4688_v28, %v4704_v36  ;;  %v4822_v12 = vcombine.high %v4735_v0, %v4738_v47  ;;  %v4824_v44 = vrot.slane %v500_v58, 4  ;;  %v4832_v28 = vld [vmem:[%s4476_s28 + $0x110] sm:$0xff] }
  0x4b   : > { %v510_v17 = vrot.slane %v508_v63, 4  ;;  %v519_v26 = vrot.slane %v517_v5, 5  ;;  %v523_v27 = vrot.slane %v521_v6, 4  ;;  %v527_v34 = vshll.u32 %v258_v24, 16 }
  0x4c   : > { %4126 = vmatpush3.bf16.msra.mxu1 %v4319_v21  ;;  %4016 = vmatpush3.bf16.msra.mxu0 %v4325_v45  ;;  %5488 = vst [vmem:[#allocation11_spill] sm:$0xff] %v4818_v10  ;;  %5489 = vst [vmem:[#allocation12_spill] sm:$0xff] %v4822_v12  ;;  %v545_v45 = vshrl.u32 %v4832_v28, 16  ;;  %v4864_v58 = vcombine.high %v4785_v42, %v4788_v43  ;;  %v569_v63 = vshrl.u32 %v4850_v41, 16 }
  0x4d   : > { %973 = vmatmul.mubr.bf16.gmra.mxu0 %v3288_v31  ;;  %v486_v31 = vrot.slane %v484_v11, 4  ;;  %4127 = vmatprep.subr.bf16.mxu1 %v4326_v48  ;;  %v4857_v48 = vcombine.low %v4735_v0, %v4738_v47  ;;  %v529_v5 = vrot.slane %v527_v34, 5 }
  0x4e   : > { %1390 = vmatmul.mubr.bf16.gmra.mxu1 %v4637_v54  ;;  %980 = vmatprep.mubr.bf16.mxu0 %v3291_v18  ;;  %v257_v18 = vld [vmem:[%s4476_s28 + $0xe8] sm:$0x11]  ;;  %5491 = vst [vmem:[#allocation14_spill] sm:$0xff] %v4864_v58 }
  0x4f   : > { %1397 = vmatprep.mubr.bf16.mxu1 %v4647_v62  ;;  %v490_v52 = vor.u32 %v489_v33, %v486_v31  ;;  %v503_v61 = vshll.u32 %v257_v18, 16  ;;  %v4840_v31 = vld [vmem:[%s4476_s28 + $0x120] sm:$0xff]  ;;  %5490 = vst [vmem:[#allocation13_spill] sm:$0xff] %v4857_v48 }
  0x50   : > { %4128 = vmatpush3.bf16.msra.mxu1 %v4327_v56  ;;  %v556_v49 = vshrl.u32 %v4840_v31, 16  ;;  %v3493_v62 = vld [vmem:[%s4476_s28 + $0x40] sm:$0x11] }
  0x51   : > { %v491_v11 = vrot.slane %v490_v52, 4  ;;  %v505_v14 = vrot.slane %v503_v61, 5  ;;  %v559_v52 = vshll.u32 %v4840_v31, 16  ;;  %v565_v61 = vshll.u32 %v4850_v41, 16 }
  0x53   : > { %v4837_v36 = vsel %vm4491_vm2, %v491_v11, %v495_v40  ;;  %v4845_v18 = vsel %vm4491_vm2, %v4824_v44, %v505_v14  ;;  %v524_v40 = vor.u32 %v523_v27, %v519_v26  ;;  %v561_v24 = vrot.slane %v559_v52, 5 }
  0x54   : > { %v3299_v0 = vcombine.high %v4837_v36, %v4845_v18  ;;  %v567_v34 = vrot.slane %v565_v61, 5  ;;  %v4895_v61 = vld [vmem:[%s4476_s28 + $0x150] sm:$0xff] }
  0x55   : > { %981 = vmatmul.mubr.bf16.gmra.mxu0 %v3290_v53  ;;  %v511_v53 = vshll.u32 %v4785_v42, 16 }
  0x56   : > { %1398 = vmatmul.mubr.bf16.gmra.mxu1 %v4685_v25  ;;  %988 = vmatprep.mubr.bf16.mxu0 %v3293_v8  ;;  %v482_v8 = vsel %vm4491_vm2, %v4797_v51, %v481_v2  ;;  %v541_v2 = vshll.u32 %v4832_v28, 16 }
  0x57   : > { %1405 = vmatprep.mubr.bf16.mxu1 %v4697_v32  ;;  %v513_v20 = vrot.slane %v511_v53, 5  ;;  %v3297_v21 = vcombine.high %v4810_v7, %v482_v8  ;;  %v3296_v56 = vcombine.low %v4810_v7, %v482_v8  ;;  %v4869_v53 = vld [vmem:[%s4476_s28 + $0x138] sm:$0xff]  ;;  %v4876_v8 = vrot.slane %v524_v40, 4 }
  0x58   : > { %v543_v14 = vrot.slane %v541_v2, 5  ;;  %v580_v27 = vshrl.u32 %v4869_v53, 16 }
  0x59   : > { %v514_v33 = vor.u32 %v513_v20, %v510_v17  ;;  %v547_v17 = vrot.slane %v545_v45, 4  ;;  %v259_v20 = vld [vmem:[%s4476_s28 + $0x118] sm:$0x11] }
  0x5a   : > { %v551_v52 = vshll.u32 %v259_v20, 16 }
  0x5b   : > { %v515_v47 = vrot.slane %v514_v33, 4  ;;  %v260_v33 = vld [vmem:[%s4476_s28 + $0x130] sm:$0x11] }
  0x5d   : > { %989 = vmatmul.mubr.bf16.gmra.mxu0 %v3292_v35  ;;  %v532_v35 = vshrl.u32 %v4829_v30, 16  ;;  %v4892_v2 = vsel %vm4491_vm2, %v515_v47, %v519_v26  ;;  %v4903_v26 = vld [vmem:[%s4476_s28 + $0x158] sm:$0xff]  ;;  %v3298_v47 = vcombine.low %v4837_v36, %v4845_v18 }
  0x5e   : > { %1406 = vmatmul.mubr.bf16.gmra.mxu1 %v4732_v60  ;;  %996 = vmatprep.mubr.bf16.mxu0 %v3295_v59  ;;  %v535_v59 = vshll.u32 %v4829_v30, 16  ;;  %v613_v18 = vshll.u32 %v4903_v26, 16  ;;  %v3517_v60 = vld [vmem:[%s4476_s28 + $0x100] sm:$0x11] }
  0x5f   : > { %1413 = vmatprep.mubr.bf16.mxu1 %v4743_v3  ;;  %v534_v6 = vrot.slane %v532_v35, 4  ;;  %v571_v35 = vrot.slane %v569_v63, 4  ;;  %v575_v63 = vshll.u32 %v260_v33, 16  ;;  %v617_v33 = vshrl.u32 %v4903_v26, 16 }
  0x60   : > { %v537_v11 = vrot.slane %v535_v59, 5  ;;  %v4888_v59 = vcombine.low %v4785_v42, %v4788_v43  ;;  %v2285_v32 = vshll.u32 %v3517_v60, 16 }
  0x62   : > { %5492 = vst [vmem:[#allocation15_spill] sm:$0xff] %v4888_v59  ;;  %v538_v45 = vor.u32 %v537_v11, %v534_v6  ;;  %v4909_v6 = vcombine.high %v4829_v30, %v4832_v28  ;;  %v261_v11 = vld [vmem:[%s4476_s28 + $0x148] sm:$0x11] }
  0x63   : > { %v599_v3 = vshll.u32 %v261_v11, 16 }
  0x64   : > { %5493 = vst [vmem:[#allocation16_spill] sm:$0xff] %v4909_v6  ;;  %v539_v20 = vrot.slane %v538_v45, 4 }
  0x65   : > { %997 = vmatmul.mubr.bf16.gmra.mxu0 %v3294_v9  ;;  %v4874_v9 = vld [vmem:[%s4476_s28 + $0x140] sm:$0xff] }
  0x66   : > { %1414 = vmatmul.mubr.bf16.gmra.mxu1 %v4773_v13  ;;  %1004 = vmatprep.mubr.bf16.mxu0 %v3297_v21  ;;  %v558_v21 = vrot.slane %v556_v49, 4  ;;  %v593_v40 = vshrl.u32 %v4874_v9, 16  ;;  %v548_v49 = vor.u32 %v547_v17, %v543_v14  ;;  %v607_v17 = vshll.u32 %v4895_v61, 16 }
  0x67   : > { %1421 = vmatprep.mubr.bf16.mxu1 %v4782_v37 }
  0x68   : > { %v562_v43 = vor.u32 %v561_v24, %v558_v21  ;;  %v595_v37 = vrot.slane %v593_v40, 4  ;;  %v553_v21 = vrot.slane %v551_v52, 5  ;;  %v577_v24 = vrot.slane %v575_v63, 5 }
  0x69   : > { %v4928_v52 = vsel %vm4491_vm2, %v539_v20, %v543_v14  ;;  %v619_v14 = vrot.slane %v617_v33, 4 }
  0x6d   : > { %1005 = vmatmul.mubr.bf16.gmra.mxu0 %v3296_v56  ;;  %v4900_v56 = vsel %vm4491_vm2, %v4876_v8, %v529_v5  ;;  %v604_v5 = vshrl.u32 %v4895_v61, 16 }
  0x6e   : > { %1422 = vmatmul.mubr.bf16.gmra.mxu1 %v4818_v10  ;;  %v589_v10 = vshll.u32 %v4874_v9, 16  ;;  %1012 = vmatprep.mubr.bf16.mxu0 %v3299_v0  ;;  %v572_v0 = vor.u32 %v571_v35, %v567_v34  ;;  %v563_v35 = vrot.slane %v562_v43, 4  ;;  %v4942_v43 = vcombine.high %v4840_v31, %v4850_v41 }
  0x6f   : > { %1429 = vmatprep.mubr.bf16.mxu1 %v4822_v12  ;;  %v583_v12 = vshll.u32 %v4869_v53, 16  ;;  %v606_v45 = vrot.slane %v604_v5, 4  ;;  %v601_v5 = vrot.slane %v599_v3, 5  ;;  %v4972_v3 = vcombine.high %v4869_v53, %v4874_v9 }
  0x70   : > { %v4921_v40 = vrot.slane %v572_v0, 4  ;;  %5495 = vst [vmem:[#allocation18_spill] sm:$0xff] %v4942_v43  ;;  %v4944_v0 = vrot.slane %v613_v18, 5  ;;  %v4951_v11 = vsel %vm4491_vm2, %v563_v35, %v567_v34  ;;  %v3502_v34 = vld [vmem:[%s4476_s28 + $0x88] sm:$0x11] }
  0x71   : > { %v585_v42 = vrot.slane %v583_v12, 5  ;;  %v3301_v12 = vcombine.high %v4892_v2, %v4900_v56 }
  0x75   : > { %1013 = vmatmul.mubr.bf16.gmra.mxu0 %v3298_v47  ;;  %v4947_v47 = vld [vmem:[%s4476_s28 + $0x168] sm:$0xff] }
  0x76   : > { %1430 = vmatmul.mubr.bf16.gmra.mxu1 %v4857_v48  ;;  %v591_v48 = vrot.slane %v589_v10, 5  ;;  %v4916_v10 = vrot.slane %v548_v49, 4  ;;  %v609_v49 = vrot.slane %v607_v17, 5  ;;  %1020 = vmatprep.mubr.bf16.mxu0 %v3301_v12  ;;  %v4964_v12 = vcombine.low %v4840_v31, %v4850_v41  ;;  %v3508_v41 = vld [vmem:[%s4476_s28 + $0xb8] sm:$0x11] }
  0x77   : > { %1437 = vmatprep.mubr.bf16.mxu1 %v4864_v58  ;;  %v582_v58 = vrot.slane %v580_v27, 4  ;;  %v628_v31 = vshrl.u32 %v4947_v47, 16 }
  0x78   : > { %v596_v13 = vor.u32 %v595_v37, %v591_v48  ;;  %v4933_v63 = vsel %vm4491_vm2, %v4916_v10, %v553_v21  ;;  %v4937_v37 = vcombine.low %v4829_v30, %v4832_v28  ;;  %v4956_v30 = vsel %vm4491_vm2, %v4921_v40, %v577_v24 }
  0x79   : > { %v586_v27 = vor.u32 %v585_v42, %v582_v58  ;;  %v3300_v58 = vcombine.low %v4892_v2, %v4900_v56  ;;  %v262_v42 = vld [vmem:[%s4476_s28 + $0x160] sm:$0x11]  ;;  %v3303_v17 = vcombine.high %v4928_v52, %v4933_v63  ;;  %v610_v20 = vor.u32 %v609_v49, %v606_v45  ;;  %v3511_v49 = vld [vmem:[%s4476_s28 + $0xd0] sm:$0x11] }
  0x7a   : > { %5494 = vst [vmem:[#allocation17_spill] sm:$0xff] %v4937_v37  ;;  %v4958_v28 = vrot.slane %v596_v13, 4  ;;  %v623_v21 = vshll.u32 %v262_v42, 16  ;;  %v3302_v24 = vcombine.low %v4928_v52, %v4933_v63  ;;  %v4976_v13 = vcombine.low %v4869_v53, %v4874_v9  ;;  %v4999_v63 = vld [vmem:[%s4476_s28 + $0x170] sm:$0xff]  ;;  %v5002_v42 = vld [vmem:[%s4476_s28 + $0x18] sm:$0xff] }
  0x7b   : > { %v587_v56 = vrot.slane %v586_v27, 4  ;;  %v3505_v27 = vld [vmem:[%s4476_s28 + $0xa0] sm:$0x11]  ;;  %v3305_v18 = vcombine.high %v4951_v11, %v4956_v30  ;;  %v620_v45 = vor.u32 %v619_v14, %v4944_v0  ;;  %v5005_v14 = vrot.slane %v610_v20, 4 }
  0x7c   : > { %5496 = vst [vmem:[#allocation19_spill] sm:$0xff] %v4976_v13  ;;  %v4994_v53 = vsel %vm4491_vm2, %v4958_v28, %v601_v5  ;;  %v5007_v33 = vrot.slane %v623_v21, 5  ;;  %v2213_v9 = vshll.u32 %v3508_v41, 16  ;;  %v637_v20 = vshll.u32 %v4999_v63, 16 }
  0x7d   : > { %v4986_v35 = vsel %vm4491_vm2, %v587_v56, %v591_v48  ;;  %v2165_v48 = vshll.u32 %v3502_v34, 16  ;;  %v2189_v56 = vshll.u32 %v3505_v27, 16  ;;  %1021 = vmatmul.mubr.bf16.gmra.mxu0 %v3300_v58  ;;  %v2237_v58 = vshll.u32 %v3511_v49, 16 }
  0x7e   : > { %1438 = vmatmul.mubr.bf16.gmra.mxu1 %v4888_v59  ;;  %1028 = vmatprep.mubr.bf16.mxu0 %v3303_v17  ;;  %v3514_v59 = vld [vmem:[%s4476_s28 + $0xe8] sm:$0x11]  ;;  %v641_v21 = vshrl.u32 %v4999_v63, 16  ;;  %v2050_v5 = vshrl.u32 %v5002_v42, 16  ;;  %v2053_v17 = vshll.u32 %v5002_v42, 16  ;;  %v2215_v25 = vrot.slane %v2213_v9, 5 }
  0x7f   : > { %1445 = vmatprep.mubr.bf16.mxu1 %v4909_v6  ;;  %v5013_v6 = vrot.slane %v628_v31, 4  ;;  %v2167_v34 = vrot.slane %v2165_v48, 5  ;;  %v2191_v27 = vrot.slane %v2189_v56, 5  ;;  %v3523_v48 = vld [vmem:[%s4476_s28 + $0x130] sm:$0x11]  ;;  %v2261_v54 = vshll.u32 %v3514_v59, 16 }
  0x80   : > { %v5049_v56 = vsel %vm4491_vm2, %v4747_v29, %v2215_v25  ;;  %v2287_v29 = vrot.slane %v2285_v32, 5  ;;  %v643_v25 = vrot.slane %v641_v21, 4  ;;  %v5111_v9 = vld [vmem:[%s4476_s28 + $0x38] sm:$0xff]  ;;  %v5499_v21 = vcombine.low %v4951_v11, %v4956_v30 }
  0x81   : > { %v5029_v49 = vsel %vm4491_vm2, %v4661_v4, %v2167_v34  ;;  %v5040_v41 = vsel %vm4491_vm2, %v4706_v38, %v2191_v27  ;;  %v2239_v34 = vrot.slane %v2237_v58, 5  ;;  %v2263_v27 = vrot.slane %v2261_v54, 5  ;;  %v3526_v58 = vld [vmem:[%s4476_s28 + $0x148] sm:$0x11] }
  0x82   : > { %5497 = vst [vmem:[#allocation20_spill] sm:$0xff] %v5029_v49  ;;  %v2333_v49 = vshll.u32 %v3523_v48, 16 }
  0x83   : > { %v5059_v59 = vsel %vm4491_vm2, %v4797_v51, %v2239_v34  ;;  %v5071_v54 = vsel %vm4491_vm2, %v4824_v44, %v2263_v27  ;;  %v639_v34 = vrot.slane %v637_v20, 5  ;;  %v3356_v27 = vcombine.low %v4895_v61, %v4903_v26 }
  0x84   : > { %v2335_v51 = vrot.slane %v2333_v49, 5 }
  0x85   : > { %1029 = vmatmul.mubr.bf16.gmra.mxu0 %v3302_v24  ;;  %v2357_v24 = vshll.u32 %v3526_v58, 16  ;;  %v2055_v58 = vrot.slane %v2053_v17, 5  ;;  %v644_v20 = vor.u32 %v643_v25, %v639_v34 }
  0x86   : > { %1446 = vmatmul.mubr.bf16.gmra.mxu1 %v4937_v37  ;;  %v5011_v37 = vld [vmem:[%s4476_s28 + $0x20] sm:$0xff]  ;;  %1036 = vmatprep.mubr.bf16.mxu0 %v3305_v18  ;;  %v5102_v18 = vld [vmem:[%s4476_s28 + $0x30] sm:$0xff] }
  0x87   : > { %1453 = vmatprep.mubr.bf16.mxu1 %v4942_v43  ;;  %v5016_v43 = vrot.slane %v620_v45, 4  ;;  %v2059_v31 = vshll.u32 %v5011_v37, 16  ;;  %v3520_v45 = vld [vmem:[%s4476_s28 + $0x118] sm:$0x11]  ;;  %v2063_v48 = vshrl.u32 %v5011_v37, 16 }
  0x88   : > { %v2309_v23 = vshll.u32 %v3520_v45, 16 }
  0x89   : > { %v2061_v44 = vrot.slane %v2059_v31, 5  ;;  %v2065_v60 = vrot.slane %v2063_v48, 4  ;;  %v616_v31 = vsel %vm4491_vm2, %v5005_v14, %v4944_v0  ;;  %v263_v48 = vld [vmem:[%s4476_s28 + $0x178] sm:$0x11]  ;;  %v2074_v14 = vshrl.u32 %v5102_v18, 16 }
  0x8a   : > { %v2311_v45 = vrot.slane %v2309_v23, 5  ;;  %v5080_v23 = vsel %vm4491_vm2, %v4876_v8, %v2287_v29  ;;  %v2052_v8 = vrot.slane %v2050_v5, 4  ;;  %v2359_v29 = vrot.slane %v2357_v24, 5 }
  0x8b   : > { %v5498_v5 = vshll.u32 %v4947_v47, 16  ;;  %v5500_v24 = vcombine.high %v4895_v61, %v4903_v26  ;;  %v2093_v61 = vshll.u32 %v3493_v62, 16 }
  0x8c   : > { %v5085_v32 = vsel %vm4491_vm2, %v4916_v10, %v2311_v45  ;;  %v5098_v10 = vsel %vm4491_vm2, %v4921_v40, %v2335_v51  ;;  %v3490_v45 = vld [vmem:[%s4476_s28 + $0x28] sm:$0x11]  ;;  %v5116_v40 = vsel %vm4491_vm2, %v4958_v28, %v2359_v29  ;;  %v626_v28 = vsel %vm4491_vm2, %v5016_v43, %v5007_v33 }
  0x8d   : > { %v633_v17 = vrot.slane %v5498_v5, 5  ;;  %1037 = vmatmul.mubr.bf16.gmra.mxu0 %v5499_v21  ;;  %v2069_v0 = vshll.u32 %v3490_v45, 16  ;;  %v2077_v29 = vshll.u32 %v5102_v18, 16  ;;  %v5501_v5 = vcombine.high %v4986_v35, %v4994_v53 }
  0x8e   : > { %1454 = vmatmul.mubr.bf16.gmra.mxu1 %v4964_v12  ;;  %v2056_v30 = vor.u32 %v2055_v58, %v2052_v8  ;;  %v2066_v21 = vor.u32 %v2065_v60, %v2061_v44  ;;  %v2083_v51 = vshll.u32 %v5111_v9, 16  ;;  %v2087_v43 = vshrl.u32 %v5111_v9, 16 }
  0x8f   : > { %1461 = vmatprep.mubr.bf16.mxu1 %v4972_v3  ;;  %1044 = vmatprep.mubr.bf16.mxu0 %v5501_v5  ;;  %v634_v33 = vor.u32 %v633_v17, %v5013_v6  ;;  %v3306_v45 = vcombine.low %v4986_v35, %v4994_v53  ;;  %v3359_v5 = vcombine.high %v4947_v47, %v4999_v63  ;;  %v2071_v58 = vrot.slane %v2069_v0, 5 }
  0x90   : > { %v3309_v8 = vcombine.high %v616_v31, %v626_v28  ;;  %v2076_v60 = vrot.slane %v2074_v14, 4  ;;  %v2079_v49 = vrot.slane %v2077_v29, 5  ;;  %v2057_v38 = vrot.slane %v2056_v30, 4 }
  0x91   : > { %v2067_v4 = vrot.slane %v2066_v21, 4  ;;  %v2089_v6 = vrot.slane %v2087_v43, 4  ;;  %v635_v25 = vrot.slane %v634_v33, 4  ;;  %v645_v17 = vrot.slane %v644_v20, 4  ;;  %v3496_v43 = vld [vmem:[%s4476_s28 + $0x58] sm:$0x11] }
  0x92   : > { %v2062_v26 = vsel %vm4491_vm2, %v2057_v38, %v2061_v44  ;;  %v2080_v0 = vor.u32 %v2079_v49, %v2076_v60  ;;  %v3308_v29 = vcombine.low %v616_v31, %v626_v28  ;;  %v2095_v44 = vrot.slane %v2093_v61, 5  ;;  %v5510_v61 = vld [vmem:[#allocation5_spill] sm:$0xff] }
  0x93   : > { %v2072_v53 = vsel %vm4491_vm2, %v2067_v4, %v2071_v58  ;;  %v2117_v49 = vshll.u32 %v3496_v43, 16  ;;  %v3441_v28 = vcombine.high %v5002_v42, %v5011_v37  ;;  %v3443_v60 = vcombine.high %v5102_v18, %v5111_v9 }
  0x94   : > { %v3569_v62 = vcombine.high %v2062_v26, %v2072_v53  ;;  %v2081_v21 = vrot.slane %v2080_v0, 4  ;;  %v5514_v0 = vld [vmem:[#allocation7_spill] sm:$0xff] }
  0x95   : > { %1045 = vmatmul.mubr.bf16.gmra.mxu0 %v3306_v45  ;;  %v2119_v33 = vrot.slane %v2117_v49, 5 }
  0x96   : > { %1462 = vmatmul.mubr.bf16.gmra.mxu1 %v4976_v13  ;;  %v2085_v13 = vrot.slane %v2083_v51, 5  ;;  %1052 = vmatprep.mubr.bf16.mxu0 %v3309_v8  ;;  %v640_v51 = vsel %vm4491_vm2, %v635_v25, %v639_v34  ;;  %v3440_v8 = vcombine.low %v5002_v42, %v5011_v37 }
  0x97   : > { %1469 = vmatprep.mubr.bf16.mxu1 %v5500_v24  ;;  %v647_v24 = vshll.u32 %v263_v48, 16 }
  0x98   : > { %v2090_v14 = vor.u32 %v2089_v6, %v2085_v13  ;;  %v2086_v4 = vsel %vm4491_vm2, %v2081_v21, %v2085_v13  ;;  %v2120_v13 = vsel %vm4491_vm2, %v4584_v16, %v2119_v33  ;;  %v5527_v33 = vcombine.high %v4928_v52, %v5085_v32 }
  0x99   : > { %v649_v48 = vrot.slane %v647_v24, 5  ;;  %v3499_v24 = vld [vmem:[%s4476_s28 + $0x70] sm:$0x11]  ;;  %v3573_v58 = vcombine.high %v4582_v15, %v2120_v13  ;;  %v3572_v16 = vcombine.low %v4582_v15, %v2120_v13  ;;  %v5504_v15 = vld [vmem:[#allocation2_spill] sm:$0xff] }
  0x9a   : > { %v2091_v38 = vrot.slane %v2090_v14, 4  ;;  %v2141_v45 = vshll.u32 %v3499_v24, 16  ;;  %v5515_v14 = vcombine.high %v4810_v7, %v5059_v59  ;;  %v5528_v24 = vld [vmem:[#allocation14_spill] sm:$0xff] }
  0x9b   : > { %v650_v20 = vsel %vm4491_vm2, %v645_v17, %v649_v48  ;;  %v3442_v17 = vcombine.low %v5102_v18, %v5111_v9  ;;  %v5502_v48 = vld [vmem:[#allocation20_spill] sm:$0xff]  ;;  %v5506_v18 = vld [vmem:[#allocation3_spill] sm:$0xff] }
  0x9c   : > { %v3311_v30 = vcombine.high %v640_v51, %v650_v20  ;;  %v2096_v34 = vsel %vm4491_vm2, %v2091_v38, %v2095_v44  ;;  %v2143_v6 = vrot.slane %v2141_v45, 5  ;;  %v5505_v9 = vcombine.low %v4677_v19, %v5502_v48  ;;  %v5234_v38 = vld [vmem:[%s4476_s28 + $0x150] sm:$0xff]  ;;  %v5237_v44 = vld [vmem:[%s4476_s28 + $0x158] sm:$0xff] }
  0x9d   : > { %1053 = vmatmul.mubr.bf16.gmra.mxu0 %v3308_v29  ;;  %v3571_v31 = vcombine.high %v2086_v4, %v2096_v34  ;;  %v5522_v29 = vld [vmem:[#allocation11_spill] sm:$0xff]  ;;  %v2365_v49 = vshll.u32 %v5234_v38, 16 }
  0x9e   : > { %1470 = vmatmul.mubr.bf16.gmra.mxu1 %v3356_v27  ;;  %v3358_v27 = vcombine.low %v4947_v47, %v4999_v63  ;;  %1060 = vmatprep.mubr.bf16.mxu0 %v3311_v30  ;;  %v3568_v47 = vcombine.low %v2062_v26, %v2072_v53  ;;  %v3310_v63 = vcombine.low %v640_v51, %v650_v20  ;;  %v5518_v51 = vld [vmem:[#allocation9_spill] sm:$0xff] }
  0x9f   : > { %1477 = vmatprep.mubr.bf16.mxu1 %v3359_v5  ;;  %v3570_v5 = vcombine.low %v2086_v4, %v2096_v34  ;;  %v2144_v25 = vsel %vm4491_vm2, %v4615_v39, %v2143_v6  ;;  %v5503_v39 = vcombine.high %v4677_v19, %v5502_v48  ;;  %v5511_v26 = vcombine.high %v4766_v22, %v5049_v56  ;;  %v5512_v19 = vld [vmem:[#allocation6_spill] sm:$0xff]  ;;  %v5258_v48 = vld [vmem:[%s4476_s28 + $0x170] sm:$0xff] }
  0xa0   : > { %v3575_v37 = vcombine.high %v4628_v50, %v2144_v25  ;;  %v3574_v42 = vcombine.low %v4628_v50, %v2144_v25  ;;  %v5508_v50 = vld [vmem:[#allocation4_spill] sm:$0xff]  ;;  %v5513_v53 = vcombine.low %v4766_v22, %v5049_v56  ;;  %v5519_v22 = vcombine.high %v4837_v36, %v5071_v54  ;;  %v5520_v56 = vld [vmem:[#allocation10_spill] sm:$0xff] }
  0xa1   : > { %v5525_v34 = vcombine.low %v4892_v2, %v5080_v23 }
  0xa5   : > { %1061 = vmatmul.mubr.bf16.gmra.mxu0 %v3310_v63  ;;  %v2375_v63 = vshrl.u32 %v5237_v44, 16 }
  0xa6   : > { %1478 = vmatmul.mubr.bf16.gmra.mxu1 %v3358_v27  ;;  %1840 = vmatprep.mubr.bf16.mxu0 %v3441_v28  ;;  %v5521_v27 = vcombine.low %v4837_v36, %v5071_v54  ;;  %v2362_v36 = vshrl.u32 %v5234_v38, 16  ;;  %v5526_v28 = vld [vmem:[#allocation13_spill] sm:$0xff] }
  0xa7   : > { %2722 = vmatprep.mubr.bf16.mxu1 %v3569_v62  ;;  %v5523_v62 = vcombine.high %v4892_v2, %v5080_v23  ;;  %v2377_v6 = vrot.slane %v2375_v63, 4 }
  0xa8   : > { %v2364_v45 = vrot.slane %v2362_v36, 4 }
  0xad   : > { %1841 = vmatmul.mubr.bf16.vlgmr.msra.gmra.mxu0 %v3440_v8 }
  0xae   : > { %2723 = vmatmul.mubr.bf16.vlgmr.msra.gmra.mxu1 %v3568_v47  ;;  %1848 = vmatprep.mubr.bf16.mxu0 %v3443_v60  ;;  %v2371_v47 = vshll.u32 %v5237_v44, 16 }
  0xaf   : > { %2730 = vmatprep.mubr.bf16.mxu1 %v3571_v31 }
  0xb0   : > { %v2373_v60 = vrot.slane %v2371_v47, 5 }
  0xb5   : > { %1849 = vmatmul.mubr.bf16.gmra.mxu0 %v3442_v17 }
  0xb6   : > { %2731 = vmatmul.mubr.bf16.gmra.mxu1 %v3570_v5  ;;  %1856 = vmatprep.mubr.bf16.mxu0 %v4554_v57  ;;  %v5507_v57 = vcombine.high %v4722_v55, %v5040_v41 }
  0xb7   : > { %2738 = vmatprep.mubr.bf16.mxu1 %v3573_v58  ;;  %v2367_v58 = vrot.slane %v2365_v49, 5  ;;  %v5278_v49 = vld [vmem:[%s4476_s28 + $0x180] sm:$0xff] }
  0xbd   : > { %1857 = vmatmul.mubr.bf16.gmra.mxu0 %v4567_v1  ;;  %v5509_v1 = vcombine.low %v4722_v55, %v5040_v41  ;;  %v5516_v55 = vld [vmem:[#allocation8_spill] sm:$0xff]  ;;  %v5517_v41 = vcombine.low %v4810_v7, %v5059_v59 }
  0xbe   : > { %2739 = vmatmul.mubr.bf16.gmra.mxu1 %v3572_v16  ;;  %1864 = vmatprep.mubr.bf16.mxu0 %v5504_v15  ;;  %v5524_v7 = vld [vmem:[#allocation12_spill] sm:$0xff]  ;;  %v3529_v16 = vld [vmem:[%s4476_s28 + $0x160] sm:$0x11] }
  0xbf   : > { %2746 = vmatprep.mubr.bf16.mxu1 %v3575_v37 }
  0xc5   : > { %1865 = vmatmul.mubr.bf16.gmra.mxu0 %v5506_v18 }
  0xc6   : > { %2747 = vmatmul.mubr.bf16.gmra.mxu1 %v3574_v42  ;;  %1872 = vmatprep.mubr.bf16.mxu0 %v5508_v50  ;;  %v5255_v42 = vld [vmem:[%s4476_s28 + $0x168] sm:$0xff]  ;;  %v2368_v50 = vor.u32 %v2367_v58, %v2364_v45  ;;  %v5534_v45 = vld [vmem:[#allocation17_spill] sm:$0xff] }
  0xc7   : > { %2754 = vmatprep.mubr.bf16.mxu1 %v5503_v39 }
  0xcd   : > { %1873 = vmatmul.mubr.bf16.gmra.mxu0 %v5510_v61  ;;  %v2381_v61 = vshll.u32 %v3529_v16, 16  ;;  %v2413_v16 = vshll.u32 %v5278_v49, 16 }
  0xce   : > { %2755 = vmatmul.mubr.bf16.gmra.mxu1 %v5505_v9  ;;  %1880 = vmatprep.mubr.bf16.mxu0 %v5512_v19  ;;  %v5530_v19 = vld [vmem:[#allocation15_spill] sm:$0xff] }
  0xcf   : > { %2762 = vmatprep.mubr.bf16.mxu1 %v5507_v57  ;;  %v5529_v57 = vcombine.low %v4928_v52, %v5085_v32  ;;  %v5532_v32 = vld [vmem:[#allocation16_spill] sm:$0xff] }
  0xd5   : > { %1881 = vmatmul.mubr.bf16.gmra.mxu0 %v5514_v0  ;;  %v2386_v0 = vshrl.u32 %v5255_v42, 16 }
  0xd6   : > { %2763 = vmatmul.mubr.bf16.gmra.mxu1 %v5509_v1  ;;  %1888 = vmatprep.mubr.bf16.mxu0 %v5516_v55  ;;  %v2378_v1 = vor.u32 %v2377_v6, %v2373_v60  ;;  %v2395_v55 = vshll.u32 %v5258_v48, 16 }
  0xd7   : > { %2770 = vmatprep.mubr.bf16.mxu1 %v5511_v26 }
  0xdd   : > { %1889 = vmatmul.mubr.bf16.gmra.mxu0 %v5518_v51 }
  0xde   : > { %2771 = vmatmul.mubr.bf16.gmra.mxu1 %v5513_v53  ;;  %1896 = vmatprep.mubr.bf16.mxu0 %v5520_v56  ;;  %v5531_v53 = vcombine.high %v4951_v11, %v5098_v10 }
  0xdf   : > { %2778 = vmatprep.mubr.bf16.mxu1 %v5515_v14  ;;  %v2389_v14 = vshll.u32 %v5255_v42, 16 }
  0xe5   : > { %1897 = vmatmul.mubr.bf16.gmra.mxu0 %v5522_v29  ;;  %v2369_v29 = vrot.slane %v2368_v50, 4 }
  0xe6   : > { %2779 = vmatmul.mubr.bf16.gmra.mxu1 %v5517_v41  ;;  %1904 = vmatprep.mubr.bf16.mxu0 %v5524_v7  ;;  %v2399_v41 = vshrl.u32 %v5258_v48, 16  ;;  %v2383_v7 = vrot.slane %v2381_v61, 5 }
  0xe7   : > { %2786 = vmatprep.mubr.bf16.mxu1 %v5519_v22 }
  0xe8   : > { %v2401_v36 = vrot.slane %v2399_v41, 4 }
  0xed   : > { %v3793_v31 = vpop.f32.mrf.mxu0  ;;  %1905 = vmatmul.mubr.bf16.gmra.mxu0 %v5526_v28 }
  0xee   : > { %v3905_v20 = vpop.f32.mrf.mxu1  ;;  %2787 = vmatmul.mubr.bf16.gmra.mxu1 %v5521_v27  ;;  %1912 = vmatprep.mubr.bf16.mxu0 %v5528_v24  ;;  %v5533_v24 = vcombine.low %v4951_v11, %v5098_v10  ;;  %v2410_v11 = vshrl.u32 %v5278_v49, 16 }
  0xef   : > { %2794 = vmatprep.mubr.bf16.mxu1 %v5523_v62  ;;  %v3794_v23 = vpop.f32.mrf.mxu0  ;;  %v2379_v62 = vrot.slane %v2378_v1, 4 }
  0xf0   : > { %v3906_v59 = vpop.f32.mrf.mxu1  ;;  %v3795_v5 = vadd.f32 %v3794_v23, %v3793_v31  ;;  %v5281_v31 = vld [vmem:[%s4476_s28 + $0x188] sm:$0xff] }
  0xf1   : > { %v3907_v30 = vadd.f32 %v3906_v59, %v3905_v20  ;;  %v3796_v25 = vpop.f32.mrf.mxu0  ;;  %v5292_v23 = vsel %vm4491_vm2, %v2379_v62, %v2383_v7  ;;  %v5537_v62 = vcombine.low %v4986_v35, %v5116_v40 }
  0xf2   : > { %v3908_v21 = vpop.f32.mrf.mxu1 }
  0xf3   : > { %v5252_v17 = vadd.f32 %v3907_v30, %v3795_v5  ;;  %v3797_v39 = vpop.f32.mrf.mxu0  ;;  %v2388_v30 = vrot.slane %v2386_v0, 4  ;;  %v5535_v5 = vcombine.high %v4986_v35, %v5116_v40 }
  0xf4   : > { %v3909_v43 = vpop.f32.mrf.mxu1  ;;  %v3798_v9 = vadd.f32 %v3797_v39, %v3796_v25  ;;  %v2423_v39 = vshrl.u32 %v5281_v31, 16 }
  0xf5   : > { %v3910_v4 = vadd.f32 %v3909_v43, %v3908_v21  ;;  %v3799_v26 = vpop.f32.mrf.mxu0  ;;  %1913 = vmatmul.mubr.bf16.gmra.mxu0 %v5530_v19  ;;  %v2391_v21 = vrot.slane %v2389_v14, 5  ;;  %v2397_v43 = vrot.slane %v2395_v55, 5  ;;  %v2415_v55 = vrot.slane %v2413_v16, 5 }
  0xf6   : > { %v3911_v54 = vpop.f32.mrf.mxu1  ;;  %2795 = vmatmul.mubr.bf16.gmra.mxu1 %v5525_v34  ;;  %1920 = vmatprep.mubr.bf16.mxu0 %v5532_v32  ;;  %v3532_v34 = vld [vmem:[%s4476_s28 + $0x178] sm:$0x11]  ;;  %v2425_v32 = vrot.slane %v2423_v39, 4 }
  0xf7   : > { %2802 = vmatprep.mubr.bf16.mxu1 %v5527_v33  ;;  %v5271_v52 = vadd.f32 %v3910_v4, %v3798_v9  ;;  %v3800_v22 = vpop.f32.mrf.mxu0  ;;  %v2402_v58 = vor.u32 %v2401_v36, %v2397_v43  ;;  %v2405_v6 = vshll.u32 %v3532_v34, 16 }
  0xf8   : > { %v3912_v2 = vpop.f32.mrf.mxu1  ;;  %v3801_v20 = vadd.f32 %v3800_v22, %v3799_v26 }
  0xf9   : > { %v3913_v13 = vadd.f32 %v3912_v2, %v3911_v54  ;;  %v3802_v59 = vpop.f32.mrf.mxu0  ;;  %v5288_v2 = vsel %vm4491_vm2, %v2369_v29, %v2373_v60  ;;  %v5536_v60 = vld [vmem:[#allocation18_spill] sm:$0xff]  ;;  %v2403_v26 = vrot.slane %v2402_v58, 4  ;;  %v2407_v19 = vrot.slane %v2405_v6, 5 }
  0xfa   : > { %v3914_v8 = vpop.f32.mrf.mxu1  ;;  %v3595_v1 = vcombine.high %v5288_v2, %v5292_v23 }
  0xfb   : > { %v5274_v4 = vadd.f32 %v3913_v13, %v3801_v20  ;;  %v3803_v47 = vpop.f32.mrf.mxu0  ;;  %v3535_v20 = vld [vmem:[%s4476_s28 + $0x190] sm:$0x11]  ;;  %s3245_s28 = sshll.u32 %s4374_s13, 5 }
  0xfc   : > { %v3915_v37 = vpop.f32.mrf.mxu1  ;;  %v3804_v28 = vadd.f32 %v3803_v47, %v3802_v59  ;;  %v2408_v59 = vsel %vm4491_vm2, %v2403_v26, %v2407_v19  ;;  %v2429_v34 = vshll.u32 %v3535_v20, 16  ;;  %p174_p4 = scmp.lt.s32.totalorder %s3245_s28, 63 }
  0xfd   : > { %v3916_v15 = vadd.f32 %v3915_v37, %v3914_v8  ;;  %v3805_v13 = vpop.f32.mrf.mxu0  ;;  %1921 = vmatmul.mubr.bf16.gmra.mxu0 %v5534_v45  ;;  %v2392_v8 = vor.u32 %v2391_v21, %v2388_v30  ;;  %v2419_v37 = vshll.u32 %v5281_v31, 16 }
  0xfe   : > { %v3917_v18 = vpop.f32.mrf.mxu1  ;;  %2803 = vmatmul.mubr.bf16.gmra.mxu1 %v5529_v57  ;;  %1928 = vmatprep.mubr.bf16.mxu0 %v5536_v60  ;;  %s5540_s28 = smov (!%p174_p4, %s3245_s28), 63 }
  0xff   : > { %2810 = vmatprep.mubr.bf16.mxu1 %v5531_v53  ;;  %v5299_v10 = vadd.f32 %v3916_v15, %v3804_v28  ;;  %v3806_v9 = vpop.f32.mrf.mxu0  ;;  %v2393_v15 = vrot.slane %v2392_v8, 4  ;;  %v2412_v53 = vrot.slane %v2410_v11, 4  ;;  %v2421_v41 = vrot.slane %v2419_v37, 5  ;;  %s3246_s13 = sshll.u32 %s5540_s28, 2 }
 0x100   : > { %v3918_v51 = vpop.f32.mrf.mxu1  ;;  %v3807_v57 = vadd.f32 %v3806_v9, %v3805_v13  ;;  %s5398_s30 = scalar_lea.vmem %s5455_s2, %s3246_s13 }
 0x101   : > { %v3919_v56 = vadd.f32 %v3918_v51, %v3917_v18  ;;  %v3808_v61 = vpop.f32.mrf.mxu0  ;;  %v2416_v36 = vor.u32 %v2415_v55, %v2412_v53  ;;  %v3469_v53 = vcombine.high %v5255_v42, %v5258_v48 }
 0x102   : > { %v3920_v27 = vpop.f32.mrf.mxu1 }
 0x103   : > { %v5307_v0 = vadd.f32 %v3919_v56, %v3807_v57  ;;  %v3809_v51 = vpop.f32.mrf.mxu0  ;;  %v2398_v56 = vsel %vm4491_vm2, %v2393_v15, %v2397_v43  ;;  %v3467_v43 = vcombine.high %v5234_v38, %v5237_v44 }
 0x104   : > { %v3921_v54 = vpop.f32.mrf.mxu1 }
 0x105   : > { %v3922_v63 = vadd.f32 %v3921_v54, %v3920_v27  ;;  %v3810_v27 = vadd.f32 %v3809_v51, %v3808_v61  ;;  %v3811_v7 = vpop.f32.mrf.mxu0  ;;  %1929 = vmatmul.mubr.bf16.gmra.mxu0 %v4964_v12  ;;  %v2426_v54 = vor.u32 %v2425_v32, %v2421_v41  ;;  %v3594_v12 = vcombine.low %v5288_v2, %v5292_v23 }
 0x106   : > { %v3923_v33 = vpop.f32.mrf.mxu1  ;;  %2811 = vmatmul.mubr.bf16.gmra.mxu1 %v5533_v24  ;;  %1936 = vmatprep.mubr.bf16.mxu0 %v4972_v3  ;;  %v3597_v24 = vcombine.high %v2398_v56, %v2408_v59  ;;  %v2417_v3 = vrot.slane %v2416_v36, 4  ;;  %v3466_v61 = vcombine.low %v5234_v38, %v5237_v44 }
 0x107   : > { %2818 = vmatprep.mubr.bf16.mxu1 %v5535_v5  ;;  %v5318_v30 = vadd.f32 %v3922_v63, %v3810_v27  ;;  %v3812_v35 = vpop.f32.mrf.mxu0  ;;  %v2427_v45 = vrot.slane %v2426_v54, 4  ;;  %v2431_v5 = vrot.slane %v2429_v34, 5 }
 0x108   : > { %v3924_v25 = vpop.f32.mrf.mxu1  ;;  %v3813_v47 = vadd.f32 %v3812_v35, %v3811_v7  ;;  %v2422_v16 = vsel %vm4491_vm2, %v2417_v3, %v2421_v41  ;;  %v3468_v7 = vcombine.low %v5255_v42, %v5258_v48 }
 0x109   : > { %v3925_v18 = vadd.f32 %v3924_v25, %v3923_v33  ;;  %v3814_v33 = vpop.f32.mrf.mxu0  ;;  %v5538_v25 = vld [vmem:[#allocation19_spill] sm:$0xff]  ;;  %v2432_v37 = vsel %vm4491_vm2, %v2427_v45, %v2431_v5 }
 0x10a   : > { %v3926_v50 = vpop.f32.mrf.mxu1  ;;  %v3599_v15 = vcombine.high %v2422_v16, %v2432_v37 }
 0x10b   : > { %v5325_v63 = vadd.f32 %v3925_v18, %v3813_v47  ;;  %v3815_v8 = vpop.f32.mrf.mxu0 }
 0x10c   : > { %v3927_v14 = vpop.f32.mrf.mxu1  ;;  %v3816_v6 = vadd.f32 %v3815_v8, %v3814_v33 }
 0x10d   : > { %v3928_v22 = vadd.f32 %v3927_v14, %v3926_v50  ;;  %v3817_v60 = vpop.f32.mrf.mxu0  ;;  %1937 = vmatmul.mubr.bf16.gmra.mxu0 %v5538_v25  ;;  %v3596_v50 = vcombine.low %v2398_v56, %v2408_v59 }
 0x10e   : > { %v3929_v29 = vpop.f32.mrf.mxu1  ;;  %2819 = vmatmul.mubr.bf16.gmra.mxu1 %v5537_v62  ;;  %1944 = vmatprep.mubr.bf16.mxu0 %v3467_v43 }
 0x10f   : > { %2826 = vmatprep.mubr.bf16.mxu1 %v3595_v1  ;;  %v5328_v2 = vadd.f32 %v3928_v22, %v3816_v6  ;;  %v3818_v39 = vpop.f32.mrf.mxu0 }
 0x110   : > { %v3930_v21 = vpop.f32.mrf.mxu1  ;;  %v3819_v18 = vadd.f32 %v3818_v39, %v3817_v60 }
 0x111   : > { %v3931_v40 = vadd.f32 %v3930_v21, %v3929_v29  ;;  %v3820_v1 = vpop.f32.mrf.mxu0  ;;  %v3598_v29 = vcombine.low %v2422_v16, %v2432_v37  ;;  %v3471_v21 = vcombine.high %v5278_v49, %v5281_v31 }
 0x112   : > { %v3932_v28 = vpop.f32.mrf.mxu1 }
 0x113   : > { %v5336_v26 = vadd.f32 %v3931_v40, %v3819_v18  ;;  %v3821_v14 = vpop.f32.mrf.mxu0 }
 0x114   : > { %v3933_v13 = vpop.f32.mrf.mxu1  ;;  %v3822_v46 = vadd.f32 %v3821_v14, %v3820_v1 }
 0x115   : > { %v3934_v58 = vadd.f32 %v3933_v13, %v3932_v28  ;;  %v3823_v32 = vpop.f32.mrf.mxu0  ;;  %1945 = vmatmul.mubr.bf16.gmra.mxu0 %v3466_v61 }
 0x116   : > { %v3935_v11 = vpop.f32.mrf.mxu1  ;;  %2827 = vmatmul.mubr.bf16.gmra.mxu1 %v3594_v12  ;;  %1952 = vmatprep.mubr.bf16.mxu0 %v3469_v53 }
 0x117   : > { %2834 = vmatprep.mubr.bf16.mxu1 %v3597_v24  ;;  %v5340_v51 = vadd.f32 %v3934_v58, %v3822_v46  ;;  %v3824_v38 = vpop.f32.mrf.mxu0  ;;  %v3470_v24 = vcombine.low %v5278_v49, %v5281_v31 }
 0x118   : > { %v3936_v23 = vpop.f32.mrf.mxu1  ;;  %v3825_v20 = vadd.f32 %v3824_v38, %v3823_v32 }
 0x119   : > { %v3937_v9 = vadd.f32 %v3936_v23, %v3935_v11  ;;  %v3826_v62 = vpop.f32.mrf.mxu0 }
 0x11a   : > { %v3938_v57 = vpop.f32.mrf.mxu1 }
 0x11b   : > { %v5344_v56 = vadd.f32 %v3937_v9, %v3825_v20  ;;  %v3827_v36 = vpop.f32.mrf.mxu0 }
 0x11c   : > { %v3939_v19 = vpop.f32.mrf.mxu1  ;;  %v3828_v34 = vadd.f32 %v3827_v36, %v3826_v62 }
 0x11d   : > { %v3940_v55 = vadd.f32 %v3939_v19, %v3938_v57  ;;  %v3829_v40 = vpop.f32.mrf.mxu0  ;;  %1953 = vmatmul.mubr.bf16.gmra.mxu0 %v3468_v7 }
 0x11e   : > { %v3941_v41 = vpop.f32.mrf.mxu1  ;;  %2835 = vmatmul.mubr.bf16.gmra.mxu1 %v3596_v50  ;;  %1960 = vmatprep.mubr.bf16.mxu0 %v3471_v21 }
 0x11f   : > { %2842 = vmatprep.mubr.bf16.mxu1 %v3599_v15  ;;  %v5348_v47 = vadd.f32 %v3940_v55, %v3828_v34  ;;  %v3830_v12 = vpop.f32.mrf.mxu0 }
 0x120   : > { %v3942_v22 = vpop.f32.mrf.mxu1  ;;  %v3831_v42 = vadd.f32 %v3830_v12, %v3829_v40 }
 0x121   : > { %v3943_v44 = vadd.f32 %v3942_v22, %v3941_v41  ;;  %v3832_v43 = vpop.f32.mrf.mxu0 }
 0x122   : > { %v3944_v27 = vpop.f32.mrf.mxu1 }
 0x123   : > { %v5352_v13 = vadd.f32 %v3943_v44, %v3831_v42  ;;  %v3833_v45 = vpop.f32.mrf.mxu0 }
 0x124   : > { %v3945_v59 = vpop.f32.mrf.mxu1  ;;  %v3834_v8 = vadd.f32 %v3833_v45, %v3832_v43 }
 0x125   : > { %v3946_v54 = vadd.f32 %v3945_v59, %v3944_v27  ;;  %v3835_v6 = vpop.f32.mrf.mxu0  ;;  %1961 = vmatmul.mubr.bf16.gmra.mxu0 %v3470_v24 }
 0x126   : > { %v3947_v35 = vpop.f32.mrf.mxu1  ;;  %2843 = vmatmul.mubr.bf16.gmra.mxu1 %v3598_v29 }
 0x127   : > { %v5354_v11 = vadd.f32 %v3946_v54, %v3834_v8  ;;  %v3836_v25 = vpop.f32.mrf.mxu0 }
 0x128   : > { %v3948_v28 = vpop.f32.mrf.mxu1  ;;  %v3837_v16 = vadd.f32 %v3836_v25, %v3835_v6 }
 0x129   : > { %v3949_v33 = vadd.f32 %v3948_v28, %v3947_v35  ;;  %v3838_v39 = vpop.f32.mrf.mxu0 }
 0x12a   : > { %v3950_v48 = vpop.f32.mrf.mxu1 }
 0x12b   : > { %v5356_v9 = vadd.f32 %v3949_v33, %v3837_v16  ;;  %v3839_v31 = vpop.f32.mrf.mxu0 }
 0x12c   : > { %v3951_v3 = vpop.f32.mrf.mxu1  ;;  %v3840_v57 = vadd.f32 %v3839_v31, %v3838_v39 }
 0x12d   : > { %v3952_v5 = vadd.f32 %v3951_v3, %v3950_v48  ;;  %v3841_v1 = vpop.f32.mrf.mxu0 }
 0x12e   : > { %v3953_v58 = vpop.f32.mrf.mxu1 }
 0x12f   : > { %v5358_v61 = vadd.f32 %v3952_v5, %v3840_v57  ;;  %v3842_v19 = vpop.f32.mrf.mxu0 }
 0x130   : > { %v3954_v60 = vpop.f32.mrf.mxu1  ;;  %v3843_v14 = vadd.f32 %v3842_v19, %v3841_v1 }
 0x131   : > { %v3955_v23 = vadd.f32 %v3954_v60, %v3953_v58  ;;  %v3844_v46 = vpop.f32.mrf.mxu0 }
 0x132   : > { %v3956_v37 = vpop.f32.mrf.mxu1 }
 0x133   : > { %v5360_v41 = vadd.f32 %v3955_v23, %v3843_v14  ;;  %v3845_v22 = vpop.f32.mrf.mxu0 }
 0x134   : > { %v3957_v49 = vpop.f32.mrf.mxu1  ;;  %v3846_v44 = vadd.f32 %v3845_v22, %v3844_v46 }
 0x135   : > { %v3958_v18 = vadd.f32 %v3957_v49, %v3956_v37  ;;  %v3847_v27 = vpop.f32.mrf.mxu0 }
 0x136   : > { %v3959_v50 = vpop.f32.mrf.mxu1 }
 0x137   : > { %v5362_v29 = vadd.f32 %v3958_v18, %v3846_v44  ;;  %v3848_v7 = vpop.f32.mrf.mxu0 }
 0x138   : > { %v3960_v15 = vpop.f32.mrf.mxu1  ;;  %v3849_v21 = vadd.f32 %v3848_v7, %v3847_v27 }
 0x139   : > { %v3961_v53 = vadd.f32 %v3960_v15, %v3959_v50  ;;  %v3850_v54 = vpop.f32.mrf.mxu0 }
 0x13a   : > { %v3962_v55 = vpop.f32.mrf.mxu1 }
 0x13b   : > { %v5364_v34 = vadd.f32 %v3961_v53, %v3849_v21  ;;  %v3851_v40 = vpop.f32.mrf.mxu0 }
 0x13c   : > { %v3963_v32 = vpop.f32.mrf.mxu1  ;;  %v3852_v12 = vadd.f32 %v3851_v40, %v3850_v54 }
 0x13d   : > { %v3964_v38 = vadd.f32 %v3963_v32, %v3962_v55  ;;  %v3853_v42 = vpop.f32.mrf.mxu0 }
 0x13e   : > { %v3965_v20 = vpop.f32.mrf.mxu1 }
 0x13f   : > { %v5366_v48 = vadd.f32 %v3964_v38, %v3852_v12  ;;  %v3854_v24 = vpop.f32.mrf.mxu0 }
 0x140   : > { %v3966_v62 = vpop.f32.mrf.mxu1  ;;  %v3855_v45 = vadd.f32 %v3854_v24, %v3853_v42 }
 0x141   : > { %v3967_v59 = vadd.f32 %v3966_v62, %v3965_v20  ;;  %v3856_v8 = vpop.f32.mrf.mxu0 }
 0x142   : > { %v3968_v36 = vpop.f32.mrf.mxu1 }
 0x143   : > { %v5368_v58 = vadd.f32 %v3967_v59, %v3855_v45  ;;  %v3857_v60 = vpop.f32.mrf.mxu0 }
 0x144   : > { %v3969_v35 = vpop.f32.mrf.mxu1  ;;  %v3858_v23 = vadd.f32 %v3857_v60, %v3856_v8 }
 0x145   : > { %v3970_v28 = vadd.f32 %v3969_v35, %v3968_v36  ;;  %v3859_v37 = vpop.f32.mrf.mxu0 }
 0x146   : > { %v3971_v33 = vpop.f32.mrf.mxu1 }
 0x147   : > { %v5370_v39 = vadd.f32 %v3970_v28, %v3858_v23  ;;  %v3860_v31 = vpop.f32.mrf.mxu0 }
 0x148   : > { %v3972_v43 = vpop.f32.mrf.mxu1  ;;  %v3861_v57 = vadd.f32 %v3860_v31, %v3859_v37 }
 0x149   : > { %v3973_v3 = vadd.f32 %v3972_v43, %v3971_v33  ;;  %v3862_v1 = vpop.f32.mrf.mxu0 }
 0x14a   : > { %v3974_v5 = vpop.f32.mrf.mxu1 }
 0x14b   : > { %v5372_v15 = vadd.f32 %v3973_v3, %v3861_v57  ;;  %v3863_v53 = vpop.f32.mrf.mxu0 }
 0x14c   : > { %v3975_v6 = vpop.f32.mrf.mxu1  ;;  %v3864_v55 = vadd.f32 %v3863_v53, %v3862_v1 }
 0x14d   : > { %v3976_v25 = vadd.f32 %v3975_v6, %v3974_v5  ;;  %v3865_v32 = vpop.f32.mrf.mxu0 }
 0x14e   : > { %v3977_v16 = vpop.f32.mrf.mxu1 }
 0x14f   : > { %v5374_v22 = vadd.f32 %v3976_v25, %v3864_v55  ;;  %v3866_v44 = vpop.f32.mrf.mxu0 }
 0x150   : > { %v3978_v49 = vpop.f32.mrf.mxu1  ;;  %v3867_v27 = vadd.f32 %v3866_v44, %v3865_v32 }
 0x151   : > { %v3979_v18 = vadd.f32 %v3978_v49, %v3977_v16  ;;  %v3868_v7 = vpop.f32.mrf.mxu0 }
 0x152   : > { %v3980_v50 = vpop.f32.mrf.mxu1 }
 0x153   : > { %v5376_v59 = vadd.f32 %v3979_v18, %v3867_v27  ;;  %v3869_v36 = vpop.f32.mrf.mxu0 }
 0x154   : > { %v3981_v19 = vpop.f32.mrf.mxu1  ;;  %v3870_v35 = vadd.f32 %v3869_v36, %v3868_v7 }
 0x155   : > { %v3982_v14 = vadd.f32 %v3981_v19, %v3980_v50  ;;  %v3871_v28 = vpop.f32.mrf.mxu0 }
 0x156   : > { %v3983_v46 = vpop.f32.mrf.mxu1 }
 0x157   : > { %v5378_v12 = vadd.f32 %v3982_v14, %v3870_v35  ;;  %v3872_v42 = vpop.f32.mrf.mxu0 }
 0x158   : > { %v3984_v38 = vpop.f32.mrf.mxu1  ;;  %v3873_v24 = vadd.f32 %v3872_v42, %v3871_v28 }
 0x159   : > { %v3985_v20 = vadd.f32 %v3984_v38, %v3983_v46  ;;  %v3874_v45 = vpop.f32.mrf.mxu0 }
 0x15a   : > { %v3986_v62 = vpop.f32.mrf.mxu1 }
 0x15b   : > { %v5380_v5 = vadd.f32 %v3985_v20, %v3873_v24  ;;  %v3875_v6 = vpop.f32.mrf.mxu0 }
 0x15c   : > { %v3987_v21 = vpop.f32.mrf.mxu1  ;;  %v3876_v25 = vadd.f32 %v3875_v6, %v3874_v45 }
 0x15d   : > { %v3988_v54 = vadd.f32 %v3987_v21, %v3986_v62  ;;  %v3877_v16 = vpop.f32.mrf.mxu0 }
 0x15e   : > { %v3989_v40 = vpop.f32.mrf.mxu1 }
 0x15f   : > { %v5382_v37 = vadd.f32 %v3988_v54, %v3876_v25  ;;  %v3878_v31 = vpop.f32.mrf.mxu0 }
 0x160   : > { %v3990_v33 = vpop.f32.mrf.mxu1  ;;  %v3879_v57 = vadd.f32 %v3878_v31, %v3877_v16 }
 0x161   : > { %v3991_v43 = vadd.f32 %v3990_v33, %v3989_v40  ;;  %v3880_v1 = vpop.f32.mrf.mxu0 }
 0x162   : > { %v3992_v3 = vpop.f32.mrf.mxu1 }
 0x163   : > { %v5384_v19 = vadd.f32 %v3991_v43, %v3879_v57  ;;  %v3881_v14 = vpop.f32.mrf.mxu0 }
 0x164   : > { %v3993_v8 = vpop.f32.mrf.mxu1  ;;  %v3882_v46 = vadd.f32 %v3881_v14, %v3880_v1 }
 0x165   : > { %v3994_v60 = vadd.f32 %v3993_v8, %v3992_v3  ;;  %v3883_v38 = vpop.f32.mrf.mxu0 }
 0x166   : > { %v3995_v23 = vpop.f32.mrf.mxu1 }
 0x167   : > { %v5386_v44 = vadd.f32 %v3994_v60, %v3882_v46  ;;  %v3884_v27 = vpop.f32.mrf.mxu0 }
 0x168   : > { %v3996_v49 = vpop.f32.mrf.mxu1  ;;  %v3885_v62 = vadd.f32 %v3884_v27, %v3883_v38 }
 0x169   : > { %v3997_v18 = vadd.f32 %v3996_v49, %v3995_v23  ;;  %v3886_v21 = vpop.f32.mrf.mxu0 }
 0x16a   : > { %v3998_v50 = vpop.f32.mrf.mxu1 }
 0x16b   : > { %v5388_v36 = vadd.f32 %v3997_v18, %v3885_v62  ;;  %v3887_v35 = vpop.f32.mrf.mxu0 }
 0x16c   : > { %v3999_v53 = vpop.f32.mrf.mxu1  ;;  %v3888_v40 = vadd.f32 %v3887_v35, %v3886_v21 }
 0x16d   : > { %v4000_v55 = vadd.f32 %v3999_v53, %v3998_v50  ;;  %v4017_v33 = vpop.f32.mrf.mxu0 }
 0x16e   : > { %v4129_v32 = vpop.f32.mrf.mxu1 }
 0x16f   : > { %v5391_v42 = vadd.f32 %v4000_v55, %v3888_v40  ;;  %v4018_v24 = vpop.f32.mrf.mxu0 }
 0x170   : > { %v4130_v20 = vpop.f32.mrf.mxu1  ;;  %v4019_v3 = vadd.f32 %v4018_v24, %v4017_v33 }
 0x171   : > { %v4020_v8 = vpop.f32.mrf.mxu0  ;;  %v4131_v25 = vadd.f32 %v4130_v20, %v4129_v32 }
 0x172   : > { %v4132_v7 = vpop.f32.mrf.mxu1  ;;  %v1969_v6 = vadd.f32 %v4019_v3, %v5252_v17 }
 0x173   : > { %v4021_v23 = vpop.f32.mrf.mxu0 }
 0x174   : > { %v4133_v54 = vpop.f32.mrf.mxu1  ;;  %v4022_v16 = vadd.f32 %v4021_v23, %v4020_v8  ;;  %v2851_v31 = vadd.f32 %v4131_v25, %v1969_v6 }
 0x175   : > { %v4023_v18 = vpop.f32.mrf.mxu0  ;;  %v4134_v50 = vadd.f32 %v4133_v54, %v4132_v7 }
 0x176   : > { %v4135_v28 = vpop.f32.mrf.mxu1  ;;  %v1970_v57 = vadd.f32 %v4022_v16, %v5271_v52  ;;  %v3080_v38 = vmul.f32 %v2851_v31, %v2851_v31 }
 0x177   : > { %v4024_v53 = vpop.f32.mrf.mxu0 }
 0x178   : > { %v4136_v43 = vpop.f32.mrf.mxu1  ;;  %v2852_v14 = vadd.f32 %v4134_v50, %v1970_v57  ;;  %v4025_v55 = vadd.f32 %v4024_v53, %v4023_v18 }
 0x179   : > { %v4137_v17 = vadd.f32 %v4136_v43, %v4135_v28  ;;  %v4026_v32 = vpop.f32.mrf.mxu0 }
 0x17a   : > { %v4138_v45 = vpop.f32.mrf.mxu1  ;;  %v3685_v20 = vpack.c.bf16 %v2852_v14, %v2851_v31  ;;  %v3043_v27 = vadd.f32 %v2852_v14, %v2851_v31  ;;  %v3081_v62 = vmul.f32 %v2852_v14, %v2852_v14  ;;  %v1971_v52 = vadd.f32 %v4025_v55, %v5274_v4 }
 0x17b   : > { %v4027_v21 = vpop.f32.mrf.mxu0 }
 0x17c   : > { %v4139_v60 = vpop.f32.mrf.mxu1  ;;  %3686 = vst [vmem:[%s5398_s30] sm:$0xff] %v3685_v20   ;;  %v3112_v54 = vadd.f32 %v3081_v62, %v3080_v38  ;;  %v2853_v35 = vadd.f32 %v4137_v17, %v1971_v52  ;;  %v4028_v40 = vadd.f32 %v4027_v21, %v4026_v32 }
 0x17d   : > { %v4029_v24 = vpop.f32.mrf.mxu0  ;;  %v4140_v28 = vadd.f32 %v4139_v60, %v4138_v45 }
 0x17e   : > { %v4141_v49 = vpop.f32.mrf.mxu1  ;;  %v3044_v3 = vadd.f32 %v3043_v27, %v2853_v35  ;;  %v3082_v8 = vmul.f32 %v2853_v35, %v2853_v35  ;;  %v1972_v6 = vadd.f32 %v4028_v40, %v5299_v10 }
 0x17f   : > { %v4030_v25 = vpop.f32.mrf.mxu0 }
 0x180   : > { %v4142_v1 = vpop.f32.mrf.mxu1  ;;  %v3113_v23 = vadd.f32 %v3112_v54, %v3082_v8  ;;  %v2854_v16 = vadd.f32 %v4140_v28, %v1972_v6  ;;  %v4031_v31 = vadd.f32 %v4030_v25, %v4029_v24 }
 0x181   : > { %v4143_v18 = vadd.f32 %v4142_v1, %v4141_v49  ;;  %v4032_v57 = vpop.f32.mrf.mxu0 }
 0x182   : > { %v4144_v46 = vpop.f32.mrf.mxu1  ;;  %v3690_v50 = vpack.c.bf16 %v2854_v16, %v2853_v35  ;;  %v3045_v53 = vadd.f32 %v3044_v3, %v2854_v16  ;;  %v3083_v14 = vmul.f32 %v2854_v16, %v2854_v16  ;;  %v1973_v55 = vadd.f32 %v4031_v31, %v5307_v0 }
 0x183   : > { %v4033_v17 = vpop.f32.mrf.mxu0 }
 0x184   : > { %v4145_v7 = vpop.f32.mrf.mxu1  ;;  %3762 = vst [vmem:[%s5398_s30 + $0x8] sm:$0xff] %v3690_v50   ;;  %v3114_v32 = vadd.f32 %v3113_v23, %v3083_v14  ;;  %v2855_v10 = vadd.f32 %v4143_v18, %v1973_v55  ;;  %v4034_v20 = vadd.f32 %v4033_v17, %v4032_v57 }
 0x185   : > { %v4035_v60 = vpop.f32.mrf.mxu0  ;;  %v4146_v49 = vadd.f32 %v4145_v7, %v4144_v46 }
 0x186   : > { %v4147_v33 = vpop.f32.mrf.mxu1  ;;  %v3046_v27 = vadd.f32 %v3045_v53, %v2855_v10  ;;  %v3084_v62 = vmul.f32 %v2855_v10, %v2855_v10  ;;  %v1974_v52 = vadd.f32 %v4034_v20, %v5318_v30 }
 0x187   : > { %v4036_v21 = vpop.f32.mrf.mxu0 }
 0x188   : > { %v4148_v43 = vpop.f32.mrf.mxu1  ;;  %v3115_v54 = vadd.f32 %v3114_v32, %v3084_v62  ;;  %v2856_v35 = vadd.f32 %v4146_v49, %v1974_v52  ;;  %v4037_v40 = vadd.f32 %v4036_v21, %v4035_v60 }
 0x189   : > { %v4149_v24 = vadd.f32 %v4148_v43, %v4147_v33  ;;  %v4038_v3 = vpop.f32.mrf.mxu0 }
 0x18a   : > { %v4150_v4 = vpop.f32.mrf.mxu1  ;;  %v3695_v8 = vpack.c.bf16 %v2856_v35, %v2855_v10  ;;  %v3047_v6 = vadd.f32 %v3046_v27, %v2856_v35  ;;  %v3085_v28 = vmul.f32 %v2856_v35, %v2856_v35  ;;  %v1975_v25 = vadd.f32 %v4037_v40, %v5325_v63 }
 0x18b   : > { %v4039_v16 = vpop.f32.mrf.mxu0 }
 0x18c   : > { %v4151_v38 = vpop.f32.mrf.mxu1  ;;  %3763 = vst [vmem:[%s5398_s30 + $0x10] sm:$0xff] %v3695_v8   ;;  %v3116_v31 = vadd.f32 %v3115_v54, %v3085_v28  ;;  %v2857_v30 = vadd.f32 %v4149_v24, %v1975_v25  ;;  %v4040_v18 = vadd.f32 %v4039_v16, %v4038_v3 }
 0x18d   : > { %v4041_v7 = vpop.f32.mrf.mxu0  ;;  %v4152_v33 = vadd.f32 %v4151_v38, %v4150_v4 }
 0x18e   : > { %v4153_v45 = vpop.f32.mrf.mxu1  ;;  %v3048_v57 = vadd.f32 %v3047_v6, %v2857_v30  ;;  %v3086_v50 = vmul.f32 %v2857_v30, %v2857_v30  ;;  %v1976_v53 = vadd.f32 %v4040_v18, %v5328_v2 }
 0x18f   : > { %v4042_v14 = vpop.f32.mrf.mxu0 }
 0x190   : > { %v4154_v1 = vpop.f32.mrf.mxu1  ;;  %v3117_v55 = vadd.f32 %v3116_v31, %v3086_v50  ;;  %v2858_v17 = vadd.f32 %v4152_v33, %v1976_v53  ;;  %v4043_v32 = vadd.f32 %v4042_v14, %v4041_v7 }
 0x191   : > { %v4155_v10 = vadd.f32 %v4154_v1, %v4153_v45  ;;  %v4044_v20 = vpop.f32.mrf.mxu0 }
 0x192   : > { %v4156_v0 = vpop.f32.mrf.mxu1  ;;  %v3700_v60 = vpack.c.bf16 %v2858_v17, %v2857_v30  ;;  %v3049_v27 = vadd.f32 %v3048_v57, %v2858_v17  ;;  %v3087_v62 = vmul.f32 %v2858_v17, %v2858_v17  ;;  %v1977_v52 = vadd.f32 %v4043_v32, %v5336_v26 }
 0x193   : > { %v4045_v21 = vpop.f32.mrf.mxu0 }
 0x194   : > { %v4157_v23 = vpop.f32.mrf.mxu1  ;;  %3764 = vst [vmem:[%s5398_s30 + $0x18] sm:$0xff] %v3700_v60   ;;  %v3118_v54 = vadd.f32 %v3117_v55, %v3087_v62  ;;  %v2859_v2 = vadd.f32 %v4155_v10, %v1977_v52  ;;  %v4046_v35 = vadd.f32 %v4045_v21, %v4044_v20 }
 0x195   : > { %v4047_v38 = vpop.f32.mrf.mxu0  ;;  %v4158_v45 = vadd.f32 %v4157_v23, %v4156_v0 }
 0x196   : > { %v4159_v46 = vpop.f32.mrf.mxu1  ;;  %v3050_v40 = vadd.f32 %v3049_v27, %v2859_v2  ;;  %v3088_v24 = vmul.f32 %v2859_v2, %v2859_v2  ;;  %v1978_v3 = vadd.f32 %v4046_v35, %v5340_v51 }
 0x197   : > { %v4048_v8 = vpop.f32.mrf.mxu0 }
 0x198   : > { %v4160_v43 = vpop.f32.mrf.mxu1  ;;  %v3119_v6 = vadd.f32 %v3118_v54, %v3088_v24  ;;  %v2860_v28 = vadd.f32 %v4158_v45, %v1978_v3  ;;  %v4049_v25 = vadd.f32 %v4048_v8, %v4047_v38 }
 0x199   : > { %v4161_v16 = vadd.f32 %v4160_v43, %v4159_v46  ;;  %v4050_v31 = vpop.f32.mrf.mxu0 }
 0x19a   : > { %v4162_v63 = vpop.f32.mrf.mxu1  ;;  %v3705_v30 = vpack.c.bf16 %v2860_v28, %v2859_v2  ;;  %v3051_v18 = vadd.f32 %v3050_v40, %v2860_v28  ;;  %v3089_v7 = vmul.f32 %v2860_v28, %v2860_v28  ;;  %v1979_v57 = vadd.f32 %v4049_v25, %v5344_v56 }
 0x19b   : > { %v4051_v53 = vpop.f32.mrf.mxu0 }
 0x19c   : > { %v4163_v49 = vpop.f32.mrf.mxu1  ;;  %3765 = vst [vmem:[%s5398_s30 + $0x20] sm:$0xff] %v3705_v30   ;;  %v3120_v33 = vadd.f32 %v3119_v6, %v3089_v7  ;;  %v2861_v51 = vadd.f32 %v4161_v16, %v1979_v57  ;;  %v4052_v14 = vadd.f32 %v4051_v53, %v4050_v31 }
 0x19d   : > { %v4053_v23 = vpop.f32.mrf.mxu0  ;;  %v4164_v46 = vadd.f32 %v4163_v49, %v4162_v63 }
 0x19e   : > { %v4165_v4 = vpop.f32.mrf.mxu1  ;;  %v3052_v55 = vadd.f32 %v3051_v18, %v2861_v51  ;;  %v3090_v17 = vmul.f32 %v2861_v51, %v2861_v51  ;;  %v1980_v32 = vadd.f32 %v4052_v14, %v5348_v47 }
 0x19f   : > { %v4054_v10 = vpop.f32.mrf.mxu0 }
 0x1a0   : > { %v4166_v1 = vpop.f32.mrf.mxu1  ;;  %v3121_v20 = vadd.f32 %v3120_v33, %v3090_v17  ;;  %v2862_v60 = vadd.f32 %v4164_v46, %v1980_v32  ;;  %v4055_v27 = vadd.f32 %v4054_v10, %v4053_v23 }
 0x1a1   : > { %v4167_v62 = vadd.f32 %v4166_v1, %v4165_v4  ;;  %v4056_v52 = vpop.f32.mrf.mxu0 }
 0x1a2   : > { %v4168_v26 = vpop.f32.mrf.mxu1  ;;  %v3710_v21 = vpack.c.bf16 %v2862_v60, %v2861_v51  ;;  %v3053_v54 = vadd.f32 %v3052_v55, %v2862_v60  ;;  %v3091_v2 = vmul.f32 %v2862_v60, %v2862_v60  ;;  %v1981_v35 = vadd.f32 %v4055_v27, %v5352_v13 }
 0x1a3   : > { %v4057_v40 = vpop.f32.mrf.mxu0 }
 0x1a4   : > { %v4169_v50 = vpop.f32.mrf.mxu1  ;;  %3766 = vst [vmem:[%s5398_s30 + $0x28] sm:$0xff] %v3710_v21   ;;  %v3122_v24 = vadd.f32 %v3121_v20, %v3091_v2  ;;  %v2863_v47 = vadd.f32 %v4167_v62, %v1981_v35  ;;  %v4058_v3 = vadd.f32 %v4057_v40, %v4056_v52 }
 0x1a5   : > { %v4059_v49 = vpop.f32.mrf.mxu0  ;;  %v4170_v4 = vadd.f32 %v4169_v50, %v4168_v26 }
 0x1a6   : > { %v4171_v0 = vpop.f32.mrf.mxu1  ;;  %v3054_v45 = vadd.f32 %v3053_v54, %v2863_v47  ;;  %v3092_v8 = vmul.f32 %v2863_v47, %v2863_v47  ;;  %v1982_v6 = vadd.f32 %v4058_v3, %v5354_v11 }
 0x1a7   : > { %v4060_v28 = vpop.f32.mrf.mxu0 }
 0x1a8   : > { %v4172_v43 = vpop.f32.mrf.mxu1  ;;  %v3123_v25 = vadd.f32 %v3122_v24, %v3092_v8  ;;  %v2864_v16 = vadd.f32 %v4170_v4, %v1982_v6  ;;  %v4061_v31 = vadd.f32 %v4060_v28, %v4059_v49 }
 0x1a9   : > { %v4173_v30 = vadd.f32 %v4172_v43, %v4171_v0  ;;  %v4062_v18 = vpop.f32.mrf.mxu0 }
 0x1aa   : > { %v4174_v56 = vpop.f32.mrf.mxu1  ;;  %v3715_v7 = vpack.c.bf16 %v2864_v16, %v2863_v47  ;;  %v3055_v57 = vadd.f32 %v3054_v45, %v2864_v16  ;;  %v3093_v53 = vmul.f32 %v2864_v16, %v2864_v16  ;;  %v1983_v33 = vadd.f32 %v4061_v31, %v5356_v9 }
 0x1ab   : > { %v4063_v14 = vpop.f32.mrf.mxu0 }
 0x1ac   : > { %v4175_v38 = vpop.f32.mrf.mxu1  ;;  %3767 = vst [vmem:[%s5398_s30 + $0x30] sm:$0xff] %v3715_v7   ;;  %v3124_v23 = vadd.f32 %v3123_v25, %v3093_v53  ;;  %v2865_v11 = vadd.f32 %v4173_v30, %v1983_v33  ;;  %v4064_v55 = vadd.f32 %v4063_v14, %v4062_v18 }
 0x1ad   : > { %v4065_v50 = vpop.f32.mrf.mxu0  ;;  %v4176_v0 = vadd.f32 %v4175_v38, %v4174_v56 }
 0x1ae   : > { %v4177_v63 = vpop.f32.mrf.mxu1  ;;  %v3056_v17 = vadd.f32 %v3055_v57, %v2865_v11  ;;  %v3094_v32 = vmul.f32 %v2865_v11, %v2865_v11  ;;  %v1984_v46 = vadd.f32 %v4064_v55, %v5358_v61 }
 0x1af   : > { %v4066_v10 = vpop.f32.mrf.mxu0 }
 0x1b0   : > { %v4178_v1 = vpop.f32.mrf.mxu1  ;;  %v3125_v20 = vadd.f32 %v3124_v23, %v3094_v32  ;;  %v2866_v60 = vadd.f32 %v4176_v0, %v1984_v46  ;;  %v4067_v27 = vadd.f32 %v4066_v10, %v4065_v50 }
 0x1b1   : > { %v4179_v62 = vadd.f32 %v4178_v1, %v4177_v63  ;;  %v4068_v52 = vpop.f32.mrf.mxu0 }
 0x1b2   : > { %v4180_v13 = vpop.f32.mrf.mxu1  ;;  %v3720_v21 = vpack.c.bf16 %v2866_v60, %v2865_v11  ;;  %v3057_v54 = vadd.f32 %v3056_v17, %v2866_v60  ;;  %v3095_v2 = vmul.f32 %v2866_v60, %v2866_v60  ;;  %v1985_v35 = vadd.f32 %v4067_v27, %v5360_v41 }
 0x1b3   : > { %v4069_v24 = vpop.f32.mrf.mxu0 }
 0x1b4   : > { %v4181_v51 = vpop.f32.mrf.mxu1  ;;  %3768 = vst [vmem:[%s5398_s30 + $0x38] sm:$0xff] %v3720_v21   ;;  %v3126_v47 = vadd.f32 %v3125_v20, %v3095_v2  ;;  %v2867_v61 = vadd.f32 %v4179_v62, %v1985_v35  ;;  %v4070_v3 = vadd.f32 %v4069_v24, %v4068_v52 }
 0x1b5   : > { %v4071_v38 = vpop.f32.mrf.mxu0  ;;  %v4182_v63 = vadd.f32 %v4181_v51, %v4180_v13 }
 0x1b6   : > { %v4183_v26 = vpop.f32.mrf.mxu1  ;;  %v3058_v49 = vadd.f32 %v3057_v54, %v2867_v61  ;;  %v3096_v45 = vmul.f32 %v2867_v61, %v2867_v61  ;;  %v1986_v8 = vadd.f32 %v4070_v3, %v5362_v29 }
 0x1b7   : > { %v4072_v4 = vpop.f32.mrf.mxu0 }
 0x1b8   : > { %v4184_v43 = vpop.f32.mrf.mxu1  ;;  %v3127_v1 = vadd.f32 %v3126_v47, %v3096_v45  ;;  %v2868_v28 = vadd.f32 %v4182_v63, %v1986_v8  ;;  %v4073_v25 = vadd.f32 %v4072_v4, %v4071_v38 }
 0x1b9   : > { %v4185_v16 = vadd.f32 %v4184_v43, %v4183_v26  ;;  %v4074_v31 = vpop.f32.mrf.mxu0 }
 0x1ba   : > { %v4186_v9 = vpop.f32.mrf.mxu1  ;;  %v3725_v30 = vpack.c.bf16 %v2868_v28, %v2867_v61  ;;  %v3059_v18 = vadd.f32 %v3058_v49, %v2868_v28  ;;  %v3097_v7 = vmul.f32 %v2868_v28, %v2868_v28  ;;  %v1987_v57 = vadd.f32 %v4073_v25, %v5364_v34 }
 0x1bb   : > { %v4075_v33 = vpop.f32.mrf.mxu0 }
 0x1bc   : > { %v4187_v40 = vpop.f32.mrf.mxu1  ;;  %3769 = vst [vmem:[%s5398_s30 + $0x40] sm:$0xff] %v3725_v30   ;;  %v3128_v14 = vadd.f32 %v3127_v1, %v3097_v7  ;;  %v2869_v29 = vadd.f32 %v4185_v16, %v1987_v57  ;;  %v4076_v23 = vadd.f32 %v4075_v33, %v4074_v31 }
 0x1bd   : > { %v4077_v51 = vpop.f32.mrf.mxu0  ;;  %v4188_v26 = vadd.f32 %v4187_v40, %v4186_v9 }
 0x1be   : > { %v4189_v56 = vpop.f32.mrf.mxu1  ;;  %v3060_v11 = vadd.f32 %v3059_v18, %v2869_v29  ;;  %v3098_v55 = vmul.f32 %v2869_v29, %v2869_v29  ;;  %v1988_v50 = vadd.f32 %v4076_v23, %v5366_v48 }
 0x1bf   : > { %v4078_v32 = vpop.f32.mrf.mxu0 }
 0x1c0   : > { %v4190_v6 = vpop.f32.mrf.mxu1  ;;  %v3129_v46 = vadd.f32 %v3128_v14, %v3098_v55  ;;  %v2870_v0 = vadd.f32 %v4188_v26, %v1988_v50  ;;  %v4079_v43 = vadd.f32 %v4078_v32, %v4077_v51 }
 0x1c1   : > { %v4191_v10 = vadd.f32 %v4190_v6, %v4189_v56  ;;  %v4080_v20 = vpop.f32.mrf.mxu0 }
 0x1c2   : > { %v4192_v41 = vpop.f32.mrf.mxu1  ;;  %v3730_v60 = vpack.c.bf16 %v2870_v0, %v2869_v29  ;;  %v3061_v27 = vadd.f32 %v3060_v11, %v2870_v0  ;;  %v3099_v62 = vmul.f32 %v2870_v0, %v2870_v0  ;;  %v1989_v52 = vadd.f32 %v4079_v43, %v5368_v58 }
 0x1c3   : > { %v4081_v54 = vpop.f32.mrf.mxu0 }
 0x1c4   : > { %v4193_v53 = vpop.f32.mrf.mxu1  ;;  %3770 = vst [vmem:[%s5398_s30 + $0x48] sm:$0xff] %v3730_v60   ;;  %v3130_v2 = vadd.f32 %v3129_v46, %v3099_v62  ;;  %v2871_v48 = vadd.f32 %v4191_v10, %v1989_v52  ;;  %v4082_v35 = vadd.f32 %v4081_v54, %v4080_v20 }
 0x1c5   : > { %v4083_v40 = vpop.f32.mrf.mxu0  ;;  %v4194_v3 = vadd.f32 %v4193_v53, %v4192_v41 }
 0x1c6   : > { %v4195_v13 = vpop.f32.mrf.mxu1  ;;  %v3062_v24 = vadd.f32 %v3061_v27, %v2871_v48  ;;  %v3100_v47 = vmul.f32 %v2871_v48, %v2871_v48  ;;  %v1990_v61 = vadd.f32 %v4082_v35, %v5370_v39 }
 0x1c7   : > { %v4084_v38 = vpop.f32.mrf.mxu0 }
 0x1c8   : > { %v4196_v17 = vpop.f32.mrf.mxu1  ;;  %v3131_v49 = vadd.f32 %v3130_v2, %v3100_v47  ;;  %v2872_v45 = vadd.f32 %v4194_v3, %v1990_v61  ;;  %v4085_v8 = vadd.f32 %v4084_v38, %v4083_v40 }
 0x1c9   : > { %v4197_v63 = vadd.f32 %v4196_v17, %v4195_v13  ;;  %v4086_v6 = vpop.f32.mrf.mxu0 }
 0x1ca   : > { %v4198_v34 = vpop.f32.mrf.mxu1  ;;  %v3735_v4 = vpack.c.bf16 %v2872_v45, %v2871_v48  ;;  %v3063_v1 = vadd.f32 %v3062_v24, %v2872_v45  ;;  %v3101_v28 = vmul.f32 %v2872_v45, %v2872_v45  ;;  %v1991_v25 = vadd.f32 %v4085_v8, %v5372_v15 }
 0x1cb   : > { %v4087_v31 = vpop.f32.mrf.mxu0 }
 0x1cc   : > { %v4199_v21 = vpop.f32.mrf.mxu1  ;;  %3771 = vst [vmem:[%s5398_s30 + $0x50] sm:$0xff] %v3735_v4   ;;  %v3132_v30 = vadd.f32 %v3131_v49, %v3101_v28  ;;  %v2873_v39 = vadd.f32 %v4197_v63, %v1991_v25  ;;  %v4088_v18 = vadd.f32 %v4087_v31, %v4086_v6 }
 0x1cd   : > { %v4089_v7 = vpop.f32.mrf.mxu0  ;;  %v4200_v14 = vadd.f32 %v4199_v21, %v4198_v34 }
 0x1ce   : > { %v4201_v9 = vpop.f32.mrf.mxu1  ;;  %v3064_v57 = vadd.f32 %v3063_v1, %v2873_v39  ;;  %v3102_v53 = vmul.f32 %v2873_v39, %v2873_v39  ;;  %v1992_v33 = vadd.f32 %v4088_v18, %v5374_v22 }
 0x1cf   : > { %v4090_v23 = vpop.f32.mrf.mxu0 }
 0x1d0   : > { %v4202_v56 = vpop.f32.mrf.mxu1  ;;  %v3133_v13 = vadd.f32 %v3132_v30, %v3102_v53  ;;  %v2874_v51 = vadd.f32 %v4200_v14, %v1992_v33  ;;  %v4091_v11 = vadd.f32 %v4090_v23, %v4089_v7 }
 0x1d1   : > { %v4203_v55 = vadd.f32 %v4202_v56, %v4201_v9  ;;  %v4092_v50 = vpop.f32.mrf.mxu0 }
 0x1d2   : > { %v4204_v58 = vpop.f32.mrf.mxu1  ;;  %v3740_v26 = vpack.c.bf16 %v2874_v51, %v2873_v39  ;;  %v3065_v17 = vadd.f32 %v3064_v57, %v2874_v51  ;;  %v3103_v32 = vmul.f32 %v2874_v51, %v2874_v51  ;;  %v1993_v46 = vadd.f32 %v4091_v11, %v5376_v59 }
 0x1d3   : > { %v4093_v43 = vpop.f32.mrf.mxu0 }
 0x1d4   : > { %v4205_v16 = vpop.f32.mrf.mxu1  ;;  %3772 = vst [vmem:[%s5398_s30 + $0x58] sm:$0xff] %v3740_v26   ;;  %v3134_v10 = vadd.f32 %v3133_v13, %v3103_v32  ;;  %v2875_v22 = vadd.f32 %v4203_v55, %v1993_v46  ;;  %v4094_v20 = vadd.f32 %v4093_v43, %v4092_v50 }
 0x1d5   : > { %v4095_v60 = vpop.f32.mrf.mxu0  ;;  %v4206_v21 = vadd.f32 %v4205_v16, %v4204_v58 }
 0x1d6   : > { %v4207_v41 = vpop.f32.mrf.mxu1  ;;  %v3066_v27 = vadd.f32 %v3065_v17, %v2875_v22  ;;  %v3104_v62 = vmul.f32 %v2875_v22, %v2875_v22  ;;  %v1994_v52 = vadd.f32 %v4094_v20, %v5378_v12 }
 0x1d7   : > { %v4096_v2 = vpop.f32.mrf.mxu0 }
 0x1d8   : > { %v4208_v29 = vpop.f32.mrf.mxu1  ;;  %v3135_v48 = vadd.f32 %v3134_v10, %v3104_v62  ;;  %v2876_v35 = vadd.f32 %v4206_v21, %v1994_v52  ;;  %v4097_v9 = vadd.f32 %v4096_v2, %v4095_v60 }
 0x1d9   : > { %v4209_v40 = vadd.f32 %v4208_v29, %v4207_v41  ;;  %v4098_v24 = vpop.f32.mrf.mxu0 }
 0x1da   : > { %v4210_v15 = vpop.f32.mrf.mxu1  ;;  %v3745_v47 = vpack.c.bf16 %v2876_v35, %v2875_v22  ;;  %v3067_v61 = vadd.f32 %v3066_v27, %v2876_v35  ;;  %v3105_v3 = vmul.f32 %v2876_v35, %v2876_v35  ;;  %v1995_v56 = vadd.f32 %v4097_v9, %v5380_v5 }
 0x1db   : > { %v4099_v38 = vpop.f32.mrf.mxu0 }
 0x1dc   : > { %v4211_v0 = vpop.f32.mrf.mxu1  ;;  %3773 = vst [vmem:[%s5398_s30 + $0x60] sm:$0xff] %v3745_v47   ;;  %v3136_v45 = vadd.f32 %v3135_v48, %v3105_v3  ;;  %v2877_v12 = vadd.f32 %v4209_v40, %v1995_v56  ;;  %v4100_v8 = vadd.f32 %v4099_v38, %v4098_v24 }
 0x1dd   : > { %v4101_v58 = vpop.f32.mrf.mxu0  ;;  %v4212_v1 = vadd.f32 %v4211_v0, %v4210_v15 }
 0x1de   : > { %v4213_v34 = vpop.f32.mrf.mxu1  ;;  %v3068_v63 = vadd.f32 %v3067_v61, %v2877_v12  ;;  %v3106_v6 = vmul.f32 %v2877_v12, %v2877_v12  ;;  %v1996_v4 = vadd.f32 %v4100_v8, %v5382_v37 }
 0x1df   : > { %v4102_v28 = vpop.f32.mrf.mxu0 }
 0x1e0   : > { %v4214_v54 = vpop.f32.mrf.mxu1  ;;  %v3137_v16 = vadd.f32 %v3136_v45, %v3106_v6  ;;  %v2878_v31 = vadd.f32 %v4212_v1, %v1996_v4  ;;  %v4103_v30 = vadd.f32 %v4102_v28, %v4101_v58 }
 0x1e1   : > { %v4215_v39 = vadd.f32 %v4214_v54, %v4213_v34  ;;  %v4104_v5 = vpop.f32.mrf.mxu0 }
 0x1e2   : > { %v4216_v59 = vpop.f32.mrf.mxu1  ;;  %v3750_v18 = vpack.c.bf16 %v2878_v31, %v2877_v12  ;;  %v3069_v41 = vadd.f32 %v3068_v63, %v2878_v31  ;;  %v3107_v7 = vmul.f32 %v2878_v31, %v2878_v31  ;;  %v1997_v57 = vadd.f32 %v4103_v30, %v5384_v19 }
 0x1e3   : > { %v4105_v53 = vpop.f32.mrf.mxu0 }
 0x1e4   : > { %v4217_v49 = vpop.f32.mrf.mxu1  ;;  %3774 = vst [vmem:[%s5398_s30 + $0x68] sm:$0xff] %v3750_v18   ;;  %v3138_v14 = vadd.f32 %v3137_v16, %v3107_v7  ;;  %v2879_v29 = vadd.f32 %v4215_v39, %v1997_v57  ;;  %v4106_v23 = vadd.f32 %v4105_v53, %v4104_v5 }
 0x1e5   : > { %v4107_v37 = vpop.f32.mrf.mxu0  ;;  %v4218_v15 = vadd.f32 %v4217_v49, %v4216_v59 }
 0x1e6   : > { %v4219_v25 = vpop.f32.mrf.mxu1  ;;  %v3070_v13 = vadd.f32 %v3069_v41, %v2879_v29  ;;  %v3108_v51 = vmul.f32 %v2879_v29, %v2879_v29  ;;  %v1998_v11 = vadd.f32 %v4106_v23, %v5386_v44 }
 0x1e7   : > { %v4108_v55 = vpop.f32.mrf.mxu0 }
 0x1e8   : > { %v4220_v33 = vpop.f32.mrf.mxu1  ;;  %v3139_v26 = vadd.f32 %v3138_v14, %v3108_v51  ;;  %v2880_v17 = vadd.f32 %v4218_v15, %v1998_v11  ;;  %v4109_v32 = vadd.f32 %v4108_v55, %v4107_v37 }
 0x1e9   : > { %v4221_v46 = vadd.f32 %v4220_v33, %v4219_v25  ;;  %v4110_v19 = vpop.f32.mrf.mxu0 }
 0x1ea   : > { %v4222_v50 = vpop.f32.mrf.mxu1  ;;  %v3755_v0 = vpack.c.bf16 %v2880_v17, %v2879_v29  ;;  %v3071_v43 = vadd.f32 %v3070_v13, %v2880_v17  ;;  %v3109_v10 = vmul.f32 %v2880_v17, %v2880_v17  ;;  %v1999_v22 = vadd.f32 %v4109_v32, %v5388_v36 }
 0x1eb   : > { %v4111_v20 = vpop.f32.mrf.mxu0 }
 0x1ec   : > { %v4223_v34 = vpop.f32.mrf.mxu1  ;;  %3775 = vst [vmem:[%s5398_s30 + $0x70] sm:$0xff] %v3755_v0   ;;  %v3140_v60 = vadd.f32 %v3139_v26, %v3109_v10  ;;  %v2881_v27 = vadd.f32 %v4221_v46, %v1999_v22  ;;  %v4112_v44 = vadd.f32 %v4111_v20, %v4110_v19 }
 0x1ed   : > { %v4224_v54 = vadd.f32 %v4223_v34, %v4222_v50 }
 0x1ee   : > { %v3072_v62 = vadd.f32 %v3071_v43, %v2881_v27  ;;  %v3110_v52 = vmul.f32 %v2881_v27, %v2881_v27  ;;  %v2000_v21 = vadd.f32 %v4112_v44, %v5391_v42 }
 0x1f0   : > { %v3141_v2 = vadd.f32 %v3140_v60, %v3110_v52  ;;  %v2882_v48 = vadd.f32 %v4224_v54, %v2000_v21 }
 0x1f2   : > { %v3760_v35 = vpack.c.bf16 %v2882_v48, %v2881_v27  ;;  %v3073_v9 = vadd.f32 %v3072_v62, %v2882_v48  ;;  %v3111_v59 = vmul.f32 %v2882_v48, %v2882_v48 }
 0x1f4   : > { %3776 = vst [vmem:[%s5398_s30 + $0x78] sm:$0xff] %v3760_v35   ;;  %v3074_v36 = vrot.slane %v3073_v9, 4  ;;  %v3142_v40 = vadd.f32 %v3141_v2, %v3111_v59 }
 0x1f6   : > { %v3075_v24 = vadd.f32 %v3074_v36, %v3073_v9  ;;  %v3143_v47 = vrot.slane %v3142_v40, 4 }
 0x1f8   : > { %v3076_v61 = vrot.slane %v3075_v24, 2  ;;  %v3144_v3 = vadd.f32 %v3143_v47, %v3142_v40 }
 0x1fa   : > { %v3077_v56 = vadd.f32 %v3076_v61, %v3075_v24  ;;  %v3145_v38 = vrot.slane %v3144_v3, 2 }
 0x1fc   : > { %v3078_v49 = vrot.slane %v3077_v56, 1  ;;  %v3146_v45 = vadd.f32 %v3145_v38, %v3144_v3 }
 0x1fe   : > { %v3147_v42 = vrot.slane %v3146_v45, 1  ;;  %v3079_v12 = vadd.f32 %v3078_v49, %v3077_v56 }
 0x200   : > { %v3148_v8 = vadd.f32 %v3147_v42, %v3146_v45 }
 0x202   : > { %v3150_v58 = vsel %vm3149_vm3, %v3079_v12, %v3148_v8 }
 0x203   : > { %3151 = vst [vmem:[%s182_s8] sm:$0x3] %v3150_v58 }
 0x204 PF: > { %s14_s12 = sadd.s32 1, %s4346_s12  }
 0x205   : > { %p11_p5 = scmp.ge.s32.totalorder %s14_s12, 4  }
 0x207   :  { %13 = sbr.rel (!%p11_p5) target bundleno = 1 (0x1), region = 74 }

// kernel: discriminator_forward.12
= control target key start
LH: loop header
LB: loop body
LE: loop exit
PB: predicated region body
PF: predicated region fallthrough
CT: control target
= control target key end

     0   :  { %s488_s12 = smov 0   ;;  %s579_s0 = inlined_call_operand.vmem [shape: bf16[128,256], index: 0, kind: input, shape index: {}]   ;;  %s580_s1 = inlined_call_operand.vmem [shape: f32[1,256], index: 1, kind: input, shape index: {}]   ;;  %s581_s2 = inlined_call_operand.vmem [shape: f32[1,256], index: 2, kind: input, shape index: {}]   ;;  %s582_s3 = inlined_call_operand.vmem [shape: bf16[128,256], index: 3, kind: output, shape index: {}]  }
   0x1 LB: > { %s421_s13 = sadd.s32 4294967295, %s466_s12   ;;  %p425_p0 = scmp.ge.s32.totalorder %s466_s12, 1  ;;  %s466_s12 = sphi %s488_s12, %s13_s12  }
   0x2   : > { %p139_p1 = scmp.lt.s32.totalorder %s466_s12, 3 }
   0x4   : > { %p140_p2 = pnand %p425_p0, %p139_p1 }
   0x5   : > { %s426_s14 = sshll.u32 (!%p140_p2), %s421_s13, 3 }
   0x6   : > { %143 = sbr.rel (%p140_p2) target bundleno = 48 (0x30), region = 32  ;;  %p166_p3 = scmp.lt.s32.totalorder (!%p140_p2), %s426_s14, 15 }
   0xb   : > { %v205_v0 = vlaneseq  ;;  %s584_s14 = smov (!%p166_p3, %s426_s14), 15  ;;  %v203_v2 = vld [vmem:[%s580_s1] sm:$0x3] }
   0xc   : > { %v231_v5 = vld [vmem:[%s581_s2] sm:$0x3]  ;;  %s442_s19 = sshll.u32 %s584_s14, 3 }
   0xd   : > { %v206_v1 = vshrl.u32 %v205_v0, 7  ;;  %s510_s22 = scalar_lea.vmem %s579_s0, %s442_s19  ;;  %s545_s25 = scalar_lea.vmem %s582_s3, %s442_s19 }
   0xe   : > { %v179_v8 = vld [vmem:[%s510_s22] sm:$0xff]  ;;  %v180_v11 = vld [vmem:[%s510_s22 + $0x8] sm:$0xff]  ;;  %v181_v12 = vld [vmem:[%s510_s22 + $0x10] sm:$0xff] }
   0xf   : > { %v207_v3 = vsub.s32 0, %v206_v1  ;;  %v211_v4 = vsub.s32 1, %v206_v1  ;;  %v187_v13 = vunpack.c.l.bf16 %v179_v8  ;;  %v188_v14 = vunpack.c.h.bf16 %v179_v8  ;;  %v182_v17 = vld [vmem:[%s510_s22 + $0x18] sm:$0xff]  ;;  %v183_v44 = vld [vmem:[%s510_s22 + $0x20] sm:$0xff]  ;;  %v184_v49 = vld [vmem:[%s510_s22 + $0x28] sm:$0xff] }
  0x10   : > { %v189_v15 = vunpack.c.l.bf16 %v180_v11  ;;  %v190_v16 = vunpack.c.h.bf16 %v180_v11  ;;  %v191_v18 = vunpack.c.l.bf16 %v181_v12  ;;  %v192_v19 = vunpack.c.h.bf16 %v181_v12  ;;  %v185_v60 = vld [vmem:[%s510_s22 + $0x30] sm:$0xff]  ;;  %v186_v61 = vld [vmem:[%s510_s22 + $0x38] sm:$0xff] }
  0x11   : > { %v512_v6 = vrot.slane %v203_v2, %v207_v3  ;;  %v514_v7 = vrot.slane %v203_v2, %v211_v4  ;;  %v517_v9 = vrot.slane %v231_v5, %v207_v3  ;;  %v519_v10 = vrot.slane %v231_v5, %v211_v4 }
  0x12   : > { %v193_v20 = vunpack.c.l.bf16 %v182_v17  ;;  %v194_v21 = vunpack.c.h.bf16 %v182_v17  ;;  %v195_v55 = vunpack.c.l.bf16 %v183_v44  ;;  %v196_v57 = vunpack.c.h.bf16 %v183_v44 }
  0x13   : > { %v215_v22 = vmul.f32 %v512_v6, %v187_v13  ;;  %v216_v23 = vmul.f32 %v514_v7, %v188_v14  ;;  %v217_v24 = vmul.f32 %v512_v6, %v189_v15  ;;  %v218_v25 = vmul.f32 %v514_v7, %v190_v16 }
  0x14   : > { %v219_v26 = vmul.f32 %v512_v6, %v191_v18  ;;  %v220_v27 = vmul.f32 %v514_v7, %v192_v19  ;;  %v221_v28 = vmul.f32 %v512_v6, %v193_v20  ;;  %v222_v29 = vmul.f32 %v514_v7, %v194_v21 }
  0x15   : > { %v243_v30 = vadd.f32 %v517_v9, %v215_v22  ;;  %v244_v31 = vadd.f32 %v519_v10, %v216_v23  ;;  %v245_v32 = vadd.f32 %v517_v9, %v217_v24  ;;  %v246_v33 = vadd.f32 %v519_v10, %v218_v25 }
  0x16   : > { %v247_v34 = vadd.f32 %v517_v9, %v219_v26  ;;  %v248_v35 = vadd.f32 %v519_v10, %v220_v27  ;;  %v249_v36 = vadd.f32 %v517_v9, %v221_v28  ;;  %v250_v37 = vadd.f32 %v519_v10, %v222_v29 }
  0x17   : > { %vm259_vm0 = vcmp.ge.f32.partialorder %v243_v30, 0.0  ;;  %vm260_vm1 = vcmp.ge.f32.partialorder %v244_v31, 0.0  ;;  %v275_v38 = vmul.f32 0.2, %v243_v30  ;;  %v276_v39 = vmul.f32 0.2, %v244_v31 }
  0x18   : > { %vm261_vm2 = vcmp.ge.f32.partialorder %v245_v32, 0.0  ;;  %vm262_vm3 = vcmp.ge.f32.partialorder %v246_v33, 0.0  ;;  %v277_v40 = vmul.f32 0.2, %v245_v32  ;;  %v278_v41 = vmul.f32 0.2, %v246_v33 }
  0x19   : > { %v291_v42 = vsel %vm259_vm0, %v243_v30, %v275_v38  ;;  %v292_v43 = vsel %vm260_vm1, %v244_v31, %v276_v39  ;;  %vm263_vm4 = vcmp.ge.f32.partialorder %v247_v34, 0.0  ;;  %vm264_vm5 = vcmp.ge.f32.partialorder %v248_v35, 0.0 }
  0x1a   : > { %v444_v45 = vpack.c.bf16 %v292_v43, %v291_v42  ;;  %v293_v46 = vsel %vm261_vm2, %v245_v32, %v277_v40  ;;  %v294_v47 = vsel %vm262_vm3, %v246_v33, %v278_v41  ;;  %v279_v48 = vmul.f32 0.2, %v247_v34 }
  0x1b   : > { %v445_v50 = vpack.c.bf16 %v294_v47, %v293_v46  ;;  %v280_v51 = vmul.f32 0.2, %v248_v35  ;;  %vm265_vm6 = vcmp.ge.f32.partialorder %v249_v36, 0.0  ;;  %vm266_vm7 = vcmp.ge.f32.partialorder %v250_v37, 0.0 }
  0x1c   : > { %355 = vst [vmem:[%s545_s25] sm:$0xff] %v444_v45  ;;  %v295_v52 = vsel %vm263_vm4, %v247_v34, %v279_v48  ;;  %v281_v53 = vmul.f32 0.2, %v249_v36  ;;  %v282_v54 = vmul.f32 0.2, %v250_v37  ;;  %v197_v58 = vunpack.c.l.bf16 %v184_v49 }
  0x1d   : > { %356 = vst [vmem:[%s545_s25 + $0x8] sm:$0xff] %v445_v50  ;;  %v296_v56 = vsel %vm264_vm5, %v248_v35, %v280_v51  ;;  %v198_v59 = vunpack.c.h.bf16 %v184_v49  ;;  %v223_v1 = vmul.f32 %v512_v6, %v195_v55  ;;  %v224_v3 = vmul.f32 %v514_v7, %v196_v57 }
  0x1e   : > { %v446_v62 = vpack.c.bf16 %v296_v56, %v295_v52  ;;  %v297_v63 = vsel %vm265_vm6, %v249_v36, %v281_v53  ;;  %v298_v0 = vsel %vm266_vm7, %v250_v37, %v282_v54  ;;  %v225_v4 = vmul.f32 %v512_v6, %v197_v58 }
  0x1f   : > { %v447_v2 = vpack.c.bf16 %v298_v0, %v297_v63  ;;  %v226_v5 = vmul.f32 %v514_v7, %v198_v59  ;;  %v251_v8 = vadd.f32 %v517_v9, %v223_v1  ;;  %v199_v11 = vunpack.c.l.bf16 %v185_v60 }
  0x20   : > { %357 = vst [vmem:[%s545_s25 + $0x10] sm:$0xff] %v446_v62  ;;  %v200_v12 = vunpack.c.h.bf16 %v185_v60  ;;  %v201_v13 = vunpack.c.l.bf16 %v186_v61  ;;  %v252_v14 = vadd.f32 %v519_v10, %v224_v3  ;;  %v253_v15 = vadd.f32 %v517_v9, %v225_v4 }
  0x21   : > { %358 = vst [vmem:[%s545_s25 + $0x18] sm:$0xff] %v447_v2  ;;  %v254_v16 = vadd.f32 %v519_v10, %v226_v5  ;;  %v202_v17 = vunpack.c.h.bf16 %v186_v61  ;;  %vm267_vm8 = vcmp.ge.f32.partialorder %v251_v8, 0.0  ;;  %v283_v18 = vmul.f32 0.2, %v251_v8 }
  0x22   : > { %v227_v19 = vmul.f32 %v512_v6, %v199_v11  ;;  %v228_v20 = vmul.f32 %v514_v7, %v200_v12  ;;  %vm268_vm9 = vcmp.ge.f32.partialorder %v252_v14, 0.0  ;;  %v284_v21 = vmul.f32 0.2, %v252_v14 }
  0x23   : > { %vm269_vm10 = vcmp.ge.f32.partialorder %v253_v15, 0.0  ;;  %vm270_vm11 = vcmp.ge.f32.partialorder %v254_v16, 0.0  ;;  %v299_v22 = vsel %vm267_vm8, %v251_v8, %v283_v18  ;;  %v285_v23 = vmul.f32 0.2, %v253_v15 }
  0x24   : > { %v286_v24 = vmul.f32 0.2, %v254_v16  ;;  %v255_v25 = vadd.f32 %v517_v9, %v227_v19  ;;  %v300_v26 = vsel %vm268_vm9, %v252_v14, %v284_v21  ;;  %v256_v27 = vadd.f32 %v519_v10, %v228_v20 }
  0x25   : > { %v229_v28 = vmul.f32 %v512_v6, %v201_v13  ;;  %v230_v29 = vmul.f32 %v514_v7, %v202_v17  ;;  %v448_v30 = vpack.c.bf16 %v300_v26, %v299_v22  ;;  %v301_v31 = vsel %vm269_vm10, %v253_v15, %v285_v23 }
  0x26   : > { %v302_v32 = vsel %vm270_vm11, %v254_v16, %v286_v24  ;;  %vm271_vm12 = vcmp.ge.f32.partialorder %v255_v25, 0.0  ;;  %vm272_vm13 = vcmp.ge.f32.partialorder %v256_v27, 0.0  ;;  %v287_v34 = vmul.f32 0.2, %v255_v25 }
  0x27   : > { %v449_v33 = vpack.c.bf16 %v302_v32, %v301_v31  ;;  %v288_v35 = vmul.f32 0.2, %v256_v27  ;;  %359 = vst [vmem:[%s545_s25 + $0x20] sm:$0xff] %v448_v30  ;;  %v257_v36 = vadd.f32 %v517_v9, %v229_v28  ;;  %v258_v37 = vadd.f32 %v519_v10, %v230_v29 }
  0x28   : > { %v303_v38 = vsel %vm271_vm12, %v255_v25, %v287_v34 }
  0x29   : > { %360 = vst [vmem:[%s545_s25 + $0x28] sm:$0xff] %v449_v33  ;;  %v304_v6 = vsel %vm272_vm13, %v256_v27, %v288_v35  ;;  %vm273_vm14 = vcmp.ge.f32.partialorder %v257_v36, 0.0  ;;  %vm274_vm15 = vcmp.ge.f32.partialorder %v258_v37, 0.0  ;;  %v289_v7 = vmul.f32 0.2, %v257_v36 }
  0x2a   : > { %v450_v39 = vpack.c.bf16 %v304_v6, %v303_v38  ;;  %v290_v40 = vmul.f32 0.2, %v258_v37 }
  0x2b   : > { %v305_v41 = vsel %vm273_vm14, %v257_v36, %v289_v7 }
  0x2c   : > { %361 = vst [vmem:[%s545_s25 + $0x30] sm:$0xff] %v450_v39  ;;  %v306_v42 = vsel %vm274_vm15, %v258_v37, %v290_v40 }
  0x2d   : > { %v451_v43 = vpack.c.bf16 %v306_v42, %v305_v41 }
  0x2f   : > { %362 = vst [vmem:[%s545_s25 + $0x38] sm:$0xff] %v451_v43 }
  0x30 PF: > { %s13_s12 = sadd.s32 1, %s466_s12  }
  0x31   : > { %p10_p4 = scmp.ge.s32.totalorder %s13_s12, 4  }
  0x33   :  { %12 = sbr.rel (!%p10_p4) target bundleno = 1 (0x1), region = 62 }

// kernel: discriminator_forward.11
= control target key start
LH: loop header
LB: loop body
LE: loop exit
PB: predicated region body
PF: predicated region fallthrough
CT: control target
= control target key end

     0   :  { %s4409_s12 = smov 0   ;;  %s5725_s0 = inlined_call_operand.vmem [shape: bf16[2,9,9,512], index: 0, kind: input, shape index: {}]   ;;  %s5726_s1 = inlined_call_operand.vmem [shape: bf16[4,512,256], index: 1, kind: input, shape index: {}]   ;;  %s5727_s2 = inlined_call_operand.vmem [shape: bf16[128,256], index: 2, kind: output, shape index: {0}]   ;;  %s5728_s3 = inlined_call_operand.vmem [shape: f32[2,2,256], index: 3, kind: output, shape index: {1}]  }
   0x1 LB: > { %s4415_s13 = sadd.s32 4294967295, %s4387_s12   ;;  %p3396_p0 = scmp.ge.s32.totalorder %s4387_s12, 1  ;;  %s4387_s12 = sphi %s4409_s12, %s14_s12  }
   0x2   : > { %p140_p1 = scmp.lt.s32.totalorder %s4387_s12, 3 }
   0x4   : > { %p141_p2 = pnand %p3396_p0, %p140_p1 }
   0x6   : > { %144 = sbr.rel (%p141_p2) target bundleno = 517 (0x205), region = 28 }
   0xb   : > { %v3993_v0 = vld [vmem:[%s5726_s1 + $0x274] ss:$8 sps:$4 sm:$0xff]   ;;  %v3997_v2 = vld [vmem:[%s5726_s1 + $0x270] ss:$8 sps:$4 sm:$0xff]   ;;  %v3999_v4 = vld [vmem:[%s5726_s1 + $0x264] ss:$8 sps:$4 sm:$0xff]  }
   0xc   : > { %v3995_v1 = vld [vmem:[%s5726_s1 + $0x374] ss:$8 sps:$4 sm:$0xff]   ;;  %959 = vmatprep.subr.bf16.mxu0 %v3993_v0  ;;  %v3998_v3 = vld [vmem:[%s5726_s1 + $0x370] ss:$8 sps:$4 sm:$0xff]   ;;  %v4001_v5 = vld [vmem:[%s5726_s1 + $0x364] ss:$8 sps:$4 sm:$0xff]  }
   0xd   : > { %1032 = vmatprep.subr.bf16.mxu1 %v3995_v1  ;;  %960 = vmatpush1.bf16.msra.mxu0 %v3997_v2  ;;  %v4003_v6 = vld [vmem:[%s5726_s1 + $0x260] ss:$8 sps:$4 sm:$0xff]   ;;  %v4005_v8 = vld [vmem:[%s5726_s1 + $0x254] ss:$8 sps:$4 sm:$0xff]   ;;  %v4009_v10 = vld [vmem:[%s5726_s1 + $0x250] ss:$8 sps:$4 sm:$0xff]  }
   0xe   : > { %1033 = vmatpush1.bf16.msra.mxu1 %v3998_v3  ;;  %961 = vmatprep.subr.bf16.mxu0 %v3999_v4  ;;  %v4004_v7 = vld [vmem:[%s5726_s1 + $0x360] ss:$8 sps:$4 sm:$0xff]   ;;  %v4007_v9 = vld [vmem:[%s5726_s1 + $0x354] ss:$8 sps:$4 sm:$0xff]   ;;  %v4010_v11 = vld [vmem:[%s5726_s1 + $0x350] ss:$8 sps:$4 sm:$0xff]  }
   0xf   : > { %1034 = vmatprep.subr.bf16.mxu1 %v4001_v5  ;;  %v4011_v12 = vld [vmem:[%s5726_s1 + $0x244] ss:$8 sps:$4 sm:$0xff]   ;;  %v4015_v14 = vld [vmem:[%s5726_s1 + $0x240] ss:$8 sps:$4 sm:$0xff]   ;;  %v4017_v16 = vld [vmem:[%s5726_s1 + $0x234] ss:$8 sps:$4 sm:$0xff]  }
  0x10   : > { %v4013_v13 = vld [vmem:[%s5726_s1 + $0x344] ss:$8 sps:$4 sm:$0xff]   ;;  %v4016_v15 = vld [vmem:[%s5726_s1 + $0x340] ss:$8 sps:$4 sm:$0xff]   ;;  %v4019_v17 = vld [vmem:[%s5726_s1 + $0x334] ss:$8 sps:$4 sm:$0xff]  }
  0x11   : > { %962 = vmatpush1.bf16.msra.mxu0 %v4003_v6  ;;  %v4021_v18 = vld [vmem:[%s5726_s1 + $0x230] ss:$8 sps:$4 sm:$0xff]   ;;  %v4023_v20 = vld [vmem:[%s5726_s1 + $0x224] ss:$8 sps:$4 sm:$0xff]   ;;  %v4027_v22 = vld [vmem:[%s5726_s1 + $0x220] ss:$8 sps:$4 sm:$0xff]  }
  0x12   : > { %1035 = vmatpush1.bf16.msra.mxu1 %v4004_v7  ;;  %963 = vmatprep.subr.bf16.mxu0 %v4005_v8  ;;  %v4022_v19 = vld [vmem:[%s5726_s1 + $0x330] ss:$8 sps:$4 sm:$0xff]   ;;  %v4025_v21 = vld [vmem:[%s5726_s1 + $0x324] ss:$8 sps:$4 sm:$0xff]   ;;  %v4028_v23 = vld [vmem:[%s5726_s1 + $0x320] ss:$8 sps:$4 sm:$0xff]  }
  0x13   : > { %1036 = vmatprep.subr.bf16.mxu1 %v4007_v9  ;;  %v4029_v24 = vld [vmem:[%s5726_s1 + $0x214] ss:$8 sps:$4 sm:$0xff]   ;;  %v4033_v26 = vld [vmem:[%s5726_s1 + $0x210] ss:$8 sps:$4 sm:$0xff]   ;;  %v4035_v28 = vld [vmem:[%s5726_s1 + $0x204] ss:$8 sps:$4 sm:$0xff]  }
  0x14   : > { %v4031_v25 = vld [vmem:[%s5726_s1 + $0x314] ss:$8 sps:$4 sm:$0xff]   ;;  %v4034_v27 = vld [vmem:[%s5726_s1 + $0x310] ss:$8 sps:$4 sm:$0xff]   ;;  %v4037_v29 = vld [vmem:[%s5726_s1 + $0x304] ss:$8 sps:$4 sm:$0xff]  }
  0x15   : > { %964 = vmatpush1.bf16.msra.mxu0 %v4009_v10  ;;  %v4039_v30 = vld [vmem:[%s5726_s1 + $0x200] ss:$8 sps:$4 sm:$0xff]   ;;  %p170_p3 = scmp.lt.s32.totalorder %s4415_s13, 1  ;;  %v4041_v32 = vld [vmem:[%s5726_s1 + $0x2f4] ss:$8 sps:$4 sm:$0xff]   ;;  %vm3286_vm3 = vcmask 1040384  }
  0x16   : > { %1037 = vmatpush1.bf16.msra.mxu1 %v4010_v11  ;;  %965 = vmatprep.subr.bf16.mxu0 %v4011_v12  ;;  %v4040_v31 = vld [vmem:[%s5726_s1 + $0x300] ss:$8 sps:$4 sm:$0xff]   ;;  %v4043_v33 = vld [vmem:[%s5726_s1 + $0x3f4] ss:$8 sps:$4 sm:$0xff]   ;;  %v4045_v34 = vld [vmem:[%s5726_s1 + $0x2f0] ss:$8 sps:$4 sm:$0xff]  }
  0x17   : > { %1038 = vmatprep.subr.bf16.mxu1 %v4013_v13  ;;  %v4046_v35 = vld [vmem:[%s5726_s1 + $0x3f0] ss:$8 sps:$4 sm:$0xff]   ;;  %s4529_s9 = scalar_select %p170_p3, %s4415_s13, 1  ;;  %v4047_v36 = vld [vmem:[%s5726_s1 + $0x2e4] ss:$8 sps:$4 sm:$0xff]  }
  0x18   : > { %v4049_v37 = vld [vmem:[%s5726_s1 + $0x3e4] ss:$8 sps:$4 sm:$0xff]   ;;  %v4051_v38 = vld [vmem:[%s5726_s1 + $0x2e0] ss:$8 sps:$4 sm:$0xff]   ;;  %v4053_v40 = vld [vmem:[%s5726_s1 + $0x2d4] ss:$8 sps:$4 sm:$0xff]  }
  0x19   : > { %966 = vmatpush1.bf16.msra.mxu0 %v4015_v14  ;;  %s3984_s18 = smul.u32 288, %s4529_s9  ;;  %v4052_v39 = vld [vmem:[%s5726_s1 + $0x3e0] ss:$8 sps:$4 sm:$0xff]   ;;  %v4055_v41 = vld [vmem:[%s5726_s1 + $0x3d4] ss:$8 sps:$4 sm:$0xff]   ;;  %s3975_s21 = sshll.u32 %s4529_s9, 2 }
  0x1a   : > { %1039 = vmatpush1.bf16.msra.mxu1 %v4016_v15  ;;  %967 = vmatprep.subr.bf16.mxu0 %v4017_v16  ;;  %v4057_v42 = vld [vmem:[%s5726_s1 + $0x2d0] ss:$8 sps:$4 sm:$0xff]   ;;  %v4059_v44 = vld [vmem:[%s5726_s1 + $0x2c4] ss:$8 sps:$4 sm:$0xff]   ;;  %vm283_vm0 = vsmask.f32 3328  ;;  %s186_s24 = scalar_lea.vmem %s5728_s3, %s3975_s21 }
  0x1b   : > { %1040 = vmatprep.subr.bf16.mxu1 %v4019_v17  ;;  %v4058_v43 = vld [vmem:[%s5726_s1 + $0x3d0] ss:$8 sps:$4 sm:$0xff]   ;;  %s4559_s4 = scalar_lea.vmem %s5725_s0, %s3984_s18  ;;  %v4061_v45 = vld [vmem:[%s5726_s1 + $0x3c4] ss:$8 sps:$4 sm:$0xff]   ;;  %vm284_vm1 = vsmask.f32 7440 }
  0x1c   : > { %v4063_v46 = vld [vmem:[%s5726_s1 + $0x2c0] ss:$8 sps:$4 sm:$0xff]   ;;  %v4065_v49 = vld [vmem:[%s5726_s1 + $0x2b4] ss:$8 sps:$4 sm:$0xff]   ;;  %v4069_v3 = vld [vmem:[%s5726_s1 + $0x2b0] ss:$8 sps:$4 sm:$0xff]  }
  0x1d   : > { %968 = vmatpush1.bf16.msra.mxu0 %v4021_v18  ;;  %v4064_v47 = vld [vmem:[%s5726_s1 + $0x3c0] ss:$8 sps:$4 sm:$0xff]   ;;  %v4067_v50 = vld [vmem:[%s5726_s1 + $0x3b4] ss:$8 sps:$4 sm:$0xff]   ;;  %v4070_v8 = vld [vmem:[%s5726_s1 + $0x3b0] ss:$8 sps:$4 sm:$0xff]  }
  0x1e   : > { %1041 = vmatpush1.bf16.msra.mxu1 %v4022_v19  ;;  %969 = vmatprep.subr.bf16.mxu0 %v4023_v20  ;;  %v4574_v48 = vld [vmem:[%s4559_s4] sm:$0xff]  ;;  %v267_v52 = vld [vmem:[%s4559_s4 + $0x10] sm:$0x11]  ;;  %v4592_v59 = vld [vmem:[%s4559_s4 + $0x8] sm:$0xff] }
  0x1f   : > { %1042 = vmatprep.subr.bf16.mxu1 %v4025_v21  ;;  %v4583_v51 = vld [vmem:[%s4559_s4 + $0x20] sm:$0xff]  ;;  %v269_v53 = vld [vmem:[%s4559_s4 + $0x30] sm:$0x11]  ;;  %v287_v54 = vshrl.u32 %v4574_v48, 16  ;;  %v290_v55 = vshll.u32 %v4574_v48, 16  ;;  %v296_v56 = vshll.u32 %v267_v52, 16  ;;  %vm4621_vm2 = vmor %vm283_vm0, %vm284_vm1 }
  0x20   : > { %v315_v57 = vshrl.u32 %v4583_v51, 16  ;;  %v318_v58 = vshll.u32 %v4583_v51, 16  ;;  %v4595_v60 = vld [vmem:[%s4559_s4 + $0x28] sm:$0xff]  ;;  %v324_v62 = vshll.u32 %v269_v53, 16  ;;  %v268_v63 = vld [vmem:[%s4559_s4 + $0x18] sm:$0x11]  ;;  %v3548_v1 = vcombine.high %v4574_v48, %v4583_v51 }
  0x21   : > { %970 = vmatpush1.bf16.msra.mxu0 %v4027_v22  ;;  %v289_v61 = vrot.slane %v287_v54, 4  ;;  %v270_v0 = vld [vmem:[%s4559_s4 + $0x38] sm:$0x11]  ;;  %v3550_v2 = vcombine.high %v4592_v59, %v4595_v60  ;;  %v292_v4 = vrot.slane %v290_v55, 5  ;;  %v298_v5 = vrot.slane %v296_v56, 5 }
  0x22   : > { %1043 = vmatpush1.bf16.msra.mxu1 %v4028_v23  ;;  %971 = vmatprep.subr.bf16.mxu0 %v4029_v24  ;;  %v317_v6 = vrot.slane %v315_v57, 4  ;;  %v320_v7 = vrot.slane %v318_v58, 5  ;;  %v326_v9 = vrot.slane %v324_v62, 5  ;;  %v301_v10 = vshrl.u32 %v4592_v59, 16  ;;  %v4071_v13 = vld [vmem:[%s5726_s1 + $0x2a4] ss:$8 sps:$4 sm:$0xff]  }
  0x23   : > { %1044 = vmatprep.subr.bf16.mxu1 %v4031_v25  ;;  %v304_v11 = vshll.u32 %v4592_v59, 16  ;;  %v310_v12 = vshll.u32 %v268_v63, 16  ;;  %v293_v14 = vor.u32 %v292_v4, %v289_v61  ;;  %v329_v16 = vshrl.u32 %v4595_v60, 16  ;;  %v4073_v18 = vld [vmem:[%s5726_s1 + $0x3a4] ss:$8 sps:$4 sm:$0xff]  }
  0x24   : > { %v321_v15 = vor.u32 %v320_v7, %v317_v6  ;;  %v332_v17 = vshll.u32 %v4595_v60, 16  ;;  %v303_v20 = vrot.slane %v301_v10, 4  ;;  %v338_v22 = vshll.u32 %v270_v0, 16  ;;  %v4088_v52 = vld [vmem:[%s5726_s1 + $0x380] ss:$8 sps:$4 sm:$0xff]  }
  0x25   : > { %972 = vmatpush1.bf16.msra.mxu0 %v4033_v26  ;;  %v306_v21 = vrot.slane %v304_v11, 5  ;;  %v294_v23 = vrot.slane %v293_v14, 4  ;;  %v331_v25 = vrot.slane %v329_v16, 4  ;;  %v4091_v53 = vld [vmem:[%s5726_s1 + $0x74] ss:$8 sps:$4 sm:$0xff]   ;;  %v4713_v10 = vld [vmem:[%s4559_s4 + $0x60] sm:$0xff] }
  0x26   : > { %1045 = vmatpush1.bf16.msra.mxu1 %v4034_v27  ;;  %973 = vmatprep.subr.bf16.mxu0 %v4035_v28  ;;  %v322_v24 = vrot.slane %v321_v15, 4  ;;  %v334_v26 = vrot.slane %v332_v17, 5  ;;  %v4075_v27 = vld [vmem:[%s5726_s1 + $0x2a0] ss:$8 sps:$4 sm:$0xff]   ;;  %v4094_v54 = vld [vmem:[%s5726_s1 + $0x174] ss:$8 sps:$4 sm:$0xff]  }
  0x27   : > { %1046 = vmatprep.subr.bf16.mxu1 %v4037_v29  ;;  %v307_v28 = vor.u32 %v306_v21, %v303_v20  ;;  %v312_v29 = vrot.slane %v310_v12, 5  ;;  %v4089_v57 = vld [vmem:[%s5726_s1 + $0x70] ss:$8 sps:$4 sm:$0xff]   ;;  %v4097_v61 = vld [vmem:[%s5726_s1 + $0x64] ss:$8 sps:$4 sm:$0xff]   ;;  %v374_v20 = vshll.u32 %v4713_v10, 16 }
  0x28   : > { %v4092_v58 = vld [vmem:[%s5726_s1 + $0x170] ss:$8 sps:$4 sm:$0xff]   ;;  %v4100_v62 = vld [vmem:[%s5726_s1 + $0x164] ss:$8 sps:$4 sm:$0xff]   ;;  %v4095_v63 = vld [vmem:[%s5726_s1 + $0x60] ss:$8 sps:$4 sm:$0xff]  }
  0x29   : > { %974 = vmatpush1.bf16.msra.mxu0 %v4039_v30  ;;  %v3547_v30 = vcombine.low %v4574_v48, %v4583_v51  ;;  %v4098_v0 = vld [vmem:[%s5726_s1 + $0x160] ss:$8 sps:$4 sm:$0xff]   ;;  %v4106_v4 = vld [vmem:[%s5726_s1 + $0x154] ss:$8 sps:$4 sm:$0xff]   ;;  %v4104_v6 = vld [vmem:[%s5726_s1 + $0x150] ss:$8 sps:$4 sm:$0xff]  }
  0x2a   : > { %1047 = vmatpush1.bf16.msra.mxu1 %v4040_v31  ;;  %975 = vmatprep.subr.bf16.mxu0 %v4041_v32  ;;  %v3549_v31 = vcombine.low %v4592_v59, %v4595_v60  ;;  %v4076_v32 = vld [vmem:[%s5726_s1 + $0x3a0] ss:$8 sps:$4 sm:$0xff]   ;;  %v4109_v7 = vld [vmem:[%s5726_s1 + $0x44] ss:$8 sps:$4 sm:$0xff]   ;;  %v271_v11 = vld [vmem:[%s4559_s4 + $0x50] sm:$0x11] }
  0x2b   : > { %1048 = vmatprep.subr.bf16.mxu1 %v4043_v33  ;;  %v299_v33 = vsel %vm4621_vm2, %v294_v23, %v298_v5  ;;  %v4101_v5 = vld [vmem:[%s5726_s1 + $0x50] ss:$8 sps:$4 sm:$0xff]   ;;  %v4107_v15 = vld [vmem:[%s5726_s1 + $0x40] ss:$8 sps:$4 sm:$0xff]   ;;  %v352_v17 = vshll.u32 %v271_v11, 16 }
  0x2c   : > { %v273_v12 = vld [vmem:[%s4559_s4 + $0x70] sm:$0x11]  ;;  %v4110_v16 = vld [vmem:[%s5726_s1 + $0x140] ss:$8 sps:$4 sm:$0xff]  }
  0x2d   : > { %976 = vmatpush2.bf16.msra.mxu0 %v4045_v34  ;;  %v327_v34 = vsel %vm4621_vm2, %v322_v24, %v326_v9  ;;  %v4710_v9 = vld [vmem:[%s4559_s4 + $0x40] sm:$0xff]  ;;  %v380_v21 = vshll.u32 %v273_v12, 16  ;;  %v4731_v23 = vld [vmem:[%s4559_s4 + $0x68] sm:$0xff]  ;;  %v4115_v24 = vld [vmem:[%s5726_s1 + $0x34] ss:$8 sps:$4 sm:$0xff]  }
  0x2e   : > { %1049 = vmatpush2.bf16.msra.mxu1 %v4046_v35  ;;  %977 = vmatprep.subr.bf16.mxu0 %v4047_v36  ;;  %v335_v35 = vor.u32 %v334_v26, %v331_v25  ;;  %v340_v36 = vrot.slane %v338_v22, 5  ;;  %v3467_v55 = vcombine.low %v299_v33, %v327_v34  ;;  %v346_v14 = vshll.u32 %v4710_v9, 16  ;;  %v4728_v22 = vld [vmem:[%s4559_s4 + $0x48] sm:$0xff]  ;;  %v4774_v11 = vld [vmem:[%s4559_s4 + $0x80] sm:$0xff]  ;;  %v4199_v48 = vld [vmem:[%s5726_s1 + $0x454] ss:$8 sps:$4 sm:$0xff]  }
  0x2f   : > { %1050 = vmatprep.subr.bf16.mxu1 %v4049_v37  ;;  %v4077_v37 = vld [vmem:[%s5726_s1 + $0x294] ss:$8 sps:$4 sm:$0xff]   ;;  %v3551_v59 = vcombine.low %v4710_v9, %v4713_v10  ;;  %v4197_v60 = vld [vmem:[%s5726_s1 + $0x450] ss:$8 sps:$4 sm:$0xff]  }
  0x30   : > { %v348_v26 = vrot.slane %v346_v14, 5  ;;  %v275_v14 = vld [vmem:[%s4559_s4 + $0x90] sm:$0x11] }
  0x31   : > { %978 = vmatpush2.bf16.msra.mxu0 %v4051_v38  ;;  %v4079_v38 = vld [vmem:[%s5726_s1 + $0x394] ss:$8 sps:$4 sm:$0xff]  }
  0x32   : > { %1051 = vmatpush2.bf16.msra.mxu1 %v4052_v39  ;;  %979 = vmatprep.subr.bf16.mxu0 %v4053_v40  ;;  %v3468_v39 = vcombine.high %v299_v33, %v327_v34  ;;  %v308_v40 = vrot.slane %v307_v28, 4  ;;  %v274_v28 = vld [vmem:[%s4559_s4 + $0x78] sm:$0x11]  ;;  %v376_v33 = vrot.slane %v374_v20, 5  ;;  %v382_v34 = vrot.slane %v380_v21, 5 }
  0x33   : > { %1052 = vmatprep.subr.bf16.mxu1 %v4055_v41  ;;  %v336_v41 = vrot.slane %v335_v35, 4  ;;  %v4118_v35 = vld [vmem:[%s5726_s1 + $0x134] ss:$8 sps:$4 sm:$0xff]   ;;  %v399_v20 = vshrl.u32 %v4774_v11, 16  ;;  %v402_v21 = vshll.u32 %v4774_v11, 16 }
  0x34   : > { %991 = vmatprep.mubr.bf16.mxu0 %v3468_v39  ;;  %v4202_v51 = vld [vmem:[%s5726_s1 + $0x554] ss:$8 sps:$4 sm:$0xff]  }
  0x35   : > { %980 = vmatpush2.bf16.msra.mxu0 %v4057_v42  ;;  %v4081_v42 = vld [vmem:[%s5726_s1 + $0x290] ss:$8 sps:$4 sm:$0xff]  }
  0x36   : > { %1053 = vmatpush2.bf16.msra.mxu1 %v4058_v43  ;;  %981 = vmatprep.subr.bf16.mxu0 %v4059_v44  ;;  %v313_v43 = vsel %vm4621_vm2, %v308_v40, %v312_v29  ;;  %v4082_v44 = vld [vmem:[%s5726_s1 + $0x390] ss:$8 sps:$4 sm:$0xff]   ;;  %v354_v29 = vrot.slane %v352_v17, 5  ;;  %v3711_v17 = vcombine.low %v4713_v10, %v4774_v11 }
  0x37   : > { %1054 = vmatprep.subr.bf16.mxu1 %v4061_v45  ;;  %v341_v45 = vsel %vm4621_vm2, %v336_v41, %v340_v36  ;;  %v4113_v40 = vld [vmem:[%s5726_s1 + $0x30] ss:$8 sps:$4 sm:$0xff]  }
  0x38   : > { %v3469_v56 = vcombine.low %v313_v43, %v341_v45 }
  0x39   : > { %982 = vmatpush2.bf16.msra.mxu0 %v4063_v46  ;;  %v4083_v46 = vld [vmem:[%s5726_s1 + $0x284] ss:$8 sps:$4 sm:$0xff]  }
  0x3a   : > { %1055 = vmatpush2.bf16.msra.mxu1 %v4064_v47  ;;  %983 = vmatprep.subr.bf16.mxu0 %v4065_v49  ;;  %v4085_v47 = vld [vmem:[%s5726_s1 + $0x384] ss:$8 sps:$4 sm:$0xff]   ;;  %v3470_v49 = vcombine.high %v313_v43, %v341_v45  ;;  %v388_v43 = vshll.u32 %v4731_v23, 16  ;;  %v4116_v45 = vld [vmem:[%s5726_s1 + $0x130] ss:$8 sps:$4 sm:$0xff]  }
  0x3b   : > { %1056 = vmatprep.subr.bf16.mxu1 %v4067_v50  ;;  %v4087_v50 = vld [vmem:[%s5726_s1 + $0x280] ss:$8 sps:$4 sm:$0xff]  }
  0x3c   : > { %1064 = vmatprep.mubr.bf16.mxu1 %v3470_v49 }
  0x3d   : > { %984 = vmatpush2.bf16.msra.mxu0 %v4069_v3  ;;  %v4103_v3 = vld [vmem:[%s5726_s1 + $0x54] ss:$8 sps:$4 sm:$0xff]  }
  0x3e   : > { %1057 = vmatpush2.bf16.msra.mxu1 %v4070_v8  ;;  %985 = vmatprep.subr.bf16.mxu0 %v4071_v13  ;;  %v4112_v8 = vld [vmem:[%s5726_s1 + $0x144] ss:$8 sps:$4 sm:$0xff]   ;;  %v343_v13 = vshrl.u32 %v4710_v9, 16 }
  0x3f   : > { %1058 = vmatprep.subr.bf16.mxu1 %v4073_v18  ;;  %v371_v18 = vshrl.u32 %v4713_v10, 16 }
  0x40   : > { %v345_v25 = vrot.slane %v343_v13, 4  ;;  %v4777_v13 = vld [vmem:[%s4559_s4 + $0xa0] sm:$0xff] }
  0x41   : > { %986 = vmatpush2.bf16.msra.mxu0 %v4075_v27  ;;  %v272_v27 = vld [vmem:[%s4559_s4 + $0x58] sm:$0x11] }
  0x42   : > { %1059 = vmatpush2.bf16.msra.mxu1 %v4076_v32  ;;  %987 = vmatprep.subr.bf16.mxu0 %v4077_v37  ;;  %v373_v32 = vrot.slane %v371_v18, 4  ;;  %v349_v36 = vor.u32 %v348_v26, %v345_v25  ;;  %v357_v37 = vshrl.u32 %v4728_v22, 16  ;;  %v366_v39 = vshll.u32 %v272_v27, 16  ;;  %v4790_v25 = vld [vmem:[%s4559_s4 + $0x88] sm:$0xff]  ;;  %v4125_v26 = vld [vmem:[%s5726_s1 + $0x10] ss:$8 sps:$4 sm:$0xff]  }
  0x43   : > { %1060 = vmatprep.subr.bf16.mxu1 %v4079_v38  ;;  %v360_v38 = vshll.u32 %v4728_v22, 16  ;;  %v4128_v27 = vld [vmem:[%s5726_s1 + $0x110] ss:$8 sps:$4 sm:$0xff]  }
  0x44   : > { %v377_v41 = vor.u32 %v376_v33, %v373_v32  ;;  %v430_v32 = vshll.u32 %v4777_v13, 16 }
  0x45   : > { %988 = vmatpush2.bf16.msra.mxu0 %v4081_v42  ;;  %v385_v42 = vshrl.u32 %v4731_v23, 16  ;;  %v362_v49 = vrot.slane %v360_v38, 5  ;;  %v401_v38 = vrot.slane %v399_v20, 4 }
  0x46   : > { %1061 = vmatpush2.bf16.msra.mxu1 %v4082_v44  ;;  %989 = vmatprep.subr.bf16.mxu0 %v4083_v46  ;;  %v394_v44 = vshll.u32 %v274_v28, 16  ;;  %v350_v46 = vrot.slane %v349_v36, 4 }
  0x47   : > { %1062 = vmatprep.subr.bf16.mxu1 %v4085_v47  ;;  %v359_v47 = vrot.slane %v357_v37, 4 }
  0x49   : > { %990 = vmatpush2.bf16.msra.mxu0 %v4087_v50  ;;  %v4121_v50 = vld [vmem:[%s5726_s1 + $0x24] ss:$8 sps:$4 sm:$0xff]  }
  0x4a   : > { %1063 = vmatpush2.bf16.msra.mxu1 %v4088_v52  ;;  %1505 = vmatprep.subr.bf16.mxu0 %v4091_v53  ;;  %v378_v52 = vrot.slane %v377_v41, 4  ;;  %v387_v53 = vrot.slane %v385_v42, 4  ;;  %v278_v41 = vld [vmem:[%s4559_s4 + $0xb8] sm:$0x11]  ;;  %v4136_v42 = vld [vmem:[%s5726_s1 + $0x104] ss:$8 sps:$4 sm:$0xff]  }
  0x4b   : > { %1578 = vmatprep.subr.bf16.mxu1 %v4094_v54  ;;  %v390_v54 = vrot.slane %v388_v43, 5 }
  0x4c   : > { %992 = vmatmul.mubr.bf16.vlgmr.msra.gmra.mxu0 %v3467_v55  ;;  %v4124_v55 = vld [vmem:[%s5726_s1 + $0x124] ss:$8 sps:$4 sm:$0xff]  }
  0x4d   : > { %1065 = vmatmul.mubr.bf16.vlgmr.msra.gmra.mxu1 %v3469_v56  ;;  %1506 = vmatpush1.bf16.msra.mxu0 %v4089_v57  ;;  %v355_v56 = vsel %vm4621_vm2, %v350_v46, %v354_v29  ;;  %v363_v57 = vor.u32 %v362_v49, %v359_v47  ;;  %v427_v29 = vshrl.u32 %v4777_v13, 16  ;;  %v413_v49 = vshrl.u32 %v4790_v25, 16 }
  0x4e   : > { %1579 = vmatpush1.bf16.msra.mxu1 %v4092_v58  ;;  %1507 = vmatprep.subr.bf16.mxu0 %v4097_v61  ;;  %v368_v58 = vrot.slane %v366_v39, 5  ;;  %v4119_v61 = vld [vmem:[%s5726_s1 + $0x20] ss:$8 sps:$4 sm:$0xff]   ;;  %v404_v39 = vrot.slane %v402_v21, 5 }
  0x4f   : > { %1580 = vmatprep.subr.bf16.mxu1 %v4100_v62  ;;  %v4122_v62 = vld [vmem:[%s5726_s1 + $0x120] ss:$8 sps:$4 sm:$0xff]  }
  0x50   : > { %v405_v47 = vor.u32 %v404_v39, %v401_v38 }
  0x51   : > { %1508 = vmatpush1.bf16.msra.mxu0 %v4095_v63  ;;  %v383_v63 = vsel %vm4621_vm2, %v378_v52, %v382_v34  ;;  %v276_v34 = vld [vmem:[%s4559_s4 + $0x98] sm:$0x11] }
  0x52   : > { %1581 = vmatpush1.bf16.msra.mxu1 %v4098_v0  ;;  %1509 = vmatprep.subr.bf16.mxu0 %v4103_v3  ;;  %v391_v0 = vor.u32 %v390_v54, %v387_v53  ;;  %v396_v3 = vrot.slane %v394_v44, 5  ;;  %v429_v44 = vrot.slane %v427_v29, 4  ;;  %v422_v52 = vshll.u32 %v276_v34, 16  ;;  %v4131_v53 = vld [vmem:[%s5726_s1] ss:$8 sps:$4 sm:$0xff]  }
  0x53   : > { %1582 = vmatprep.subr.bf16.mxu1 %v4106_v4  ;;  %v4127_v4 = vld [vmem:[%s5726_s1 + $0x14] ss:$8 sps:$4 sm:$0xff]  }
  0x54   : > { %v392_v12 = vrot.slane %v391_v0, 4  ;;  %v4139_v0 = vld [vmem:[%s5726_s1 + $0xf4] ss:$8 sps:$4 sm:$0xff]  }
  0x55   : > { %1510 = vmatpush1.bf16.msra.mxu0 %v4101_v5  ;;  %v4130_v5 = vld [vmem:[%s5726_s1 + $0x114] ss:$8 sps:$4 sm:$0xff]  }
  0x56   : > { %1583 = vmatpush1.bf16.msra.mxu1 %v4104_v6  ;;  %1511 = vmatprep.subr.bf16.mxu0 %v4109_v7  ;;  %v3472_v6 = vcombine.high %v355_v56, %v383_v63  ;;  %v364_v7 = vrot.slane %v363_v57, 4  ;;  %v397_v28 = vsel %vm4621_vm2, %v392_v12, %v396_v3  ;;  %v450_v57 = vshll.u32 %v278_v41, 16  ;;  %v281_v34 = vld [vmem:[%s4559_s4 + $0xf0] sm:$0x11] }
  0x57   : > { %1584 = vmatprep.subr.bf16.mxu1 %v4112_v8  ;;  %v3471_v8 = vcombine.low %v355_v56, %v383_v63  ;;  %v424_v12 = vrot.slane %v422_v52, 5 }
  0x58   : > { %v369_v18 = vsel %vm4621_vm2, %v364_v7, %v368_v58  ;;  %1001 = vmatprep.mubr.bf16.mxu0 %v3472_v6  ;;  %v4134_v58 = vld [vmem:[%s5726_s1 + $0x100] ss:$8 sps:$4 sm:$0xff]   ;;  %v4142_v6 = vld [vmem:[%s5726_s1 + $0x1f4] ss:$8 sps:$4 sm:$0xff]   ;;  %v452_v21 = vrot.slane %v450_v57, 5 }
  0x59   : > { %1512 = vmatpush1.bf16.msra.mxu0 %v4107_v15  ;;  %v277_v15 = vld [vmem:[%s4559_s4 + $0xb0] sm:$0x11]  ;;  %v3474_v36 = vcombine.high %v369_v18, %v397_v28  ;;  %v3473_v37 = vcombine.low %v369_v18, %v397_v28 }
  0x5a   : > { %1585 = vmatpush1.bf16.msra.mxu1 %v4110_v16  ;;  %1513 = vmatprep.subr.bf16.mxu0 %v4115_v24  ;;  %v3712_v16 = vcombine.high %v4713_v10, %v4774_v11  ;;  %v408_v24 = vshll.u32 %v275_v14, 16  ;;  %v436_v33 = vshll.u32 %v277_v15, 16  ;;  %v4137_v14 = vld [vmem:[%s5726_s1 + $0xf0] ss:$8 sps:$4 sm:$0xff]  }
  0x5b   : > { %1586 = vmatprep.subr.bf16.mxu1 %v4118_v35  ;;  %v4133_v35 = vld [vmem:[%s5726_s1 + $0x4] ss:$8 sps:$4 sm:$0xff]   ;;  %1002 = vmatmul.mubr.bf16.gmra.mxu0 %v3471_v8  ;;  %v4140_v15 = vld [vmem:[%s5726_s1 + $0x1f0] ss:$8 sps:$4 sm:$0xff]  }
  0x5c   : > { %v410_v43 = vrot.slane %v408_v24, 5  ;;  %v438_v46 = vrot.slane %v436_v33, 5  ;;  %1074 = vmatprep.mubr.bf16.mxu1 %v3474_v36  ;;  %v4840_v24 = vld [vmem:[%s4559_s4 + $0xc0] sm:$0xff]  ;;  %v279_v33 = vld [vmem:[%s4559_s4 + $0xd0] sm:$0x11] }
  0x5d   : > { %1514 = vmatpush1.bf16.msra.mxu0 %v4113_v40  ;;  %v4807_v40 = vld [vmem:[%s4559_s4 + $0xa8] sm:$0xff]  ;;  %1075 = vmatmul.mubr.bf16.gmra.mxu1 %v3473_v37  ;;  %v455_v37 = vshrl.u32 %v4840_v24, 16  ;;  %v458_v38 = vshll.u32 %v4840_v24, 16  ;;  %v464_v39 = vshll.u32 %v279_v33, 16  ;;  %v4152_v33 = vld [vmem:[%s5726_s1 + $0x1d0] ss:$8 sps:$4 sm:$0xff]  }
  0x5e   : > { %1587 = vmatpush1.bf16.msra.mxu1 %v4116_v45  ;;  %1515 = vmatprep.subr.bf16.mxu0 %v4121_v50  ;;  %v432_v45 = vrot.slane %v430_v32, 5  ;;  %v416_v50 = vshll.u32 %v4790_v25, 16  ;;  %v444_v56 = vshll.u32 %v4807_v40, 16  ;;  %v4846_v32 = vld [vmem:[%s4559_s4 + $0xe0] sm:$0xff] }
  0x5f   : > { %1588 = vmatprep.subr.bf16.mxu1 %v4124_v55  ;;  %v441_v55 = vshrl.u32 %v4807_v40, 16  ;;  %v457_v52 = vrot.slane %v455_v37, 4  ;;  %v4157_v37 = vld [vmem:[%s5726_s1 + $0xc4] ss:$8 sps:$4 sm:$0xff]  }
  0x60   : > { %v433_v54 = vor.u32 %v432_v45, %v429_v44  ;;  %v418_v63 = vrot.slane %v416_v50, 5  ;;  %v492_v44 = vshll.u32 %v281_v34, 16  ;;  %v4860_v45 = vld [vmem:[%s4559_s4 + $0xc8] sm:$0xff] }
  0x61   : > { %1516 = vmatpush1.bf16.msra.mxu0 %v4119_v61  ;;  %v406_v61 = vrot.slane %v405_v47, 4  ;;  %v4143_v47 = vld [vmem:[%s5726_s1 + $0xe0] ss:$8 sps:$4 sm:$0xff]  }
  0x62   : > { %1589 = vmatpush1.bf16.msra.mxu1 %v4122_v62  ;;  %1517 = vmatprep.subr.bf16.mxu0 %v4127_v4  ;;  %v415_v62 = vrot.slane %v413_v49, 4  ;;  %v434_v3 = vrot.slane %v433_v54, 4  ;;  %v443_v4 = vrot.slane %v441_v55, 4  ;;  %v4146_v49 = vld [vmem:[%s5726_s1 + $0x1e0] ss:$8 sps:$4 sm:$0xff]   ;;  %v466_v54 = vrot.slane %v464_v39, 5 }
  0x63   : > { %1590 = vmatprep.subr.bf16.mxu1 %v4130_v5  ;;  %v446_v5 = vrot.slane %v444_v56, 5  ;;  %v411_v7 = vsel %vm4621_vm2, %v406_v61, %v410_v43  ;;  %v486_v43 = vshll.u32 %v4846_v32, 16  ;;  %v280_v55 = vld [vmem:[%s4559_s4 + $0xd8] sm:$0x11] }
  0x64   : > { %v419_v8 = vor.u32 %v418_v63, %v415_v62  ;;  %v439_v18 = vsel %vm4621_vm2, %v434_v3, %v438_v46  ;;  %v4863_v46 = vld [vmem:[%s4559_s4 + $0xe8] sm:$0xff]  ;;  %v4151_v56 = vld [vmem:[%s5726_s1 + $0xd4] ss:$8 sps:$4 sm:$0xff]   ;;  %v494_v3 = vrot.slane %v492_v44, 5 }
  0x65   : > { %1518 = vmatpush1.bf16.msra.mxu0 %v4125_v26  ;;  %v447_v20 = vor.u32 %v446_v5, %v443_v4  ;;  %v4145_v26 = vld [vmem:[%s5726_s1 + $0xe4] ss:$8 sps:$4 sm:$0xff]   ;;  %v3475_v29 = vcombine.low %v411_v7, %v439_v18  ;;  %v488_v62 = vrot.slane %v486_v43, 5  ;;  %v282_v63 = vld [vmem:[%s4559_s4 + $0xf8] sm:$0x11]  ;;  %v469_v4 = vshrl.u32 %v4860_v45, 16 }
  0x66   : > { %1591 = vmatpush1.bf16.msra.mxu1 %v4128_v27  ;;  %1519 = vmatprep.subr.bf16.mxu0 %v4133_v35  ;;  %v3476_v27 = vcombine.high %v411_v7, %v439_v18  ;;  %v420_v28 = vrot.slane %v419_v8, 4  ;;  %v4148_v35 = vld [vmem:[%s5726_s1 + $0x1e4] ss:$8 sps:$4 sm:$0xff]   ;;  %v472_v5 = vshll.u32 %v4860_v45, 16  ;;  %v478_v8 = vshll.u32 %v280_v55, 16 }
  0x67   : > { %1592 = vmatprep.subr.bf16.mxu1 %v4136_v42  ;;  %v448_v36 = vrot.slane %v447_v20, 4  ;;  %v483_v42 = vshrl.u32 %v4846_v32, 16  ;;  %v500_v18 = vshll.u32 %v4863_v46, 16 }
  0x68   : > { %v425_v41 = vsel %vm4621_vm2, %v420_v28, %v424_v12  ;;  %1011 = vmatprep.mubr.bf16.mxu0 %v3476_v27  ;;  %v497_v12 = vshrl.u32 %v4863_v46, 16  ;;  %v474_v20 = vrot.slane %v472_v5, 5 }
  0x69   : > { %1520 = vmatpush1.bf16.msra.mxu0 %v4131_v53  ;;  %v453_v50 = vsel %vm4621_vm2, %v448_v36, %v452_v21  ;;  %v460_v53 = vrot.slane %v458_v38, 5  ;;  %v485_v61 = vrot.slane %v483_v42, 4  ;;  %v506_v21 = vshll.u32 %v282_v63, 16  ;;  %v4160_v38 = vld [vmem:[%s5726_s1 + $0x1c4] ss:$8 sps:$4 sm:$0xff]  }
  0x6a   : > { %1593 = vmatpush1.bf16.msra.mxu1 %v4134_v58  ;;  %1521 = vmatprep.subr.bf16.mxu0 %v4139_v0  ;;  %v3478_v57 = vcombine.high %v425_v41, %v453_v50  ;;  %v3477_v58 = vcombine.low %v425_v41, %v453_v50  ;;  %v499_v28 = vrot.slane %v497_v12, 4  ;;  %v480_v36 = vrot.slane %v478_v8, 5  ;;  %v4172_v8 = vld [vmem:[%s5726_s1 + $0x1a4] ss:$8 sps:$4 sm:$0xff]   ;;  %v4167_v12 = vld [vmem:[%s5726_s1 + $0xa0] ss:$8 sps:$4 sm:$0xff]  }
  0x6b   : > { %1594 = vmatprep.subr.bf16.mxu1 %v4142_v6  ;;  %1012 = vmatmul.mubr.bf16.gmra.mxu0 %v3475_v29  ;;  %v461_v0 = vor.u32 %v460_v53, %v457_v52  ;;  %v4154_v6 = vld [vmem:[%s5726_s1 + $0x1d4] ss:$8 sps:$4 sm:$0xff]   ;;  %v489_v7 = vor.u32 %v488_v62, %v485_v61  ;;  %v502_v29 = vrot.slane %v500_v18, 5  ;;  %v508_v42 = vrot.slane %v506_v21, 5  ;;  %v4170_v18 = vld [vmem:[%s5726_s1 + $0x1a0] ss:$8 sps:$4 sm:$0xff]  }
  0x6c   : > { %1084 = vmatprep.mubr.bf16.mxu1 %v3478_v57  ;;  %v3714_v52 = vcombine.high %v4731_v23, %v4790_v25  ;;  %v3713_v53 = vcombine.low %v4731_v23, %v4790_v25  ;;  %v3718_v57 = vcombine.high %v4807_v40, %v4860_v45  ;;  %v4166_v61 = vld [vmem:[%s5726_s1 + $0x1b4] ss:$8 sps:$4 sm:$0xff]   ;;  %v3715_v63 = vcombine.low %v4777_v13, %v4840_v24  ;;  %v4181_v21 = vld [vmem:[%s5726_s1 + $0x84] ss:$8 sps:$4 sm:$0xff]  }
  0x6d   : > { %1522 = vmatpush2.bf16.msra.mxu0 %v4137_v14  ;;  %v462_v14 = vrot.slane %v461_v0, 4  ;;  %1085 = vmatmul.mubr.bf16.gmra.mxu1 %v3477_v58  ;;  %v490_v27 = vrot.slane %v489_v7, 4  ;;  %v503_v41 = vor.u32 %v502_v29, %v499_v28  ;;  %v4163_v58 = vld [vmem:[%s5726_s1 + $0xb4] ss:$8 sps:$4 sm:$0xff]   ;;  %v3717_v0 = vcombine.low %v4807_v40, %v4860_v45  ;;  %v4169_v7 = vld [vmem:[%s5726_s1 + $0xa4] ss:$8 sps:$4 sm:$0xff]  }
  0x6e   : > { %1595 = vmatpush2.bf16.msra.mxu1 %v4140_v15  ;;  %1523 = vmatprep.subr.bf16.mxu0 %v4145_v26  ;;  %v471_v15 = vrot.slane %v469_v4, 4  ;;  %v4149_v26 = vld [vmem:[%s5726_s1 + $0xd0] ss:$8 sps:$4 sm:$0xff]   ;;  %v4187_v28 = vld [vmem:[%s5726_s1 + $0x474] ss:$8 sps:$4 sm:$0xff]  }
  0x6f   : > { %1596 = vmatprep.subr.bf16.mxu1 %v4148_v35  ;;  %v467_v34 = vsel %vm4621_vm2, %v462_v14, %v466_v54  ;;  %v495_v39 = vsel %vm4621_vm2, %v490_v27, %v494_v3  ;;  %v4158_v54 = vld [vmem:[%s5726_s1 + $0x1c0] ss:$8 sps:$4 sm:$0xff]   ;;  %v4161_v4 = vld [vmem:[%s5726_s1 + $0xb0] ss:$8 sps:$4 sm:$0xff]   ;;  %v4175_v14 = vld [vmem:[%s5726_s1 + $0x94] ss:$8 sps:$4 sm:$0xff]  }
  0x70   : > { %v475_v35 = vor.u32 %v474_v20, %v471_v15  ;;  %v3480_v43 = vcombine.high %v467_v34, %v495_v39  ;;  %v3479_v50 = vcombine.low %v467_v34, %v495_v39  ;;  %v4173_v15 = vld [vmem:[%s5726_s1 + $0x90] ss:$8 sps:$4 sm:$0xff]   ;;  %v4182_v27 = vld [vmem:[%s5726_s1 + $0x180] ss:$8 sps:$4 sm:$0xff]   ;;  %v4190_v29 = vld [vmem:[%s5726_s1 + $0x574] ss:$8 sps:$4 sm:$0xff]  }
  0x71   : > { %1524 = vmatpush2.bf16.msra.mxu0 %v4143_v47  ;;  %v4155_v47 = vld [vmem:[%s5726_s1 + $0xc0] ss:$8 sps:$4 sm:$0xff]   ;;  %v4176_v20 = vld [vmem:[%s5726_s1 + $0x190] ss:$8 sps:$4 sm:$0xff]  }
  0x72   : > { %1597 = vmatpush2.bf16.msra.mxu1 %v4146_v49  ;;  %1525 = vmatprep.subr.bf16.mxu0 %v4151_v56  ;;  %v476_v44 = vrot.slane %v475_v35, 4  ;;  %v504_v49 = vrot.slane %v503_v41, 4  ;;  %v3716_v56 = vcombine.high %v4777_v13, %v4840_v24  ;;  %v4188_v34 = vld [vmem:[%s5726_s1 + $0x570] ss:$8 sps:$4 sm:$0xff]   ;;  %v4193_v35 = vld [vmem:[%s5726_s1 + $0x464] ss:$8 sps:$4 sm:$0xff]  }
  0x73   : > { %1598 = vmatprep.subr.bf16.mxu1 %v4154_v6  ;;  %1021 = vmatprep.mubr.bf16.mxu0 %v3480_v43  ;;  %v4164_v6 = vld [vmem:[%s5726_s1 + $0x1b0] ss:$8 sps:$4 sm:$0xff]   ;;  %v4191_v39 = vld [vmem:[%s5726_s1 + $0x460] ss:$8 sps:$4 sm:$0xff]   ;;  %v4208_v43 = vld [vmem:[%s5726_s1 + $0x544] ss:$8 sps:$4 sm:$0xff]  }
  0x74   : > { %v481_v55 = vsel %vm4621_vm2, %v476_v44, %v480_v36  ;;  %v509_v62 = vsel %vm4621_vm2, %v504_v49, %v508_v42  ;;  %1022 = vmatmul.mubr.bf16.gmra.mxu0 %v3479_v50  ;;  %v4196_v36 = vld [vmem:[%s5726_s1 + $0x564] ss:$8 sps:$4 sm:$0xff]   ;;  %v4194_v41 = vld [vmem:[%s5726_s1 + $0x560] ss:$8 sps:$4 sm:$0xff]   ;;  %v3556_v44 = vcombine.high %v4774_v11, %v4777_v13 }
  0x75   : > { %1526 = vmatpush2.bf16.msra.mxu0 %v4149_v26  ;;  %v3482_v3 = vcombine.high %v481_v55, %v509_v62  ;;  %v3481_v5 = vcombine.low %v481_v55, %v509_v62  ;;  %1537 = vmatprep.mubr.bf16.mxu0 %v3548_v1  ;;  %v4178_v1 = vld [vmem:[%s5726_s1 + $0x194] ss:$8 sps:$4 sm:$0xff]   ;;  %v4179_v26 = vld [vmem:[%s5726_s1 + $0x80] ss:$8 sps:$4 sm:$0xff]   ;;  %v4205_v42 = vld [vmem:[%s5726_s1 + $0x444] ss:$8 sps:$4 sm:$0xff]   ;;  %v3557_v62 = vcombine.low %v4790_v25, %v4807_v40 }
  0x76   : > { %1599 = vmatpush2.bf16.msra.mxu1 %v4152_v33  ;;  %1527 = vmatprep.subr.bf16.mxu0 %v4157_v37  ;;  %v4185_v33 = vld [vmem:[%s5726_s1 + $0x470] ss:$8 sps:$4 sm:$0xff]   ;;  %v3552_v37 = vcombine.high %v4710_v9, %v4713_v10  ;;  %v4203_v49 = vld [vmem:[%s5726_s1 + $0x440] ss:$8 sps:$4 sm:$0xff]   ;;  %v4214_v55 = vld [vmem:[%s5726_s1 + $0x534] ss:$8 sps:$4 sm:$0xff]  }
  0x77   : > { %1600 = vmatprep.subr.bf16.mxu1 %v4160_v38  ;;  %1094 = vmatprep.mubr.bf16.mxu1 %v3482_v3  ;;  %v3554_v38 = vcombine.high %v4728_v22, %v4731_v23  ;;  %v4206_v50 = vld [vmem:[%s5726_s1 + $0x540] ss:$8 sps:$4 sm:$0xff]   ;;  %v4212_v3 = vld [vmem:[%s5726_s1 + $0x530] ss:$8 sps:$4 sm:$0xff]  }
  0x78   : > { %1095 = vmatmul.mubr.bf16.gmra.mxu1 %v3481_v5  ;;  %v4220_v5 = vld [vmem:[%s5726_s1 + $0x524] ss:$8 sps:$4 sm:$0xff]   ;;  %v3794_v10 = vld [vmem:[%s4559_s4 + $0x58] sm:$0x11] }
  0x79   : > { %1528 = vmatpush2.bf16.msra.mxu0 %v4155_v47  ;;  %1610 = vmatprep.mubr.bf16.mxu1 %v3550_v2  ;;  %v4184_v2 = vld [vmem:[%s5726_s1 + $0x184] ss:$8 sps:$4 sm:$0xff]   ;;  %v3558_v47 = vcombine.high %v4790_v25, %v4807_v40  ;;  %v4319_v40 = vld [vmem:[%s5726_s1 + $0x614] ss:$8 sps:$4 sm:$0xff]  }
  0x7a   : > { %1601 = vmatpush2.bf16.msra.mxu1 %v4158_v54  ;;  %1529 = vmatprep.subr.bf16.mxu0 %v4163_v58  ;;  %v4211_v54 = vld [vmem:[%s5726_s1 + $0x434] ss:$8 sps:$4 sm:$0xff]   ;;  %v3555_v58 = vcombine.low %v4774_v11, %v4777_v13  ;;  %v4314_v13 = vld [vmem:[%s5726_s1 + $0x720] ss:$8 sps:$4 sm:$0xff]  }
  0x7b   : > { %1602 = vmatprep.subr.bf16.mxu1 %v4166_v61  ;;  %v4209_v61 = vld [vmem:[%s5726_s1 + $0x430] ss:$8 sps:$4 sm:$0xff]   ;;  %v4310_v11 = vld [vmem:[%s5726_s1 + $0x734] ss:$8 sps:$4 sm:$0xff]  }
  0x7d   : > { %1530 = vmatpush2.bf16.msra.mxu0 %v4161_v4  ;;  %v4217_v4 = vld [vmem:[%s5726_s1 + $0x424] ss:$8 sps:$4 sm:$0xff]  }
  0x7e   : > { %1603 = vmatpush2.bf16.msra.mxu1 %v4164_v6  ;;  %1531 = vmatprep.subr.bf16.mxu0 %v4169_v7  ;;  %v3560_v6 = vcombine.high %v4840_v24, %v4846_v32  ;;  %v3562_v7 = vcombine.high %v4860_v45, %v4863_v46 }
  0x7f   : > { %1604 = vmatprep.subr.bf16.mxu1 %v4172_v8  ;;  %v4215_v8 = vld [vmem:[%s5726_s1 + $0x420] ss:$8 sps:$4 sm:$0xff]  }
  0x81   : > { %1532 = vmatpush2.bf16.msra.mxu0 %v4167_v12  ;;  %v4218_v12 = vld [vmem:[%s5726_s1 + $0x520] ss:$8 sps:$4 sm:$0xff]  }
  0x82   : > { %1605 = vmatpush2.bf16.msra.mxu1 %v4170_v18  ;;  %1533 = vmatprep.subr.bf16.mxu0 %v4175_v14  ;;  %v4223_v18 = vld [vmem:[%s5726_s1 + $0x414] ss:$8 sps:$4 sm:$0xff]  }
  0x83   : > { %1606 = vmatprep.subr.bf16.mxu1 %v4178_v1  ;;  %v4226_v14 = vld [vmem:[%s5726_s1 + $0x514] ss:$8 sps:$4 sm:$0xff]   ;;  %v4221_v1 = vld [vmem:[%s5726_s1 + $0x410] ss:$8 sps:$4 sm:$0xff]  }
  0x85   : > { %1534 = vmatpush2.bf16.msra.mxu0 %v4173_v15  ;;  %v3559_v15 = vcombine.low %v4840_v24, %v4846_v32  ;;  %v4232_v32 = vld [vmem:[%s5726_s1 + $0x504] ss:$8 sps:$4 sm:$0xff]   ;;  %v4322_v24 = vld [vmem:[%s5726_s1 + $0x714] ss:$8 sps:$4 sm:$0xff]  }
  0x86   : > { %1607 = vmatpush2.bf16.msra.mxu1 %v4176_v20  ;;  %1535 = vmatprep.subr.bf16.mxu0 %v4181_v21  ;;  %v3561_v20 = vcombine.low %v4860_v45, %v4863_v46  ;;  %v5089_v21 = vld [vmem:[%s4559_s4 + $0x20] sm:$0xff] }
  0x87   : > { %1608 = vmatprep.subr.bf16.mxu1 %v4184_v2  ;;  %v5092_v2 = vld [vmem:[%s4559_s4 + $0x28] sm:$0xff] }
  0x89   : > { %1536 = vmatpush2.bf16.msra.mxu0 %v4179_v26  ;;  %v4224_v26 = vld [vmem:[%s5726_s1 + $0x510] ss:$8 sps:$4 sm:$0xff]  }
  0x8a   : > { %1609 = vmatpush2.bf16.msra.mxu1 %v4182_v27  ;;  %2133 = vmatprep.subr.bf16.mxu0 %v4187_v28  ;;  %v4229_v27 = vld [vmem:[%s5726_s1 + $0x404] ss:$8 sps:$4 sm:$0xff]   ;;  %v3708_v28 = vcombine.high %v5089_v21, %v4710_v9  ;;  %v4238_v9 = vld [vmem:[%s5726_s1 + $0x5f4] ss:$8 sps:$4 sm:$0xff]  }
  0x8b   : > { %2206 = vmatprep.subr.bf16.mxu1 %v4190_v29  ;;  %v3710_v29 = vcombine.high %v5092_v2, %v4728_v22 }
  0x8c   : > { %1538 = vmatmul.mubr.bf16.vlgmr.msra.gmra.mxu0 %v3547_v30  ;;  %v3553_v30 = vcombine.low %v4728_v22, %v4731_v23  ;;  %v4233_v22 = vld [vmem:[%s5726_s1 + $0x4f0] ss:$8 sps:$4 sm:$0xff]   ;;  %v4307_v23 = vld [vmem:[%s5726_s1 + $0x634] ss:$8 sps:$4 sm:$0xff]  }
  0x8d   : > { %1611 = vmatmul.mubr.bf16.vlgmr.msra.gmra.mxu1 %v3549_v31  ;;  %2134 = vmatpush1.bf16.msra.mxu0 %v4185_v33  ;;  %v4200_v31 = vld [vmem:[%s5726_s1 + $0x550] ss:$8 sps:$4 sm:$0xff]   ;;  %v4227_v33 = vld [vmem:[%s5726_s1 + $0x400] ss:$8 sps:$4 sm:$0xff]  }
  0x8e   : > { %2207 = vmatpush1.bf16.msra.mxu1 %v4188_v34  ;;  %2135 = vmatprep.subr.bf16.mxu0 %v4193_v35  ;;  %v4230_v34 = vld [vmem:[%s5726_s1 + $0x500] ss:$8 sps:$4 sm:$0xff]   ;;  %v4235_v35 = vld [vmem:[%s5726_s1 + $0x4f4] ss:$8 sps:$4 sm:$0xff]  }
  0x8f   : > { %2208 = vmatprep.subr.bf16.mxu1 %v4196_v36  ;;  %1547 = vmatprep.mubr.bf16.mxu0 %v3552_v37  ;;  %v4236_v36 = vld [vmem:[%s5726_s1 + $0x5f0] ss:$8 sps:$4 sm:$0xff]   ;;  %v4241_v37 = vld [vmem:[%s5726_s1 + $0x4e4] ss:$8 sps:$4 sm:$0xff]  }
  0x90   : > { %1620 = vmatprep.mubr.bf16.mxu1 %v3554_v38  ;;  %v4244_v38 = vld [vmem:[%s5726_s1 + $0x5e4] ss:$8 sps:$4 sm:$0xff]  }
  0x91   : > { %2136 = vmatpush1.bf16.msra.mxu0 %v4191_v39  ;;  %v4239_v39 = vld [vmem:[%s5726_s1 + $0x4e0] ss:$8 sps:$4 sm:$0xff]  }
  0x92   : > { %2209 = vmatpush1.bf16.msra.mxu1 %v4194_v41  ;;  %2137 = vmatprep.subr.bf16.mxu0 %v4199_v48  ;;  %v4242_v41 = vld [vmem:[%s5726_s1 + $0x5e0] ss:$8 sps:$4 sm:$0xff]   ;;  %v4247_v48 = vld [vmem:[%s5726_s1 + $0x4d4] ss:$8 sps:$4 sm:$0xff]  }
  0x93   : > { %2210 = vmatprep.subr.bf16.mxu1 %v4202_v51  ;;  %v4250_v51 = vld [vmem:[%s5726_s1 + $0x5d4] ss:$8 sps:$4 sm:$0xff]  }
  0x94   : > { %1548 = vmatmul.mubr.bf16.gmra.mxu0 %v3551_v59  ;;  %v4245_v59 = vld [vmem:[%s5726_s1 + $0x4d0] ss:$8 sps:$4 sm:$0xff]  }
  0x95   : > { %1621 = vmatmul.mubr.bf16.gmra.mxu1 %v3553_v30  ;;  %2138 = vmatpush1.bf16.msra.mxu0 %v4197_v60  ;;  %v4248_v60 = vld [vmem:[%s5726_s1 + $0x5d0] ss:$8 sps:$4 sm:$0xff]   ;;  %v4253_v30 = vld [vmem:[%s5726_s1 + $0x4c4] ss:$8 sps:$4 sm:$0xff]  }
  0x96   : > { %2211 = vmatpush1.bf16.msra.mxu1 %v4200_v31  ;;  %2139 = vmatprep.subr.bf16.mxu0 %v4205_v42  ;;  %v4256_v31 = vld [vmem:[%s5726_s1 + $0x5c4] ss:$8 sps:$4 sm:$0xff]   ;;  %v4251_v42 = vld [vmem:[%s5726_s1 + $0x4c0] ss:$8 sps:$4 sm:$0xff]  }
  0x97   : > { %2212 = vmatprep.subr.bf16.mxu1 %v4208_v43  ;;  %1557 = vmatprep.mubr.bf16.mxu0 %v3556_v44  ;;  %v4254_v43 = vld [vmem:[%s5726_s1 + $0x5c0] ss:$8 sps:$4 sm:$0xff]   ;;  %v4259_v44 = vld [vmem:[%s5726_s1 + $0x4b4] ss:$8 sps:$4 sm:$0xff]  }
  0x98   : > { %1630 = vmatprep.mubr.bf16.mxu1 %v3558_v47  ;;  %v4262_v47 = vld [vmem:[%s5726_s1 + $0x5b4] ss:$8 sps:$4 sm:$0xff]  }
  0x99   : > { %2140 = vmatpush1.bf16.msra.mxu0 %v4203_v49  ;;  %v4257_v49 = vld [vmem:[%s5726_s1 + $0x4b0] ss:$8 sps:$4 sm:$0xff]  }
  0x9a   : > { %2213 = vmatpush1.bf16.msra.mxu1 %v4206_v50  ;;  %2141 = vmatprep.subr.bf16.mxu0 %v4211_v54  ;;  %v4260_v50 = vld [vmem:[%s5726_s1 + $0x5b0] ss:$8 sps:$4 sm:$0xff]   ;;  %v4265_v54 = vld [vmem:[%s5726_s1 + $0x4a4] ss:$8 sps:$4 sm:$0xff]  }
  0x9b   : > { %2214 = vmatprep.subr.bf16.mxu1 %v4214_v55  ;;  %v4268_v55 = vld [vmem:[%s5726_s1 + $0x5a4] ss:$8 sps:$4 sm:$0xff]  }
  0x9c   : > { %1558 = vmatmul.mubr.bf16.gmra.mxu0 %v3555_v58  ;;  %v4263_v58 = vld [vmem:[%s5726_s1 + $0x4a0] ss:$8 sps:$4 sm:$0xff]  }
  0x9d   : > { %1631 = vmatmul.mubr.bf16.gmra.mxu1 %v3557_v62  ;;  %2142 = vmatpush1.bf16.msra.mxu0 %v4209_v61  ;;  %v4266_v61 = vld [vmem:[%s5726_s1 + $0x5a0] ss:$8 sps:$4 sm:$0xff]   ;;  %v4271_v62 = vld [vmem:[%s5726_s1 + $0x494] ss:$8 sps:$4 sm:$0xff]  }
  0x9e   : > { %2215 = vmatpush1.bf16.msra.mxu1 %v4212_v3  ;;  %2143 = vmatprep.subr.bf16.mxu0 %v4217_v4  ;;  %v4274_v3 = vld [vmem:[%s5726_s1 + $0x594] ss:$8 sps:$4 sm:$0xff]   ;;  %v4269_v4 = vld [vmem:[%s5726_s1 + $0x490] ss:$8 sps:$4 sm:$0xff]  }
  0x9f   : > { %2216 = vmatprep.subr.bf16.mxu1 %v4220_v5  ;;  %1567 = vmatprep.mubr.bf16.mxu0 %v3560_v6  ;;  %v4272_v5 = vld [vmem:[%s5726_s1 + $0x590] ss:$8 sps:$4 sm:$0xff]   ;;  %v4277_v6 = vld [vmem:[%s5726_s1 + $0x484] ss:$8 sps:$4 sm:$0xff]  }
  0xa0   : > { %1640 = vmatprep.mubr.bf16.mxu1 %v3562_v7  ;;  %v4280_v7 = vld [vmem:[%s5726_s1 + $0x584] ss:$8 sps:$4 sm:$0xff]  }
  0xa1   : > { %2144 = vmatpush1.bf16.msra.mxu0 %v4215_v8  ;;  %v4275_v8 = vld [vmem:[%s5726_s1 + $0x480] ss:$8 sps:$4 sm:$0xff]  }
  0xa2   : > { %2217 = vmatpush1.bf16.msra.mxu1 %v4218_v12  ;;  %2145 = vmatprep.subr.bf16.mxu0 %v4223_v18  ;;  %v4278_v12 = vld [vmem:[%s5726_s1 + $0x580] ss:$8 sps:$4 sm:$0xff]   ;;  %v4283_v18 = vld [vmem:[%s5726_s1 + $0x674] ss:$8 sps:$4 sm:$0xff]  }
  0xa3   : > { %2218 = vmatprep.subr.bf16.mxu1 %v4226_v14  ;;  %v4286_v14 = vld [vmem:[%s5726_s1 + $0x774] ss:$8 sps:$4 sm:$0xff]  }
  0xa4   : > { %1568 = vmatmul.mubr.bf16.gmra.mxu0 %v3559_v15 }
  0xa5   : > { %1641 = vmatmul.mubr.bf16.gmra.mxu1 %v3561_v20  ;;  %2146 = vmatpush1.bf16.msra.mxu0 %v4221_v1  ;;  %v4377_v1 = vld [vmem:[%s4559_s4 + $0x40] sm:$0xff]  ;;  %v4378_v20 = vld [vmem:[%s4559_s4 + $0x48] sm:$0xff] }
  0xa6   : > { %2219 = vmatpush1.bf16.msra.mxu1 %v4224_v26  ;;  %2147 = vmatprep.subr.bf16.mxu0 %v4229_v27  ;;  %v3707_v15 = vcombine.low %v5089_v21, %v4377_v1  ;;  %v3709_v26 = vcombine.low %v5092_v2, %v4378_v20  ;;  %v4281_v27 = vld [vmem:[%s5726_s1 + $0x670] ss:$8 sps:$4 sm:$0xff]   ;;  %v4379_v20 = vld [vmem:[%s4559_s4 + $0xe0] sm:$0xff] }
  0xa7   : > { %2220 = vmatprep.subr.bf16.mxu1 %v4232_v32  ;;  %2165 = vmatprep.mubr.bf16.mxu0 %v3708_v28  ;;  %v4284_v32 = vld [vmem:[%s5726_s1 + $0x770] ss:$8 sps:$4 sm:$0xff]   ;;  %v4289_v28 = vld [vmem:[%s5726_s1 + $0x664] ss:$8 sps:$4 sm:$0xff]  }
  0xa8   : > { %2238 = vmatprep.mubr.bf16.mxu1 %v3710_v29  ;;  %v4292_v29 = vld [vmem:[%s5726_s1 + $0x764] ss:$8 sps:$4 sm:$0xff]  }
  0xa9   : > { %2148 = vmatpush1.bf16.msra.mxu0 %v4227_v33  ;;  %v2328_v33 = vshrl.u32 %v5089_v21, 16 }
  0xaa   : > { %2221 = vmatpush1.bf16.msra.mxu1 %v4230_v34  ;;  %2149 = vmatprep.subr.bf16.mxu0 %v4235_v35  ;;  %v2331_v34 = vshll.u32 %v5089_v21, 16  ;;  %v4287_v35 = vld [vmem:[%s5726_s1 + $0x660] ss:$8 sps:$4 sm:$0xff]   ;;  %v4298_v21 = vld [vmem:[%s5726_s1 + $0x754] ss:$8 sps:$4 sm:$0xff]  }
  0xab   : > { %2222 = vmatprep.subr.bf16.mxu1 %v4238_v9  ;;  %v4290_v9 = vld [vmem:[%s5726_s1 + $0x760] ss:$8 sps:$4 sm:$0xff]  }
  0xad   : > { %2150 = vmatpush2.bf16.msra.mxu0 %v4233_v22  ;;  %v3791_v22 = vld [vmem:[%s4559_s4 + $0x40] sm:$0xff] }
  0xae   : > { %2223 = vmatpush2.bf16.msra.mxu1 %v4236_v36  ;;  %2151 = vmatprep.subr.bf16.mxu0 %v4241_v37  ;;  %v2342_v36 = vshrl.u32 %v5092_v2, 16  ;;  %v4295_v37 = vld [vmem:[%s5726_s1 + $0x654] ss:$8 sps:$4 sm:$0xff]  }
  0xaf   : > { %2224 = vmatprep.subr.bf16.mxu1 %v4244_v38  ;;  %v3792_v38 = vld [vmem:[%s4559_s4 + $0x48] sm:$0xff] }
  0xb1   : > { %2152 = vmatpush2.bf16.msra.mxu0 %v4239_v39  ;;  %v2345_v39 = vshll.u32 %v5092_v2, 16  ;;  %v4293_v2 = vld [vmem:[%s5726_s1 + $0x650] ss:$8 sps:$4 sm:$0xff]  }
  0xb2   : > { %2225 = vmatpush2.bf16.msra.mxu1 %v4242_v41  ;;  %2153 = vmatprep.subr.bf16.mxu0 %v4247_v48  ;;  %v2356_v41 = vshrl.u32 %v3791_v22, 16  ;;  %v2359_v48 = vshll.u32 %v3791_v22, 16 }
  0xb3   : > { %2226 = vmatprep.subr.bf16.mxu1 %v4250_v51  ;;  %v2370_v51 = vshrl.u32 %v3792_v38, 16 }
  0xb5   : > { %2154 = vmatpush2.bf16.msra.mxu0 %v4245_v59  ;;  %v2373_v59 = vshll.u32 %v3792_v38, 16  ;;  %v4320_v38 = vld [vmem:[%s5726_s1 + $0x710] ss:$8 sps:$4 sm:$0xff]  }
  0xb6   : > { %2227 = vmatpush2.bf16.msra.mxu1 %v4248_v60  ;;  %2155 = vmatprep.subr.bf16.mxu0 %v4253_v30  ;;  %v2330_v60 = vrot.slane %v2328_v33, 4  ;;  %v2333_v30 = vrot.slane %v2331_v34, 5 }
  0xb7   : > { %2228 = vmatprep.subr.bf16.mxu1 %v4256_v31  ;;  %v4304_v31 = vld [vmem:[%s5726_s1 + $0x744] ss:$8 sps:$4 sm:$0xff]  }
  0xb9   : > { %2156 = vmatpush2.bf16.msra.mxu0 %v4251_v42  ;;  %v2344_v42 = vrot.slane %v2342_v36, 4 }
  0xba   : > { %2229 = vmatpush2.bf16.msra.mxu1 %v4254_v43  ;;  %2157 = vmatprep.subr.bf16.mxu0 %v4259_v44  ;;  %v2347_v43 = vrot.slane %v2345_v39, 5  ;;  %v4299_v44 = vld [vmem:[%s5726_s1 + $0x640] ss:$8 sps:$4 sm:$0xff]   ;;  %v4325_v39 = vld [vmem:[%s5726_s1 + $0x604] ss:$8 sps:$4 sm:$0xff]  }
  0xbb   : > { %2230 = vmatprep.subr.bf16.mxu1 %v4262_v47  ;;  %v3789_v47 = vld [vmem:[%s4559_s4 + $0x30] sm:$0x11] }
  0xbc   : > { %v2348_v25 = vor.u32 %v2347_v43, %v2344_v42  ;;  %v4340_v42 = vld [vmem:[%s5726_s1 + $0x7e4] ss:$8 sps:$4 sm:$0xff]   ;;  %v4335_v43 = vld [vmem:[%s5726_s1 + $0x6e0] ss:$8 sps:$4 sm:$0xff]  }
  0xbd   : > { %2158 = vmatpush2.bf16.msra.mxu0 %v4257_v49  ;;  %v3793_v49 = vld [vmem:[%s4559_s4 + $0x50] sm:$0x11] }
  0xbe   : > { %2231 = vmatpush2.bf16.msra.mxu1 %v4260_v50  ;;  %2159 = vmatprep.subr.bf16.mxu0 %v4265_v54  ;;  %v2358_v50 = vrot.slane %v2356_v41, 4  ;;  %v2361_v54 = vrot.slane %v2359_v48, 5  ;;  %v4328_v41 = vld [vmem:[%s5726_s1 + $0x704] ss:$8 sps:$4 sm:$0xff]  }
  0xbf   : > { %2232 = vmatprep.subr.bf16.mxu1 %v4268_v55  ;;  %v2372_v55 = vrot.slane %v2370_v51, 4 }
  0xc1   : > { %2160 = vmatpush2.bf16.msra.mxu0 %v4263_v58  ;;  %v2375_v58 = vrot.slane %v2373_v59, 5  ;;  %v4323_v59 = vld [vmem:[%s5726_s1 + $0x600] ss:$8 sps:$4 sm:$0xff]  }
  0xc2   : > { %2233 = vmatpush2.bf16.msra.mxu1 %v4266_v61  ;;  %2161 = vmatprep.subr.bf16.mxu0 %v4271_v62  ;;  %v4302_v61 = vld [vmem:[%s5726_s1 + $0x740] ss:$8 sps:$4 sm:$0xff]   ;;  %v3790_v62 = vld [vmem:[%s4559_s4 + $0x38] sm:$0x11] }
  0xc3   : > { %2234 = vmatprep.subr.bf16.mxu1 %v4274_v3  ;;  %v2365_v3 = vshll.u32 %v3793_v49, 16  ;;  %v4346_v49 = vld [vmem:[%s5726_s1 + $0x7d4] ss:$8 sps:$4 sm:$0xff]  }
  0xc5   : > { %2162 = vmatpush2.bf16.msra.mxu0 %v4269_v4  ;;  %v5296_v4 = vld [vmem:[%s4559_s4 + $0x100] sm:$0xff] }
  0xc6   : > { %2235 = vmatpush2.bf16.msra.mxu1 %v4272_v5  ;;  %2163 = vmatprep.subr.bf16.mxu0 %v4277_v6  ;;  %v5299_v5 = vld [vmem:[%s4559_s4 + $0x108] sm:$0xff]  ;;  %v2362_v6 = vor.u32 %v2361_v54, %v2358_v50  ;;  %v3719_v45 = vcombine.low %v4379_v20, %v5296_v4  ;;  %v3795_v50 = vld [vmem:[%s4559_s4 + $0x60] sm:$0xff]  ;;  %v2524_v54 = vshrl.u32 %v5296_v4, 16 }
  0xc7   : > { %2236 = vmatprep.subr.bf16.mxu1 %v4280_v7  ;;  %v2351_v7 = vshll.u32 %v3790_v62, 16  ;;  %v3799_v62 = vld [vmem:[%s4559_s4 + $0x80] sm:$0xff] }
  0xc9   : > { %2164 = vmatpush2.bf16.msra.mxu0 %v4275_v8  ;;  %v2376_v8 = vor.u32 %v2375_v58, %v2372_v55  ;;  %v2353_v33 = vrot.slane %v2351_v7, 5  ;;  %v2527_v55 = vshll.u32 %v5296_v4, 16  ;;  %v2538_v58 = vshrl.u32 %v5299_v5, 16 }
  0xca   : > { %2237 = vmatpush2.bf16.msra.mxu1 %v4278_v12  ;;  %3000 = vmatprep.subr.bf16.mxu0 %v4283_v18  ;;  %v2379_v12 = vshll.u32 %v3794_v10, 16  ;;  %v4313_v18 = vld [vmem:[%s5726_s1 + $0x624] ss:$8 sps:$4 sm:$0xff]   ;;  %v4344_v10 = vld [vmem:[%s5726_s1 + $0x7d0] ss:$8 sps:$4 sm:$0xff]   ;;  %v2415_v7 = vshll.u32 %v3799_v62, 16 }
  0xcb   : > { %3073 = vmatprep.subr.bf16.mxu1 %v4286_v14  ;;  %v4316_v14 = vld [vmem:[%s5726_s1 + $0x724] ss:$8 sps:$4 sm:$0xff]   ;;  %v2377_v34 = vrot.slane %v2376_v8, 4  ;;  %v5427_v8 = vrot.slane %v2527_v55, 5 }
  0xcc   : > { %2166 = vmatmul.mubr.bf16.vlgmr.msra.gmra.mxu0 %v3707_v15  ;;  %v2349_v15 = vrot.slane %v2348_v25, 4  ;;  %v3800_v25 = vld [vmem:[%s4559_s4 + $0x88] sm:$0xff] }
  0xcd   : > { %2239 = vmatmul.mubr.bf16.vlgmr.msra.gmra.mxu1 %v3709_v26  ;;  %3001 = vmatpush1.bf16.msra.mxu0 %v4281_v27  ;;  %v3720_v26 = vcombine.high %v4379_v20, %v5296_v4  ;;  %v3722_v27 = vcombine.high %v4863_v46, %v5299_v5  ;;  %v4311_v46 = vld [vmem:[%s5726_s1 + $0x620] ss:$8 sps:$4 sm:$0xff]   ;;  %v5425_v4 = vrot.slane %v2524_v54, 4  ;;  %v4355_v20 = vld [vmem:[%s5726_s1 + $0x6b4] ss:$8 sps:$4 sm:$0xff]  }
  0xce   : > { %3074 = vmatpush1.bf16.msra.mxu1 %v4284_v32  ;;  %3002 = vmatprep.subr.bf16.mxu0 %v4289_v28  ;;  %v2367_v28 = vrot.slane %v2365_v3, 5  ;;  %v5348_v36 = vsel %vm4621_vm2, %v2349_v15, %v2353_v33  ;;  %v4352_v3 = vld [vmem:[%s5726_s1 + $0x7c4] ss:$8 sps:$4 sm:$0xff]   ;;  %v4350_v15 = vld [vmem:[%s5726_s1 + $0x7c0] ss:$8 sps:$4 sm:$0xff]  }
  0xcf   : > { %3075 = vmatprep.subr.bf16.mxu1 %v4292_v29  ;;  %2175 = vmatprep.mubr.bf16.mxu0 %v3712_v16  ;;  %v4296_v16 = vld [vmem:[%s5726_s1 + $0x750] ss:$8 sps:$4 sm:$0xff]   ;;  %v2363_v29 = vrot.slane %v2362_v6, 4  ;;  %v2412_v6 = vshrl.u32 %v3799_v62, 16 }
  0xd0   : > { %2248 = vmatprep.mubr.bf16.mxu1 %v3714_v52  ;;  %v4301_v52 = vld [vmem:[%s5726_s1 + $0x644] ss:$8 sps:$4 sm:$0xff]   ;;  %v4353_v33 = vld [vmem:[%s5726_s1 + $0x6b0] ss:$8 sps:$4 sm:$0xff]  }
  0xd1   : > { %3003 = vmatpush1.bf16.msra.mxu0 %v4287_v35  ;;  %v2381_v35 = vrot.slane %v2379_v12, 5  ;;  %v5344_v22 = vsel %vm4621_vm2, %v2363_v29, %v2367_v28  ;;  %v5429_v12 = vrot.slane %v2538_v58, 4  ;;  %v3797_v28 = vld [vmem:[%s4559_s4 + $0x70] sm:$0x11] }
  0xd2   : > { %3076 = vmatpush1.bf16.msra.mxu1 %v4290_v9  ;;  %3004 = vmatprep.subr.bf16.mxu0 %v4295_v37  ;;  %v3801_v29 = vld [vmem:[%s4559_s4 + $0x90] sm:$0x11] }
  0xd3   : > { %3077 = vmatprep.subr.bf16.mxu1 %v4298_v21  ;;  %v5352_v37 = vsel %vm4621_vm2, %v2377_v34, %v2381_v35  ;;  %v4317_v21 = vld [vmem:[%s5726_s1 + $0x610] ss:$8 sps:$4 sm:$0xff]   ;;  %v2414_v34 = vrot.slane %v2412_v6, 4  ;;  %v2417_v35 = vrot.slane %v2415_v7, 5 }
  0xd4   : > { %2176 = vmatmul.mubr.bf16.gmra.mxu0 %v3711_v17  ;;  %v2334_v17 = vor.u32 %v2333_v30, %v2330_v60  ;;  %v3886_v51 = vcombine.high %v5348_v36, %v5352_v37  ;;  %v4334_v60 = vld [vmem:[%s5726_s1 + $0x7f4] ss:$8 sps:$4 sm:$0xff]   ;;  %v4329_v30 = vld [vmem:[%s5726_s1 + $0x6f0] ss:$8 sps:$4 sm:$0xff]  }
  0xd5   : > { %2249 = vmatmul.mubr.bf16.gmra.mxu1 %v3713_v53  ;;  %3005 = vmatpush1.bf16.msra.mxu0 %v4293_v2  ;;  %v2337_v53 = vshll.u32 %v3789_v47, 16  ;;  %v4326_v2 = vld [vmem:[%s5726_s1 + $0x700] ss:$8 sps:$4 sm:$0xff]   ;;  %v4343_v47 = vld [vmem:[%s5726_s1 + $0x6d4] ss:$8 sps:$4 sm:$0xff]  }
  0xd6   : > { %3078 = vmatpush1.bf16.msra.mxu1 %v4296_v16  ;;  %3006 = vmatprep.subr.bf16.mxu0 %v4301_v52  ;;  %v2335_v1 = vrot.slane %v2334_v17, 4  ;;  %v4331_v16 = vld [vmem:[%s5726_s1 + $0x6f4] ss:$8 sps:$4 sm:$0xff]   ;;  %v4332_v52 = vld [vmem:[%s5726_s1 + $0x7f0] ss:$8 sps:$4 sm:$0xff]   ;;  %v3796_v17 = vld [vmem:[%s4559_s4 + $0x68] sm:$0xff] }
  0xd7   : > { %3079 = vmatprep.subr.bf16.mxu1 %v4304_v31  ;;  %2185 = vmatprep.mubr.bf16.mxu0 %v3716_v56  ;;  %v4305_v56 = vld [vmem:[%s5726_s1 + $0x630] ss:$8 sps:$4 sm:$0xff]   ;;  %v2339_v32 = vrot.slane %v2337_v53, 5  ;;  %v4337_v31 = vld [vmem:[%s5726_s1 + $0x6e4] ss:$8 sps:$4 sm:$0xff]  }
  0xd8   : > { %2258 = vmatprep.mubr.bf16.mxu1 %v3718_v57  ;;  %v4308_v57 = vld [vmem:[%s5726_s1 + $0x730] ss:$8 sps:$4 sm:$0xff]   ;;  %v4349_v53 = vld [vmem:[%s5726_s1 + $0x6c4] ss:$8 sps:$4 sm:$0xff]  }
  0xd9   : > { %3007 = vmatpush1.bf16.msra.mxu0 %v4299_v44  ;;  %v5340_v9 = vsel %vm4621_vm2, %v2335_v1, %v2339_v32  ;;  %v4338_v44 = vld [vmem:[%s5726_s1 + $0x7e0] ss:$8 sps:$4 sm:$0xff]   ;;  %v2429_v1 = vshll.u32 %v3800_v25, 16  ;;  %v4358_v32 = vld [vmem:[%s5726_s1 + $0x7b4] ss:$8 sps:$4 sm:$0xff]  }
  0xda   : > { %3080 = vmatpush1.bf16.msra.mxu1 %v4302_v61  ;;  %3008 = vmatprep.subr.bf16.mxu0 %v4307_v23  ;;  %v3884_v48 = vcombine.high %v5340_v9, %v5344_v22  ;;  %v4341_v61 = vld [vmem:[%s5726_s1 + $0x6d0] ss:$8 sps:$4 sm:$0xff]   ;;  %v2384_v23 = vshrl.u32 %v3795_v50, 16 }
  0xdb   : > { %3081 = vmatprep.subr.bf16.mxu1 %v4310_v11  ;;  %v2387_v11 = vshll.u32 %v3795_v50, 16  ;;  %v4368_v6 = vld [vmem:[%s5726_s1 + $0x790] ss:$8 sps:$4 sm:$0xff]  }
  0xdc   : > { %2186 = vmatmul.mubr.bf16.gmra.mxu0 %v3715_v63  ;;  %v4380_v63 = vld [vmem:[%s4559_s4 + $0xe8] sm:$0xff] }
  0xdd   : > { %2259 = vmatmul.mubr.bf16.gmra.mxu1 %v3717_v0  ;;  %3009 = vmatpush1.bf16.msra.mxu0 %v4305_v56  ;;  %v3721_v0 = vcombine.low %v4380_v63, %v5299_v5  ;;  %v4347_v56 = vld [vmem:[%s5726_s1 + $0x6c0] ss:$8 sps:$4 sm:$0xff]   ;;  %v2431_v63 = vrot.slane %v2429_v1, 5 }
  0xde   : > { %3082 = vmatpush1.bf16.msra.mxu1 %v4308_v57  ;;  %3010 = vmatprep.subr.bf16.mxu0 %v4313_v18  ;;  %v2398_v57 = vshrl.u32 %v3796_v17, 16  ;;  %v2401_v18 = vshll.u32 %v3796_v17, 16 }
  0xdf   : > { %3083 = vmatprep.subr.bf16.mxu1 %v4316_v14  ;;  %2195 = vmatprep.mubr.bf16.mxu0 %v3720_v26  ;;  %v2426_v14 = vshrl.u32 %v3800_v25, 16  ;;  %v2386_v26 = vrot.slane %v2384_v23, 4  ;;  %v4370_v23 = vld [vmem:[%s5726_s1 + $0x794] ss:$8 sps:$4 sm:$0xff]  }
  0xe0   : > { %2268 = vmatprep.mubr.bf16.mxu1 %v3722_v27  ;;  %v2389_v27 = vrot.slane %v2387_v11, 5 }
  0xe1   : > { %3011 = vmatpush1.bf16.msra.mxu0 %v4311_v46  ;;  %v3798_v46 = vld [vmem:[%s4559_s4 + $0x78] sm:$0x11] }
  0xe2   : > { %3084 = vmatpush1.bf16.msra.mxu1 %v4314_v13  ;;  %3012 = vmatprep.subr.bf16.mxu0 %v4319_v40  ;;  %v3802_v13 = vld [vmem:[%s4559_s4 + $0x98] sm:$0x11]  ;;  %v2400_v40 = vrot.slane %v2398_v57, 4 }
  0xe3   : > { %3085 = vmatprep.subr.bf16.mxu1 %v4322_v24  ;;  %v2403_v24 = vrot.slane %v2401_v18, 5 }
  0xe4   : > { %2196 = vmatmul.mubr.bf16.gmra.mxu0 %v3719_v45  ;;  %v2428_v45 = vrot.slane %v2426_v14, 4  ;;  %v4373_v14 = vld [vmem:[%s5726_s1 + $0x684] ss:$8 sps:$4 sm:$0xff]  }
  0xe5   : > { %2269 = vmatmul.mubr.bf16.gmra.mxu1 %v3721_v0  ;;  %3013 = vmatpush1.bf16.msra.mxu0 %v4317_v21  ;;  %v3803_v0 = vld [vmem:[%s4559_s4 + $0xa0] sm:$0xff]  ;;  %v4356_v21 = vld [vmem:[%s5726_s1 + $0x7b0] ss:$8 sps:$4 sm:$0xff]  }
  0xe6   : > { %3086 = vmatpush1.bf16.msra.mxu1 %v4320_v38  ;;  %3014 = vmatprep.subr.bf16.mxu0 %v4325_v39  ;;  %v4361_v38 = vld [vmem:[%s5726_s1 + $0x6a4] ss:$8 sps:$4 sm:$0xff]   ;;  %v2390_v39 = vor.u32 %v2389_v27, %v2386_v26  ;;  %v2432_v50 = vor.u32 %v2431_v63, %v2428_v45 }
  0xe7   : > { %3087 = vmatprep.subr.bf16.mxu1 %v4328_v41  ;;  %3032 = vmatprep.mubr.bf16.mxu0 %v3884_v48  ;;  %v2393_v41 = vshll.u32 %v3797_v28, 16  ;;  %v3807_v48 = vld [vmem:[%s4559_s4 + $0xc0] sm:$0xff]  ;;  %v3809_v28 = vld [vmem:[%s4559_s4 + $0xd0] sm:$0x11] }
  0xe8   : > { %3105 = vmatprep.mubr.bf16.mxu1 %v3886_v51  ;;  %v4364_v51 = vld [vmem:[%s5726_s1 + $0x7a4] ss:$8 sps:$4 sm:$0xff]   ;;  %v2468_v54 = vshrl.u32 %v3807_v48, 16  ;;  %v2471_v55 = vshll.u32 %v3807_v48, 16  ;;  %v2391_v58 = vrot.slane %v2390_v39, 4 }
  0xe9   : > { %3015 = vmatpush1.bf16.msra.mxu0 %v4323_v59  ;;  %v2421_v59 = vshll.u32 %v3801_v29, 16  ;;  %v4371_v39 = vld [vmem:[%s5726_s1 + $0x680] ss:$8 sps:$4 sm:$0xff]  }
  0xea   : > { %3088 = vmatpush1.bf16.msra.mxu1 %v4326_v2  ;;  %3016 = vmatprep.subr.bf16.mxu0 %v4331_v16  ;;  %v2407_v2 = vshll.u32 %v3798_v46, 16  ;;  %v3804_v16 = vld [vmem:[%s4559_s4 + $0xa8] sm:$0xff]  ;;  %v2470_v26 = vrot.slane %v2468_v54, 4  ;;  %v2473_v27 = vrot.slane %v2471_v55, 5 }
  0xeb   : > { %3089 = vmatprep.subr.bf16.mxu1 %v4334_v60  ;;  %v2541_v60 = vshll.u32 %v5299_v5, 16  ;;  %v4367_v5 = vld [vmem:[%s5726_s1 + $0x694] ss:$8 sps:$4 sm:$0xff]   ;;  %v2454_v62 = vshrl.u32 %v3804_v16, 16  ;;  %v2423_v11 = vrot.slane %v2421_v59, 5  ;;  %v2477_v59 = vshll.u32 %v3809_v28, 16 }
  0xec   : > { %v2409_v17 = vrot.slane %v2407_v2, 5  ;;  %v4374_v2 = vld [vmem:[%s5726_s1 + $0x780] ss:$8 sps:$4 sm:$0xff]  }
  0xed   : > { %3017 = vmatpush2.bf16.msra.mxu0 %v4329_v30  ;;  %v2418_v30 = vor.u32 %v2417_v35, %v2414_v34  ;;  %v2456_v29 = vrot.slane %v2454_v62, 4  ;;  %v3806_v34 = vld [vmem:[%s4559_s4 + $0xb8] sm:$0x11] }
  0xee   : > { %3090 = vmatpush2.bf16.msra.mxu1 %v4332_v52  ;;  %3018 = vmatprep.subr.bf16.mxu0 %v4337_v31  ;;  %v2435_v52 = vshll.u32 %v3802_v13, 16  ;;  %v2440_v31 = vshrl.u32 %v3803_v0, 16  ;;  %v3811_v13 = vld [vmem:[%s4559_s4 + $0xe0] sm:$0xff] }
  0xef   : > { %3091 = vmatprep.subr.bf16.mxu1 %v4340_v42  ;;  %v2443_v42 = vshll.u32 %v3803_v0, 16  ;;  %v2419_v7 = vrot.slane %v2418_v30, 4  ;;  %v2496_v30 = vshrl.u32 %v3811_v13, 16 }
  0xf0   : > { %v2442_v57 = vrot.slane %v2440_v31, 4 }
  0xf1   : > { %3019 = vmatpush2.bf16.msra.mxu0 %v4335_v43  ;;  %v3808_v43 = vld [vmem:[%s4559_s4 + $0xc8] sm:$0xff]  ;;  %v2445_v18 = vrot.slane %v2443_v42, 5  ;;  %v5500_v45 = vsel %vm4621_vm2, %v2419_v7, %v2423_v11  ;;  %v3817_v11 = vld [vmem:[%s4559_s4 + $0x110] sm:$0x11] }
  0xf2   : > { %3092 = vmatpush2.bf16.msra.mxu1 %v4338_v44  ;;  %3020 = vmatprep.subr.bf16.mxu0 %v4343_v47  ;;  %v4359_v44 = vld [vmem:[%s5726_s1 + $0x6a0] ss:$8 sps:$4 sm:$0xff]   ;;  %v2482_v25 = vshrl.u32 %v3808_v43, 16 }
  0xf3   : > { %3093 = vmatprep.subr.bf16.mxu1 %v4346_v49  ;;  %v4362_v47 = vld [vmem:[%s5726_s1 + $0x7a0] ss:$8 sps:$4 sm:$0xff]   ;;  %v2404_v49 = vor.u32 %v2403_v24, %v2400_v40  ;;  %v5492_v40 = vrot.slane %v2541_v60, 5  ;;  %v2446_v63 = vor.u32 %v2445_v18, %v2442_v57  ;;  %v2463_v60 = vshll.u32 %v3806_v34, 16 }
  0xf4   : > { %v2484_v35 = vrot.slane %v2482_v25, 4 }
  0xf5   : > { %3021 = vmatpush2.bf16.msra.mxu0 %v4341_v61  ;;  %v2395_v61 = vrot.slane %v2393_v41, 5  ;;  %v2405_v1 = vrot.slane %v2404_v49, 4  ;;  %v3885_v49 = vcombine.low %v5348_v36, %v5352_v37 }
  0xf6   : > { %3094 = vmatpush2.bf16.msra.mxu1 %v4344_v10  ;;  %3022 = vmatprep.subr.bf16.mxu0 %v4349_v53  ;;  %v2457_v10 = vshll.u32 %v3804_v16, 16  ;;  %v2485_v53 = vshll.u32 %v3808_v43, 16 }
  0xf7   : > { %3095 = vmatprep.subr.bf16.mxu1 %v4352_v3  ;;  %v4365_v3 = vld [vmem:[%s5726_s1 + $0x690] ss:$8 sps:$4 sm:$0xff]   ;;  %v5496_v24 = vsel %vm4621_vm2, %v2391_v58, %v2395_v61  ;;  %v5509_v41 = vsel %vm4621_vm2, %v2405_v1, %v2409_v17  ;;  %v2479_v61 = vrot.slane %v2477_v59, 5  ;;  %v2544_v1 = vor.u32 %v5492_v40, %v5429_v12 }
  0xf8   : > { %v2487_v46 = vrot.slane %v2485_v53, 5  ;;  %v2530_v53 = vor.u32 %v5427_v8, %v5425_v4 }
  0xf9   : > { %3023 = vmatpush2.bf16.msra.mxu0 %v4347_v56  ;;  %v2437_v56 = vrot.slane %v2435_v52, 5  ;;  %v2499_v52 = vshll.u32 %v3811_v13, 16  ;;  %v3887_v13 = vcombine.low %v5496_v24, %v5500_v45 }
  0xfa   : > { %3096 = vmatpush2.bf16.msra.mxu1 %v4350_v15  ;;  %3024 = vmatprep.subr.bf16.mxu0 %v4355_v20  ;;  %v2433_v15 = vrot.slane %v2432_v50, 4  ;;  %v3805_v20 = vld [vmem:[%s4559_s4 + $0xb0] sm:$0x11]  ;;  %v2488_v31 = vor.u32 %v2487_v46, %v2484_v35  ;;  %v3888_v50 = vcombine.high %v5496_v24, %v5500_v45  ;;  %v2531_v12 = vrot.slane %v2530_v53, 4 }
  0xfb   : > { %3097 = vmatprep.subr.bf16.mxu1 %v4358_v32  ;;  %v4376_v32 = vld [vmem:[%s5726_s1 + $0x784] ss:$8 sps:$4 sm:$0xff]   ;;  %v2449_v0 = vshll.u32 %v3805_v20, 16  ;;  %v2501_v36 = vrot.slane %v2499_v52, 5  ;;  %v2533_v20 = vshll.u32 %v3817_v11, 16 }
  0xfc   : > { %v5513_v48 = vsel %vm4621_vm2, %v2433_v15, %v2437_v56  ;;  %v2489_v37 = vrot.slane %v2488_v31, 4 }
  0xfd   : > { %3025 = vmatpush2.bf16.msra.mxu0 %v4353_v33  ;;  %v2459_v33 = vrot.slane %v2457_v10, 5  ;;  %v2451_v54 = vrot.slane %v2449_v0, 5  ;;  %v3890_v55 = vcombine.high %v5509_v41, %v5513_v48  ;;  %v2498_v10 = vrot.slane %v2496_v30, 4 }
  0xfe   : > { %3098 = vmatpush2.bf16.msra.mxu1 %v4356_v21  ;;  %3026 = vmatprep.subr.bf16.mxu0 %v4361_v38  ;;  %v3810_v21 = vld [vmem:[%s4559_s4 + $0xd8] sm:$0x11]  ;;  %v3812_v38 = vld [vmem:[%s4559_s4 + $0xe8] sm:$0xff]  ;;  %v3889_v40 = vcombine.low %v5509_v41, %v5513_v48  ;;  %v2545_v0 = vrot.slane %v2544_v1, 4 }
  0xff   : > { %3099 = vmatprep.subr.bf16.mxu1 %v4364_v51  ;;  %v2474_v51 = vor.u32 %v2473_v27, %v2470_v26  ;;  %v2460_v16 = vor.u32 %v2459_v33, %v2456_v29  ;;  %v2491_v42 = vshll.u32 %v3810_v21, 16  ;;  %v2510_v43 = vshrl.u32 %v3812_v38, 16 }
 0x100   : > { %v2502_v8 = vor.u32 %v2501_v36, %v2498_v10 }
 0x101   : > { %3027 = vmatpush2.bf16.msra.mxu0 %v4359_v44  ;;  %v2513_v44 = vshll.u32 %v3812_v38, 16  ;;  %v2475_v58 = vrot.slane %v2474_v51, 4  ;;  %v2461_v62 = vrot.slane %v2460_v16, 4  ;;  %v2512_v17 = vrot.slane %v2510_v43, 4 }
 0x102   : > { %3100 = vmatpush2.bf16.msra.mxu1 %v4362_v47  ;;  %3028 = vmatprep.subr.bf16.mxu0 %v4367_v5  ;;  %v3883_v47 = vcombine.low %v5340_v9, %v5344_v22  ;;  %v2447_v5 = vrot.slane %v2446_v63, 4  ;;  %v2465_v9 = vrot.slane %v2463_v60, 5  ;;  %v3813_v22 = vld [vmem:[%s4559_s4 + $0xf0] sm:$0x11]  ;;  %v2535_v51 = vrot.slane %v2533_v20, 5 }
 0x103   : > { %3101 = vmatprep.subr.bf16.mxu1 %v4370_v23  ;;  %v2493_v23 = vrot.slane %v2491_v42, 5  ;;  %v2515_v25 = vrot.slane %v2513_v44, 5  ;;  %v2480_v18 = vsel %vm4621_vm2, %v2475_v58, %v2479_v61  ;;  %v2503_v16 = vrot.slane %v2502_v8, 4 }
 0x104   : > { %v2452_v57 = vsel %vm4621_vm2, %v2447_v5, %v2451_v54  ;;  %v2466_v4 = vsel %vm4621_vm2, %v2461_v62, %v2465_v9  ;;  %v2536_v45 = vsel %vm4621_vm2, %v2531_v12, %v2535_v51 }
 0x105   : > { %3029 = vmatpush2.bf16.msra.mxu0 %v4365_v3  ;;  %v3814_v3 = vld [vmem:[%s4559_s4 + $0xf8] sm:$0x11]  ;;  %v2516_v28 = vor.u32 %v2515_v25, %v2512_v17  ;;  %v3892_v38 = vcombine.high %v2452_v57, %v2480_v18  ;;  %v3891_v42 = vcombine.low %v2452_v57, %v2480_v18 }
 0x106   : > { %3102 = vmatpush2.bf16.msra.mxu1 %v4368_v6  ;;  %3030 = vmatprep.subr.bf16.mxu0 %v4373_v14  ;;  %v3818_v6 = vld [vmem:[%s4559_s4 + $0x118] sm:$0x11]  ;;  %v2505_v14 = vshll.u32 %v3813_v22, 16  ;;  %v2519_v29 = vshll.u32 %v3814_v3, 16  ;;  %s3398_s4 = sshll.u32 %s4415_s13, 3 }
 0x107   : > { %3103 = vmatprep.subr.bf16.mxu1 %v4376_v32  ;;  %v2494_v32 = vsel %vm4621_vm2, %v2489_v37, %v2493_v23  ;;  %v2547_v33 = vshll.u32 %v3818_v6, 16  ;;  %v2517_v60 = vrot.slane %v2516_v28, 4  ;;  %p176_p4 = scmp.lt.s32.totalorder %s3398_s4, 15 }
 0x108   : > { %v2507_v63 = vrot.slane %v2505_v14, 5  ;;  %v2521_v30 = vrot.slane %v2519_v29, 5  ;;  %v3893_v43 = vcombine.low %v2466_v4, %v2494_v32 }
 0x109   : > { %3031 = vmatpush2.bf16.msra.mxu0 %v4371_v39  ;;  %v3894_v39 = vcombine.high %v2466_v4, %v2494_v32  ;;  %v2549_v52 = vrot.slane %v2547_v33, 5  ;;  %s5756_s4 = smov (!%p176_p4, %s3398_s4), 15 }
 0x10a   : > { %3104 = vmatpush2.bf16.msra.mxu1 %v4374_v2  ;;  %v2508_v24 = vsel %vm4621_vm2, %v2503_v16, %v2507_v63  ;;  %v2522_v41 = vsel %vm4621_vm2, %v2517_v60, %v2521_v30  ;;  %s3974_s13 = sshll.u32 %s5756_s4, 3 }
 0x10b   : > { %v2550_v48 = vsel %vm4621_vm2, %v2545_v0, %v2549_v52  ;;  %v3896_v44 = vcombine.high %v2508_v24, %v2536_v45  ;;  %s5676_s20 = scalar_lea.vmem %s5727_s2, %s3974_s13 }
 0x10c   : > { %v993_v7 = vpop.f32.mrf.mxu0  ;;  %3033 = vmatmul.mubr.bf16.vlgmr.msra.gmra.mxu0 %v3883_v47  ;;  %v3898_v47 = vcombine.high %v2522_v41, %v2550_v48 }
 0x10d   : > { %v1066_v56 = vpop.f32.mrf.mxu1  ;;  %3106 = vmatmul.mubr.bf16.vlgmr.msra.gmra.mxu1 %v3885_v49  ;;  %3042 = vmatprep.mubr.bf16.mxu0 %v3888_v50  ;;  %v3895_v49 = vcombine.low %v2508_v24, %v2536_v45  ;;  %v3897_v50 = vcombine.low %v2522_v41, %v2550_v48 }
 0x10e   : > { %v5538_v15 = vadd.f32 %v1066_v56, %v993_v7  ;;  %3115 = vmatprep.mubr.bf16.mxu1 %v3890_v55  ;;  %v995_v26 = vpop.f32.mrf.mxu0 }
 0x10f   : > { %v1068_v27 = vpop.f32.mrf.mxu1 }
 0x110   : > { %v5544_v34 = vadd.f32 %v1068_v27, %v995_v26  ;;  %v997_v35 = vpop.f32.mrf.mxu0 }
 0x111   : > { %v1070_v46 = vpop.f32.mrf.mxu1 }
 0x112   : > { %v5550_v21 = vadd.f32 %v1070_v46, %v997_v35  ;;  %v999_v59 = vpop.f32.mrf.mxu0 }
 0x113   : > { %v1072_v2 = vpop.f32.mrf.mxu1 }
 0x114   : > { %v5552_v31 = vadd.f32 %v1072_v2, %v999_v59  ;;  %3043 = vmatmul.mubr.bf16.gmra.mxu0 %v3887_v13 }
 0x115   : > { %3116 = vmatmul.mubr.bf16.gmra.mxu1 %v3889_v40  ;;  %3052 = vmatprep.mubr.bf16.mxu0 %v3892_v38 }
 0x116   : > { %3125 = vmatprep.mubr.bf16.mxu1 %v3894_v39 }
 0x11b   : > { %v1003_v54 = vpop.f32.mrf.mxu0 }
 0x11c   : > { %3053 = vmatmul.mubr.bf16.gmra.mxu0 %v3891_v42 }
 0x11d   : > { %3126 = vmatmul.mubr.bf16.gmra.mxu1 %v3893_v43  ;;  %3062 = vmatprep.mubr.bf16.mxu0 %v3896_v44  ;;  %v1005_v55 = vpop.f32.mrf.mxu0  ;;  %v1076_v5 = vpop.f32.mrf.mxu1 }
 0x11e   : > { %3135 = vmatprep.mubr.bf16.mxu1 %v3898_v47  ;;  %v1077_v61 = vadd.f32 %v1076_v5, %v1003_v54 }
 0x11f   : > { %v1007_v58 = vpop.f32.mrf.mxu0  ;;  %v1078_v62 = vpop.f32.mrf.mxu1 }
 0x120   : > { %v5562_v19 = vadd.f32 %v1078_v62, %v1005_v55 }
 0x121   : > { %v1080_v9 = vpop.f32.mrf.mxu1  ;;  %v1009_v22 = vpop.f32.mrf.mxu0 }
 0x122   : > { %v1081_v10 = vadd.f32 %v1080_v9, %v1007_v58 }
 0x123   : > { %v1082_v36 = vpop.f32.mrf.mxu1 }
 0x124   : > { %3063 = vmatmul.mubr.bf16.gmra.mxu0 %v3895_v49  ;;  %v5564_v37 = vadd.f32 %v1082_v36, %v1009_v22 }
 0x125   : > { %3136 = vmatmul.mubr.bf16.gmra.mxu1 %v3897_v50 }
 0x12b   : > { %v1013_v23 = vpop.f32.mrf.mxu0 }
 0x12d   : > { %v1015_v11 = vpop.f32.mrf.mxu0  ;;  %v1086_v17 = vpop.f32.mrf.mxu1 }
 0x12e   : > { %v1087_v53 = vadd.f32 %v1086_v17, %v1013_v23 }
 0x12f   : > { %v1017_v25 = vpop.f32.mrf.mxu0  ;;  %v1088_v3 = vpop.f32.mrf.mxu1 }
 0x130   : > { %v5566_v6 = vadd.f32 %v1088_v3, %v1015_v11 }
 0x131   : > { %v1090_v7 = vpop.f32.mrf.mxu1  ;;  %v1019_v56 = vpop.f32.mrf.mxu0 }
 0x132   : > { %v1091_v57 = vadd.f32 %v1090_v7, %v1017_v25 }
 0x133   : > { %v1092_v18 = vpop.f32.mrf.mxu1 }
 0x134   : > { %v5568_v14 = vadd.f32 %v1092_v18, %v1019_v56  ;;  %v1023_v1 = vpop.f32.mrf.mxu0 }
 0x136   : > { %v1025_v4 = vpop.f32.mrf.mxu0 }
 0x138   : > { %v1096_v8 = vpop.f32.mrf.mxu1  ;;  %v1027_v20 = vpop.f32.mrf.mxu0 }
 0x139   : > { %v1097_v26 = vadd.f32 %v1096_v8, %v1023_v1 }
 0x13a   : > { %v1098_v27 = vpop.f32.mrf.mxu1  ;;  %v1029_v29 = vpop.f32.mrf.mxu0 }
 0x13b   : > { %v5570_v32 = vadd.f32 %v1098_v27, %v1025_v4 }
 0x13c   : > { %v1100_v28 = vpop.f32.mrf.mxu1 }
 0x13d   : > { %v1101_v33 = vadd.f32 %v1100_v28, %v1027_v20 }
 0x13e   : > { %v1102_v12 = vpop.f32.mrf.mxu1 }
 0x13f   : > { %v5572_v35 = vadd.f32 %v1102_v12, %v1029_v29 }
 0x14c   : > { %v1539_v46 = vpop.f32.mrf.mxu0 }
 0x14d   : > { %v1612_v13 = vpop.f32.mrf.mxu1  ;;  %v1540_v40 = vadd.f32 %v1539_v46, %v5538_v15 }
 0x14e   : > { %v5575_v63 = vpop.f32.mrf.mxu0 }
 0x14f   : > { %v5577_v0 = vpop.f32.mrf.mxu1  ;;  %v5579_v38 = vadd.f32 %v1612_v13, %v1540_v40 }
 0x150   : > { %v1543_v39 = vpop.f32.mrf.mxu0 }
 0x151   : > { %v1616_v51 = vpop.f32.mrf.mxu1  ;;  %v1544_v59 = vadd.f32 %v1543_v39, %v5550_v21 }
 0x152   : > { %v5582_v2 = vpop.f32.mrf.mxu0 }
 0x153   : > { %v5584_v16 = vpop.f32.mrf.mxu1  ;;  %v5586_v60 = vadd.f32 %v1616_v51, %v1544_v59 }
 0x154   : > { %v1549_v30 = vpop.f32.mrf.mxu0 }
 0x155   : > { %v1622_v52 = vpop.f32.mrf.mxu1  ;;  %v1550_v24 = vadd.f32 %v1549_v30, %v1077_v61 }
 0x156   : > { %v5588_v15 = vpop.f32.mrf.mxu0 }
 0x157   : > { %v5590_v45 = vpop.f32.mrf.mxu1  ;;  %v5592_v41 = vadd.f32 %v1622_v52, %v1550_v24 }
 0x158   : > { %v1553_v48 = vpop.f32.mrf.mxu0 }
 0x159   : > { %v1626_v42 = vpop.f32.mrf.mxu1  ;;  %v1554_v43 = vadd.f32 %v1553_v48, %v1081_v10 }
 0x15a   : > { %v5594_v44 = vpop.f32.mrf.mxu0 }
 0x15b   : > { %v5596_v21 = vpop.f32.mrf.mxu1  ;;  %v5598_v47 = vadd.f32 %v1626_v42, %v1554_v43 }
 0x15c   : > { %v1559_v49 = vpop.f32.mrf.mxu0 }
 0x15d   : > { %v1632_v50 = vpop.f32.mrf.mxu1  ;;  %v1560_v54 = vadd.f32 %v1559_v49, %v1087_v53 }
 0x15e   : > { %v5600_v55 = vpop.f32.mrf.mxu0 }
 0x15f   : > { %v5602_v5 = vpop.f32.mrf.mxu1  ;;  %v5604_v58 = vadd.f32 %v1632_v50, %v1560_v54 }
 0x160   : > { %v1563_v61 = vpop.f32.mrf.mxu0 }
 0x161   : > { %v1636_v62 = vpop.f32.mrf.mxu1  ;;  %v1564_v9 = vadd.f32 %v1563_v61, %v1091_v57 }
 0x162   : > { %v5606_v22 = vpop.f32.mrf.mxu0 }
 0x163   : > { %v5608_v10 = vpop.f32.mrf.mxu1  ;;  %v5610_v36 = vadd.f32 %v1636_v62, %v1564_v9 }
 0x164   : > { %v1569_v23 = vpop.f32.mrf.mxu0 }
 0x165   : > { %v1642_v11 = vpop.f32.mrf.mxu1  ;;  %v1570_v17 = vadd.f32 %v1569_v23, %v1097_v26 }
 0x166   : > { %v5612_v25 = vpop.f32.mrf.mxu0 }
 0x167   : > { %v5614_v53 = vpop.f32.mrf.mxu1  ;;  %v5616_v3 = vadd.f32 %v1642_v11, %v1570_v17 }
 0x168   : > { %5731 = vst [vmem:[#allocation2_spill] sm:$0xff] %v5614_v53  ;;  %v1573_v7 = vpop.f32.mrf.mxu0 }
 0x169   : > { %5732 = vst [vmem:[#allocation3_spill] sm:$0xff] %v5616_v3  ;;  %v1646_v56 = vpop.f32.mrf.mxu1  ;;  %v1574_v18 = vadd.f32 %v1573_v7, %v1101_v33 }
 0x16a   : > { %v5620_v57 = vpop.f32.mrf.mxu0 }
 0x16b   : > { %v5618_v1 = vadd.f32 %v1646_v56, %v1574_v18  ;;  %v5622_v4 = vpop.f32.mrf.mxu1  ;;  %v1542_v56 = vadd.f32 %v5575_v63, %v5544_v34  ;;  %v1556_v34 = vadd.f32 %v5594_v44, %v5564_v37 }
 0x16c   : > { %5734 = vst [vmem:[#allocation5_spill] sm:$0xff] %v5622_v4 }
 0x16d   : > { %5733 = vst [vmem:[#allocation4_spill] sm:$0xff] %v5618_v1  ;;  %v1629_v37 = vadd.f32 %v5596_v21, %v1556_v34 }
 0x18c   : > { %v2167_v8 = vpop.f32.mrf.mxu0 }
 0x18d   : > { %v2240_v20 = vpop.f32.mrf.mxu1 }
 0x18e   : > { %v2169_v27 = vpop.f32.mrf.mxu0  ;;  %v2241_v18 = vadd.f32 %v2240_v20, %v2167_v8 }
 0x18f   : > { %v2242_v28 = vpop.f32.mrf.mxu1 }
 0x190   : > { %v2171_v26 = vpop.f32.mrf.mxu0  ;;  %v2243_v3 = vadd.f32 %v2242_v28, %v2169_v27  ;;  %v2279_v63 = vadd.f32 %v2241_v18, %v5579_v38  ;;  %v1562_v38 = vadd.f32 %v5600_v55, %v5566_v6 }
 0x191   : > { %v2244_v29 = vpop.f32.mrf.mxu1 }
 0x192   : > { %v2173_v12 = vpop.f32.mrf.mxu0 }
 0x193   : > { %v2246_v46 = vpop.f32.mrf.mxu1 }
 0x194   : > { %v2177_v13 = vpop.f32.mrf.mxu0  ;;  %v2247_v28 = vadd.f32 %v2246_v46, %v2173_v12 }
 0x195   : > { %v2250_v40 = vpop.f32.mrf.mxu1 }
 0x196   : > { %v2179_v39 = vpop.f32.mrf.mxu0  ;;  %v2251_v44 = vadd.f32 %v2250_v40, %v2177_v13 }
 0x197   : > { %v2252_v51 = vpop.f32.mrf.mxu1 }
 0x198   : > { %v2181_v59 = vpop.f32.mrf.mxu0 }
 0x199   : > { %v2254_v33 = vpop.f32.mrf.mxu1 }
 0x19a   : > { %v2183_v30 = vpop.f32.mrf.mxu0 }
 0x19b   : > { %v2256_v52 = vpop.f32.mrf.mxu1 }
 0x19c   : > { %v5624_v24 = vpop.f32.mrf.mxu0  ;;  %v2257_v12 = vadd.f32 %v2256_v52, %v2183_v30 }
 0x19d   : > { %v5626_v48 = vpop.f32.mrf.mxu1 }
 0x19e   : > { %v5628_v42 = vpop.f32.mrf.mxu0 }
 0x19f   : > { %v5630_v43 = vpop.f32.mrf.mxu1 }
 0x1a0   : > { %v5632_v49 = vpop.f32.mrf.mxu0 }
 0x1a1   : > { %v5634_v50 = vpop.f32.mrf.mxu1 }
 0x1a2   : > { %v5636_v54 = vpop.f32.mrf.mxu0 }
 0x1a3   : > { %v5638_v61 = vpop.f32.mrf.mxu1 }
 0x1a4   : > { %v5640_v62 = vpop.f32.mrf.mxu0 }
 0x1a5   : > { %5735 = vst [vmem:[#allocation6_spill] sm:$0xff] %v5640_v62  ;;  %v5642_v9 = vpop.f32.mrf.mxu1  ;;  %v1552_v62 = vadd.f32 %v5588_v15, %v5562_v19 }
 0x1a6   : > { %5736 = vst [vmem:[#allocation7_spill] sm:$0xff] %v5642_v9  ;;  %v5644_v23 = vpop.f32.mrf.mxu0  ;;  %v2245_v9 = vadd.f32 %v2244_v29, %v2171_v26  ;;  %v2253_v29 = vadd.f32 %v2252_v51, %v2179_v39 }
 0x1a7   : > { %5737 = vst [vmem:[#allocation8_spill] sm:$0xff] %v5644_v23  ;;  %v5646_v11 = vpop.f32.mrf.mxu1  ;;  %v1625_v15 = vadd.f32 %v5590_v45, %v1552_v62  ;;  %v2255_v45 = vadd.f32 %v2254_v33, %v2181_v59 }
 0x1a8   : > { %5738 = vst [vmem:[#allocation9_spill] sm:$0xff] %v5646_v11  ;;  %v5649_v17 = vpop.f32.mrf.mxu0  ;;  %v1615_v11 = vadd.f32 %v5577_v0, %v1542_v56 }
 0x1a9   : > { %5739 = vst [vmem:[#allocation10_spill] sm:$0xff] %v5649_v17  ;;  %v5651_v7 = vpop.f32.mrf.mxu1  ;;  %v1546_v17 = vadd.f32 %v5582_v2, %v5552_v31  ;;  %v2281_v2 = vadd.f32 %v2245_v9, %v5586_v60  ;;  %v1635_v9 = vadd.f32 %v5602_v5, %v1562_v38  ;;  %v2285_v18 = vadd.f32 %v2255_v45, %v5598_v47 }
 0x1aa   : > { %5740 = vst [vmem:[#allocation11_spill] sm:$0xff] %v5651_v7  ;;  %v5655_v1 = vpop.f32.mrf.mxu0  ;;  %v2280_v27 = vadd.f32 %v2243_v3, %v1615_v11  ;;  %v2283_v11 = vadd.f32 %v2251_v44, %v5592_v41  ;;  %v2265_v47 = vadd.f32 %v5634_v50, %v5632_v49  ;;  %v1572_v49 = vadd.f32 %v5612_v25, %v5570_v32 }
 0x1ab   : > { %5741 = vst [vmem:[#allocation12_spill] sm:$0xff] %v5655_v1  ;;  %v5657_v4 = vpop.f32.mrf.mxu1  ;;  %v1619_v31 = vadd.f32 %v5584_v16, %v1546_v17 }
 0x1ac   : > { %5742 = vst [vmem:[#allocation13_spill] sm:$0xff] %v5657_v4  ;;  %v2289_v32 = vadd.f32 %v2265_v47, %v5610_v36 }
 0x1ad   : > { %v2282_v26 = vadd.f32 %v2247_v28, %v1619_v31 }
 0x1b2   : > { %v5751_v47 = vld [vmem:[#allocation12_spill] sm:$0xff] }
 0x1cc   : > { %v3034_v53 = vpop.f32.mrf.mxu0 }
 0x1cd   : > { %v3107_v23 = vpop.f32.mrf.mxu1 }
 0x1ce   : > { %v3108_v7 = vadd.f32 %v3107_v23, %v3034_v53  ;;  %v3036_v8 = vpop.f32.mrf.mxu0  ;;  %v1566_v23 = vadd.f32 %v5606_v22, %v5568_v14  ;;  %v2261_v14 = vadd.f32 %v5626_v48, %v5624_v24 }
 0x1cf   : > { %v3109_v20 = vpop.f32.mrf.mxu1 }
 0x1d0   : > { %v3110_v4 = vadd.f32 %v3109_v20, %v3036_v8  ;;  %v3146_v0 = vadd.f32 %v3108_v7, %v2279_v63  ;;  %v3038_v56 = vpop.f32.mrf.mxu0  ;;  %v2284_v7 = vadd.f32 %v2253_v29, %v1625_v15  ;;  %v2286_v20 = vadd.f32 %v2257_v12, %v1629_v37 }
 0x1d1   : > { %v3111_v1 = vpop.f32.mrf.mxu1  ;;  %v2287_v50 = vadd.f32 %v2261_v14, %v5604_v58 }
 0x1d2   : > { %v3147_v53 = vadd.f32 %v3110_v4, %v2280_v27  ;;  %v3112_v19 = vadd.f32 %v3111_v1, %v3038_v56  ;;  %v3040_v3 = vpop.f32.mrf.mxu0  ;;  %v3244_v21 = vmul.f32 %v3146_v0, %v3146_v0  ;;  %v2263_v27 = vadd.f32 %v5630_v43, %v5628_v42 }
 0x1d3   : > { %v3113_v16 = vpop.f32.mrf.mxu1 }
 0x1d4   : > { %v3976_v60 = vpack.c.bf16 %v3147_v53, %v3146_v0  ;;  %v3148_v4 = vadd.f32 %v3112_v19, %v2281_v2  ;;  %v3114_v1 = vadd.f32 %v3113_v16, %v3040_v3  ;;  %v3044_v46 = vpop.f32.mrf.mxu0  ;;  %v3245_v17 = vmul.f32 %v3147_v53, %v3147_v53 }
 0x1d5   : > { %v3117_v62 = vpop.f32.mrf.mxu1 }
 0x1d6   : > { %3210 = vst [vmem:[%s5676_s20] sm:$0xff] %v3976_v60  ;;  %v3218_v6 = vadd.f32 %v3148_v4, %v3146_v0  ;;  %v3246_v55 = vmul.f32 %v3148_v4, %v3148_v4  ;;  %v3149_v13 = vadd.f32 %v3114_v1, %v2282_v26  ;;  %v3118_v40 = vadd.f32 %v3117_v62, %v3044_v46  ;;  %v3046_v39 = vpop.f32.mrf.mxu0 }
 0x1d7   : > { %v3119_v51 = vpop.f32.mrf.mxu1  ;;  %v1639_v60 = vadd.f32 %v5608_v10, %v1566_v23  ;;  %v2288_v46 = vadd.f32 %v2263_v27, %v1635_v9  ;;  %v5744_v23 = vld [vmem:[#allocation7_spill] sm:$0xff] }
 0x1d8   : > { %v3260_v59 = vadd.f32 %v3246_v55, %v3244_v21  ;;  %v3977_v33 = vpack.c.bf16 %v3149_v13, %v3148_v4  ;;  %v3231_v30 = vadd.f32 %v3149_v13, %v3147_v53  ;;  %v3247_v52 = vmul.f32 %v3149_v13, %v3149_v13  ;;  %v3048_v8 = vpop.f32.mrf.mxu0 }
 0x1d9   : > { %v3150_v34 = vadd.f32 %v3118_v40, %v2283_v11  ;;  %v3120_v63 = vadd.f32 %v3119_v51, %v3046_v39  ;;  %v3121_v5 = vpop.f32.mrf.mxu1  ;;  %v2267_v53 = vadd.f32 %v5638_v61, %v5636_v54  ;;  %v1576_v21 = vadd.f32 %v5620_v57, %v5572_v35  ;;  %v5743_v40 = vld [vmem:[#allocation6_spill] sm:$0xff]  ;;  %v5745_v35 = vld [vmem:[#allocation8_spill] sm:$0xff]  ;;  %v5746_v57 = vld [vmem:[#allocation9_spill] sm:$0xff] }
 0x1da   : > { %3211 = vst [vmem:[%s5676_s20 + $0x8] sm:$0xff] %v3977_v33  ;;  %v3273_v41 = vadd.f32 %v3247_v52, %v3245_v17  ;;  %v3122_v22 = vadd.f32 %v3121_v5, %v3048_v8  ;;  %v3050_v31 = vpop.f32.mrf.mxu0  ;;  %v2271_v11 = vadd.f32 %v5744_v23, %v5743_v40  ;;  %v2273_v9 = vadd.f32 %v5746_v57, %v5745_v35  ;;  %v5748_v52 = vld [vmem:[#allocation11_spill] sm:$0xff] }
 0x1db   : > { %v3219_v28 = vadd.f32 %v3218_v6, %v3150_v34  ;;  %v3248_v0 = vmul.f32 %v3150_v34, %v3150_v34  ;;  %v3151_v56 = vadd.f32 %v3120_v63, %v2284_v7  ;;  %v3123_v2 = vpop.f32.mrf.mxu1  ;;  %v2290_v58 = vadd.f32 %v2267_v53, %v1639_v60  ;;  %v5752_v53 = vld [vmem:[#allocation13_spill] sm:$0xff] }
 0x1dc   : > { %v3152_v19 = vadd.f32 %v3122_v22, %v2285_v18  ;;  %v3124_v24 = vadd.f32 %v3123_v2, %v3050_v31  ;;  %v3054_v44 = vpop.f32.mrf.mxu0  ;;  %v5750_v31 = vld [vmem:[#allocation3_spill] sm:$0xff] }
 0x1dd   : > { %v3261_v48 = vadd.f32 %v3260_v59, %v3248_v0  ;;  %v3978_v15 = vpack.c.bf16 %v3151_v56, %v3150_v34  ;;  %v3232_v37 = vadd.f32 %v3231_v30, %v3151_v56  ;;  %v3249_v38 = vmul.f32 %v3151_v56, %v3151_v56  ;;  %v3127_v42 = vpop.f32.mrf.mxu1  ;;  %v5747_v30 = vld [vmem:[#allocation10_spill] sm:$0xff] }
 0x1de   : > { %v3220_v43 = vadd.f32 %v3219_v28, %v3152_v19  ;;  %v3250_v3 = vmul.f32 %v3152_v19, %v3152_v19  ;;  %v3153_v16 = vadd.f32 %v3124_v24, %v2286_v20  ;;  %v3128_v26 = vadd.f32 %v3127_v42, %v3054_v44  ;;  %v3056_v61 = vpop.f32.mrf.mxu0  ;;  %v5749_v0 = vld [vmem:[#allocation2_spill] sm:$0xff] }
 0x1df   : > { %3212 = vst [vmem:[%s5676_s20 + $0x10] sm:$0xff] %v3978_v15  ;;  %v3274_v54 = vadd.f32 %v3273_v41, %v3249_v38  ;;  %v3129_v4 = vpop.f32.mrf.mxu1  ;;  %v2275_v7 = vadd.f32 %v5748_v52, %v5747_v30  ;;  %v1645_v56 = vadd.f32 %v5749_v0, %v1572_v49  ;;  %v2291_v2 = vadd.f32 %v2271_v11, %v5750_v31  ;;  %v5753_v49 = vld [vmem:[#allocation5_spill] sm:$0xff] }
 0x1e0   : > { %v3262_v1 = vadd.f32 %v3261_v48, %v3250_v3  ;;  %v3979_v29 = vpack.c.bf16 %v3153_v16, %v3152_v19  ;;  %v3233_v45 = vadd.f32 %v3232_v37, %v3153_v16  ;;  %v3251_v12 = vmul.f32 %v3153_v16, %v3153_v16  ;;  %v3058_v6 = vpop.f32.mrf.mxu0 }
 0x1e1   : > { %v3154_v62 = vadd.f32 %v3128_v26, %v2287_v50  ;;  %v3130_v10 = vadd.f32 %v3129_v4, %v3056_v61  ;;  %v3131_v55 = vpop.f32.mrf.mxu1  ;;  %v2277_v19 = vadd.f32 %v5752_v53, %v5751_v47  ;;  %v1649_v50 = vadd.f32 %v5753_v49, %v1576_v21 }
 0x1e2   : > { %3213 = vst [vmem:[%s5676_s20 + $0x18] sm:$0xff] %v3979_v29  ;;  %v3275_v25 = vadd.f32 %v3274_v54, %v3251_v12  ;;  %v3132_v13 = vadd.f32 %v3131_v55, %v3058_v6  ;;  %v3060_v59 = vpop.f32.mrf.mxu0  ;;  %v5754_v54 = vld [vmem:[#allocation4_spill] sm:$0xff] }
 0x1e3   : > { %v3221_v17 = vadd.f32 %v3220_v43, %v3154_v62  ;;  %v3252_v39 = vmul.f32 %v3154_v62, %v3154_v62  ;;  %v3155_v51 = vadd.f32 %v3130_v10, %v2288_v46  ;;  %v3133_v33 = vpop.f32.mrf.mxu1  ;;  %v2292_v43 = vadd.f32 %v2273_v9, %v1645_v56 }
 0x1e4   : > { %v3156_v36 = vadd.f32 %v3132_v13, %v2289_v32  ;;  %v3134_v18 = vadd.f32 %v3133_v33, %v3060_v59  ;;  %v3064_v20 = vpop.f32.mrf.mxu0  ;;  %v2293_v61 = vadd.f32 %v2275_v7, %v5754_v54  ;;  %v2294_v10 = vadd.f32 %v2277_v19, %v1649_v50 }
 0x1e5   : > { %v3263_v34 = vadd.f32 %v3262_v1, %v3252_v39  ;;  %v3980_v63 = vpack.c.bf16 %v3155_v51, %v3154_v62  ;;  %v3234_v8 = vadd.f32 %v3233_v45, %v3155_v51  ;;  %v3253_v5 = vmul.f32 %v3155_v51, %v3155_v51  ;;  %v3137_v14 = vpop.f32.mrf.mxu1 }
 0x1e6   : > { %v3222_v41 = vadd.f32 %v3221_v17, %v3156_v36  ;;  %v3254_v22 = vmul.f32 %v3156_v36, %v3156_v36  ;;  %v3157_v27 = vadd.f32 %v3134_v18, %v2290_v58  ;;  %v3138_v28 = vadd.f32 %v3137_v14, %v3064_v20  ;;  %v3066_v48 = vpop.f32.mrf.mxu0 }
 0x1e7   : > { %3214 = vst [vmem:[%s5676_s20 + $0x20] sm:$0xff] %v3980_v63  ;;  %v3276_v24 = vadd.f32 %v3275_v25, %v3253_v5  ;;  %v3139_v15 = vpop.f32.mrf.mxu1 }
 0x1e8   : > { %v3264_v37 = vadd.f32 %v3263_v34, %v3254_v22  ;;  %v3981_v38 = vpack.c.bf16 %v3157_v27, %v3156_v36  ;;  %v3235_v44 = vadd.f32 %v3234_v8, %v3157_v27  ;;  %v3255_v42 = vmul.f32 %v3157_v27, %v3157_v27  ;;  %v3068_v26 = vpop.f32.mrf.mxu0 }
 0x1e9   : > { %v3158_v3 = vadd.f32 %v3138_v28, %v2291_v2  ;;  %v3140_v16 = vadd.f32 %v3139_v15, %v3066_v48  ;;  %v3141_v60 = vpop.f32.mrf.mxu1 }
 0x1ea   : > { %3215 = vst [vmem:[%s5676_s20 + $0x28] sm:$0xff] %v3981_v38  ;;  %v3277_v4 = vadd.f32 %v3276_v24, %v3255_v42  ;;  %v3142_v1 = vadd.f32 %v3141_v60, %v3068_v26  ;;  %v3070_v46 = vpop.f32.mrf.mxu0 }
 0x1eb   : > { %v3223_v29 = vadd.f32 %v3222_v41, %v3158_v3  ;;  %v3256_v45 = vmul.f32 %v3158_v3, %v3158_v3  ;;  %v3159_v12 = vadd.f32 %v3140_v16, %v2292_v43  ;;  %v3143_v62 = vpop.f32.mrf.mxu1 }
 0x1ec   : > { %v3160_v6 = vadd.f32 %v3142_v1, %v2293_v61  ;;  %v3144_v55 = vadd.f32 %v3143_v62, %v3070_v46 }
 0x1ed   : > { %v3265_v32 = vadd.f32 %v3264_v37, %v3256_v45  ;;  %v3982_v58 = vpack.c.bf16 %v3159_v12, %v3158_v3  ;;  %v3236_v25 = vadd.f32 %v3235_v44, %v3159_v12  ;;  %v3257_v13 = vmul.f32 %v3159_v12, %v3159_v12 }
 0x1ee   : > { %v3224_v21 = vadd.f32 %v3223_v29, %v3160_v6  ;;  %v3258_v40 = vmul.f32 %v3160_v6, %v3160_v6  ;;  %v3161_v23 = vadd.f32 %v3144_v55, %v2294_v10 }
 0x1ef   : > { %3216 = vst [vmem:[%s5676_s20 + $0x30] sm:$0xff] %v3982_v58  ;;  %v3278_v11 = vadd.f32 %v3277_v4, %v3257_v13 }
 0x1f0   : > { %v3225_v17 = vrot.slane %v3224_v21, 4  ;;  %v3266_v39 = vadd.f32 %v3265_v32, %v3258_v40  ;;  %v3983_v51 = vpack.c.bf16 %v3161_v23, %v3160_v6  ;;  %v3237_v59 = vadd.f32 %v3236_v25, %v3161_v23 }
 0x1f1   : > { %v3259_v33 = vmul.f32 %v3161_v23, %v3161_v23 }
 0x1f2   : > { %v3226_v35 = vadd.f32 %v3225_v17, %v3224_v21  ;;  %v3267_v57 = vrot.slane %v3266_v39, 4  ;;  %3217 = vst [vmem:[%s5676_s20 + $0x38] sm:$0xff] %v3983_v51  ;;  %v3238_v9 = vrot.slane %v3237_v59, 4 }
 0x1f3   : > { %v3279_v30 = vadd.f32 %v3278_v11, %v3259_v33 }
 0x1f4   : > { %v3227_v52 = vrot.slane %v3226_v35, 2  ;;  %v3268_v7 = vadd.f32 %v3267_v57, %v3266_v39  ;;  %v3239_v36 = vadd.f32 %v3238_v9, %v3237_v59 }
 0x1f5   : > { %v3280_v18 = vrot.slane %v3279_v30, 4 }
 0x1f6   : > { %v3228_v34 = vadd.f32 %v3227_v52, %v3226_v35  ;;  %v3269_v63 = vrot.slane %v3268_v7, 2  ;;  %v3240_v8 = vrot.slane %v3239_v36, 2 }
 0x1f7   : > { %v3281_v5 = vadd.f32 %v3280_v18, %v3279_v30 }
 0x1f8   : > { %v3229_v20 = vrot.slane %v3228_v34, 1  ;;  %v3270_v14 = vadd.f32 %v3269_v63, %v3268_v7  ;;  %v3241_v41 = vadd.f32 %v3240_v8, %v3239_v36 }
 0x1f9   : > { %v3282_v22 = vrot.slane %v3281_v5, 2 }
 0x1fa   : > { %v3271_v27 = vrot.slane %v3270_v14, 1  ;;  %v3242_v28 = vrot.slane %v3241_v41, 1  ;;  %v3230_v56 = vadd.f32 %v3229_v20, %v3228_v34 }
 0x1fb   : > { %v3283_v0 = vadd.f32 %v3282_v22, %v3281_v5 }
 0x1fc   : > { %v3272_v31 = vadd.f32 %v3271_v27, %v3270_v14  ;;  %v3243_v53 = vadd.f32 %v3242_v28, %v3241_v41 }
 0x1fd   : > { %v3284_v2 = vrot.slane %v3283_v0, 1 }
 0x1fe   : > { %v3287_v47 = vsel %vm3286_vm3, %v3230_v56, %v3272_v31 }
 0x1ff   : > { %v3285_v19 = vadd.f32 %v3284_v2, %v3283_v0 }
 0x201   : > { %v3288_v24 = vsel %vm3286_vm3, %v3243_v53, %v3285_v19 }
 0x202   : > { %v3291_v48 = vcombine.low %v3287_v47, %v3288_v24 }
 0x204   : > { %3971 = vst.sshfl [vmem:[%s186_s24] sm:$0x33 pattern:$0x76325410] %v3291_v48 }
 0x205 PF: > { %s14_s12 = sadd.s32 1, %s4387_s12  }
 0x206   : > { %p11_p5 = scmp.ge.s32.totalorder %s14_s12, 4  }
 0x208   :  { %13 = sbr.rel (!%p11_p5) target bundleno = 1 (0x1), region = 74 }

// kernel: discriminator_forward.14
= control target key start
LH: loop header
LB: loop body
LE: loop exit
PB: predicated region body
PF: predicated region fallthrough
CT: control target
= control target key end

     0   :  { %s420_s12 = smov 0   ;;  %s450_s0 = inlined_call_operand.vmem [shape: bf16[32,512], index: 0, kind: input, shape index: {}]   ;;  %s451_s1 = inlined_call_operand.vmem [shape: f32[1,512], index: 1, kind: input, shape index: {}]   ;;  %s452_s2 = inlined_call_operand.vmem [shape: f32[1,512], index: 2, kind: input, shape index: {}]   ;;  %s453_s3 = inlined_call_operand.vmem [shape: bf16[32,512], index: 3, kind: output, shape index: {}]  }
   0x1 LB: > { %s361_s13 = sadd.s32 4294967295, %s398_s12   ;;  %p365_p0 = scmp.ge.s32.totalorder %s398_s12, 1  ;;  %s398_s12 = sphi %s420_s12, %s13_s12  }
   0x2   : > { %p139_p1 = scmp.lt.s32.totalorder %s398_s12, 3 }
   0x4   : > { %p140_p2 = pnand %p365_p0, %p139_p1 }
   0x5   : > { %s366_s14 = sshll.u32 (!%p140_p2), %s361_s13, 1 }
   0x6   : > { %143 = sbr.rel (%p140_p2) target bundleno = 35 (0x23), region = 32  ;;  %p166_p3 = scmp.lt.s32.totalorder (!%p140_p2), %s366_s14, 3 }
   0xb   : > { %v193_v0 = vlaneseq  ;;  %s455_s14 = smov (!%p166_p3, %s366_s14), 3  ;;  %v191_v2 = vld [vmem:[%s451_s1] sm:$0xf] }
   0xc   : > { %v221_v3 = vld [vmem:[%s452_s2] sm:$0xf]  ;;  %s378_s19 = sshll.u32 %s455_s14, 4 }
   0xd   : > { %v194_v1 = vshrl.u32 %v193_v0, 7  ;;  %s170_s22 = scalar_lea.vmem %s450_s0, %s378_s19  ;;  %s177_s25 = scalar_lea.vmem %s453_s3, %s378_s19 }
   0xe   : > { %v179_v12 = vld [vmem:[%s170_s22] sm:$0xff]  ;;  %v180_v13 = vld [vmem:[%s170_s22 + $0x8] sm:$0xff]  ;;  %v181_v14 = vld [vmem:[%s170_s22 + $0x10] sm:$0xff] }
   0xf   : > { %v195_v4 = vsub.s32 0, %v194_v1  ;;  %v199_v5 = vsub.s32 1, %v194_v1  ;;  %v203_v6 = vsub.s32 2, %v194_v1  ;;  %v207_v7 = vsub.s32 3, %v194_v1  ;;  %v182_v19 = vld [vmem:[%s170_s22 + $0x18] sm:$0xff] }
  0x10   : > { %v183_v20 = vunpack.c.l.bf16 %v179_v12  ;;  %v184_v21 = vunpack.c.h.bf16 %v179_v12  ;;  %v185_v22 = vunpack.c.l.bf16 %v180_v13  ;;  %v186_v23 = vunpack.c.h.bf16 %v180_v13 }
  0x11   : > { %v196_v8 = vrot.slane %v191_v2, %v195_v4  ;;  %v200_v9 = vrot.slane %v191_v2, %v199_v5  ;;  %v226_v10 = vrot.slane %v221_v3, %v195_v4  ;;  %v230_v11 = vrot.slane %v221_v3, %v199_v5 }
  0x12   : > { %v204_v15 = vrot.slane %v191_v2, %v203_v6  ;;  %v208_v16 = vrot.slane %v191_v2, %v207_v7  ;;  %v234_v17 = vrot.slane %v221_v3, %v203_v6  ;;  %v238_v18 = vrot.slane %v221_v3, %v207_v7 }
  0x13   : > { %v187_v24 = vunpack.c.l.bf16 %v181_v14  ;;  %v188_v25 = vunpack.c.h.bf16 %v181_v14  ;;  %v189_v26 = vunpack.c.l.bf16 %v182_v19  ;;  %v190_v27 = vunpack.c.h.bf16 %v182_v19 }
  0x14   : > { %v213_v28 = vmul.f32 %v196_v8, %v183_v20  ;;  %v214_v29 = vmul.f32 %v200_v9, %v184_v21  ;;  %v215_v30 = vmul.f32 %v204_v15, %v185_v22  ;;  %v216_v31 = vmul.f32 %v208_v16, %v186_v23 }
  0x15   : > { %v217_v32 = vmul.f32 %v196_v8, %v187_v24  ;;  %v218_v33 = vmul.f32 %v200_v9, %v188_v25  ;;  %v219_v34 = vmul.f32 %v204_v15, %v189_v26  ;;  %v220_v35 = vmul.f32 %v208_v16, %v190_v27 }
  0x16   : > { %v243_v36 = vadd.f32 %v226_v10, %v213_v28  ;;  %v244_v37 = vadd.f32 %v230_v11, %v214_v29  ;;  %v245_v38 = vadd.f32 %v234_v17, %v215_v30  ;;  %v246_v39 = vadd.f32 %v238_v18, %v216_v31 }
  0x17   : > { %v247_v40 = vadd.f32 %v226_v10, %v217_v32  ;;  %v248_v41 = vadd.f32 %v230_v11, %v218_v33  ;;  %v249_v42 = vadd.f32 %v234_v17, %v219_v34  ;;  %v250_v43 = vadd.f32 %v238_v18, %v220_v35 }
  0x18   : > { %vm251_vm0 = vcmp.ge.f32.partialorder %v243_v36, 0.0  ;;  %vm252_vm1 = vcmp.ge.f32.partialorder %v244_v37, 0.0  ;;  %v259_v44 = vmul.f32 0.2, %v243_v36  ;;  %v260_v45 = vmul.f32 0.2, %v244_v37 }
  0x19   : > { %vm253_vm2 = vcmp.ge.f32.partialorder %v245_v38, 0.0  ;;  %vm254_vm3 = vcmp.ge.f32.partialorder %v246_v39, 0.0  ;;  %v261_v46 = vmul.f32 0.2, %v245_v38  ;;  %v262_v47 = vmul.f32 0.2, %v246_v39 }
  0x1a   : > { %v267_v48 = vsel %vm251_vm0, %v243_v36, %v259_v44  ;;  %v268_v49 = vsel %vm252_vm1, %v244_v37, %v260_v45  ;;  %vm255_vm4 = vcmp.ge.f32.partialorder %v247_v40, 0.0  ;;  %vm256_vm5 = vcmp.ge.f32.partialorder %v248_v41, 0.0 }
  0x1b   : > { %v380_v50 = vpack.c.bf16 %v268_v49, %v267_v48  ;;  %v269_v51 = vsel %vm253_vm2, %v245_v38, %v261_v46  ;;  %v270_v52 = vsel %vm254_vm3, %v246_v39, %v262_v47  ;;  %v263_v53 = vmul.f32 0.2, %v247_v40 }
  0x1c   : > { %v381_v54 = vpack.c.bf16 %v270_v52, %v269_v51  ;;  %v264_v55 = vmul.f32 0.2, %v248_v41  ;;  %vm257_vm6 = vcmp.ge.f32.partialorder %v249_v42, 0.0  ;;  %vm258_vm7 = vcmp.ge.f32.partialorder %v250_v43, 0.0 }
  0x1d   : > { %299 = vst [vmem:[%s177_s25] sm:$0xff] %v380_v50  ;;  %v271_v56 = vsel %vm255_vm4, %v247_v40, %v263_v53  ;;  %v265_v57 = vmul.f32 0.2, %v249_v42  ;;  %v266_v58 = vmul.f32 0.2, %v250_v43 }
  0x1e   : > { %300 = vst [vmem:[%s177_s25 + $0x8] sm:$0xff] %v381_v54  ;;  %v272_v59 = vsel %vm256_vm5, %v248_v41, %v264_v55 }
  0x1f   : > { %v382_v60 = vpack.c.bf16 %v272_v59, %v271_v56  ;;  %v273_v61 = vsel %vm257_vm6, %v249_v42, %v265_v57  ;;  %v274_v62 = vsel %vm258_vm7, %v250_v43, %v266_v58 }
  0x20   : > { %v383_v63 = vpack.c.bf16 %v274_v62, %v273_v61 }
  0x21   : > { %301 = vst [vmem:[%s177_s25 + $0x10] sm:$0xff] %v382_v60 }
  0x22   : > { %302 = vst [vmem:[%s177_s25 + $0x18] sm:$0xff] %v383_v63 }
  0x23 PF: > { %s13_s12 = sadd.s32 1, %s398_s12  }
  0x24   : > { %p10_p4 = scmp.ge.s32.totalorder %s13_s12, 4  }
  0x26   :  { %12 = sbr.rel (!%p10_p4) target bundleno = 1 (0x1), region = 62 }

// kernel: discriminator_forward.15
= control target key start
LH: loop header
LB: loop body
LE: loop exit
PB: predicated region body
PF: predicated region fallthrough
CT: control target
= control target key end

     0   :  { %v147_v0 = vlaneseq  ;;  %vm858_vm0 = vcmask 7168   ;;  %s1563_s1 = inlined_call_operand.vmem [shape: bf16[1,8192], index: 1, kind: input, shape index: {}]   ;;  %s1564_s0 = inlined_call_operand.vmem [shape: bf16[8,8192], index: 0, kind: input, shape index: {}]   ;;  %s1565_s2 = inlined_call_operand.vmem [shape: f32[8,1], index: 2, kind: output, shape index: {}]  }
   0x1   :  { %v112_v1 = vld [vmem:[%s1563_s1 + $0x28] sm:$0xff]  ;;  %v113_v2 = vld [vmem:[%s1563_s1 + $0x30] sm:$0xff]  ;;  %v114_v4 = vld [vmem:[%s1563_s1 + $0x38] sm:$0xff] }
   0x2   :  { %v148_v3 = vshrl.u32 %v147_v0, 7  ;;  %v893_v5 = vunpack.c.l.bf16 %v112_v1  ;;  %v895_v6 = vunpack.c.h.bf16 %v112_v1  ;;  %v897_v7 = vunpack.c.l.bf16 %v113_v2  ;;  %v948_v31 = vld [vmem:[%s1564_s0] sm:$0xff]  ;;  %v953_v32 = vld [vmem:[%s1564_s0 + $0x8] sm:$0xff]  ;;  %v966_v37 = vld [vmem:[%s1564_s0 + $0x10] sm:$0xff] }
   0x3   :  { %v907_v12 = vunpack.c.h.bf16 %v113_v2  ;;  %v909_v13 = vunpack.c.l.bf16 %v114_v4  ;;  %v911_v14 = vunpack.c.h.bf16 %v114_v4  ;;  %1583 = vst [vmem:[#allocation6_spill] sm:$0xff] %v966_v37  ;;  %v971_v38 = vld [vmem:[%s1564_s0 + $0x88] sm:$0xff]  ;;  %v111_v39 = vld [vmem:[%s1563_s1 + $0x20] sm:$0xff]  ;;  %v987_v44 = vld [vmem:[%s1564_s0 + $0x90] sm:$0xff] }
   0x4   :  { %v899_v8 = vsub.s32 0, %v148_v3  ;;  %v901_v9 = vsub.s32 2, %v148_v3  ;;  %v903_v10 = vsub.s32 4, %v148_v3  ;;  %v905_v11 = vsub.s32 6, %v148_v3  ;;  %v992_v45 = vld [vmem:[%s1564_s0 + $0x98] sm:$0xff]  ;;  %v107_v53 = vld [vmem:[%s1563_s1] sm:$0xff] }
   0x5   :  { %v1004_v54 = vunpack.c.l.bf16 %v111_v39  ;;  %v1009_v55 = vld [vmem:[%s1564_s0 + $0xa0] sm:$0xff]  ;;  %v1014_v56 = vld [vmem:[%s1564_s0 + $0xa8] sm:$0xff]  ;;  %v1019_v60 = vunpack.c.h.bf16 %v111_v39  ;;  %v1024_v61 = vld [vmem:[%s1564_s0 + $0xb0] sm:$0xff]  ;;  %v1038_v3 = vunpack.c.l.bf16 %v107_v53  ;;  %v1054_v47 = vunpack.c.h.bf16 %v107_v53 }
   0x6   :  { %1579 = vst [vmem:[#allocation2_spill] sm:$0xff] %v899_v8  ;;  %1580 = vst [vmem:[#allocation3_spill] sm:$0xff] %v901_v9  ;;  %v310_v15 = vrot.slane %v893_v5, %v899_v8  ;;  %v314_v16 = vrot.slane %v893_v5, %v901_v9  ;;  %v318_v17 = vrot.slane %v893_v5, %v903_v10  ;;  %v1029_v62 = vld [vmem:[%s1564_s0 + $0xb8] sm:$0xff]  ;;  %v41_v49 = vld [vmem:[%s1564_s0 + $0xf0] sm:$0xff] }
   0x7   :  { %1581 = vst [vmem:[#allocation4_spill] sm:$0xff] %v903_v10  ;;  %1582 = vst [vmem:[#allocation5_spill] sm:$0xff] %v905_v11  ;;  %v322_v18 = vrot.slane %v893_v5, %v905_v11  ;;  %v326_v19 = vrot.slane %v895_v6, %v899_v8  ;;  %v330_v20 = vrot.slane %v895_v6, %v901_v9 }
   0x8   :  { %v334_v21 = vrot.slane %v895_v6, %v903_v10  ;;  %v338_v22 = vrot.slane %v895_v6, %v905_v11  ;;  %v342_v23 = vrot.slane %v897_v7, %v899_v8  ;;  %v346_v24 = vrot.slane %v897_v7, %v901_v9  ;;  %1584 = vst [vmem:[#allocation7_spill] sm:$0xff] %v1004_v54 }
   0x9   :  { %v350_v25 = vrot.slane %v897_v7, %v903_v10  ;;  %v354_v26 = vrot.slane %v897_v7, %v905_v11  ;;  %v358_v27 = vrot.slane %v907_v12, %v899_v8  ;;  %v362_v28 = vrot.slane %v907_v12, %v901_v9 }
   0xa   :  { %v366_v29 = vrot.slane %v907_v12, %v903_v10  ;;  %v370_v30 = vrot.slane %v907_v12, %v905_v11  ;;  %v374_v33 = vrot.slane %v909_v13, %v899_v8  ;;  %v378_v34 = vrot.slane %v909_v13, %v901_v9 }
   0xb   :  { %v382_v35 = vrot.slane %v909_v13, %v903_v10  ;;  %v386_v36 = vrot.slane %v909_v13, %v905_v11  ;;  %v390_v40 = vrot.slane %v911_v14, %v899_v8  ;;  %v394_v41 = vrot.slane %v911_v14, %v901_v9 }
   0xc   :  { %v398_v42 = vrot.slane %v911_v14, %v903_v10  ;;  %v402_v43 = vrot.slane %v911_v14, %v905_v11  ;;  %v282_v0 = vrot.slane %v1004_v54, %v901_v9  ;;  %v286_v1 = vrot.slane %v1004_v54, %v903_v10  ;;  %v40_v14 = vld [vmem:[%s1564_s0 + $0xe8] sm:$0xff] }
   0xd   :  { %v290_v2 = vrot.slane %v1004_v54, %v905_v11  ;;  %v298_v4 = vrot.slane %v1019_v60, %v901_v9  ;;  %v302_v39 = vrot.slane %v1019_v60, %v903_v10  ;;  %v306_v51 = vrot.slane %v1019_v60, %v905_v11 }
   0xe   :  { %v1057_v46 = vrot.slane %v282_v0, %v899_v8  ;;  %v1060_v50 = vrot.slane %v286_v1, %v899_v8  ;;  %v150_v58 = vrot.slane %v1038_v3, %v899_v8  ;;  %v1080_v0 = vrot.slane %v310_v15, %v899_v8 }
   0xf   :  { %v1063_v63 = vrot.slane %v290_v2, %v899_v8  ;;  %v1068_v57 = vrot.slane %v298_v4, %v899_v8  ;;  %v1071_v52 = vrot.slane %v302_v39, %v899_v8  ;;  %v1074_v53 = vrot.slane %v306_v51, %v899_v8 }
  0x10   :  { %1585 = vst [vmem:[#allocation8_spill] sm:$0xff] %v1057_v46  ;;  %v1086_v1 = vrot.slane %v314_v16, %v899_v8  ;;  %v1092_v2 = vrot.slane %v318_v17, %v899_v8  ;;  %v1098_v51 = vrot.slane %v322_v18, %v899_v8  ;;  %v1104_v15 = vrot.slane %v326_v19, %v899_v8 }
  0x11   :  { %v1110_v16 = vrot.slane %v330_v20, %v899_v8  ;;  %v1116_v17 = vrot.slane %v334_v21, %v899_v8  ;;  %v1122_v5 = vrot.slane %v338_v22, %v899_v8  ;;  %v1128_v18 = vrot.slane %v342_v23, %v899_v8  ;;  %v1151_v21 = vld [vmem:[%s1564_s0 + $0xc0] sm:$0xff] }
  0x12   :  { %v1134_v19 = vrot.slane %v346_v24, %v899_v8  ;;  %v1140_v20 = vrot.slane %v350_v25, %v899_v8  ;;  %v1146_v6 = vrot.slane %v354_v26, %v899_v8  ;;  %v1157_v22 = vrot.slane %v358_v27, %v899_v8  ;;  %v1180_v25 = vld [vmem:[%s1564_s0 + $0xc8] sm:$0xff] }
  0x13   :  { %v1163_v23 = vrot.slane %v362_v28, %v899_v8  ;;  %v1169_v7 = vrot.slane %v366_v29, %v899_v8  ;;  %v1175_v24 = vrot.slane %v370_v30, %v899_v8  ;;  %v1186_v26 = vrot.slane %v374_v33, %v899_v8  ;;  %v1209_v29 = vld [vmem:[%s1564_s0 + $0xd0] sm:$0xff]  ;;  %v1214_v30 = vld [vmem:[%s1564_s0 + $0xd8] sm:$0xff] }
  0x14   :  { %1586 = vst [vmem:[#allocation9_spill] sm:$0xff] %v1157_v22  ;;  %v1192_v27 = vrot.slane %v378_v34, %v899_v8  ;;  %v1198_v12 = vrot.slane %v382_v35, %v899_v8  ;;  %v1204_v28 = vrot.slane %v386_v36, %v899_v8  ;;  %v1220_v33 = vrot.slane %v390_v40, %v899_v8  ;;  %v1243_v36 = vld [vmem:[%s1564_s0 + $0xe0] sm:$0xff] }
  0x15   :  { %1587 = vst [vmem:[#allocation10_spill] sm:$0xff] %v1163_v23  ;;  %1588 = vst [vmem:[#allocation11_spill] sm:$0xff] %v1169_v7  ;;  %v1226_v13 = vrot.slane %v394_v41, %v899_v8  ;;  %v1232_v34 = vrot.slane %v398_v42, %v899_v8  ;;  %v1238_v35 = vrot.slane %v402_v43, %v899_v8  ;;  %v90_v40 = vunpack.c.h.bf16 %v1029_v62 }
  0x16   :  { %1589 = vst [vmem:[#allocation12_spill] sm:$0xff] %v1175_v24  ;;  %1590 = vst [vmem:[#allocation13_spill] sm:$0xff] %v1186_v26  ;;  %v91_v41 = vunpack.c.l.bf16 %v1151_v21  ;;  %v154_v4 = vrot.slane %v1038_v3, %v901_v9  ;;  %v158_v42 = vrot.slane %v1038_v3, %v903_v10  ;;  %v92_v43 = vunpack.c.h.bf16 %v1151_v21  ;;  %v42_v21 = vld [vmem:[%s1564_s0 + $0xf8] sm:$0xff] }
  0x17   :  { %1591 = vst [vmem:[#allocation14_spill] sm:$0xff] %v1192_v27  ;;  %1592 = vst [vmem:[#allocation15_spill] sm:$0xff] %v1198_v12  ;;  %v93_v39 = vunpack.c.l.bf16 %v1180_v25  ;;  %v94_v48 = vunpack.c.h.bf16 %v1180_v25  ;;  %v294_v59 = vrot.slane %v1019_v60, %v899_v8  ;;  %v95_v46 = vunpack.c.l.bf16 %v1209_v29  ;;  %v1273_v60 = vld [vmem:[%s1563_s1 + $0x8] sm:$0xff] }
  0x18   :  { %1593 = vst [vmem:[#allocation16_spill] sm:$0xff] %v1204_v28  ;;  %1594 = vst [vmem:[#allocation17_spill] sm:$0xff] %v1220_v33  ;;  %v96_v54 = vunpack.c.h.bf16 %v1209_v29  ;;  %v97_v37 = vunpack.c.l.bf16 %v1214_v30  ;;  %v99_v25 = vunpack.c.l.bf16 %v1243_v36  ;;  %v166_v29 = vrot.slane %v1054_v47, %v899_v8 }
  0x19   :  { %1595 = vst [vmem:[#allocation18_spill] sm:$0xff] %v1226_v13  ;;  %1596 = vst [vmem:[#allocation19_spill] sm:$0xff] %v1232_v34  ;;  %v162_v34 = vrot.slane %v1038_v3, %v905_v11  ;;  %v470_v13 = vrot.slane %v150_v58, %v899_v8  ;;  %v101_v33 = vunpack.c.l.bf16 %v40_v14  ;;  %v474_v28 = vrot.slane %v154_v4, %v899_v8 }
  0x1a   :  { %1597 = vst [vmem:[#allocation20_spill] sm:$0xff] %v1238_v35  ;;  %v98_v35 = vunpack.c.h.bf16 %v1214_v30  ;;  %1598 = vst [vmem:[#allocation21_spill] sm:$0xff] %v1273_v60  ;;  %v100_v30 = vunpack.c.h.bf16 %v1243_v36  ;;  %v478_v12 = vrot.slane %v158_v42, %v899_v8  ;;  %v102_v27 = vunpack.c.h.bf16 %v40_v14 }
  0x1b   :  { %v103_v26 = vunpack.c.l.bf16 %v41_v49  ;;  %v104_v24 = vunpack.c.h.bf16 %v41_v49  ;;  %v614_v7 = vrot.slane %v294_v59, %v899_v8  ;;  %v105_v23 = vunpack.c.l.bf16 %v42_v21 }
  0x1c   :  { %v106_v22 = vunpack.c.h.bf16 %v42_v21  ;;  %v1285_v3 = vunpack.c.l.bf16 %v1273_v60  ;;  %v170_v58 = vrot.slane %v1054_v47, %v901_v9  ;;  %v174_v36 = vrot.slane %v1054_v47, %v903_v10 }
  0x1d   :  { %v482_v4 = vrot.slane %v162_v34, %v899_v8  ;;  %v486_v42 = vrot.slane %v166_v29, %v899_v8  ;;  %v1600_v14 = vunpack.c.l.bf16 %v948_v31  ;;  %v1601_v59 = vunpack.c.h.bf16 %v948_v31 }
  0x1e   :  { %1599 = vst [vmem:[#allocation22_spill] sm:$0xff] %v1285_v3  ;;  %v1602_v21 = vunpack.c.l.bf16 %v953_v32  ;;  %v1603_v3 = vunpack.c.l.bf16 %v971_v38  ;;  %v1604_v10 = vunpack.c.h.bf16 %v971_v38  ;;  %v1605_v29 = vunpack.c.l.bf16 %v987_v44 }
  0x1f   :  { %v723_v49 = vmul.f32 %v470_v13, %v1600_v14  ;;  %v724_v11 = vmul.f32 %v474_v28, %v1601_v59  ;;  %v1606_v31 = vunpack.c.h.bf16 %v987_v44  ;;  %v1610_v44 = vunpack.c.h.bf16 %v1009_v55 }
  0x20   :  { %v725_v60 = vmul.f32 %v478_v12, %v1602_v21  ;;  %v1302_v9 = vmul.f32 %v1060_v50, %v1603_v3  ;;  %v1307_v34 = vmul.f32 %v1063_v63, %v1604_v10  ;;  %v1311_v8 = vmul.f32 %v614_v7, %v1605_v29 }
  0x21   :  { %v1316_v28 = vmul.f32 %v1068_v57, %v1606_v31  ;;  %v1607_v12 = vunpack.c.l.bf16 %v992_v45  ;;  %v1608_v50 = vunpack.c.h.bf16 %v992_v45  ;;  %v1609_v10 = vunpack.c.l.bf16 %v1009_v55 }
  0x22   :  { %v1336_v57 = vmul.f32 %v1086_v1, %v1610_v44  ;;  %v1611_v7 = vunpack.c.l.bf16 %v1014_v56  ;;  %v1612_v45 = vunpack.c.h.bf16 %v1014_v56  ;;  %v1613_v3 = vunpack.c.l.bf16 %v1024_v61 }
  0x23   :  { %v1321_v13 = vmul.f32 %v1071_v52, %v1607_v12  ;;  %v1326_v38 = vmul.f32 %v1074_v53, %v1608_v50  ;;  %v1331_v63 = vmul.f32 %v1080_v0, %v1609_v10  ;;  %v1614_v55 = vunpack.c.h.bf16 %v1024_v61  ;;  %v1626_v50 = vld [vmem:[#allocation19_spill] sm:$0xff] }
  0x24   :  { %v1341_v52 = vmul.f32 %v1092_v2, %v1611_v7  ;;  %v1346_v53 = vmul.f32 %v1098_v51, %v1612_v45  ;;  %v1351_v0 = vmul.f32 %v1104_v15, %v1613_v3  ;;  %v1615_v14 = vunpack.c.l.bf16 %v1029_v62 }
  0x25   :  { %v1356_v1 = vmul.f32 %v1110_v16, %v1614_v55  ;;  %v1364_v56 = vmul.f32 %v1122_v5, %v90_v40  ;;  %v1367_v51 = vmul.f32 %v1128_v18, %v91_v41  ;;  %v1370_v59 = vmul.f32 %v1134_v19, %v92_v43  ;;  %v1616_v16 = vld [vmem:[#allocation9_spill] sm:$0xff]  ;;  %v1618_v5 = vld [vmem:[#allocation11_spill] sm:$0xff]  ;;  %v1619_v18 = vld [vmem:[#allocation12_spill] sm:$0xff] }
  0x26   :  { %v1361_v2 = vmul.f32 %v1116_v17, %v1615_v14  ;;  %v1373_v15 = vmul.f32 %v1140_v20, %v93_v39  ;;  %v1376_v61 = vmul.f32 %v1146_v6, %v94_v48  ;;  %v1379_v62 = vmul.f32 %v1616_v16, %v95_v46  ;;  %v1617_v17 = vld [vmem:[#allocation10_spill] sm:$0xff]  ;;  %v14_v19 = vld [vmem:[%s1564_s0 + $0x18] sm:$0xff]  ;;  %v1622_v46 = vld [vmem:[#allocation15_spill] sm:$0xff] }
  0x27   :  { %v1382_v21 = vmul.f32 %v1617_v17, %v96_v54  ;;  %v1385_v40 = vmul.f32 %v1618_v5, %v97_v37  ;;  %v1388_v41 = vmul.f32 %v1619_v18, %v98_v35  ;;  %v1620_v20 = vld [vmem:[#allocation13_spill] sm:$0xff]  ;;  %v1621_v48 = vld [vmem:[#allocation14_spill] sm:$0xff]  ;;  %v1400_v39 = vmul.f32 %v1622_v46, %v101_v33  ;;  %v1623_v54 = vld [vmem:[#allocation16_spill] sm:$0xff] }
  0x28   :  { %v1394_v43 = vmul.f32 %v1620_v20, %v99_v25  ;;  %v1397_v6 = vmul.f32 %v1621_v48, %v100_v30  ;;  %v1403_v29 = vmul.f32 %v1623_v54, %v102_v27  ;;  %v1624_v37 = vld [vmem:[#allocation17_spill] sm:$0xff]  ;;  %v1625_v35 = vld [vmem:[#allocation18_spill] sm:$0xff]  ;;  %v1412_v10 = vmul.f32 %v1626_v50, %v105_v23  ;;  %v1627_v25 = vld [vmem:[#allocation20_spill] sm:$0xff] }
  0x29   :  { %v1406_v31 = vmul.f32 %v1624_v37, %v103_v26  ;;  %v1409_v12 = vmul.f32 %v1625_v35, %v104_v24  ;;  %v1415_v44 = vmul.f32 %v1627_v25, %v106_v22  ;;  %v1628_v30 = vld [vmem:[#allocation5_spill] sm:$0xff]  ;;  %v1629_v33 = vld [vmem:[#allocation2_spill] sm:$0xff]  ;;  %v1630_v27 = vunpack.c.h.bf16 %v953_v32  ;;  %v1637_v37 = vld [vmem:[#allocation4_spill] sm:$0xff] }
  0x2a   :  { %v178_v7 = vrot.slane %v1054_v47, %v1628_v30  ;;  %v490_v45 = vrot.slane %v170_v58, %v1629_v33  ;;  %v787_v55 = vadd.f32 %v724_v11, %v723_v49  ;;  %v49_v26 = vunpack.c.l.bf16 %v14_v19  ;;  %v15_v24 = vld [vmem:[%s1564_s0 + $0x20] sm:$0xff]  ;;  %v1634_v58 = vld [vmem:[#allocation3_spill] sm:$0xff]  ;;  %v1636_v46 = vld [vmem:[#allocation21_spill] sm:$0xff] }
  0x2b   :  { %v726_v3 = vmul.f32 %v482_v4, %v1630_v27  ;;  %v1631_v23 = vld [vmem:[#allocation22_spill] sm:$0xff]  ;;  %v494_v22 = vrot.slane %v174_v36, %v1629_v33  ;;  %v50_v18 = vunpack.c.h.bf16 %v14_v19  ;;  %v51_v48 = vunpack.c.l.bf16 %v15_v24  ;;  %v16_v36 = vld [vmem:[%s1564_s0 + $0x28] sm:$0xff] }
  0x2c   :  { %v182_v14 = vrot.slane %v1631_v23, %v1629_v33  ;;  %v1632_v16 = vld [vmem:[#allocation6_spill] sm:$0xff]  ;;  %v788_v47 = vadd.f32 %v787_v55, %v725_v60  ;;  %v186_v32 = vrot.slane %v1631_v23, %v1634_v58  ;;  %v498_v11 = vrot.slane %v178_v7, %v1629_v33  ;;  %v17_v55 = vld [vmem:[%s1564_s0 + $0x30] sm:$0xff] }
  0x2d   :  { %v1633_v17 = vunpack.c.l.bf16 %v1632_v16  ;;  %v1635_v4 = vunpack.c.h.bf16 %v1632_v16  ;;  %v118_v54 = vunpack.c.h.bf16 %v1636_v46  ;;  %v190_v60 = vrot.slane %v1631_v23, %v1637_v37  ;;  %v109_v16 = vld [vmem:[%s1563_s1 + $0x10] sm:$0xff] }
  0x2e   :  { %v789_v20 = vadd.f32 %v788_v47, %v726_v3  ;;  %v729_v19 = vmul.f32 %v494_v22, %v49_v26  ;;  %v52_v50 = vunpack.c.h.bf16 %v15_v24  ;;  %v194_v25 = vrot.slane %v1631_v23, %v1628_v30 }
  0x2f   :  { %v727_v5 = vmul.f32 %v486_v42, %v1633_v17  ;;  %v728_v49 = vmul.f32 %v490_v45, %v1635_v4  ;;  %v502_v42 = vrot.slane %v182_v14, %v1629_v33  ;;  %v506_v7 = vrot.slane %v186_v32, %v1629_v33  ;;  %v18_v4 = vld [vmem:[%s1564_s0 + $0x38] sm:$0xff] }
  0x30   :  { %v730_v45 = vmul.f32 %v498_v11, %v50_v18  ;;  %v53_v3 = vunpack.c.l.bf16 %v16_v36  ;;  %v198_v26 = vrot.slane %v118_v54, %v1629_v33  ;;  %v510_v24 = vrot.slane %v190_v60, %v1629_v33 }
  0x31   :  { %v790_v35 = vadd.f32 %v789_v20, %v727_v5  ;;  %v731_v14 = vmul.f32 %v502_v42, %v51_v48  ;;  %v54_v23 = vunpack.c.h.bf16 %v16_v36  ;;  %v202_v17 = vrot.slane %v118_v54, %v1634_v58 }
  0x32   :  { %v514_v5 = vrot.slane %v194_v25, %v1629_v33  ;;  %v732_v47 = vmul.f32 %v506_v7, %v52_v50  ;;  %v55_v32 = vunpack.c.l.bf16 %v17_v55  ;;  %v119_v11 = vunpack.c.l.bf16 %v109_v16  ;;  %v19_v25 = vld [vmem:[%s1564_s0 + $0x40] sm:$0xff] }
  0x33   :  { %v791_v27 = vadd.f32 %v790_v35, %v728_v49  ;;  %v206_v49 = vrot.slane %v118_v54, %v1637_v37  ;;  %v518_v20 = vrot.slane %v198_v26, %v1629_v33  ;;  %v733_v46 = vmul.f32 %v510_v24, %v53_v3 }
  0x34   :  { %v56_v60 = vunpack.c.h.bf16 %v17_v55  ;;  %v210_v36 = vrot.slane %v118_v54, %v1628_v30  ;;  %v522_v42 = vrot.slane %v202_v17, %v1629_v33  ;;  %v57_v50 = vunpack.c.l.bf16 %v18_v4  ;;  %v20_v17 = vld [vmem:[%s1564_s0 + $0x48] sm:$0xff] }
  0x35   :  { %v792_v22 = vadd.f32 %v791_v27, %v729_v19  ;;  %v734_v19 = vmul.f32 %v514_v5, %v54_v23  ;;  %v214_v7 = vrot.slane %v119_v11, %v1629_v33  ;;  %v735_v27 = vmul.f32 %v518_v20, %v55_v32 }
  0x36   :  { %v58_v3 = vunpack.c.h.bf16 %v18_v4  ;;  %v218_v55 = vrot.slane %v119_v11, %v1634_v58  ;;  %v530_v54 = vrot.slane %v210_v36, %v1629_v33  ;;  %v736_v24 = vmul.f32 %v522_v42, %v56_v60  ;;  %v110_v36 = vld [vmem:[%s1563_s1 + $0x18] sm:$0xff] }
  0x37   :  { %v793_v18 = vadd.f32 %v792_v22, %v730_v45  ;;  %v526_v45 = vrot.slane %v206_v49, %v1629_v33  ;;  %v59_v22 = vunpack.c.l.bf16 %v19_v25  ;;  %v120_v23 = vunpack.c.h.bf16 %v109_v16  ;;  %v21_v16 = vld [vmem:[%s1564_s0 + $0x50] sm:$0xff] }
  0x38   :  { %v222_v5 = vrot.slane %v119_v11, %v1637_v37  ;;  %v60_v49 = vunpack.c.h.bf16 %v19_v25  ;;  %v226_v4 = vrot.slane %v119_v11, %v1628_v30  ;;  %v538_v20 = vrot.slane %v218_v55, %v1629_v33  ;;  %v22_v55 = vld [vmem:[%s1564_s0 + $0x58] sm:$0xff] }
  0x39   :  { %v794_v48 = vadd.f32 %v793_v18, %v731_v14  ;;  %v737_v18 = vmul.f32 %v526_v45, %v57_v50  ;;  %v61_v60 = vunpack.c.l.bf16 %v20_v17  ;;  %v230_v42 = vrot.slane %v120_v23, %v1629_v33 }
  0x3a   :  { %v62_v11 = vunpack.c.h.bf16 %v20_v17  ;;  %v234_v25 = vrot.slane %v120_v23, %v1634_v58  ;;  %v740_v45 = vmul.f32 %v538_v20, %v60_v49  ;;  %v242_v17 = vrot.slane %v120_v23, %v1628_v30 }
  0x3b   :  { %v795_v35 = vadd.f32 %v794_v48, %v732_v47  ;;  %v534_v47 = vrot.slane %v214_v7, %v1629_v33  ;;  %v546_v7 = vrot.slane %v226_v4, %v1629_v33  ;;  %v65_v49 = vunpack.c.l.bf16 %v22_v55  ;;  %v23_v4 = vld [vmem:[%s1564_s0 + $0x60] sm:$0xff] }
  0x3d   :  { %v796_v26 = vadd.f32 %v795_v35, %v733_v46  ;;  %v738_v46 = vmul.f32 %v530_v54, %v58_v3  ;;  %v739_v35 = vmul.f32 %v534_v47, %v59_v22  ;;  %v121_v3 = vunpack.c.l.bf16 %v110_v36 }
  0x3e   :  { %v238_v54 = vrot.slane %v120_v23, %v1637_v37  ;;  %v554_v47 = vrot.slane %v234_v25, %v1629_v33  ;;  %v562_v23 = vrot.slane %v242_v17, %v1629_v33  ;;  %v24_v25 = vld [vmem:[%s1564_s0 + $0x68] sm:$0xff] }
  0x3f   :  { %v797_v14 = vadd.f32 %v796_v26, %v734_v19  ;;  %v542_v19 = vrot.slane %v222_v5, %v1629_v33  ;;  %v63_v26 = vunpack.c.l.bf16 %v21_v16  ;;  %v64_v5 = vunpack.c.h.bf16 %v21_v16 }
  0x40   :  { %v246_v20 = vrot.slane %v121_v3, %v1629_v33  ;;  %v250_v16 = vrot.slane %v121_v3, %v1634_v58 }
  0x41   :  { %v798_v32 = vadd.f32 %v797_v14, %v735_v27  ;;  %v741_v14 = vmul.f32 %v542_v19, %v61_v60  ;;  %v66_v60 = vunpack.c.h.bf16 %v22_v55  ;;  %v744_v19 = vmul.f32 %v554_v47, %v64_v5 }
  0x42   :  { %v258_v55 = vrot.slane %v121_v3, %v1628_v30  ;;  %v69_v5 = vunpack.c.l.bf16 %v24_v25 }
  0x43   :  { %v799_v48 = vadd.f32 %v798_v32, %v736_v24  ;;  %v550_v24 = vrot.slane %v230_v42, %v1629_v33 }
  0x45   :  { %v800_v50 = vadd.f32 %v799_v48, %v737_v18  ;;  %v742_v18 = vmul.f32 %v546_v7, %v62_v11  ;;  %v743_v48 = vmul.f32 %v550_v24, %v63_v26  ;;  %v122_v11 = vunpack.c.h.bf16 %v110_v36  ;;  %v25_v36 = vld [vmem:[%s1564_s0 + $0x70] sm:$0xff] }
  0x46   :  { %v254_v7 = vrot.slane %v121_v3, %v1637_v37  ;;  %v570_v24 = vrot.slane %v250_v16, %v1629_v33  ;;  %v578_v3 = vrot.slane %v258_v55, %v1629_v33 }
  0x47   :  { %v801_v27 = vadd.f32 %v800_v50, %v738_v46  ;;  %v558_v46 = vrot.slane %v238_v54, %v1629_v33  ;;  %v67_v50 = vunpack.c.l.bf16 %v23_v4  ;;  %v68_v54 = vunpack.c.h.bf16 %v23_v4 }
  0x48   :  { %v262_v17 = vrot.slane %v122_v11, %v1629_v33  ;;  %v574_v47 = vrot.slane %v254_v7, %v1629_v33  ;;  %v266_v4 = vrot.slane %v122_v11, %v1634_v58 }
  0x49   :  { %v802_v22 = vadd.f32 %v801_v27, %v739_v35  ;;  %v745_v27 = vmul.f32 %v558_v46, %v65_v49  ;;  %v70_v49 = vunpack.c.h.bf16 %v24_v25 }
  0x4a   :  { %v582_v16 = vrot.slane %v262_v17, %v1629_v33  ;;  %v586_v58 = vrot.slane %v266_v4, %v1629_v33 }
  0x4b   :  { %v803_v32 = vadd.f32 %v802_v22, %v740_v45  ;;  %v566_v45 = vrot.slane %v246_v20, %v1629_v33  ;;  %v748_v20 = vmul.f32 %v570_v24, %v68_v54  ;;  %v750_v25 = vmul.f32 %v578_v3, %v70_v49 }
  0x4d   :  { %v804_v42 = vadd.f32 %v803_v32, %v741_v14  ;;  %v746_v14 = vmul.f32 %v562_v23, %v66_v60  ;;  %v270_v60 = vrot.slane %v122_v11, %v1637_v37  ;;  %v749_v23 = vmul.f32 %v574_v47, %v69_v5  ;;  %v27_v37 = vld [vmem:[%s1564_s0 + $0x80] sm:$0xff] }
  0x4e   :  { %v75_v5 = vunpack.c.l.bf16 %v27_v37 }
  0x4f   :  { %v805_v35 = vadd.f32 %v804_v42, %v742_v18  ;;  %v747_v18 = vmul.f32 %v566_v45, %v67_v50  ;;  %v26_v42 = vld [vmem:[%s1564_s0 + $0x78] sm:$0xff]  ;;  %v274_v50 = vrot.slane %v122_v11, %v1628_v30  ;;  %v590_v54 = vrot.slane %v270_v60, %v1629_v33 }
  0x50   :  { %v73_v45 = vunpack.c.l.bf16 %v26_v42 }
  0x51   :  { %v806_v26 = vadd.f32 %v805_v35, %v743_v48  ;;  %v71_v48 = vunpack.c.l.bf16 %v25_v36  ;;  %v72_v35 = vunpack.c.h.bf16 %v25_v36 }
  0x52   :  { %v753_v17 = vmul.f32 %v590_v54, %v73_v45 }
  0x53   :  { %v807_v22 = vadd.f32 %v806_v26, %v744_v19  ;;  %v751_v55 = vmul.f32 %v582_v16, %v71_v48  ;;  %v752_v30 = vmul.f32 %v586_v58, %v72_v35 }
  0x55   :  { %v808_v32 = vadd.f32 %v807_v22, %v745_v27  ;;  %v1638_v27 = vld [vmem:[#allocation7_spill] sm:$0xff]  ;;  %v594_v22 = vrot.slane %v274_v50, %v1629_v33 }
  0x56   :  { %v278_v26 = vrot.slane %v1638_v27, %v1629_v33 }
  0x57   :  { %v809_v46 = vadd.f32 %v808_v32, %v746_v14  ;;  %v74_v14 = vunpack.c.h.bf16 %v26_v42 }
  0x58   :  { %v598_v36 = vrot.slane %v278_v26, %v1629_v33 }
  0x59   :  { %v810_v19 = vadd.f32 %v809_v46, %v747_v18  ;;  %v76_v18 = vunpack.c.h.bf16 %v27_v37  ;;  %v754_v32 = vmul.f32 %v594_v22, %v74_v14 }
  0x5a   :  { %v755_v4 = vmul.f32 %v598_v36, %v75_v5 }
  0x5b   :  { %v811_v7 = vadd.f32 %v810_v19, %v748_v20  ;;  %v1639_v20 = vld [vmem:[#allocation8_spill] sm:$0xff] }
  0x5c   :  { %v756_v46 = vmul.f32 %v1639_v20, %v76_v18 }
  0x5d   :  { %v812_v24 = vadd.f32 %v811_v7, %v749_v23 }
  0x5f   :  { %v813_v11 = vadd.f32 %v812_v24, %v750_v25 }
  0x61   :  { %v814_v47 = vadd.f32 %v813_v11, %v751_v55 }
  0x63   :  { %v815_v49 = vadd.f32 %v814_v47, %v752_v30 }
  0x65   :  { %v816_v3 = vadd.f32 %v815_v49, %v753_v17 }
  0x67   :  { %v817_v48 = vadd.f32 %v816_v3, %v754_v32 }
  0x69   :  { %v818_v60 = vadd.f32 %v817_v48, %v755_v4 }
  0x6b   :  { %v819_v16 = vadd.f32 %v818_v60, %v756_v46 }
  0x6d   :  { %v820_v42 = vadd.f32 %v819_v16, %v1302_v9 }
  0x6f   :  { %v821_v23 = vadd.f32 %v820_v42, %v1307_v34 }
  0x71   :  { %v822_v19 = vadd.f32 %v821_v23, %v1311_v8 }
  0x73   :  { %v823_v33 = vadd.f32 %v822_v19, %v1316_v28 }
  0x75   :  { %v824_v35 = vadd.f32 %v823_v33, %v1321_v13 }
  0x77   :  { %v825_v50 = vadd.f32 %v824_v35, %v1326_v38 }
  0x79   :  { %v826_v58 = vadd.f32 %v825_v50, %v1331_v63 }
  0x7b   :  { %v827_v25 = vadd.f32 %v826_v58, %v1336_v57 }
  0x7d   :  { %v828_v7 = vadd.f32 %v827_v25, %v1341_v52 }
  0x7f   :  { %v829_v45 = vadd.f32 %v828_v7, %v1346_v53 }
  0x81   :  { %v830_v9 = vadd.f32 %v829_v45, %v1351_v0 }
  0x83   :  { %v831_v34 = vadd.f32 %v830_v9, %v1356_v1 }
  0x85   :  { %v832_v8 = vadd.f32 %v831_v34, %v1361_v2 }
  0x87   :  { %v833_v28 = vadd.f32 %v832_v8, %v1364_v56 }
  0x89   :  { %v834_v13 = vadd.f32 %v833_v28, %v1367_v51 }
  0x8b   :  { %v835_v38 = vadd.f32 %v834_v13, %v1370_v59 }
  0x8d   :  { %v836_v63 = vadd.f32 %v835_v38, %v1373_v15 }
  0x8f   :  { %v837_v57 = vadd.f32 %v836_v63, %v1376_v61 }
  0x91   :  { %v838_v52 = vadd.f32 %v837_v57, %v1379_v62 }
  0x93   :  { %v839_v53 = vadd.f32 %v838_v52, %v1382_v21 }
  0x95   :  { %v840_v0 = vadd.f32 %v839_v53, %v1385_v40 }
  0x97   :  { %v841_v1 = vadd.f32 %v840_v0, %v1388_v41 }
  0x99   :  { %v842_v2 = vadd.f32 %v841_v1, %v1394_v43 }
  0x9b   :  { %v843_v56 = vadd.f32 %v842_v2, %v1397_v6 }
  0x9d   :  { %v844_v51 = vadd.f32 %v843_v56, %v1400_v39 }
  0x9f   :  { %v845_v59 = vadd.f32 %v844_v51, %v1403_v29 }
  0xa1   :  { %v846_v15 = vadd.f32 %v845_v59, %v1406_v31 }
  0xa3   :  { %v847_v61 = vadd.f32 %v846_v15, %v1409_v12 }
  0xa5   :  { %v848_v62 = vadd.f32 %v847_v61, %v1412_v10 }
  0xa7   :  { %v849_v21 = vadd.f32 %v848_v62, %v1415_v44 }
  0xa9   :  { %850 = vadd.xlane.f32.xlu0 %v849_v21 }
 0x132   :  { %v851_v40 = vpop.xlane.xlu0 %850 }
 0x133   :  { %v864_v27 = vmul.f32 -1.442695, %v851_v40 }
 0x135   :  { %865 = vpow2.f32 %v864_v27 }
 0x142   :  { %v866_v41 = vpop.eup %865 }
 0x143   :  { %v855_v43 = vadd.f32 1.0, %v866_v41 }
 0x145   :  { %867 = vrcp.f32 %v855_v43 }
 0x152   :  { %v868_v6 = vpop.eup %867 }
 0x153   :  { %859 = vst.msk [vmem:[%s1565_s2] sm:$0xff] %vm858_vm0, %v868_v6 }

// kernel: discriminator_forward.13
= control target key start
LH: loop header
LB: loop body
LE: loop exit
PB: predicated region body
PF: predicated region fallthrough
CT: control target
= control target key end

     0   :  { %s10771_s12 = smov 0   ;;  %s14297_s0 = inlined_call_operand.vmem [shape: bf16[32,4096], index: 0, kind: input, shape index: {}]   ;;  %s14298_s1 = inlined_call_operand.vmem [shape: bf16[4096,512], index: 1, kind: input, shape index: {}]   ;;  %s14299_s2 = inlined_call_operand.vmem [shape: bf16[32,512], index: 2, kind: output, shape index: {0}]   ;;  %s14300_s3 = inlined_call_operand.vmem [shape: f32[2,2,512], index: 3, kind: output, shape index: {1}]  }
   0x1 LB: > { %s10777_s13 = sadd.s32 4294967295, %s10748_s12   ;;  %p8119_p0 = scmp.ge.s32.totalorder %s10748_s12, 1  ;;  %s10748_s12 = sphi %s10771_s12, %s14_s12  }
   0x2   : > { %p142_p1 = scmp.lt.s32.totalorder %s10748_s12, 3 }
   0x4   : > { %p143_p2 = pnand %p8119_p0, %p142_p1 }
   0x6   : > { %146 = sbr.rel (%p143_p2) target bundleno = 1264 (0x4f0), region = 28 }
   0xb   : > { %v9206_v0 = vld [vmem:[%s14298_s1 + $0xe4] ss:$16 sps:$4 sm:$0xff]   ;;  %v9210_v2 = vld [vmem:[%s14298_s1 + $0xe0] ss:$16 sps:$4 sm:$0xff]   ;;  %s8120_s24 = sshll.u32 %s10777_s13, 1  ;;  %vm7996_vm0 = vcmask 1040384  }
   0xc   : > { %v9208_v1 = vld [vmem:[%s14298_s1 + $0x2e4] ss:$16 sps:$4 sm:$0xff]   ;;  %6528 = vmatprep.subr.bf16.mxu0 %v9206_v0  ;;  %v9211_v3 = vld [vmem:[%s14298_s1 + $0x2e0] ss:$16 sps:$4 sm:$0xff]   ;;  %p174_p3 = scmp.lt.s32.totalorder %s8120_s24, 3  ;;  %p187_p4 = scmp.lt.s32.totalorder %s10777_s13, 1 }
   0xd   : > { %6571 = vmatprep.subr.bf16.mxu1 %v9208_v1  ;;  %v9212_v4 = vld [vmem:[%s14298_s1 + $0xc4] ss:$16 sps:$4 sm:$0xff]   ;;  %6529 = vmatpush1.bf16.msra.mxu0 %v9210_v2  ;;  %v9216_v6 = vld [vmem:[%s14298_s1 + $0xc0] ss:$16 sps:$4 sm:$0xff]  }
   0xe   : > { %6572 = vmatpush1.bf16.msra.mxu1 %v9211_v3  ;;  %v9214_v5 = vld [vmem:[%s14298_s1 + $0x2c4] ss:$16 sps:$4 sm:$0xff]   ;;  %6530 = vmatprep.subr.bf16.mxu0 %v9212_v4  ;;  %v9217_v7 = vld [vmem:[%s14298_s1 + $0x2c0] ss:$16 sps:$4 sm:$0xff]   ;;  %s14317_s24 = smov (!%p174_p3, %s8120_s24), 3  ;;  %s14319_s13 = smov (!%p187_p4, %s10777_s13), 1 }
   0xf   : > { %6573 = vmatprep.subr.bf16.mxu1 %v9214_v5  ;;  %v9218_v8 = vld [vmem:[%s14298_s1 + $0xa4] ss:$16 sps:$4 sm:$0xff]   ;;  %v9222_v10 = vld [vmem:[%s14298_s1 + $0xa0] ss:$16 sps:$4 sm:$0xff]   ;;  %s9190_s22 = sshll.u32 %s14317_s24, 7  ;;  %s9191_s15 = sshll.u32 %s14317_s24, 4 }
  0x10   : > { %v9220_v9 = vld [vmem:[%s14298_s1 + $0x2a4] ss:$16 sps:$4 sm:$0xff]   ;;  %v9223_v11 = vld [vmem:[%s14298_s1 + $0x2a0] ss:$16 sps:$4 sm:$0xff]   ;;  %s10920_s5 = scalar_lea.vmem %s14297_s0, %s9190_s22  ;;  %s13328_s20 = scalar_lea.vmem %s14299_s2, %s9191_s15 }
  0x11   : > { %6531 = vmatpush1.bf16.msra.mxu0 %v9216_v6  ;;  %v9224_v12 = vld [vmem:[%s14298_s1 + $0x84] ss:$16 sps:$4 sm:$0xff]   ;;  %v9228_v14 = vld [vmem:[%s14298_s1 + $0x80] ss:$16 sps:$4 sm:$0xff]   ;;  %v193_v50 = vld [vmem:[%s10920_s5 + $0x8] sm:$0xff] }
  0x12   : > { %6574 = vmatpush1.bf16.msra.mxu1 %v9217_v7  ;;  %6532 = vmatprep.subr.bf16.mxu0 %v9218_v8  ;;  %v9226_v13 = vld [vmem:[%s14298_s1 + $0x284] ss:$16 sps:$4 sm:$0xff]   ;;  %v9229_v15 = vld [vmem:[%s14298_s1 + $0x280] ss:$16 sps:$4 sm:$0xff]   ;;  %v209_v51 = vld [vmem:[%s10920_s5 + $0x88] sm:$0xff] }
  0x13   : > { %6575 = vmatprep.subr.bf16.mxu1 %v9220_v9  ;;  %v9230_v16 = vld [vmem:[%s14298_s1 + $0x64] ss:$16 sps:$4 sm:$0xff]   ;;  %v9234_v18 = vld [vmem:[%s14298_s1 + $0x60] ss:$16 sps:$4 sm:$0xff]   ;;  %v10946_v55 = vcombine.high %v193_v50, %v209_v51  ;;  %v11000_v9 = vcombine.low %v193_v50, %v209_v51 }
  0x14   : > { %v9232_v17 = vld [vmem:[%s14298_s1 + $0x264] ss:$16 sps:$4 sm:$0xff]   ;;  %v9235_v19 = vld [vmem:[%s14298_s1 + $0x260] ss:$16 sps:$4 sm:$0xff]  }
  0x15   : > { %6533 = vmatpush1.bf16.msra.mxu0 %v9222_v10  ;;  %v9236_v20 = vld [vmem:[%s14298_s1 + $0x44] ss:$16 sps:$4 sm:$0xff]   ;;  %v9240_v22 = vld [vmem:[%s14298_s1 + $0x40] ss:$16 sps:$4 sm:$0xff]   ;;  %6603 = vmatprep.mubr.bf16.mxu1 %v10946_v55 }
  0x16   : > { %6576 = vmatpush1.bf16.msra.mxu1 %v9223_v11  ;;  %6534 = vmatprep.subr.bf16.mxu0 %v9224_v12  ;;  %v9238_v21 = vld [vmem:[%s14298_s1 + $0x244] ss:$16 sps:$4 sm:$0xff]   ;;  %v9241_v23 = vld [vmem:[%s14298_s1 + $0x240] ss:$16 sps:$4 sm:$0xff]  }
  0x17   : > { %6577 = vmatprep.subr.bf16.mxu1 %v9226_v13  ;;  %v9242_v24 = vld [vmem:[%s14298_s1 + $0x24] ss:$16 sps:$4 sm:$0xff]   ;;  %v9246_v26 = vld [vmem:[%s14298_s1 + $0x20] ss:$16 sps:$4 sm:$0xff]  }
  0x18   : > { %v9244_v25 = vld [vmem:[%s14298_s1 + $0x224] ss:$16 sps:$4 sm:$0xff]   ;;  %v9247_v27 = vld [vmem:[%s14298_s1 + $0x220] ss:$16 sps:$4 sm:$0xff]  }
  0x19   : > { %6535 = vmatpush1.bf16.msra.mxu0 %v9228_v14  ;;  %v9248_v28 = vld [vmem:[%s14298_s1 + $0x4] ss:$16 sps:$4 sm:$0xff]   ;;  %v9252_v30 = vld [vmem:[%s14298_s1] ss:$16 sps:$4 sm:$0xff]  }
  0x1a   : > { %6578 = vmatpush1.bf16.msra.mxu1 %v9229_v15  ;;  %6536 = vmatprep.subr.bf16.mxu0 %v9230_v16  ;;  %v9250_v29 = vld [vmem:[%s14298_s1 + $0x204] ss:$16 sps:$4 sm:$0xff]   ;;  %v9253_v31 = vld [vmem:[%s14298_s1 + $0x200] ss:$16 sps:$4 sm:$0xff]  }
  0x1b   : > { %6579 = vmatprep.subr.bf16.mxu1 %v9232_v17  ;;  %v9254_v32 = vld [vmem:[%s14298_s1 + $0x1e4] ss:$16 sps:$4 sm:$0xff]   ;;  %v9258_v34 = vld [vmem:[%s14298_s1 + $0x1e0] ss:$16 sps:$4 sm:$0xff]  }
  0x1c   : > { %v9256_v33 = vld [vmem:[%s14298_s1 + $0x3e4] ss:$16 sps:$4 sm:$0xff]   ;;  %v9259_v35 = vld [vmem:[%s14298_s1 + $0x3e0] ss:$16 sps:$4 sm:$0xff]  }
  0x1d   : > { %6537 = vmatpush1.bf16.msra.mxu0 %v9234_v18  ;;  %v9260_v36 = vld [vmem:[%s14298_s1 + $0x1c4] ss:$16 sps:$4 sm:$0xff]   ;;  %v9264_v38 = vld [vmem:[%s14298_s1 + $0x1c0] ss:$16 sps:$4 sm:$0xff]  }
  0x1e   : > { %6580 = vmatpush1.bf16.msra.mxu1 %v9235_v19  ;;  %6538 = vmatprep.subr.bf16.mxu0 %v9236_v20  ;;  %v9262_v37 = vld [vmem:[%s14298_s1 + $0x3c4] ss:$16 sps:$4 sm:$0xff]   ;;  %v9265_v39 = vld [vmem:[%s14298_s1 + $0x3c0] ss:$16 sps:$4 sm:$0xff]  }
  0x1f   : > { %6581 = vmatprep.subr.bf16.mxu1 %v9238_v21  ;;  %v9266_v40 = vld [vmem:[%s14298_s1 + $0x1a4] ss:$16 sps:$4 sm:$0xff]   ;;  %v9270_v42 = vld [vmem:[%s14298_s1 + $0x1a0] ss:$16 sps:$4 sm:$0xff]  }
  0x20   : > { %v9268_v41 = vld [vmem:[%s14298_s1 + $0x3a4] ss:$16 sps:$4 sm:$0xff]   ;;  %v9271_v43 = vld [vmem:[%s14298_s1 + $0x3a0] ss:$16 sps:$4 sm:$0xff]  }
  0x21   : > { %6539 = vmatpush1.bf16.msra.mxu0 %v9240_v22  ;;  %v9272_v44 = vld [vmem:[%s14298_s1 + $0x184] ss:$16 sps:$4 sm:$0xff]   ;;  %v9276_v46 = vld [vmem:[%s14298_s1 + $0x180] ss:$16 sps:$4 sm:$0xff]  }
  0x22   : > { %6582 = vmatpush1.bf16.msra.mxu1 %v9241_v23  ;;  %6540 = vmatprep.subr.bf16.mxu0 %v9242_v24  ;;  %v9274_v45 = vld [vmem:[%s14298_s1 + $0x384] ss:$16 sps:$4 sm:$0xff]   ;;  %v9277_v47 = vld [vmem:[%s14298_s1 + $0x380] ss:$16 sps:$4 sm:$0xff]  }
  0x23   : > { %6583 = vmatprep.subr.bf16.mxu1 %v9244_v25  ;;  %v192_v48 = vld [vmem:[%s10920_s5] sm:$0xff] }
  0x24   : > { %v208_v49 = vld [vmem:[%s10920_s5 + $0x80] sm:$0xff] }
  0x25   : > { %6541 = vmatpush1.bf16.msra.mxu0 %v9246_v26  ;;  %v9278_v52 = vld [vmem:[%s14298_s1 + $0x164] ss:$16 sps:$4 sm:$0xff]   ;;  %v10941_v53 = vcombine.high %v192_v48, %v208_v49  ;;  %v9282_v56 = vld [vmem:[%s14298_s1 + $0x160] ss:$16 sps:$4 sm:$0xff]   ;;  %v10998_v8 = vcombine.low %v192_v48, %v208_v49 }
  0x26   : > { %6584 = vmatpush1.bf16.msra.mxu1 %v9247_v27  ;;  %6542 = vmatprep.subr.bf16.mxu0 %v9248_v28  ;;  %v9280_v54 = vld [vmem:[%s14298_s1 + $0x364] ss:$16 sps:$4 sm:$0xff]   ;;  %v9283_v57 = vld [vmem:[%s14298_s1 + $0x360] ss:$16 sps:$4 sm:$0xff]  }
  0x27   : > { %6585 = vmatprep.subr.bf16.mxu1 %v9250_v29  ;;  %6560 = vmatprep.mubr.bf16.mxu0 %v10941_v53  ;;  %v9284_v58 = vld [vmem:[%s14298_s1 + $0x144] ss:$16 sps:$4 sm:$0xff]   ;;  %v9288_v60 = vld [vmem:[%s14298_s1 + $0x140] ss:$16 sps:$4 sm:$0xff]  }
  0x28   : > { %v9286_v59 = vld [vmem:[%s14298_s1 + $0x344] ss:$16 sps:$4 sm:$0xff]   ;;  %v9289_v61 = vld [vmem:[%s14298_s1 + $0x340] ss:$16 sps:$4 sm:$0xff]  }
  0x29   : > { %6543 = vmatpush1.bf16.msra.mxu0 %v9252_v30  ;;  %v9290_v62 = vld [vmem:[%s14298_s1 + $0x124] ss:$16 sps:$4 sm:$0xff]   ;;  %v9294_v0 = vld [vmem:[%s14298_s1 + $0x120] ss:$16 sps:$4 sm:$0xff]  }
  0x2a   : > { %6586 = vmatpush1.bf16.msra.mxu1 %v9253_v31  ;;  %6544 = vmatprep.subr.bf16.mxu0 %v9254_v32  ;;  %v9292_v63 = vld [vmem:[%s14298_s1 + $0x324] ss:$16 sps:$4 sm:$0xff]   ;;  %v9295_v1 = vld [vmem:[%s14298_s1 + $0x320] ss:$16 sps:$4 sm:$0xff]  }
  0x2b   : > { %6587 = vmatprep.subr.bf16.mxu1 %v9256_v33  ;;  %v9296_v2 = vld [vmem:[%s14298_s1 + $0x104] ss:$16 sps:$4 sm:$0xff]   ;;  %v9300_v4 = vld [vmem:[%s14298_s1 + $0x100] ss:$16 sps:$4 sm:$0xff]  }
  0x2c   : > { %v9298_v3 = vld [vmem:[%s14298_s1 + $0x304] ss:$16 sps:$4 sm:$0xff]   ;;  %v9301_v5 = vld [vmem:[%s14298_s1 + $0x300] ss:$16 sps:$4 sm:$0xff]  }
  0x2d   : > { %6545 = vmatpush2.bf16.msra.mxu0 %v9258_v34  ;;  %v9304_v6 = vld [vmem:[%s14298_s1 + $0x4e4] ss:$16 sps:$4 sm:$0xff]   ;;  %v9302_v10 = vld [vmem:[%s14298_s1 + $0x4e0] ss:$16 sps:$4 sm:$0xff]  }
  0x2e   : > { %6588 = vmatpush2.bf16.msra.mxu1 %v9259_v35  ;;  %6546 = vmatprep.subr.bf16.mxu0 %v9260_v36  ;;  %v9307_v7 = vld [vmem:[%s14298_s1 + $0x6e4] ss:$16 sps:$4 sm:$0xff]   ;;  %v9305_v11 = vld [vmem:[%s14298_s1 + $0x6e0] ss:$16 sps:$4 sm:$0xff]  }
  0x2f   : > { %6589 = vmatprep.subr.bf16.mxu1 %v9262_v37  ;;  %v9310_v12 = vld [vmem:[%s14298_s1 + $0x4c4] ss:$16 sps:$4 sm:$0xff]   ;;  %v9308_v14 = vld [vmem:[%s14298_s1 + $0x4c0] ss:$16 sps:$4 sm:$0xff]  }
  0x30   : > { %v9313_v13 = vld [vmem:[%s14298_s1 + $0x6c4] ss:$16 sps:$4 sm:$0xff]   ;;  %v9311_v15 = vld [vmem:[%s14298_s1 + $0x6c0] ss:$16 sps:$4 sm:$0xff]  }
  0x31   : > { %6547 = vmatpush2.bf16.msra.mxu0 %v9264_v38  ;;  %v9316_v16 = vld [vmem:[%s14298_s1 + $0x4a4] ss:$16 sps:$4 sm:$0xff]   ;;  %v9314_v18 = vld [vmem:[%s14298_s1 + $0x4a0] ss:$16 sps:$4 sm:$0xff]   ;;  %v11089_v38 = vld [vmem:[%s10920_s5 + $0x18] sm:$0xff] }
  0x32   : > { %6590 = vmatpush2.bf16.msra.mxu1 %v9265_v39  ;;  %6548 = vmatprep.subr.bf16.mxu0 %v9266_v40  ;;  %v9319_v17 = vld [vmem:[%s14298_s1 + $0x6a4] ss:$16 sps:$4 sm:$0xff]   ;;  %v9317_v19 = vld [vmem:[%s14298_s1 + $0x6a0] ss:$16 sps:$4 sm:$0xff]   ;;  %v11092_v39 = vld [vmem:[%s10920_s5 + $0x98] sm:$0xff] }
  0x33   : > { %6591 = vmatprep.subr.bf16.mxu1 %v9268_v41  ;;  %v9322_v20 = vld [vmem:[%s14298_s1 + $0x484] ss:$16 sps:$4 sm:$0xff]   ;;  %v9320_v22 = vld [vmem:[%s14298_s1 + $0x480] ss:$16 sps:$4 sm:$0xff]  }
  0x34   : > { %v9325_v21 = vld [vmem:[%s14298_s1 + $0x684] ss:$16 sps:$4 sm:$0xff]   ;;  %v9323_v23 = vld [vmem:[%s14298_s1 + $0x680] ss:$16 sps:$4 sm:$0xff]  }
  0x35   : > { %6549 = vmatpush2.bf16.msra.mxu0 %v9270_v42  ;;  %v9328_v24 = vld [vmem:[%s14298_s1 + $0x464] ss:$16 sps:$4 sm:$0xff]   ;;  %v9326_v26 = vld [vmem:[%s14298_s1 + $0x460] ss:$16 sps:$4 sm:$0xff]  }
  0x36   : > { %6592 = vmatpush2.bf16.msra.mxu1 %v9271_v43  ;;  %6550 = vmatprep.subr.bf16.mxu0 %v9272_v44  ;;  %v9331_v25 = vld [vmem:[%s14298_s1 + $0x664] ss:$16 sps:$4 sm:$0xff]   ;;  %v9329_v27 = vld [vmem:[%s14298_s1 + $0x660] ss:$16 sps:$4 sm:$0xff]   ;;  %v11106_v43 = vcombine.high %v11089_v38, %v11092_v39 }
  0x37   : > { %6593 = vmatprep.subr.bf16.mxu1 %v9274_v45  ;;  %v9334_v28 = vld [vmem:[%s14298_s1 + $0x444] ss:$16 sps:$4 sm:$0xff]   ;;  %v9332_v30 = vld [vmem:[%s14298_s1 + $0x440] ss:$16 sps:$4 sm:$0xff]  }
  0x38   : > { %v9337_v29 = vld [vmem:[%s14298_s1 + $0x644] ss:$16 sps:$4 sm:$0xff]   ;;  %v9335_v31 = vld [vmem:[%s14298_s1 + $0x640] ss:$16 sps:$4 sm:$0xff]  }
  0x39   : > { %6551 = vmatpush2.bf16.msra.mxu0 %v9276_v46  ;;  %v9340_v32 = vld [vmem:[%s14298_s1 + $0x424] ss:$16 sps:$4 sm:$0xff]   ;;  %v9338_v34 = vld [vmem:[%s14298_s1 + $0x420] ss:$16 sps:$4 sm:$0xff]  }
  0x3a   : > { %6594 = vmatpush2.bf16.msra.mxu1 %v9277_v47  ;;  %6552 = vmatprep.subr.bf16.mxu0 %v9278_v52  ;;  %v9343_v33 = vld [vmem:[%s14298_s1 + $0x624] ss:$16 sps:$4 sm:$0xff]   ;;  %v9341_v35 = vld [vmem:[%s14298_s1 + $0x620] ss:$16 sps:$4 sm:$0xff]  }
  0x3b   : > { %6595 = vmatprep.subr.bf16.mxu1 %v9280_v54  ;;  %v11083_v36 = vld [vmem:[%s10920_s5 + $0x10] sm:$0xff] }
  0x3c   : > { %v11086_v37 = vld [vmem:[%s10920_s5 + $0x90] sm:$0xff] }
  0x3d   : > { %6553 = vmatpush2.bf16.msra.mxu0 %v9282_v56  ;;  %v9346_v40 = vld [vmem:[%s14298_s1 + $0x404] ss:$16 sps:$4 sm:$0xff]   ;;  %v11099_v41 = vcombine.high %v11083_v36, %v11086_v37  ;;  %v9344_v44 = vld [vmem:[%s14298_s1 + $0x400] ss:$16 sps:$4 sm:$0xff]  }
  0x3e   : > { %6596 = vmatpush2.bf16.msra.mxu1 %v9283_v57  ;;  %6554 = vmatprep.subr.bf16.mxu0 %v9284_v58  ;;  %v9349_v42 = vld [vmem:[%s14298_s1 + $0x604] ss:$16 sps:$4 sm:$0xff]   ;;  %v9347_v45 = vld [vmem:[%s14298_s1 + $0x600] ss:$16 sps:$4 sm:$0xff]  }
  0x3f   : > { %6597 = vmatprep.subr.bf16.mxu1 %v9286_v59  ;;  %v9352_v46 = vld [vmem:[%s14298_s1 + $0x5e4] ss:$16 sps:$4 sm:$0xff]   ;;  %v9350_v48 = vld [vmem:[%s14298_s1 + $0x5e0] ss:$16 sps:$4 sm:$0xff]  }
  0x40   : > { %v9355_v47 = vld [vmem:[%s14298_s1 + $0x7e4] ss:$16 sps:$4 sm:$0xff]   ;;  %v9353_v49 = vld [vmem:[%s14298_s1 + $0x7e0] ss:$16 sps:$4 sm:$0xff]  }
  0x41   : > { %6555 = vmatpush2.bf16.msra.mxu0 %v9288_v60  ;;  %v9358_v50 = vld [vmem:[%s14298_s1 + $0x5c4] ss:$16 sps:$4 sm:$0xff]   ;;  %v9356_v52 = vld [vmem:[%s14298_s1 + $0x5c0] ss:$16 sps:$4 sm:$0xff]  }
  0x42   : > { %6598 = vmatpush2.bf16.msra.mxu1 %v9289_v61  ;;  %6556 = vmatprep.subr.bf16.mxu0 %v9290_v62  ;;  %v9361_v51 = vld [vmem:[%s14298_s1 + $0x7c4] ss:$16 sps:$4 sm:$0xff]   ;;  %v9359_v54 = vld [vmem:[%s14298_s1 + $0x7c0] ss:$16 sps:$4 sm:$0xff]  }
  0x43   : > { %6599 = vmatprep.subr.bf16.mxu1 %v9292_v63  ;;  %v9364_v56 = vld [vmem:[%s14298_s1 + $0x5a4] ss:$16 sps:$4 sm:$0xff]   ;;  %v9362_v58 = vld [vmem:[%s14298_s1 + $0x5a0] ss:$16 sps:$4 sm:$0xff]  }
  0x44   : > { %v9367_v57 = vld [vmem:[%s14298_s1 + $0x7a4] ss:$16 sps:$4 sm:$0xff]   ;;  %v9365_v59 = vld [vmem:[%s14298_s1 + $0x7a0] ss:$16 sps:$4 sm:$0xff]  }
  0x45   : > { %6557 = vmatpush2.bf16.msra.mxu0 %v9294_v0  ;;  %v9370_v60 = vld [vmem:[%s14298_s1 + $0x584] ss:$16 sps:$4 sm:$0xff]   ;;  %v9368_v62 = vld [vmem:[%s14298_s1 + $0x580] ss:$16 sps:$4 sm:$0xff]  }
  0x46   : > { %6600 = vmatpush2.bf16.msra.mxu1 %v9295_v1  ;;  %6558 = vmatprep.subr.bf16.mxu0 %v9296_v2  ;;  %v9373_v61 = vld [vmem:[%s14298_s1 + $0x784] ss:$16 sps:$4 sm:$0xff]   ;;  %v9371_v63 = vld [vmem:[%s14298_s1 + $0x780] ss:$16 sps:$4 sm:$0xff]  }
  0x47   : > { %6601 = vmatprep.subr.bf16.mxu1 %v9298_v3  ;;  %v9376_v0 = vld [vmem:[%s14298_s1 + $0x564] ss:$16 sps:$4 sm:$0xff]   ;;  %v9374_v2 = vld [vmem:[%s14298_s1 + $0x560] ss:$16 sps:$4 sm:$0xff]  }
  0x48   : > { %v9379_v1 = vld [vmem:[%s14298_s1 + $0x764] ss:$16 sps:$4 sm:$0xff]   ;;  %v9377_v3 = vld [vmem:[%s14298_s1 + $0x760] ss:$16 sps:$4 sm:$0xff]  }
  0x49   : > { %6559 = vmatpush2.bf16.msra.mxu0 %v9300_v4  ;;  %v9382_v4 = vld [vmem:[%s14298_s1 + $0x544] ss:$16 sps:$4 sm:$0xff]  }
  0x4a   : > { %6602 = vmatpush2.bf16.msra.mxu1 %v9301_v5  ;;  %6614 = vmatprep.subr.bf16.mxu0 %v9304_v6  ;;  %v9385_v5 = vld [vmem:[%s14298_s1 + $0x744] ss:$16 sps:$4 sm:$0xff]   ;;  %v9380_v6 = vld [vmem:[%s14298_s1 + $0x540] ss:$16 sps:$4 sm:$0xff]  }
  0x4b   : > { %6657 = vmatprep.subr.bf16.mxu1 %v9307_v7  ;;  %v9383_v7 = vld [vmem:[%s14298_s1 + $0x740] ss:$16 sps:$4 sm:$0xff]  }
  0x4c   : > { %6561 = vmatmul.mubr.bf16.vlgmr.msra.gmra.mxu0 %v10998_v8 }
  0x4d   : > { %6604 = vmatmul.mubr.bf16.vlgmr.msra.gmra.mxu1 %v11000_v9  ;;  %6615 = vmatpush1.bf16.msra.mxu0 %v9302_v10  ;;  %v9388_v10 = vld [vmem:[%s14298_s1 + $0x524] ss:$16 sps:$4 sm:$0xff]  }
  0x4e   : > { %6658 = vmatpush1.bf16.msra.mxu1 %v9305_v11  ;;  %6616 = vmatprep.subr.bf16.mxu0 %v9310_v12  ;;  %v9391_v11 = vld [vmem:[%s14298_s1 + $0x724] ss:$16 sps:$4 sm:$0xff]   ;;  %v9386_v12 = vld [vmem:[%s14298_s1 + $0x520] ss:$16 sps:$4 sm:$0xff]  }
  0x4f   : > { %6659 = vmatprep.subr.bf16.mxu1 %v9313_v13  ;;  %6646 = vmatprep.mubr.bf16.mxu0 %v11099_v41  ;;  %v9389_v13 = vld [vmem:[%s14298_s1 + $0x720] ss:$16 sps:$4 sm:$0xff]  }
  0x50   : > { %6689 = vmatprep.mubr.bf16.mxu1 %v11106_v43 }
  0x51   : > { %6617 = vmatpush1.bf16.msra.mxu0 %v9308_v14  ;;  %v9394_v14 = vld [vmem:[%s14298_s1 + $0x504] ss:$16 sps:$4 sm:$0xff]  }
  0x52   : > { %6660 = vmatpush1.bf16.msra.mxu1 %v9311_v15  ;;  %6618 = vmatprep.subr.bf16.mxu0 %v9316_v16  ;;  %v9397_v15 = vld [vmem:[%s14298_s1 + $0x704] ss:$16 sps:$4 sm:$0xff]   ;;  %v9392_v16 = vld [vmem:[%s14298_s1 + $0x500] ss:$16 sps:$4 sm:$0xff]  }
  0x53   : > { %6661 = vmatprep.subr.bf16.mxu1 %v9319_v17  ;;  %v9395_v17 = vld [vmem:[%s14298_s1 + $0x700] ss:$16 sps:$4 sm:$0xff]  }
  0x55   : > { %6619 = vmatpush1.bf16.msra.mxu0 %v9314_v18  ;;  %v9400_v18 = vld [vmem:[%s14298_s1 + $0x8e4] ss:$16 sps:$4 sm:$0xff]  }
  0x56   : > { %6662 = vmatpush1.bf16.msra.mxu1 %v9317_v19  ;;  %6620 = vmatprep.subr.bf16.mxu0 %v9322_v20  ;;  %v9403_v19 = vld [vmem:[%s14298_s1 + $0xae4] ss:$16 sps:$4 sm:$0xff]   ;;  %v11220_v20 = vcombine.low %v11083_v36, %v11086_v37  ;;  %v9410_v36 = vld [vmem:[%s14298_s1 + $0x8a0] ss:$16 sps:$4 sm:$0xff]  }
  0x57   : > { %6663 = vmatprep.subr.bf16.mxu1 %v9325_v21  ;;  %v11224_v21 = vcombine.low %v11089_v38, %v11092_v39  ;;  %v9413_v37 = vld [vmem:[%s14298_s1 + $0xaa0] ss:$16 sps:$4 sm:$0xff]   ;;  %v9418_v38 = vld [vmem:[%s14298_s1 + $0x884] ss:$16 sps:$4 sm:$0xff]  }
  0x58   : > { %v9421_v39 = vld [vmem:[%s14298_s1 + $0xa84] ss:$16 sps:$4 sm:$0xff]  }
  0x59   : > { %6621 = vmatpush1.bf16.msra.mxu0 %v9320_v22  ;;  %v9398_v22 = vld [vmem:[%s14298_s1 + $0x8e0] ss:$16 sps:$4 sm:$0xff]  }
  0x5a   : > { %6664 = vmatpush1.bf16.msra.mxu1 %v9323_v23  ;;  %6622 = vmatprep.subr.bf16.mxu0 %v9328_v24  ;;  %v9401_v23 = vld [vmem:[%s14298_s1 + $0xae0] ss:$16 sps:$4 sm:$0xff]   ;;  %v9406_v24 = vld [vmem:[%s14298_s1 + $0x8c4] ss:$16 sps:$4 sm:$0xff]  }
  0x5b   : > { %6665 = vmatprep.subr.bf16.mxu1 %v9331_v25  ;;  %v9409_v25 = vld [vmem:[%s14298_s1 + $0xac4] ss:$16 sps:$4 sm:$0xff]  }
  0x5d   : > { %6623 = vmatpush1.bf16.msra.mxu0 %v9326_v26  ;;  %v9404_v26 = vld [vmem:[%s14298_s1 + $0x8c0] ss:$16 sps:$4 sm:$0xff]  }
  0x5e   : > { %6666 = vmatpush1.bf16.msra.mxu1 %v9329_v27  ;;  %6624 = vmatprep.subr.bf16.mxu0 %v9334_v28  ;;  %v9407_v27 = vld [vmem:[%s14298_s1 + $0xac0] ss:$16 sps:$4 sm:$0xff]  }
  0x5f   : > { %6667 = vmatprep.subr.bf16.mxu1 %v9337_v29  ;;  %v11245_v28 = vld [vmem:[%s10920_s5 + $0x20] sm:$0xff] }
  0x60   : > { %v11250_v29 = vld [vmem:[%s10920_s5 + $0xa0] sm:$0xff] }
  0x61   : > { %6625 = vmatpush1.bf16.msra.mxu0 %v9332_v30  ;;  %v11253_v30 = vld [vmem:[%s10920_s5 + $0x28] sm:$0xff] }
  0x62   : > { %6668 = vmatpush1.bf16.msra.mxu1 %v9335_v31  ;;  %6626 = vmatprep.subr.bf16.mxu0 %v9340_v32  ;;  %v11256_v31 = vld [vmem:[%s10920_s5 + $0xa8] sm:$0xff]  ;;  %v9412_v32 = vld [vmem:[%s14298_s1 + $0x8a4] ss:$16 sps:$4 sm:$0xff]  }
  0x63   : > { %6669 = vmatprep.subr.bf16.mxu1 %v9343_v33  ;;  %v11263_v33 = vcombine.high %v11245_v28, %v11250_v29 }
  0x65   : > { %6627 = vmatpush1.bf16.msra.mxu0 %v9338_v34  ;;  %v9415_v34 = vld [vmem:[%s14298_s1 + $0xaa4] ss:$16 sps:$4 sm:$0xff]  }
  0x66   : > { %6670 = vmatpush1.bf16.msra.mxu1 %v9341_v35  ;;  %6628 = vmatprep.subr.bf16.mxu0 %v9346_v40  ;;  %v11270_v35 = vcombine.high %v11253_v30, %v11256_v31  ;;  %v9416_v40 = vld [vmem:[%s14298_s1 + $0x880] ss:$16 sps:$4 sm:$0xff]  }
  0x67   : > { %6671 = vmatprep.subr.bf16.mxu1 %v9349_v42  ;;  %v9419_v42 = vld [vmem:[%s14298_s1 + $0xa80] ss:$16 sps:$4 sm:$0xff]  }
  0x69   : > { %6629 = vmatpush1.bf16.msra.mxu0 %v9344_v44  ;;  %v9424_v44 = vld [vmem:[%s14298_s1 + $0x864] ss:$16 sps:$4 sm:$0xff]  }
  0x6a   : > { %6672 = vmatpush1.bf16.msra.mxu1 %v9347_v45  ;;  %6630 = vmatprep.subr.bf16.mxu0 %v9352_v46  ;;  %v9427_v45 = vld [vmem:[%s14298_s1 + $0xa64] ss:$16 sps:$4 sm:$0xff]   ;;  %v9422_v46 = vld [vmem:[%s14298_s1 + $0x860] ss:$16 sps:$4 sm:$0xff]  }
  0x6b   : > { %6673 = vmatprep.subr.bf16.mxu1 %v9355_v47  ;;  %v9425_v47 = vld [vmem:[%s14298_s1 + $0xa60] ss:$16 sps:$4 sm:$0xff]  }
  0x6d   : > { %6631 = vmatpush2.bf16.msra.mxu0 %v9350_v48  ;;  %v9430_v48 = vld [vmem:[%s14298_s1 + $0x844] ss:$16 sps:$4 sm:$0xff]  }
  0x6e   : > { %6674 = vmatpush2.bf16.msra.mxu1 %v9353_v49  ;;  %6632 = vmatprep.subr.bf16.mxu0 %v9358_v50  ;;  %v9433_v49 = vld [vmem:[%s14298_s1 + $0xa44] ss:$16 sps:$4 sm:$0xff]   ;;  %v9428_v50 = vld [vmem:[%s14298_s1 + $0x840] ss:$16 sps:$4 sm:$0xff]  }
  0x6f   : > { %6675 = vmatprep.subr.bf16.mxu1 %v9361_v51  ;;  %v9431_v51 = vld [vmem:[%s14298_s1 + $0xa40] ss:$16 sps:$4 sm:$0xff]  }
  0x71   : > { %6633 = vmatpush2.bf16.msra.mxu0 %v9356_v52  ;;  %v9436_v52 = vld [vmem:[%s14298_s1 + $0x824] ss:$16 sps:$4 sm:$0xff]  }
  0x72   : > { %6676 = vmatpush2.bf16.msra.mxu1 %v9359_v54  ;;  %6634 = vmatprep.subr.bf16.mxu0 %v9364_v56  ;;  %v9439_v54 = vld [vmem:[%s14298_s1 + $0xa24] ss:$16 sps:$4 sm:$0xff]   ;;  %v9434_v56 = vld [vmem:[%s14298_s1 + $0x820] ss:$16 sps:$4 sm:$0xff]  }
  0x73   : > { %6677 = vmatprep.subr.bf16.mxu1 %v9367_v57  ;;  %v9437_v57 = vld [vmem:[%s14298_s1 + $0xa20] ss:$16 sps:$4 sm:$0xff]  }
  0x75   : > { %6635 = vmatpush2.bf16.msra.mxu0 %v9362_v58  ;;  %v9442_v58 = vld [vmem:[%s14298_s1 + $0x804] ss:$16 sps:$4 sm:$0xff]  }
  0x76   : > { %6678 = vmatpush2.bf16.msra.mxu1 %v9365_v59  ;;  %6636 = vmatprep.subr.bf16.mxu0 %v9370_v60  ;;  %v9445_v59 = vld [vmem:[%s14298_s1 + $0xa04] ss:$16 sps:$4 sm:$0xff]   ;;  %v9440_v60 = vld [vmem:[%s14298_s1 + $0x800] ss:$16 sps:$4 sm:$0xff]  }
  0x77   : > { %6679 = vmatprep.subr.bf16.mxu1 %v9373_v61  ;;  %v9443_v61 = vld [vmem:[%s14298_s1 + $0xa00] ss:$16 sps:$4 sm:$0xff]  }
  0x79   : > { %6637 = vmatpush2.bf16.msra.mxu0 %v9368_v62  ;;  %v9448_v62 = vld [vmem:[%s14298_s1 + $0x9e4] ss:$16 sps:$4 sm:$0xff]  }
  0x7a   : > { %6680 = vmatpush2.bf16.msra.mxu1 %v9371_v63  ;;  %6638 = vmatprep.subr.bf16.mxu0 %v9376_v0  ;;  %v9451_v63 = vld [vmem:[%s14298_s1 + $0xbe4] ss:$16 sps:$4 sm:$0xff]   ;;  %v9446_v0 = vld [vmem:[%s14298_s1 + $0x9e0] ss:$16 sps:$4 sm:$0xff]  }
  0x7b   : > { %6681 = vmatprep.subr.bf16.mxu1 %v9379_v1  ;;  %v9449_v1 = vld [vmem:[%s14298_s1 + $0xbe0] ss:$16 sps:$4 sm:$0xff]  }
  0x7d   : > { %6639 = vmatpush2.bf16.msra.mxu0 %v9374_v2  ;;  %v9454_v2 = vld [vmem:[%s14298_s1 + $0x9c4] ss:$16 sps:$4 sm:$0xff]  }
  0x7e   : > { %6682 = vmatpush2.bf16.msra.mxu1 %v9377_v3  ;;  %6640 = vmatprep.subr.bf16.mxu0 %v9382_v4  ;;  %v9457_v3 = vld [vmem:[%s14298_s1 + $0xbc4] ss:$16 sps:$4 sm:$0xff]   ;;  %v9452_v4 = vld [vmem:[%s14298_s1 + $0x9c0] ss:$16 sps:$4 sm:$0xff]  }
  0x7f   : > { %6683 = vmatprep.subr.bf16.mxu1 %v9385_v5  ;;  %v9455_v5 = vld [vmem:[%s14298_s1 + $0xbc0] ss:$16 sps:$4 sm:$0xff]  }
  0x81   : > { %6641 = vmatpush2.bf16.msra.mxu0 %v9380_v6  ;;  %v9460_v6 = vld [vmem:[%s14298_s1 + $0x9a4] ss:$16 sps:$4 sm:$0xff]  }
  0x82   : > { %6684 = vmatpush2.bf16.msra.mxu1 %v9383_v7  ;;  %6642 = vmatprep.subr.bf16.mxu0 %v9388_v10  ;;  %v9463_v7 = vld [vmem:[%s14298_s1 + $0xba4] ss:$16 sps:$4 sm:$0xff]   ;;  %v9458_v10 = vld [vmem:[%s14298_s1 + $0x9a0] ss:$16 sps:$4 sm:$0xff]  }
  0x83   : > { %6685 = vmatprep.subr.bf16.mxu1 %v9391_v11  ;;  %v9461_v11 = vld [vmem:[%s14298_s1 + $0xba0] ss:$16 sps:$4 sm:$0xff]  }
  0x85   : > { %6643 = vmatpush2.bf16.msra.mxu0 %v9386_v12  ;;  %v9466_v12 = vld [vmem:[%s14298_s1 + $0x984] ss:$16 sps:$4 sm:$0xff]  }
  0x86   : > { %6686 = vmatpush2.bf16.msra.mxu1 %v9389_v13  ;;  %6644 = vmatprep.subr.bf16.mxu0 %v9394_v14  ;;  %v9469_v13 = vld [vmem:[%s14298_s1 + $0xb84] ss:$16 sps:$4 sm:$0xff]   ;;  %v9464_v14 = vld [vmem:[%s14298_s1 + $0x980] ss:$16 sps:$4 sm:$0xff]  }
  0x87   : > { %6687 = vmatprep.subr.bf16.mxu1 %v9397_v15  ;;  %v9467_v15 = vld [vmem:[%s14298_s1 + $0xb80] ss:$16 sps:$4 sm:$0xff]  }
  0x89   : > { %6645 = vmatpush2.bf16.msra.mxu0 %v9392_v16  ;;  %v9472_v16 = vld [vmem:[%s14298_s1 + $0x964] ss:$16 sps:$4 sm:$0xff]  }
  0x8a   : > { %6688 = vmatpush2.bf16.msra.mxu1 %v9395_v17  ;;  %6700 = vmatprep.subr.bf16.mxu0 %v9400_v18  ;;  %v9475_v17 = vld [vmem:[%s14298_s1 + $0xb64] ss:$16 sps:$4 sm:$0xff]   ;;  %v9470_v18 = vld [vmem:[%s14298_s1 + $0x960] ss:$16 sps:$4 sm:$0xff]  }
  0x8b   : > { %6743 = vmatprep.subr.bf16.mxu1 %v9403_v19  ;;  %v9473_v19 = vld [vmem:[%s14298_s1 + $0xb60] ss:$16 sps:$4 sm:$0xff]  }
  0x8c   : > { %6647 = vmatmul.mubr.bf16.vlgmr.msra.gmra.mxu0 %v11220_v20 }
  0x8d   : > { %6690 = vmatmul.mubr.bf16.vlgmr.msra.gmra.mxu1 %v11224_v21  ;;  %6701 = vmatpush1.bf16.msra.mxu0 %v9398_v22  ;;  %v9478_v22 = vld [vmem:[%s14298_s1 + $0x944] ss:$16 sps:$4 sm:$0xff]  }
  0x8e   : > { %6744 = vmatpush1.bf16.msra.mxu1 %v9401_v23  ;;  %6702 = vmatprep.subr.bf16.mxu0 %v9406_v24  ;;  %v9481_v23 = vld [vmem:[%s14298_s1 + $0xb44] ss:$16 sps:$4 sm:$0xff]   ;;  %v9476_v24 = vld [vmem:[%s14298_s1 + $0x940] ss:$16 sps:$4 sm:$0xff]  }
  0x8f   : > { %6745 = vmatprep.subr.bf16.mxu1 %v9409_v25  ;;  %6732 = vmatprep.mubr.bf16.mxu0 %v11263_v33  ;;  %v9479_v25 = vld [vmem:[%s14298_s1 + $0xb40] ss:$16 sps:$4 sm:$0xff]  }
  0x90   : > { %6775 = vmatprep.mubr.bf16.mxu1 %v11270_v35 }
  0x91   : > { %6703 = vmatpush1.bf16.msra.mxu0 %v9404_v26  ;;  %v9484_v26 = vld [vmem:[%s14298_s1 + $0x924] ss:$16 sps:$4 sm:$0xff]  }
  0x92   : > { %6746 = vmatpush1.bf16.msra.mxu1 %v9407_v27  ;;  %6704 = vmatprep.subr.bf16.mxu0 %v9412_v32  ;;  %v9487_v27 = vld [vmem:[%s14298_s1 + $0xb24] ss:$16 sps:$4 sm:$0xff]   ;;  %v9482_v32 = vld [vmem:[%s14298_s1 + $0x920] ss:$16 sps:$4 sm:$0xff]  }
  0x93   : > { %6747 = vmatprep.subr.bf16.mxu1 %v9415_v34  ;;  %v9485_v34 = vld [vmem:[%s14298_s1 + $0xb20] ss:$16 sps:$4 sm:$0xff]  }
  0x95   : > { %6705 = vmatpush1.bf16.msra.mxu0 %v9410_v36  ;;  %v9490_v36 = vld [vmem:[%s14298_s1 + $0x904] ss:$16 sps:$4 sm:$0xff]  }
  0x96   : > { %6748 = vmatpush1.bf16.msra.mxu1 %v9413_v37  ;;  %6706 = vmatprep.subr.bf16.mxu0 %v9418_v38  ;;  %v9493_v37 = vld [vmem:[%s14298_s1 + $0xb04] ss:$16 sps:$4 sm:$0xff]   ;;  %v9488_v38 = vld [vmem:[%s14298_s1 + $0x900] ss:$16 sps:$4 sm:$0xff]  }
  0x97   : > { %6749 = vmatprep.subr.bf16.mxu1 %v9421_v39  ;;  %v9491_v39 = vld [vmem:[%s14298_s1 + $0xb00] ss:$16 sps:$4 sm:$0xff]  }
  0x99   : > { %6707 = vmatpush1.bf16.msra.mxu0 %v9416_v40  ;;  %v9496_v40 = vld [vmem:[%s14298_s1 + $0xce4] ss:$16 sps:$4 sm:$0xff]  }
  0x9a   : > { %6750 = vmatpush1.bf16.msra.mxu1 %v9419_v42  ;;  %6708 = vmatprep.subr.bf16.mxu0 %v9424_v44  ;;  %v9499_v42 = vld [vmem:[%s14298_s1 + $0xee4] ss:$16 sps:$4 sm:$0xff]   ;;  %v9494_v44 = vld [vmem:[%s14298_s1 + $0xce0] ss:$16 sps:$4 sm:$0xff]  }
  0x9b   : > { %6751 = vmatprep.subr.bf16.mxu1 %v9427_v45  ;;  %v9497_v45 = vld [vmem:[%s14298_s1 + $0xee0] ss:$16 sps:$4 sm:$0xff]  }
  0x9d   : > { %6709 = vmatpush1.bf16.msra.mxu0 %v9422_v46  ;;  %v11449_v46 = vld [vmem:[%s10920_s5 + $0x30] sm:$0xff] }
  0x9e   : > { %6752 = vmatpush1.bf16.msra.mxu1 %v9425_v47  ;;  %6710 = vmatprep.subr.bf16.mxu0 %v9430_v48  ;;  %v11452_v47 = vld [vmem:[%s10920_s5 + $0xb0] sm:$0xff]  ;;  %v11456_v48 = vcombine.low %v11245_v28, %v11250_v29 }
  0x9f   : > { %6753 = vmatprep.subr.bf16.mxu1 %v9433_v49  ;;  %v11460_v49 = vcombine.low %v11253_v30, %v11256_v31  ;;  %v9505_v28 = vld [vmem:[%s14298_s1 + $0xec4] ss:$16 sps:$4 sm:$0xff]   ;;  %v11476_v29 = vcombine.high %v11449_v46, %v11452_v47  ;;  %v9500_v31 = vld [vmem:[%s14298_s1 + $0xcc0] ss:$16 sps:$4 sm:$0xff]  }
  0xa1   : > { %6711 = vmatpush1.bf16.msra.mxu0 %v9428_v50  ;;  %v11463_v50 = vld [vmem:[%s10920_s5 + $0x38] sm:$0xff] }
  0xa2   : > { %6754 = vmatpush1.bf16.msra.mxu1 %v9431_v51  ;;  %6712 = vmatprep.subr.bf16.mxu0 %v9436_v52  ;;  %v11466_v51 = vld [vmem:[%s10920_s5 + $0xb8] sm:$0xff]  ;;  %v9502_v52 = vld [vmem:[%s14298_s1 + $0xcc4] ss:$16 sps:$4 sm:$0xff]  }
  0xa3   : > { %6755 = vmatprep.subr.bf16.mxu1 %v9439_v54  ;;  %v11480_v30 = vcombine.high %v11463_v50, %v11466_v51  ;;  %v9503_v54 = vld [vmem:[%s14298_s1 + $0xec0] ss:$16 sps:$4 sm:$0xff]  }
  0xa5   : > { %6713 = vmatpush1.bf16.msra.mxu0 %v9434_v56  ;;  %v9508_v56 = vld [vmem:[%s14298_s1 + $0xca4] ss:$16 sps:$4 sm:$0xff]  }
  0xa6   : > { %6756 = vmatpush1.bf16.msra.mxu1 %v9437_v57  ;;  %6714 = vmatprep.subr.bf16.mxu0 %v9442_v58  ;;  %v9511_v57 = vld [vmem:[%s14298_s1 + $0xea4] ss:$16 sps:$4 sm:$0xff]   ;;  %v9506_v58 = vld [vmem:[%s14298_s1 + $0xca0] ss:$16 sps:$4 sm:$0xff]  }
  0xa7   : > { %6757 = vmatprep.subr.bf16.mxu1 %v9445_v59  ;;  %v9509_v59 = vld [vmem:[%s14298_s1 + $0xea0] ss:$16 sps:$4 sm:$0xff]  }
  0xa9   : > { %6715 = vmatpush1.bf16.msra.mxu0 %v9440_v60  ;;  %v9514_v60 = vld [vmem:[%s14298_s1 + $0xc84] ss:$16 sps:$4 sm:$0xff]  }
  0xaa   : > { %6758 = vmatpush1.bf16.msra.mxu1 %v9443_v61  ;;  %6716 = vmatprep.subr.bf16.mxu0 %v9448_v62  ;;  %v9517_v61 = vld [vmem:[%s14298_s1 + $0xe84] ss:$16 sps:$4 sm:$0xff]   ;;  %v9512_v62 = vld [vmem:[%s14298_s1 + $0xc80] ss:$16 sps:$4 sm:$0xff]  }
  0xab   : > { %6759 = vmatprep.subr.bf16.mxu1 %v9451_v63  ;;  %v9515_v63 = vld [vmem:[%s14298_s1 + $0xe80] ss:$16 sps:$4 sm:$0xff]  }
  0xad   : > { %6717 = vmatpush2.bf16.msra.mxu0 %v9446_v0  ;;  %v9520_v0 = vld [vmem:[%s14298_s1 + $0xc64] ss:$16 sps:$4 sm:$0xff]  }
  0xae   : > { %6760 = vmatpush2.bf16.msra.mxu1 %v9449_v1  ;;  %6718 = vmatprep.subr.bf16.mxu0 %v9454_v2  ;;  %v9523_v1 = vld [vmem:[%s14298_s1 + $0xe64] ss:$16 sps:$4 sm:$0xff]   ;;  %v9518_v2 = vld [vmem:[%s14298_s1 + $0xc60] ss:$16 sps:$4 sm:$0xff]  }
  0xaf   : > { %6761 = vmatprep.subr.bf16.mxu1 %v9457_v3  ;;  %v9521_v3 = vld [vmem:[%s14298_s1 + $0xe60] ss:$16 sps:$4 sm:$0xff]  }
  0xb1   : > { %6719 = vmatpush2.bf16.msra.mxu0 %v9452_v4  ;;  %v9526_v4 = vld [vmem:[%s14298_s1 + $0xc44] ss:$16 sps:$4 sm:$0xff]  }
  0xb2   : > { %6762 = vmatpush2.bf16.msra.mxu1 %v9455_v5  ;;  %6720 = vmatprep.subr.bf16.mxu0 %v9460_v6  ;;  %v9529_v5 = vld [vmem:[%s14298_s1 + $0xe44] ss:$16 sps:$4 sm:$0xff]   ;;  %v9524_v6 = vld [vmem:[%s14298_s1 + $0xc40] ss:$16 sps:$4 sm:$0xff]  }
  0xb3   : > { %6763 = vmatprep.subr.bf16.mxu1 %v9463_v7  ;;  %v9527_v7 = vld [vmem:[%s14298_s1 + $0xe40] ss:$16 sps:$4 sm:$0xff]  }
  0xb5   : > { %6721 = vmatpush2.bf16.msra.mxu0 %v9458_v10  ;;  %v9532_v10 = vld [vmem:[%s14298_s1 + $0xc24] ss:$16 sps:$4 sm:$0xff]  }
  0xb6   : > { %6764 = vmatpush2.bf16.msra.mxu1 %v9461_v11  ;;  %6722 = vmatprep.subr.bf16.mxu0 %v9466_v12  ;;  %v9535_v11 = vld [vmem:[%s14298_s1 + $0xe24] ss:$16 sps:$4 sm:$0xff]   ;;  %v9530_v12 = vld [vmem:[%s14298_s1 + $0xc20] ss:$16 sps:$4 sm:$0xff]  }
  0xb7   : > { %6765 = vmatprep.subr.bf16.mxu1 %v9469_v13  ;;  %v9533_v13 = vld [vmem:[%s14298_s1 + $0xe20] ss:$16 sps:$4 sm:$0xff]  }
  0xb9   : > { %6723 = vmatpush2.bf16.msra.mxu0 %v9464_v14  ;;  %v9538_v14 = vld [vmem:[%s14298_s1 + $0xc04] ss:$16 sps:$4 sm:$0xff]  }
  0xba   : > { %6766 = vmatpush2.bf16.msra.mxu1 %v9467_v15  ;;  %6724 = vmatprep.subr.bf16.mxu0 %v9472_v16  ;;  %v9541_v15 = vld [vmem:[%s14298_s1 + $0xe04] ss:$16 sps:$4 sm:$0xff]   ;;  %v9536_v16 = vld [vmem:[%s14298_s1 + $0xc00] ss:$16 sps:$4 sm:$0xff]  }
  0xbb   : > { %6767 = vmatprep.subr.bf16.mxu1 %v9475_v17  ;;  %v9539_v17 = vld [vmem:[%s14298_s1 + $0xe00] ss:$16 sps:$4 sm:$0xff]  }
  0xbd   : > { %6725 = vmatpush2.bf16.msra.mxu0 %v9470_v18  ;;  %v9544_v18 = vld [vmem:[%s14298_s1 + $0xde4] ss:$16 sps:$4 sm:$0xff]  }
  0xbe   : > { %6768 = vmatpush2.bf16.msra.mxu1 %v9473_v19  ;;  %6726 = vmatprep.subr.bf16.mxu0 %v9478_v22  ;;  %v9547_v19 = vld [vmem:[%s14298_s1 + $0xfe4] ss:$16 sps:$4 sm:$0xff]   ;;  %v9542_v22 = vld [vmem:[%s14298_s1 + $0xde0] ss:$16 sps:$4 sm:$0xff]  }
  0xbf   : > { %6769 = vmatprep.subr.bf16.mxu1 %v9481_v23  ;;  %v9545_v23 = vld [vmem:[%s14298_s1 + $0xfe0] ss:$16 sps:$4 sm:$0xff]  }
  0xc1   : > { %6727 = vmatpush2.bf16.msra.mxu0 %v9476_v24  ;;  %v9550_v24 = vld [vmem:[%s14298_s1 + $0xdc4] ss:$16 sps:$4 sm:$0xff]  }
  0xc2   : > { %6770 = vmatpush2.bf16.msra.mxu1 %v9479_v25  ;;  %6728 = vmatprep.subr.bf16.mxu0 %v9484_v26  ;;  %v9553_v25 = vld [vmem:[%s14298_s1 + $0xfc4] ss:$16 sps:$4 sm:$0xff]   ;;  %v9548_v26 = vld [vmem:[%s14298_s1 + $0xdc0] ss:$16 sps:$4 sm:$0xff]  }
  0xc3   : > { %6771 = vmatprep.subr.bf16.mxu1 %v9487_v27  ;;  %v9551_v27 = vld [vmem:[%s14298_s1 + $0xfc0] ss:$16 sps:$4 sm:$0xff]  }
  0xc5   : > { %6729 = vmatpush2.bf16.msra.mxu0 %v9482_v32  ;;  %v9556_v32 = vld [vmem:[%s14298_s1 + $0xda4] ss:$16 sps:$4 sm:$0xff]  }
  0xc6   : > { %6772 = vmatpush2.bf16.msra.mxu1 %v9485_v34  ;;  %6730 = vmatprep.subr.bf16.mxu0 %v9490_v36  ;;  %v9559_v34 = vld [vmem:[%s14298_s1 + $0xfa4] ss:$16 sps:$4 sm:$0xff]   ;;  %v9554_v36 = vld [vmem:[%s14298_s1 + $0xda0] ss:$16 sps:$4 sm:$0xff]  }
  0xc7   : > { %6773 = vmatprep.subr.bf16.mxu1 %v9493_v37  ;;  %v9557_v37 = vld [vmem:[%s14298_s1 + $0xfa0] ss:$16 sps:$4 sm:$0xff]  }
  0xc9   : > { %6731 = vmatpush2.bf16.msra.mxu0 %v9488_v38  ;;  %v9562_v38 = vld [vmem:[%s14298_s1 + $0xd84] ss:$16 sps:$4 sm:$0xff]  }
  0xca   : > { %6774 = vmatpush2.bf16.msra.mxu1 %v9491_v39  ;;  %6786 = vmatprep.subr.bf16.mxu0 %v9496_v40  ;;  %v9565_v39 = vld [vmem:[%s14298_s1 + $0xf84] ss:$16 sps:$4 sm:$0xff]   ;;  %v9560_v40 = vld [vmem:[%s14298_s1 + $0xd80] ss:$16 sps:$4 sm:$0xff]  }
  0xcb   : > { %6829 = vmatprep.subr.bf16.mxu1 %v9499_v42  ;;  %v9563_v42 = vld [vmem:[%s14298_s1 + $0xf80] ss:$16 sps:$4 sm:$0xff]  }
  0xcc   : > { %6733 = vmatmul.mubr.bf16.vlgmr.msra.gmra.mxu0 %v11456_v48 }
  0xcd   : > { %6776 = vmatmul.mubr.bf16.vlgmr.msra.gmra.mxu1 %v11460_v49  ;;  %6787 = vmatpush1.bf16.msra.mxu0 %v9494_v44  ;;  %v9568_v44 = vld [vmem:[%s14298_s1 + $0xd64] ss:$16 sps:$4 sm:$0xff]  }
  0xce   : > { %6830 = vmatpush1.bf16.msra.mxu1 %v9497_v45  ;;  %6788 = vmatprep.subr.bf16.mxu0 %v9502_v52  ;;  %v9571_v45 = vld [vmem:[%s14298_s1 + $0xf64] ss:$16 sps:$4 sm:$0xff]   ;;  %v9566_v52 = vld [vmem:[%s14298_s1 + $0xd60] ss:$16 sps:$4 sm:$0xff]  }
  0xcf   : > { %6831 = vmatprep.subr.bf16.mxu1 %v9505_v28  ;;  %6818 = vmatprep.mubr.bf16.mxu0 %v11476_v29  ;;  %v9569_v28 = vld [vmem:[%s14298_s1 + $0xf60] ss:$16 sps:$4 sm:$0xff]  }
  0xd0   : > { %6861 = vmatprep.mubr.bf16.mxu1 %v11480_v30 }
  0xd1   : > { %6789 = vmatpush1.bf16.msra.mxu0 %v9500_v31  ;;  %v9574_v31 = vld [vmem:[%s14298_s1 + $0xd44] ss:$16 sps:$4 sm:$0xff]  }
  0xd2   : > { %6832 = vmatpush1.bf16.msra.mxu1 %v9503_v54  ;;  %6790 = vmatprep.subr.bf16.mxu0 %v9508_v56  ;;  %v9577_v54 = vld [vmem:[%s14298_s1 + $0xf44] ss:$16 sps:$4 sm:$0xff]   ;;  %v9572_v56 = vld [vmem:[%s14298_s1 + $0xd40] ss:$16 sps:$4 sm:$0xff]  }
  0xd3   : > { %6833 = vmatprep.subr.bf16.mxu1 %v9511_v57  ;;  %v9575_v57 = vld [vmem:[%s14298_s1 + $0xf40] ss:$16 sps:$4 sm:$0xff]  }
  0xd5   : > { %6791 = vmatpush1.bf16.msra.mxu0 %v9506_v58  ;;  %v9580_v58 = vld [vmem:[%s14298_s1 + $0xd24] ss:$16 sps:$4 sm:$0xff]  }
  0xd6   : > { %6834 = vmatpush1.bf16.msra.mxu1 %v9509_v59  ;;  %6792 = vmatprep.subr.bf16.mxu0 %v9514_v60  ;;  %v9583_v59 = vld [vmem:[%s14298_s1 + $0xf24] ss:$16 sps:$4 sm:$0xff]   ;;  %v9578_v60 = vld [vmem:[%s14298_s1 + $0xd20] ss:$16 sps:$4 sm:$0xff]  }
  0xd7   : > { %6835 = vmatprep.subr.bf16.mxu1 %v9517_v61  ;;  %v9581_v61 = vld [vmem:[%s14298_s1 + $0xf20] ss:$16 sps:$4 sm:$0xff]  }
  0xd9   : > { %6793 = vmatpush1.bf16.msra.mxu0 %v9512_v62  ;;  %v9586_v62 = vld [vmem:[%s14298_s1 + $0xd04] ss:$16 sps:$4 sm:$0xff]  }
  0xda   : > { %6836 = vmatpush1.bf16.msra.mxu1 %v9515_v63  ;;  %6794 = vmatprep.subr.bf16.mxu0 %v9520_v0  ;;  %v9589_v63 = vld [vmem:[%s14298_s1 + $0xf04] ss:$16 sps:$4 sm:$0xff]   ;;  %v9584_v0 = vld [vmem:[%s14298_s1 + $0xd00] ss:$16 sps:$4 sm:$0xff]  }
  0xdb   : > { %6837 = vmatprep.subr.bf16.mxu1 %v9523_v1  ;;  %v9587_v1 = vld [vmem:[%s14298_s1 + $0xf00] ss:$16 sps:$4 sm:$0xff]  }
  0xdd   : > { %6795 = vmatpush1.bf16.msra.mxu0 %v9518_v2  ;;  %v9592_v2 = vld [vmem:[%s14298_s1 + $0x10e4] ss:$16 sps:$4 sm:$0xff]  }
  0xde   : > { %6838 = vmatpush1.bf16.msra.mxu1 %v9521_v3  ;;  %6796 = vmatprep.subr.bf16.mxu0 %v9526_v4  ;;  %v9595_v3 = vld [vmem:[%s14298_s1 + $0x12e4] ss:$16 sps:$4 sm:$0xff]   ;;  %v9590_v4 = vld [vmem:[%s14298_s1 + $0x10e0] ss:$16 sps:$4 sm:$0xff]  }
  0xdf   : > { %6839 = vmatprep.subr.bf16.mxu1 %v9529_v5  ;;  %v9593_v5 = vld [vmem:[%s14298_s1 + $0x12e0] ss:$16 sps:$4 sm:$0xff]  }
  0xe1   : > { %6797 = vmatpush1.bf16.msra.mxu0 %v9524_v6  ;;  %v11673_v6 = vld [vmem:[%s10920_s5 + $0x40] sm:$0xff] }
  0xe2   : > { %6840 = vmatpush1.bf16.msra.mxu1 %v9527_v7  ;;  %6798 = vmatprep.subr.bf16.mxu0 %v9532_v10  ;;  %v11676_v7 = vld [vmem:[%s10920_s5 + $0xc0] sm:$0xff]  ;;  %v11680_v10 = vcombine.low %v11449_v46, %v11452_v47 }
  0xe3   : > { %6841 = vmatprep.subr.bf16.mxu1 %v9535_v11  ;;  %v11684_v11 = vcombine.low %v11463_v50, %v11466_v51  ;;  %v9601_v46 = vld [vmem:[%s14298_s1 + $0x12c4] ss:$16 sps:$4 sm:$0xff]   ;;  %v11700_v47 = vcombine.high %v11673_v6, %v11676_v7  ;;  %v9596_v51 = vld [vmem:[%s14298_s1 + $0x10c0] ss:$16 sps:$4 sm:$0xff]  }
  0xe5   : > { %6799 = vmatpush1.bf16.msra.mxu0 %v9530_v12  ;;  %v11687_v12 = vld [vmem:[%s10920_s5 + $0x48] sm:$0xff] }
  0xe6   : > { %6842 = vmatpush1.bf16.msra.mxu1 %v9533_v13  ;;  %6800 = vmatprep.subr.bf16.mxu0 %v9538_v14  ;;  %v11690_v13 = vld [vmem:[%s10920_s5 + $0xc8] sm:$0xff]  ;;  %v9598_v14 = vld [vmem:[%s14298_s1 + $0x10c4] ss:$16 sps:$4 sm:$0xff]  }
  0xe7   : > { %6843 = vmatprep.subr.bf16.mxu1 %v9541_v15  ;;  %v11704_v50 = vcombine.high %v11687_v12, %v11690_v13  ;;  %v9599_v15 = vld [vmem:[%s14298_s1 + $0x12c0] ss:$16 sps:$4 sm:$0xff]  }
  0xe9   : > { %6801 = vmatpush1.bf16.msra.mxu0 %v9536_v16  ;;  %v9604_v16 = vld [vmem:[%s14298_s1 + $0x10a4] ss:$16 sps:$4 sm:$0xff]  }
  0xea   : > { %6844 = vmatpush1.bf16.msra.mxu1 %v9539_v17  ;;  %6802 = vmatprep.subr.bf16.mxu0 %v9544_v18  ;;  %v9607_v17 = vld [vmem:[%s14298_s1 + $0x12a4] ss:$16 sps:$4 sm:$0xff]   ;;  %v9602_v18 = vld [vmem:[%s14298_s1 + $0x10a0] ss:$16 sps:$4 sm:$0xff]  }
  0xeb   : > { %6845 = vmatprep.subr.bf16.mxu1 %v9547_v19  ;;  %v9605_v19 = vld [vmem:[%s14298_s1 + $0x12a0] ss:$16 sps:$4 sm:$0xff]  }
  0xed   : > { %6803 = vmatpush2.bf16.msra.mxu0 %v9542_v22  ;;  %v9610_v22 = vld [vmem:[%s14298_s1 + $0x1084] ss:$16 sps:$4 sm:$0xff]  }
  0xee   : > { %6846 = vmatpush2.bf16.msra.mxu1 %v9545_v23  ;;  %6804 = vmatprep.subr.bf16.mxu0 %v9550_v24  ;;  %v9613_v23 = vld [vmem:[%s14298_s1 + $0x1284] ss:$16 sps:$4 sm:$0xff]   ;;  %v9608_v24 = vld [vmem:[%s14298_s1 + $0x1080] ss:$16 sps:$4 sm:$0xff]  }
  0xef   : > { %6847 = vmatprep.subr.bf16.mxu1 %v9553_v25  ;;  %v9611_v25 = vld [vmem:[%s14298_s1 + $0x1280] ss:$16 sps:$4 sm:$0xff]  }
  0xf1   : > { %6805 = vmatpush2.bf16.msra.mxu0 %v9548_v26  ;;  %v9616_v26 = vld [vmem:[%s14298_s1 + $0x1064] ss:$16 sps:$4 sm:$0xff]  }
  0xf2   : > { %6848 = vmatpush2.bf16.msra.mxu1 %v9551_v27  ;;  %6806 = vmatprep.subr.bf16.mxu0 %v9556_v32  ;;  %v9619_v27 = vld [vmem:[%s14298_s1 + $0x1264] ss:$16 sps:$4 sm:$0xff]   ;;  %v9614_v32 = vld [vmem:[%s14298_s1 + $0x1060] ss:$16 sps:$4 sm:$0xff]  }
  0xf3   : > { %6849 = vmatprep.subr.bf16.mxu1 %v9559_v34  ;;  %v9617_v34 = vld [vmem:[%s14298_s1 + $0x1260] ss:$16 sps:$4 sm:$0xff]  }
  0xf5   : > { %6807 = vmatpush2.bf16.msra.mxu0 %v9554_v36  ;;  %v9622_v36 = vld [vmem:[%s14298_s1 + $0x1044] ss:$16 sps:$4 sm:$0xff]  }
  0xf6   : > { %6850 = vmatpush2.bf16.msra.mxu1 %v9557_v37  ;;  %6808 = vmatprep.subr.bf16.mxu0 %v9562_v38  ;;  %v9625_v37 = vld [vmem:[%s14298_s1 + $0x1244] ss:$16 sps:$4 sm:$0xff]   ;;  %v9620_v38 = vld [vmem:[%s14298_s1 + $0x1040] ss:$16 sps:$4 sm:$0xff]  }
  0xf7   : > { %6851 = vmatprep.subr.bf16.mxu1 %v9565_v39  ;;  %v9623_v39 = vld [vmem:[%s14298_s1 + $0x1240] ss:$16 sps:$4 sm:$0xff]  }
  0xf9   : > { %6809 = vmatpush2.bf16.msra.mxu0 %v9560_v40  ;;  %v9628_v40 = vld [vmem:[%s14298_s1 + $0x1024] ss:$16 sps:$4 sm:$0xff]  }
  0xfa   : > { %6852 = vmatpush2.bf16.msra.mxu1 %v9563_v42  ;;  %6810 = vmatprep.subr.bf16.mxu0 %v9568_v44  ;;  %v9631_v42 = vld [vmem:[%s14298_s1 + $0x1224] ss:$16 sps:$4 sm:$0xff]   ;;  %v9626_v44 = vld [vmem:[%s14298_s1 + $0x1020] ss:$16 sps:$4 sm:$0xff]  }
  0xfb   : > { %6853 = vmatprep.subr.bf16.mxu1 %v9571_v45  ;;  %v9629_v45 = vld [vmem:[%s14298_s1 + $0x1220] ss:$16 sps:$4 sm:$0xff]  }
  0xfd   : > { %6811 = vmatpush2.bf16.msra.mxu0 %v9566_v52  ;;  %v9634_v52 = vld [vmem:[%s14298_s1 + $0x1004] ss:$16 sps:$4 sm:$0xff]  }
  0xfe   : > { %6854 = vmatpush2.bf16.msra.mxu1 %v9569_v28  ;;  %6812 = vmatprep.subr.bf16.mxu0 %v9574_v31  ;;  %v9637_v28 = vld [vmem:[%s14298_s1 + $0x1204] ss:$16 sps:$4 sm:$0xff]   ;;  %v9632_v31 = vld [vmem:[%s14298_s1 + $0x1000] ss:$16 sps:$4 sm:$0xff]  }
  0xff   : > { %6855 = vmatprep.subr.bf16.mxu1 %v9577_v54  ;;  %v9635_v54 = vld [vmem:[%s14298_s1 + $0x1200] ss:$16 sps:$4 sm:$0xff]  }
 0x101   : > { %6813 = vmatpush2.bf16.msra.mxu0 %v9572_v56  ;;  %v9640_v56 = vld [vmem:[%s14298_s1 + $0x11e4] ss:$16 sps:$4 sm:$0xff]  }
 0x102   : > { %6856 = vmatpush2.bf16.msra.mxu1 %v9575_v57  ;;  %6814 = vmatprep.subr.bf16.mxu0 %v9580_v58  ;;  %v9643_v57 = vld [vmem:[%s14298_s1 + $0x13e4] ss:$16 sps:$4 sm:$0xff]   ;;  %v9638_v58 = vld [vmem:[%s14298_s1 + $0x11e0] ss:$16 sps:$4 sm:$0xff]  }
 0x103   : > { %6857 = vmatprep.subr.bf16.mxu1 %v9583_v59  ;;  %v9641_v59 = vld [vmem:[%s14298_s1 + $0x13e0] ss:$16 sps:$4 sm:$0xff]  }
 0x105   : > { %6815 = vmatpush2.bf16.msra.mxu0 %v9578_v60  ;;  %v9646_v60 = vld [vmem:[%s14298_s1 + $0x11c4] ss:$16 sps:$4 sm:$0xff]  }
 0x106   : > { %6858 = vmatpush2.bf16.msra.mxu1 %v9581_v61  ;;  %6816 = vmatprep.subr.bf16.mxu0 %v9586_v62  ;;  %v9649_v61 = vld [vmem:[%s14298_s1 + $0x13c4] ss:$16 sps:$4 sm:$0xff]   ;;  %v9644_v62 = vld [vmem:[%s14298_s1 + $0x11c0] ss:$16 sps:$4 sm:$0xff]  }
 0x107   : > { %6859 = vmatprep.subr.bf16.mxu1 %v9589_v63  ;;  %v9647_v63 = vld [vmem:[%s14298_s1 + $0x13c0] ss:$16 sps:$4 sm:$0xff]  }
 0x109   : > { %6817 = vmatpush2.bf16.msra.mxu0 %v9584_v0  ;;  %v9652_v0 = vld [vmem:[%s14298_s1 + $0x11a4] ss:$16 sps:$4 sm:$0xff]  }
 0x10a   : > { %6860 = vmatpush2.bf16.msra.mxu1 %v9587_v1  ;;  %6872 = vmatprep.subr.bf16.mxu0 %v9592_v2  ;;  %v9655_v1 = vld [vmem:[%s14298_s1 + $0x13a4] ss:$16 sps:$4 sm:$0xff]   ;;  %v9650_v2 = vld [vmem:[%s14298_s1 + $0x11a0] ss:$16 sps:$4 sm:$0xff]  }
 0x10b   : > { %6915 = vmatprep.subr.bf16.mxu1 %v9595_v3  ;;  %v9653_v3 = vld [vmem:[%s14298_s1 + $0x13a0] ss:$16 sps:$4 sm:$0xff]  }
 0x10c   : > { %6819 = vmatmul.mubr.bf16.vlgmr.msra.gmra.mxu0 %v11680_v10 }
 0x10d   : > { %6862 = vmatmul.mubr.bf16.vlgmr.msra.gmra.mxu1 %v11684_v11  ;;  %6873 = vmatpush1.bf16.msra.mxu0 %v9590_v4  ;;  %v9658_v4 = vld [vmem:[%s14298_s1 + $0x1184] ss:$16 sps:$4 sm:$0xff]  }
 0x10e   : > { %6916 = vmatpush1.bf16.msra.mxu1 %v9593_v5  ;;  %6874 = vmatprep.subr.bf16.mxu0 %v9598_v14  ;;  %v9661_v5 = vld [vmem:[%s14298_s1 + $0x1384] ss:$16 sps:$4 sm:$0xff]   ;;  %v9656_v14 = vld [vmem:[%s14298_s1 + $0x1180] ss:$16 sps:$4 sm:$0xff]  }
 0x10f   : > { %6917 = vmatprep.subr.bf16.mxu1 %v9601_v46  ;;  %6904 = vmatprep.mubr.bf16.mxu0 %v11700_v47  ;;  %v9659_v46 = vld [vmem:[%s14298_s1 + $0x1380] ss:$16 sps:$4 sm:$0xff]  }
 0x110   : > { %6947 = vmatprep.mubr.bf16.mxu1 %v11704_v50 }
 0x111   : > { %6875 = vmatpush1.bf16.msra.mxu0 %v9596_v51  ;;  %v9664_v51 = vld [vmem:[%s14298_s1 + $0x1164] ss:$16 sps:$4 sm:$0xff]  }
 0x112   : > { %6918 = vmatpush1.bf16.msra.mxu1 %v9599_v15  ;;  %6876 = vmatprep.subr.bf16.mxu0 %v9604_v16  ;;  %v9667_v15 = vld [vmem:[%s14298_s1 + $0x1364] ss:$16 sps:$4 sm:$0xff]   ;;  %v9662_v16 = vld [vmem:[%s14298_s1 + $0x1160] ss:$16 sps:$4 sm:$0xff]  }
 0x113   : > { %6919 = vmatprep.subr.bf16.mxu1 %v9607_v17  ;;  %v9665_v17 = vld [vmem:[%s14298_s1 + $0x1360] ss:$16 sps:$4 sm:$0xff]  }
 0x115   : > { %6877 = vmatpush1.bf16.msra.mxu0 %v9602_v18  ;;  %v9670_v18 = vld [vmem:[%s14298_s1 + $0x1144] ss:$16 sps:$4 sm:$0xff]  }
 0x116   : > { %6920 = vmatpush1.bf16.msra.mxu1 %v9605_v19  ;;  %6878 = vmatprep.subr.bf16.mxu0 %v9610_v22  ;;  %v9673_v19 = vld [vmem:[%s14298_s1 + $0x1344] ss:$16 sps:$4 sm:$0xff]   ;;  %v9668_v22 = vld [vmem:[%s14298_s1 + $0x1140] ss:$16 sps:$4 sm:$0xff]  }
 0x117   : > { %6921 = vmatprep.subr.bf16.mxu1 %v9613_v23  ;;  %v9671_v23 = vld [vmem:[%s14298_s1 + $0x1340] ss:$16 sps:$4 sm:$0xff]  }
 0x119   : > { %6879 = vmatpush1.bf16.msra.mxu0 %v9608_v24  ;;  %v9676_v24 = vld [vmem:[%s14298_s1 + $0x1124] ss:$16 sps:$4 sm:$0xff]  }
 0x11a   : > { %6922 = vmatpush1.bf16.msra.mxu1 %v9611_v25  ;;  %6880 = vmatprep.subr.bf16.mxu0 %v9616_v26  ;;  %v9679_v25 = vld [vmem:[%s14298_s1 + $0x1324] ss:$16 sps:$4 sm:$0xff]   ;;  %v9674_v26 = vld [vmem:[%s14298_s1 + $0x1120] ss:$16 sps:$4 sm:$0xff]  }
 0x11b   : > { %6923 = vmatprep.subr.bf16.mxu1 %v9619_v27  ;;  %v9677_v27 = vld [vmem:[%s14298_s1 + $0x1320] ss:$16 sps:$4 sm:$0xff]  }
 0x11d   : > { %6881 = vmatpush1.bf16.msra.mxu0 %v9614_v32  ;;  %v9682_v32 = vld [vmem:[%s14298_s1 + $0x1104] ss:$16 sps:$4 sm:$0xff]  }
 0x11e   : > { %6924 = vmatpush1.bf16.msra.mxu1 %v9617_v34  ;;  %6882 = vmatprep.subr.bf16.mxu0 %v9622_v36  ;;  %v9685_v34 = vld [vmem:[%s14298_s1 + $0x1304] ss:$16 sps:$4 sm:$0xff]   ;;  %v9680_v36 = vld [vmem:[%s14298_s1 + $0x1100] ss:$16 sps:$4 sm:$0xff]  }
 0x11f   : > { %6925 = vmatprep.subr.bf16.mxu1 %v9625_v37  ;;  %v9683_v37 = vld [vmem:[%s14298_s1 + $0x1300] ss:$16 sps:$4 sm:$0xff]  }
 0x121   : > { %6883 = vmatpush1.bf16.msra.mxu0 %v9620_v38  ;;  %v9688_v38 = vld [vmem:[%s14298_s1 + $0x14e4] ss:$16 sps:$4 sm:$0xff]  }
 0x122   : > { %6926 = vmatpush1.bf16.msra.mxu1 %v9623_v39  ;;  %6884 = vmatprep.subr.bf16.mxu0 %v9628_v40  ;;  %v9691_v39 = vld [vmem:[%s14298_s1 + $0x16e4] ss:$16 sps:$4 sm:$0xff]  }
 0x123   : > { %6927 = vmatprep.subr.bf16.mxu1 %v9631_v42  ;;  %v11891_v40 = vld [vmem:[%s10920_s5 + $0x50] sm:$0xff] }
 0x124   : > { %v9686_v42 = vld [vmem:[%s14298_s1 + $0x14e0] ss:$16 sps:$4 sm:$0xff]  }
 0x125   : > { %6885 = vmatpush1.bf16.msra.mxu0 %v9626_v44  ;;  %v11898_v44 = vcombine.low %v11673_v6, %v11676_v7  ;;  %v9694_v6 = vld [vmem:[%s14298_s1 + $0x14c4] ss:$16 sps:$4 sm:$0xff]  }
 0x126   : > { %6928 = vmatpush1.bf16.msra.mxu1 %v9629_v45  ;;  %6886 = vmatprep.subr.bf16.mxu0 %v9634_v52  ;;  %v11902_v45 = vcombine.low %v11687_v12, %v11690_v13  ;;  %v11905_v52 = vld [vmem:[%s10920_s5 + $0xd0] sm:$0xff] }
 0x127   : > { %6929 = vmatprep.subr.bf16.mxu1 %v9637_v28  ;;  %v11908_v28 = vld [vmem:[%s10920_s5 + $0x58] sm:$0xff]  ;;  %v9697_v7 = vld [vmem:[%s14298_s1 + $0x16c4] ss:$16 sps:$4 sm:$0xff]   ;;  %v9692_v12 = vld [vmem:[%s14298_s1 + $0x14c0] ss:$16 sps:$4 sm:$0xff]  }
 0x128   : > { %v9695_v13 = vld [vmem:[%s14298_s1 + $0x16c0] ss:$16 sps:$4 sm:$0xff]  }
 0x129   : > { %6887 = vmatpush1.bf16.msra.mxu0 %v9632_v31  ;;  %v11911_v31 = vld [vmem:[%s10920_s5 + $0xd8] sm:$0xff] }
 0x12a   : > { %6930 = vmatpush1.bf16.msra.mxu1 %v9635_v54  ;;  %6888 = vmatprep.subr.bf16.mxu0 %v9640_v56  ;;  %v9689_v54 = vld [vmem:[%s14298_s1 + $0x16e0] ss:$16 sps:$4 sm:$0xff]   ;;  %v11930_v56 = vcombine.high %v11891_v40, %v11905_v52 }
 0x12b   : > { %6931 = vmatprep.subr.bf16.mxu1 %v9643_v57  ;;  %v11934_v57 = vcombine.high %v11908_v28, %v11911_v31 }
 0x12d   : > { %6889 = vmatpush2.bf16.msra.mxu0 %v9638_v58  ;;  %v9700_v58 = vld [vmem:[%s14298_s1 + $0x14a4] ss:$16 sps:$4 sm:$0xff]  }
 0x12e   : > { %6932 = vmatpush2.bf16.msra.mxu1 %v9641_v59  ;;  %6890 = vmatprep.subr.bf16.mxu0 %v9646_v60  ;;  %v9703_v59 = vld [vmem:[%s14298_s1 + $0x16a4] ss:$16 sps:$4 sm:$0xff]   ;;  %v9698_v60 = vld [vmem:[%s14298_s1 + $0x14a0] ss:$16 sps:$4 sm:$0xff]  }
 0x12f   : > { %6933 = vmatprep.subr.bf16.mxu1 %v9649_v61  ;;  %v9701_v61 = vld [vmem:[%s14298_s1 + $0x16a0] ss:$16 sps:$4 sm:$0xff]  }
 0x131   : > { %6891 = vmatpush2.bf16.msra.mxu0 %v9644_v62  ;;  %v9706_v62 = vld [vmem:[%s14298_s1 + $0x1484] ss:$16 sps:$4 sm:$0xff]  }
 0x132   : > { %6934 = vmatpush2.bf16.msra.mxu1 %v9647_v63  ;;  %6892 = vmatprep.subr.bf16.mxu0 %v9652_v0  ;;  %v9709_v63 = vld [vmem:[%s14298_s1 + $0x1684] ss:$16 sps:$4 sm:$0xff]   ;;  %v9704_v0 = vld [vmem:[%s14298_s1 + $0x1480] ss:$16 sps:$4 sm:$0xff]  }
 0x133   : > { %6935 = vmatprep.subr.bf16.mxu1 %v9655_v1  ;;  %v9707_v1 = vld [vmem:[%s14298_s1 + $0x1680] ss:$16 sps:$4 sm:$0xff]  }
 0x135   : > { %6893 = vmatpush2.bf16.msra.mxu0 %v9650_v2  ;;  %v9712_v2 = vld [vmem:[%s14298_s1 + $0x1464] ss:$16 sps:$4 sm:$0xff]  }
 0x136   : > { %6936 = vmatpush2.bf16.msra.mxu1 %v9653_v3  ;;  %6894 = vmatprep.subr.bf16.mxu0 %v9658_v4  ;;  %v9715_v3 = vld [vmem:[%s14298_s1 + $0x1664] ss:$16 sps:$4 sm:$0xff]   ;;  %v9710_v4 = vld [vmem:[%s14298_s1 + $0x1460] ss:$16 sps:$4 sm:$0xff]  }
 0x137   : > { %6937 = vmatprep.subr.bf16.mxu1 %v9661_v5  ;;  %v9713_v5 = vld [vmem:[%s14298_s1 + $0x1660] ss:$16 sps:$4 sm:$0xff]  }
 0x139   : > { %6895 = vmatpush2.bf16.msra.mxu0 %v9656_v14  ;;  %v9718_v14 = vld [vmem:[%s14298_s1 + $0x1444] ss:$16 sps:$4 sm:$0xff]  }
 0x13a   : > { %6938 = vmatpush2.bf16.msra.mxu1 %v9659_v46  ;;  %6896 = vmatprep.subr.bf16.mxu0 %v9664_v51  ;;  %v9721_v46 = vld [vmem:[%s14298_s1 + $0x1644] ss:$16 sps:$4 sm:$0xff]   ;;  %v9716_v51 = vld [vmem:[%s14298_s1 + $0x1440] ss:$16 sps:$4 sm:$0xff]  }
 0x13b   : > { %6939 = vmatprep.subr.bf16.mxu1 %v9667_v15  ;;  %v9719_v15 = vld [vmem:[%s14298_s1 + $0x1640] ss:$16 sps:$4 sm:$0xff]  }
 0x13d   : > { %6897 = vmatpush2.bf16.msra.mxu0 %v9662_v16  ;;  %v9724_v16 = vld [vmem:[%s14298_s1 + $0x1424] ss:$16 sps:$4 sm:$0xff]  }
 0x13e   : > { %6940 = vmatpush2.bf16.msra.mxu1 %v9665_v17  ;;  %6898 = vmatprep.subr.bf16.mxu0 %v9670_v18  ;;  %v9727_v17 = vld [vmem:[%s14298_s1 + $0x1624] ss:$16 sps:$4 sm:$0xff]   ;;  %v9722_v18 = vld [vmem:[%s14298_s1 + $0x1420] ss:$16 sps:$4 sm:$0xff]  }
 0x13f   : > { %6941 = vmatprep.subr.bf16.mxu1 %v9673_v19  ;;  %v9725_v19 = vld [vmem:[%s14298_s1 + $0x1620] ss:$16 sps:$4 sm:$0xff]  }
 0x141   : > { %6899 = vmatpush2.bf16.msra.mxu0 %v9668_v22  ;;  %v9730_v22 = vld [vmem:[%s14298_s1 + $0x1404] ss:$16 sps:$4 sm:$0xff]  }
 0x142   : > { %6942 = vmatpush2.bf16.msra.mxu1 %v9671_v23  ;;  %6900 = vmatprep.subr.bf16.mxu0 %v9676_v24  ;;  %v9733_v23 = vld [vmem:[%s14298_s1 + $0x1604] ss:$16 sps:$4 sm:$0xff]   ;;  %v9728_v24 = vld [vmem:[%s14298_s1 + $0x1400] ss:$16 sps:$4 sm:$0xff]  }
 0x143   : > { %6943 = vmatprep.subr.bf16.mxu1 %v9679_v25  ;;  %v9731_v25 = vld [vmem:[%s14298_s1 + $0x1600] ss:$16 sps:$4 sm:$0xff]  }
 0x145   : > { %6901 = vmatpush2.bf16.msra.mxu0 %v9674_v26  ;;  %v9736_v26 = vld [vmem:[%s14298_s1 + $0x15e4] ss:$16 sps:$4 sm:$0xff]  }
 0x146   : > { %6944 = vmatpush2.bf16.msra.mxu1 %v9677_v27  ;;  %6902 = vmatprep.subr.bf16.mxu0 %v9682_v32  ;;  %v9739_v27 = vld [vmem:[%s14298_s1 + $0x17e4] ss:$16 sps:$4 sm:$0xff]   ;;  %v9734_v32 = vld [vmem:[%s14298_s1 + $0x15e0] ss:$16 sps:$4 sm:$0xff]  }
 0x147   : > { %6945 = vmatprep.subr.bf16.mxu1 %v9685_v34  ;;  %v9737_v34 = vld [vmem:[%s14298_s1 + $0x17e0] ss:$16 sps:$4 sm:$0xff]  }
 0x149   : > { %6903 = vmatpush2.bf16.msra.mxu0 %v9680_v36  ;;  %v9742_v36 = vld [vmem:[%s14298_s1 + $0x15c4] ss:$16 sps:$4 sm:$0xff]  }
 0x14a   : > { %6946 = vmatpush2.bf16.msra.mxu1 %v9683_v37  ;;  %6958 = vmatprep.subr.bf16.mxu0 %v9688_v38  ;;  %v9745_v37 = vld [vmem:[%s14298_s1 + $0x17c4] ss:$16 sps:$4 sm:$0xff]   ;;  %v9740_v38 = vld [vmem:[%s14298_s1 + $0x15c0] ss:$16 sps:$4 sm:$0xff]  }
 0x14b   : > { %7001 = vmatprep.subr.bf16.mxu1 %v9691_v39  ;;  %v9743_v39 = vld [vmem:[%s14298_s1 + $0x17c0] ss:$16 sps:$4 sm:$0xff]  }
 0x14c   : > { %6905 = vmatmul.mubr.bf16.vlgmr.msra.gmra.mxu0 %v11898_v44 }
 0x14d   : > { %6948 = vmatmul.mubr.bf16.vlgmr.msra.gmra.mxu1 %v11902_v45  ;;  %6959 = vmatpush1.bf16.msra.mxu0 %v9686_v42  ;;  %v9748_v42 = vld [vmem:[%s14298_s1 + $0x15a4] ss:$16 sps:$4 sm:$0xff]  }
 0x14e   : > { %7002 = vmatpush1.bf16.msra.mxu1 %v9689_v54  ;;  %6960 = vmatprep.subr.bf16.mxu0 %v9694_v6  ;;  %v9751_v54 = vld [vmem:[%s14298_s1 + $0x17a4] ss:$16 sps:$4 sm:$0xff]   ;;  %v9746_v6 = vld [vmem:[%s14298_s1 + $0x15a0] ss:$16 sps:$4 sm:$0xff]  }
 0x14f   : > { %7003 = vmatprep.subr.bf16.mxu1 %v9697_v7  ;;  %6990 = vmatprep.mubr.bf16.mxu0 %v11930_v56  ;;  %v9749_v7 = vld [vmem:[%s14298_s1 + $0x17a0] ss:$16 sps:$4 sm:$0xff]  }
 0x150   : > { %7033 = vmatprep.mubr.bf16.mxu1 %v11934_v57 }
 0x151   : > { %6961 = vmatpush1.bf16.msra.mxu0 %v9692_v12  ;;  %v9754_v12 = vld [vmem:[%s14298_s1 + $0x1584] ss:$16 sps:$4 sm:$0xff]  }
 0x152   : > { %7004 = vmatpush1.bf16.msra.mxu1 %v9695_v13  ;;  %6962 = vmatprep.subr.bf16.mxu0 %v9700_v58  ;;  %v9757_v13 = vld [vmem:[%s14298_s1 + $0x1784] ss:$16 sps:$4 sm:$0xff]   ;;  %v9752_v58 = vld [vmem:[%s14298_s1 + $0x1580] ss:$16 sps:$4 sm:$0xff]  }
 0x153   : > { %7005 = vmatprep.subr.bf16.mxu1 %v9703_v59  ;;  %v9755_v59 = vld [vmem:[%s14298_s1 + $0x1780] ss:$16 sps:$4 sm:$0xff]  }
 0x155   : > { %6963 = vmatpush1.bf16.msra.mxu0 %v9698_v60  ;;  %v9760_v60 = vld [vmem:[%s14298_s1 + $0x1564] ss:$16 sps:$4 sm:$0xff]  }
 0x156   : > { %7006 = vmatpush1.bf16.msra.mxu1 %v9701_v61  ;;  %6964 = vmatprep.subr.bf16.mxu0 %v9706_v62  ;;  %v9763_v61 = vld [vmem:[%s14298_s1 + $0x1764] ss:$16 sps:$4 sm:$0xff]   ;;  %v9758_v62 = vld [vmem:[%s14298_s1 + $0x1560] ss:$16 sps:$4 sm:$0xff]  }
 0x157   : > { %7007 = vmatprep.subr.bf16.mxu1 %v9709_v63  ;;  %v9761_v63 = vld [vmem:[%s14298_s1 + $0x1760] ss:$16 sps:$4 sm:$0xff]  }
 0x159   : > { %6965 = vmatpush1.bf16.msra.mxu0 %v9704_v0  ;;  %v9766_v0 = vld [vmem:[%s14298_s1 + $0x1544] ss:$16 sps:$4 sm:$0xff]  }
 0x15a   : > { %7008 = vmatpush1.bf16.msra.mxu1 %v9707_v1  ;;  %6966 = vmatprep.subr.bf16.mxu0 %v9712_v2  ;;  %v9769_v1 = vld [vmem:[%s14298_s1 + $0x1744] ss:$16 sps:$4 sm:$0xff]   ;;  %v9764_v2 = vld [vmem:[%s14298_s1 + $0x1540] ss:$16 sps:$4 sm:$0xff]  }
 0x15b   : > { %7009 = vmatprep.subr.bf16.mxu1 %v9715_v3  ;;  %v9767_v3 = vld [vmem:[%s14298_s1 + $0x1740] ss:$16 sps:$4 sm:$0xff]  }
 0x15d   : > { %6967 = vmatpush1.bf16.msra.mxu0 %v9710_v4  ;;  %v9772_v4 = vld [vmem:[%s14298_s1 + $0x1524] ss:$16 sps:$4 sm:$0xff]  }
 0x15e   : > { %7010 = vmatpush1.bf16.msra.mxu1 %v9713_v5  ;;  %6968 = vmatprep.subr.bf16.mxu0 %v9718_v14  ;;  %v9775_v5 = vld [vmem:[%s14298_s1 + $0x1724] ss:$16 sps:$4 sm:$0xff]   ;;  %v9770_v14 = vld [vmem:[%s14298_s1 + $0x1520] ss:$16 sps:$4 sm:$0xff]  }
 0x15f   : > { %7011 = vmatprep.subr.bf16.mxu1 %v9721_v46  ;;  %v9773_v46 = vld [vmem:[%s14298_s1 + $0x1720] ss:$16 sps:$4 sm:$0xff]  }
 0x161   : > { %6969 = vmatpush1.bf16.msra.mxu0 %v9716_v51  ;;  %v9778_v51 = vld [vmem:[%s14298_s1 + $0x1504] ss:$16 sps:$4 sm:$0xff]  }
 0x162   : > { %7012 = vmatpush1.bf16.msra.mxu1 %v9719_v15  ;;  %6970 = vmatprep.subr.bf16.mxu0 %v9724_v16  ;;  %v9781_v15 = vld [vmem:[%s14298_s1 + $0x1704] ss:$16 sps:$4 sm:$0xff]   ;;  %v9776_v16 = vld [vmem:[%s14298_s1 + $0x1500] ss:$16 sps:$4 sm:$0xff]  }
 0x163   : > { %7013 = vmatprep.subr.bf16.mxu1 %v9727_v17  ;;  %v9779_v17 = vld [vmem:[%s14298_s1 + $0x1700] ss:$16 sps:$4 sm:$0xff]  }
 0x165   : > { %6971 = vmatpush1.bf16.msra.mxu0 %v9722_v18  ;;  %v9784_v18 = vld [vmem:[%s14298_s1 + $0x18e4] ss:$16 sps:$4 sm:$0xff]  }
 0x166   : > { %7014 = vmatpush1.bf16.msra.mxu1 %v9725_v19  ;;  %6972 = vmatprep.subr.bf16.mxu0 %v9730_v22  ;;  %v9787_v19 = vld [vmem:[%s14298_s1 + $0x1ae4] ss:$16 sps:$4 sm:$0xff]  }
 0x167   : > { %7015 = vmatprep.subr.bf16.mxu1 %v9733_v23  ;;  %v12115_v22 = vld [vmem:[%s10920_s5 + $0x60] sm:$0xff] }
 0x168   : > { %v9782_v23 = vld [vmem:[%s14298_s1 + $0x18e0] ss:$16 sps:$4 sm:$0xff]  }
 0x169   : > { %6973 = vmatpush1.bf16.msra.mxu0 %v9728_v24  ;;  %v12122_v24 = vcombine.low %v11891_v40, %v11905_v52  ;;  %v9790_v40 = vld [vmem:[%s14298_s1 + $0x18c4] ss:$16 sps:$4 sm:$0xff]  }
 0x16a   : > { %7016 = vmatpush1.bf16.msra.mxu1 %v9731_v25  ;;  %6974 = vmatprep.subr.bf16.mxu0 %v9736_v26  ;;  %v12126_v25 = vcombine.low %v11908_v28, %v11911_v31  ;;  %v12129_v26 = vld [vmem:[%s10920_s5 + $0xe0] sm:$0xff] }
 0x16b   : > { %7017 = vmatprep.subr.bf16.mxu1 %v9739_v27  ;;  %v12132_v27 = vld [vmem:[%s10920_s5 + $0x68] sm:$0xff]  ;;  %v9793_v52 = vld [vmem:[%s14298_s1 + $0x1ac4] ss:$16 sps:$4 sm:$0xff]   ;;  %v9788_v28 = vld [vmem:[%s14298_s1 + $0x18c0] ss:$16 sps:$4 sm:$0xff]  }
 0x16c   : > { %v9791_v31 = vld [vmem:[%s14298_s1 + $0x1ac0] ss:$16 sps:$4 sm:$0xff]  }
 0x16d   : > { %6975 = vmatpush2.bf16.msra.mxu0 %v9734_v32  ;;  %v12135_v32 = vld [vmem:[%s10920_s5 + $0xe8] sm:$0xff] }
 0x16e   : > { %7018 = vmatpush2.bf16.msra.mxu1 %v9737_v34  ;;  %6976 = vmatprep.subr.bf16.mxu0 %v9742_v36  ;;  %v9785_v34 = vld [vmem:[%s14298_s1 + $0x1ae0] ss:$16 sps:$4 sm:$0xff]   ;;  %v12154_v36 = vcombine.high %v12115_v22, %v12129_v26 }
 0x16f   : > { %7019 = vmatprep.subr.bf16.mxu1 %v9745_v37  ;;  %v12158_v37 = vcombine.high %v12132_v27, %v12135_v32 }
 0x171   : > { %6977 = vmatpush2.bf16.msra.mxu0 %v9740_v38  ;;  %v9796_v38 = vld [vmem:[%s14298_s1 + $0x18a4] ss:$16 sps:$4 sm:$0xff]  }
 0x172   : > { %7020 = vmatpush2.bf16.msra.mxu1 %v9743_v39  ;;  %6978 = vmatprep.subr.bf16.mxu0 %v9748_v42  ;;  %v9799_v39 = vld [vmem:[%s14298_s1 + $0x1aa4] ss:$16 sps:$4 sm:$0xff]   ;;  %v9794_v42 = vld [vmem:[%s14298_s1 + $0x18a0] ss:$16 sps:$4 sm:$0xff]  }
 0x173   : > { %7021 = vmatprep.subr.bf16.mxu1 %v9751_v54  ;;  %v9797_v54 = vld [vmem:[%s14298_s1 + $0x1aa0] ss:$16 sps:$4 sm:$0xff]  }
 0x175   : > { %6979 = vmatpush2.bf16.msra.mxu0 %v9746_v6  ;;  %v9802_v6 = vld [vmem:[%s14298_s1 + $0x1884] ss:$16 sps:$4 sm:$0xff]  }
 0x176   : > { %7022 = vmatpush2.bf16.msra.mxu1 %v9749_v7  ;;  %6980 = vmatprep.subr.bf16.mxu0 %v9754_v12  ;;  %v9805_v7 = vld [vmem:[%s14298_s1 + $0x1a84] ss:$16 sps:$4 sm:$0xff]   ;;  %v9800_v12 = vld [vmem:[%s14298_s1 + $0x1880] ss:$16 sps:$4 sm:$0xff]  }
 0x177   : > { %7023 = vmatprep.subr.bf16.mxu1 %v9757_v13  ;;  %v9803_v13 = vld [vmem:[%s14298_s1 + $0x1a80] ss:$16 sps:$4 sm:$0xff]  }
 0x179   : > { %6981 = vmatpush2.bf16.msra.mxu0 %v9752_v58  ;;  %v9808_v58 = vld [vmem:[%s14298_s1 + $0x1864] ss:$16 sps:$4 sm:$0xff]  }
 0x17a   : > { %7024 = vmatpush2.bf16.msra.mxu1 %v9755_v59  ;;  %6982 = vmatprep.subr.bf16.mxu0 %v9760_v60  ;;  %v9811_v59 = vld [vmem:[%s14298_s1 + $0x1a64] ss:$16 sps:$4 sm:$0xff]   ;;  %v9806_v60 = vld [vmem:[%s14298_s1 + $0x1860] ss:$16 sps:$4 sm:$0xff]  }
 0x17b   : > { %7025 = vmatprep.subr.bf16.mxu1 %v9763_v61  ;;  %v9809_v61 = vld [vmem:[%s14298_s1 + $0x1a60] ss:$16 sps:$4 sm:$0xff]  }
 0x17d   : > { %6983 = vmatpush2.bf16.msra.mxu0 %v9758_v62  ;;  %v9814_v62 = vld [vmem:[%s14298_s1 + $0x1844] ss:$16 sps:$4 sm:$0xff]  }
 0x17e   : > { %7026 = vmatpush2.bf16.msra.mxu1 %v9761_v63  ;;  %6984 = vmatprep.subr.bf16.mxu0 %v9766_v0  ;;  %v9817_v63 = vld [vmem:[%s14298_s1 + $0x1a44] ss:$16 sps:$4 sm:$0xff]   ;;  %v9812_v0 = vld [vmem:[%s14298_s1 + $0x1840] ss:$16 sps:$4 sm:$0xff]  }
 0x17f   : > { %7027 = vmatprep.subr.bf16.mxu1 %v9769_v1  ;;  %v9815_v1 = vld [vmem:[%s14298_s1 + $0x1a40] ss:$16 sps:$4 sm:$0xff]  }
 0x181   : > { %6985 = vmatpush2.bf16.msra.mxu0 %v9764_v2  ;;  %v9820_v2 = vld [vmem:[%s14298_s1 + $0x1824] ss:$16 sps:$4 sm:$0xff]  }
 0x182   : > { %7028 = vmatpush2.bf16.msra.mxu1 %v9767_v3  ;;  %6986 = vmatprep.subr.bf16.mxu0 %v9772_v4  ;;  %v9823_v3 = vld [vmem:[%s14298_s1 + $0x1a24] ss:$16 sps:$4 sm:$0xff]   ;;  %v9818_v4 = vld [vmem:[%s14298_s1 + $0x1820] ss:$16 sps:$4 sm:$0xff]  }
 0x183   : > { %7029 = vmatprep.subr.bf16.mxu1 %v9775_v5  ;;  %v9821_v5 = vld [vmem:[%s14298_s1 + $0x1a20] ss:$16 sps:$4 sm:$0xff]  }
 0x185   : > { %6987 = vmatpush2.bf16.msra.mxu0 %v9770_v14  ;;  %v9826_v14 = vld [vmem:[%s14298_s1 + $0x1804] ss:$16 sps:$4 sm:$0xff]  }
 0x186   : > { %7030 = vmatpush2.bf16.msra.mxu1 %v9773_v46  ;;  %6988 = vmatprep.subr.bf16.mxu0 %v9778_v51  ;;  %v9829_v46 = vld [vmem:[%s14298_s1 + $0x1a04] ss:$16 sps:$4 sm:$0xff]   ;;  %v9824_v51 = vld [vmem:[%s14298_s1 + $0x1800] ss:$16 sps:$4 sm:$0xff]  }
 0x187   : > { %7031 = vmatprep.subr.bf16.mxu1 %v9781_v15  ;;  %v9827_v15 = vld [vmem:[%s14298_s1 + $0x1a00] ss:$16 sps:$4 sm:$0xff]  }
 0x189   : > { %6989 = vmatpush2.bf16.msra.mxu0 %v9776_v16  ;;  %v9832_v16 = vld [vmem:[%s14298_s1 + $0x19e4] ss:$16 sps:$4 sm:$0xff]  }
 0x18a   : > { %7032 = vmatpush2.bf16.msra.mxu1 %v9779_v17  ;;  %7044 = vmatprep.subr.bf16.mxu0 %v9784_v18  ;;  %v9835_v17 = vld [vmem:[%s14298_s1 + $0x1be4] ss:$16 sps:$4 sm:$0xff]   ;;  %v9830_v18 = vld [vmem:[%s14298_s1 + $0x19e0] ss:$16 sps:$4 sm:$0xff]  }
 0x18b   : > { %7087 = vmatprep.subr.bf16.mxu1 %v9787_v19  ;;  %v9833_v19 = vld [vmem:[%s14298_s1 + $0x1be0] ss:$16 sps:$4 sm:$0xff]  }
 0x18c   : > { %6991 = vmatmul.mubr.bf16.vlgmr.msra.gmra.mxu0 %v12122_v24 }
 0x18d   : > { %7034 = vmatmul.mubr.bf16.vlgmr.msra.gmra.mxu1 %v12126_v25  ;;  %7045 = vmatpush1.bf16.msra.mxu0 %v9782_v23  ;;  %v9838_v23 = vld [vmem:[%s14298_s1 + $0x19c4] ss:$16 sps:$4 sm:$0xff]  }
 0x18e   : > { %7088 = vmatpush1.bf16.msra.mxu1 %v9785_v34  ;;  %7046 = vmatprep.subr.bf16.mxu0 %v9790_v40  ;;  %v9841_v34 = vld [vmem:[%s14298_s1 + $0x1bc4] ss:$16 sps:$4 sm:$0xff]   ;;  %v9836_v40 = vld [vmem:[%s14298_s1 + $0x19c0] ss:$16 sps:$4 sm:$0xff]  }
 0x18f   : > { %7089 = vmatprep.subr.bf16.mxu1 %v9793_v52  ;;  %7076 = vmatprep.mubr.bf16.mxu0 %v12154_v36  ;;  %v9839_v52 = vld [vmem:[%s14298_s1 + $0x1bc0] ss:$16 sps:$4 sm:$0xff]  }
 0x190   : > { %7119 = vmatprep.mubr.bf16.mxu1 %v12158_v37 }
 0x191   : > { %7047 = vmatpush1.bf16.msra.mxu0 %v9788_v28  ;;  %v9844_v28 = vld [vmem:[%s14298_s1 + $0x19a4] ss:$16 sps:$4 sm:$0xff]  }
 0x192   : > { %7090 = vmatpush1.bf16.msra.mxu1 %v9791_v31  ;;  %7048 = vmatprep.subr.bf16.mxu0 %v9796_v38  ;;  %v9847_v31 = vld [vmem:[%s14298_s1 + $0x1ba4] ss:$16 sps:$4 sm:$0xff]   ;;  %v9842_v38 = vld [vmem:[%s14298_s1 + $0x19a0] ss:$16 sps:$4 sm:$0xff]  }
 0x193   : > { %7091 = vmatprep.subr.bf16.mxu1 %v9799_v39  ;;  %v9845_v39 = vld [vmem:[%s14298_s1 + $0x1ba0] ss:$16 sps:$4 sm:$0xff]  }
 0x195   : > { %7049 = vmatpush1.bf16.msra.mxu0 %v9794_v42  ;;  %v9850_v42 = vld [vmem:[%s14298_s1 + $0x1984] ss:$16 sps:$4 sm:$0xff]  }
 0x196   : > { %7092 = vmatpush1.bf16.msra.mxu1 %v9797_v54  ;;  %7050 = vmatprep.subr.bf16.mxu0 %v9802_v6  ;;  %v9853_v54 = vld [vmem:[%s14298_s1 + $0x1b84] ss:$16 sps:$4 sm:$0xff]   ;;  %v9848_v6 = vld [vmem:[%s14298_s1 + $0x1980] ss:$16 sps:$4 sm:$0xff]  }
 0x197   : > { %7093 = vmatprep.subr.bf16.mxu1 %v9805_v7  ;;  %v9851_v7 = vld [vmem:[%s14298_s1 + $0x1b80] ss:$16 sps:$4 sm:$0xff]  }
 0x199   : > { %7051 = vmatpush1.bf16.msra.mxu0 %v9800_v12  ;;  %v9856_v12 = vld [vmem:[%s14298_s1 + $0x1964] ss:$16 sps:$4 sm:$0xff]  }
 0x19a   : > { %7094 = vmatpush1.bf16.msra.mxu1 %v9803_v13  ;;  %7052 = vmatprep.subr.bf16.mxu0 %v9808_v58  ;;  %v9859_v13 = vld [vmem:[%s14298_s1 + $0x1b64] ss:$16 sps:$4 sm:$0xff]   ;;  %v9854_v58 = vld [vmem:[%s14298_s1 + $0x1960] ss:$16 sps:$4 sm:$0xff]  }
 0x19b   : > { %7095 = vmatprep.subr.bf16.mxu1 %v9811_v59  ;;  %v9857_v59 = vld [vmem:[%s14298_s1 + $0x1b60] ss:$16 sps:$4 sm:$0xff]  }
 0x19d   : > { %7053 = vmatpush1.bf16.msra.mxu0 %v9806_v60  ;;  %v9862_v60 = vld [vmem:[%s14298_s1 + $0x1944] ss:$16 sps:$4 sm:$0xff]  }
 0x19e   : > { %7096 = vmatpush1.bf16.msra.mxu1 %v9809_v61  ;;  %7054 = vmatprep.subr.bf16.mxu0 %v9814_v62  ;;  %v9865_v61 = vld [vmem:[%s14298_s1 + $0x1b44] ss:$16 sps:$4 sm:$0xff]   ;;  %v9860_v62 = vld [vmem:[%s14298_s1 + $0x1940] ss:$16 sps:$4 sm:$0xff]  }
 0x19f   : > { %7097 = vmatprep.subr.bf16.mxu1 %v9817_v63  ;;  %v9863_v63 = vld [vmem:[%s14298_s1 + $0x1b40] ss:$16 sps:$4 sm:$0xff]  }
 0x1a1   : > { %7055 = vmatpush1.bf16.msra.mxu0 %v9812_v0  ;;  %v9868_v0 = vld [vmem:[%s14298_s1 + $0x1924] ss:$16 sps:$4 sm:$0xff]  }
 0x1a2   : > { %7098 = vmatpush1.bf16.msra.mxu1 %v9815_v1  ;;  %7056 = vmatprep.subr.bf16.mxu0 %v9820_v2  ;;  %v9871_v1 = vld [vmem:[%s14298_s1 + $0x1b24] ss:$16 sps:$4 sm:$0xff]   ;;  %v9866_v2 = vld [vmem:[%s14298_s1 + $0x1920] ss:$16 sps:$4 sm:$0xff]  }
 0x1a3   : > { %7099 = vmatprep.subr.bf16.mxu1 %v9823_v3  ;;  %v9869_v3 = vld [vmem:[%s14298_s1 + $0x1b20] ss:$16 sps:$4 sm:$0xff]  }
 0x1a5   : > { %7057 = vmatpush1.bf16.msra.mxu0 %v9818_v4  ;;  %v9874_v4 = vld [vmem:[%s14298_s1 + $0x1904] ss:$16 sps:$4 sm:$0xff]  }
 0x1a6   : > { %7100 = vmatpush1.bf16.msra.mxu1 %v9821_v5  ;;  %7058 = vmatprep.subr.bf16.mxu0 %v9826_v14  ;;  %v9877_v5 = vld [vmem:[%s14298_s1 + $0x1b04] ss:$16 sps:$4 sm:$0xff]   ;;  %v9872_v14 = vld [vmem:[%s14298_s1 + $0x1900] ss:$16 sps:$4 sm:$0xff]  }
 0x1a7   : > { %7101 = vmatprep.subr.bf16.mxu1 %v9829_v46  ;;  %v9875_v46 = vld [vmem:[%s14298_s1 + $0x1b00] ss:$16 sps:$4 sm:$0xff]  }
 0x1a9   : > { %7059 = vmatpush1.bf16.msra.mxu0 %v9824_v51  ;;  %v9880_v51 = vld [vmem:[%s14298_s1 + $0x1ce4] ss:$16 sps:$4 sm:$0xff]  }
 0x1aa   : > { %7102 = vmatpush1.bf16.msra.mxu1 %v9827_v15  ;;  %7060 = vmatprep.subr.bf16.mxu0 %v9832_v16  ;;  %v9883_v15 = vld [vmem:[%s14298_s1 + $0x1ee4] ss:$16 sps:$4 sm:$0xff]  }
 0x1ab   : > { %7103 = vmatprep.subr.bf16.mxu1 %v9835_v17  ;;  %v12339_v16 = vld [vmem:[%s10920_s5 + $0x70] sm:$0xff] }
 0x1ac   : > { %v12342_v17 = vld [vmem:[%s10920_s5 + $0xf0] sm:$0xff] }
 0x1ad   : > { %7061 = vmatpush2.bf16.msra.mxu0 %v9830_v18  ;;  %v12345_v18 = vld [vmem:[%s10920_s5 + $0x78] sm:$0xff] }
 0x1ae   : > { %7104 = vmatpush2.bf16.msra.mxu1 %v9833_v19  ;;  %7062 = vmatprep.subr.bf16.mxu0 %v9838_v23  ;;  %v12348_v19 = vld [vmem:[%s10920_s5 + $0xf8] sm:$0xff]  ;;  %v9878_v23 = vld [vmem:[%s14298_s1 + $0x1ce0] ss:$16 sps:$4 sm:$0xff]  }
 0x1af   : > { %7105 = vmatprep.subr.bf16.mxu1 %v9841_v34  ;;  %v9881_v34 = vld [vmem:[%s14298_s1 + $0x1ee0] ss:$16 sps:$4 sm:$0xff]  }
 0x1b1   : > { %7063 = vmatpush2.bf16.msra.mxu0 %v9836_v40  ;;  %v12358_v40 = vcombine.low %v12115_v22, %v12129_v26  ;;  %v9884_v22 = vld [vmem:[%s14298_s1 + $0x1cc0] ss:$16 sps:$4 sm:$0xff]  }
 0x1b2   : > { %7106 = vmatpush2.bf16.msra.mxu1 %v9839_v52  ;;  %7064 = vmatprep.subr.bf16.mxu0 %v9844_v28  ;;  %v12362_v52 = vcombine.low %v12132_v27, %v12135_v32  ;;  %v9886_v28 = vld [vmem:[%s14298_s1 + $0x1cc4] ss:$16 sps:$4 sm:$0xff]   ;;  %v9887_v26 = vld [vmem:[%s14298_s1 + $0x1ec0] ss:$16 sps:$4 sm:$0xff]   ;;  %v12378_v27 = vcombine.high %v12339_v16, %v12342_v17  ;;  %v12382_v32 = vcombine.high %v12345_v18, %v12348_v19 }
 0x1b3   : > { %7107 = vmatprep.subr.bf16.mxu1 %v9847_v31  ;;  %v9889_v31 = vld [vmem:[%s14298_s1 + $0x1ec4] ss:$16 sps:$4 sm:$0xff]  }
 0x1b4   : > { %14306 = vst [vmem:[#allocation2_spill] sm:$0xff] %v12362_v52  ;;  %14307 = vst [vmem:[#allocation3_spill] sm:$0xff] %v12378_v27 }
 0x1b5   : > { %7065 = vmatpush2.bf16.msra.mxu0 %v9842_v38  ;;  %14308 = vst [vmem:[#allocation4_spill] sm:$0xff] %v12382_v32  ;;  %v9892_v38 = vld [vmem:[%s14298_s1 + $0x1ca4] ss:$16 sps:$4 sm:$0xff]  }
 0x1b6   : > { %7108 = vmatpush2.bf16.msra.mxu1 %v9845_v39  ;;  %7066 = vmatprep.subr.bf16.mxu0 %v9850_v42  ;;  %v9895_v39 = vld [vmem:[%s14298_s1 + $0x1ea4] ss:$16 sps:$4 sm:$0xff]   ;;  %v9890_v42 = vld [vmem:[%s14298_s1 + $0x1ca0] ss:$16 sps:$4 sm:$0xff]  }
 0x1b7   : > { %7109 = vmatprep.subr.bf16.mxu1 %v9853_v54  ;;  %v9893_v54 = vld [vmem:[%s14298_s1 + $0x1ea0] ss:$16 sps:$4 sm:$0xff]  }
 0x1b9   : > { %7067 = vmatpush2.bf16.msra.mxu0 %v9848_v6  ;;  %v9898_v6 = vld [vmem:[%s14298_s1 + $0x1c84] ss:$16 sps:$4 sm:$0xff]  }
 0x1ba   : > { %7110 = vmatpush2.bf16.msra.mxu1 %v9851_v7  ;;  %7068 = vmatprep.subr.bf16.mxu0 %v9856_v12  ;;  %v9901_v7 = vld [vmem:[%s14298_s1 + $0x1e84] ss:$16 sps:$4 sm:$0xff]   ;;  %v9896_v12 = vld [vmem:[%s14298_s1 + $0x1c80] ss:$16 sps:$4 sm:$0xff]  }
 0x1bb   : > { %7111 = vmatprep.subr.bf16.mxu1 %v9859_v13  ;;  %v9899_v13 = vld [vmem:[%s14298_s1 + $0x1e80] ss:$16 sps:$4 sm:$0xff]  }
 0x1bd   : > { %7069 = vmatpush2.bf16.msra.mxu0 %v9854_v58  ;;  %v9904_v58 = vld [vmem:[%s14298_s1 + $0x1c64] ss:$16 sps:$4 sm:$0xff]  }
 0x1be   : > { %7112 = vmatpush2.bf16.msra.mxu1 %v9857_v59  ;;  %7070 = vmatprep.subr.bf16.mxu0 %v9862_v60  ;;  %v9907_v59 = vld [vmem:[%s14298_s1 + $0x1e64] ss:$16 sps:$4 sm:$0xff]   ;;  %v9902_v60 = vld [vmem:[%s14298_s1 + $0x1c60] ss:$16 sps:$4 sm:$0xff]  }
 0x1bf   : > { %7113 = vmatprep.subr.bf16.mxu1 %v9865_v61  ;;  %v9905_v61 = vld [vmem:[%s14298_s1 + $0x1e60] ss:$16 sps:$4 sm:$0xff]  }
 0x1c1   : > { %7071 = vmatpush2.bf16.msra.mxu0 %v9860_v62  ;;  %v9910_v62 = vld [vmem:[%s14298_s1 + $0x1c44] ss:$16 sps:$4 sm:$0xff]  }
 0x1c2   : > { %7114 = vmatpush2.bf16.msra.mxu1 %v9863_v63  ;;  %7072 = vmatprep.subr.bf16.mxu0 %v9868_v0  ;;  %v9913_v63 = vld [vmem:[%s14298_s1 + $0x1e44] ss:$16 sps:$4 sm:$0xff]   ;;  %v9908_v0 = vld [vmem:[%s14298_s1 + $0x1c40] ss:$16 sps:$4 sm:$0xff]  }
 0x1c3   : > { %7115 = vmatprep.subr.bf16.mxu1 %v9871_v1  ;;  %v9911_v1 = vld [vmem:[%s14298_s1 + $0x1e40] ss:$16 sps:$4 sm:$0xff]  }
 0x1c5   : > { %7073 = vmatpush2.bf16.msra.mxu0 %v9866_v2  ;;  %v9916_v2 = vld [vmem:[%s14298_s1 + $0x1c24] ss:$16 sps:$4 sm:$0xff]  }
 0x1c6   : > { %7116 = vmatpush2.bf16.msra.mxu1 %v9869_v3  ;;  %7074 = vmatprep.subr.bf16.mxu0 %v9874_v4  ;;  %v9919_v3 = vld [vmem:[%s14298_s1 + $0x1e24] ss:$16 sps:$4 sm:$0xff]   ;;  %v9914_v4 = vld [vmem:[%s14298_s1 + $0x1c20] ss:$16 sps:$4 sm:$0xff]  }
 0x1c7   : > { %7117 = vmatprep.subr.bf16.mxu1 %v9877_v5  ;;  %v9917_v5 = vld [vmem:[%s14298_s1 + $0x1e20] ss:$16 sps:$4 sm:$0xff]  }
 0x1c9   : > { %7075 = vmatpush2.bf16.msra.mxu0 %v9872_v14  ;;  %v9922_v14 = vld [vmem:[%s14298_s1 + $0x1c04] ss:$16 sps:$4 sm:$0xff]  }
 0x1ca   : > { %7118 = vmatpush2.bf16.msra.mxu1 %v9875_v46  ;;  %7130 = vmatprep.subr.bf16.mxu0 %v9880_v51  ;;  %v9925_v46 = vld [vmem:[%s14298_s1 + $0x1e04] ss:$16 sps:$4 sm:$0xff]   ;;  %v9920_v51 = vld [vmem:[%s14298_s1 + $0x1c00] ss:$16 sps:$4 sm:$0xff]  }
 0x1cb   : > { %7173 = vmatprep.subr.bf16.mxu1 %v9883_v15  ;;  %v9923_v15 = vld [vmem:[%s14298_s1 + $0x1e00] ss:$16 sps:$4 sm:$0xff]  }
 0x1cc   : > { %7077 = vmatmul.mubr.bf16.vlgmr.msra.gmra.mxu0 %v12358_v40 }
 0x1cd   : > { %7120 = vmatmul.mubr.bf16.vlgmr.msra.gmra.mxu1 %v12362_v52  ;;  %7131 = vmatpush1.bf16.msra.mxu0 %v9878_v23  ;;  %v9928_v23 = vld [vmem:[%s14298_s1 + $0x1de4] ss:$16 sps:$4 sm:$0xff]  }
 0x1ce   : > { %7174 = vmatpush1.bf16.msra.mxu1 %v9881_v34  ;;  %7132 = vmatprep.subr.bf16.mxu0 %v9886_v28  ;;  %v9931_v34 = vld [vmem:[%s14298_s1 + $0x1fe4] ss:$16 sps:$4 sm:$0xff]   ;;  %v9926_v28 = vld [vmem:[%s14298_s1 + $0x1de0] ss:$16 sps:$4 sm:$0xff]  }
 0x1cf   : > { %7175 = vmatprep.subr.bf16.mxu1 %v9889_v31  ;;  %7162 = vmatprep.mubr.bf16.mxu0 %v12378_v27  ;;  %v9929_v31 = vld [vmem:[%s14298_s1 + $0x1fe0] ss:$16 sps:$4 sm:$0xff]  }
 0x1d0   : > { %7205 = vmatprep.mubr.bf16.mxu1 %v12382_v32 }
 0x1d1   : > { %7133 = vmatpush1.bf16.msra.mxu0 %v9884_v22  ;;  %v9934_v22 = vld [vmem:[%s14298_s1 + $0x1dc4] ss:$16 sps:$4 sm:$0xff]  }
 0x1d2   : > { %7176 = vmatpush1.bf16.msra.mxu1 %v9887_v26  ;;  %7134 = vmatprep.subr.bf16.mxu0 %v9892_v38  ;;  %v9937_v26 = vld [vmem:[%s14298_s1 + $0x1fc4] ss:$16 sps:$4 sm:$0xff]   ;;  %v9932_v38 = vld [vmem:[%s14298_s1 + $0x1dc0] ss:$16 sps:$4 sm:$0xff]  }
 0x1d3   : > { %7177 = vmatprep.subr.bf16.mxu1 %v9895_v39  ;;  %v9935_v39 = vld [vmem:[%s14298_s1 + $0x1fc0] ss:$16 sps:$4 sm:$0xff]  }
 0x1d5   : > { %7135 = vmatpush1.bf16.msra.mxu0 %v9890_v42  ;;  %v9940_v42 = vld [vmem:[%s14298_s1 + $0x1da4] ss:$16 sps:$4 sm:$0xff]  }
 0x1d6   : > { %7178 = vmatpush1.bf16.msra.mxu1 %v9893_v54  ;;  %7136 = vmatprep.subr.bf16.mxu0 %v9898_v6  ;;  %v9943_v54 = vld [vmem:[%s14298_s1 + $0x1fa4] ss:$16 sps:$4 sm:$0xff]   ;;  %v9938_v6 = vld [vmem:[%s14298_s1 + $0x1da0] ss:$16 sps:$4 sm:$0xff]  }
 0x1d7   : > { %7179 = vmatprep.subr.bf16.mxu1 %v9901_v7  ;;  %v9941_v7 = vld [vmem:[%s14298_s1 + $0x1fa0] ss:$16 sps:$4 sm:$0xff]  }
 0x1d9   : > { %7137 = vmatpush1.bf16.msra.mxu0 %v9896_v12  ;;  %v9946_v12 = vld [vmem:[%s14298_s1 + $0x1d84] ss:$16 sps:$4 sm:$0xff]  }
 0x1da   : > { %7180 = vmatpush1.bf16.msra.mxu1 %v9899_v13  ;;  %7138 = vmatprep.subr.bf16.mxu0 %v9904_v58  ;;  %v9949_v13 = vld [vmem:[%s14298_s1 + $0x1f84] ss:$16 sps:$4 sm:$0xff]   ;;  %v9944_v58 = vld [vmem:[%s14298_s1 + $0x1d80] ss:$16 sps:$4 sm:$0xff]  }
 0x1db   : > { %7181 = vmatprep.subr.bf16.mxu1 %v9907_v59  ;;  %v9947_v59 = vld [vmem:[%s14298_s1 + $0x1f80] ss:$16 sps:$4 sm:$0xff]  }
 0x1dd   : > { %7139 = vmatpush1.bf16.msra.mxu0 %v9902_v60  ;;  %v9952_v60 = vld [vmem:[%s14298_s1 + $0x1d64] ss:$16 sps:$4 sm:$0xff]  }
 0x1de   : > { %7182 = vmatpush1.bf16.msra.mxu1 %v9905_v61  ;;  %7140 = vmatprep.subr.bf16.mxu0 %v9910_v62  ;;  %v9955_v61 = vld [vmem:[%s14298_s1 + $0x1f64] ss:$16 sps:$4 sm:$0xff]   ;;  %v9950_v62 = vld [vmem:[%s14298_s1 + $0x1d60] ss:$16 sps:$4 sm:$0xff]  }
 0x1df   : > { %7183 = vmatprep.subr.bf16.mxu1 %v9913_v63  ;;  %v9953_v63 = vld [vmem:[%s14298_s1 + $0x1f60] ss:$16 sps:$4 sm:$0xff]  }
 0x1e1   : > { %7141 = vmatpush1.bf16.msra.mxu0 %v9908_v0  ;;  %v9958_v0 = vld [vmem:[%s14298_s1 + $0x1d44] ss:$16 sps:$4 sm:$0xff]  }
 0x1e2   : > { %7184 = vmatpush1.bf16.msra.mxu1 %v9911_v1  ;;  %7142 = vmatprep.subr.bf16.mxu0 %v9916_v2  ;;  %v9961_v1 = vld [vmem:[%s14298_s1 + $0x1f44] ss:$16 sps:$4 sm:$0xff]   ;;  %v9956_v2 = vld [vmem:[%s14298_s1 + $0x1d40] ss:$16 sps:$4 sm:$0xff]  }
 0x1e3   : > { %7185 = vmatprep.subr.bf16.mxu1 %v9919_v3  ;;  %v9959_v3 = vld [vmem:[%s14298_s1 + $0x1f40] ss:$16 sps:$4 sm:$0xff]  }
 0x1e5   : > { %7143 = vmatpush1.bf16.msra.mxu0 %v9914_v4  ;;  %v9964_v4 = vld [vmem:[%s14298_s1 + $0x1d24] ss:$16 sps:$4 sm:$0xff]  }
 0x1e6   : > { %7186 = vmatpush1.bf16.msra.mxu1 %v9917_v5  ;;  %7144 = vmatprep.subr.bf16.mxu0 %v9922_v14  ;;  %v9967_v5 = vld [vmem:[%s14298_s1 + $0x1f24] ss:$16 sps:$4 sm:$0xff]   ;;  %v9962_v14 = vld [vmem:[%s14298_s1 + $0x1d20] ss:$16 sps:$4 sm:$0xff]  }
 0x1e7   : > { %7187 = vmatprep.subr.bf16.mxu1 %v9925_v46  ;;  %v9965_v46 = vld [vmem:[%s14298_s1 + $0x1f20] ss:$16 sps:$4 sm:$0xff]  }
 0x1e9   : > { %7145 = vmatpush1.bf16.msra.mxu0 %v9920_v51  ;;  %v9970_v51 = vld [vmem:[%s14298_s1 + $0x1d04] ss:$16 sps:$4 sm:$0xff]  }
 0x1ea   : > { %7188 = vmatpush1.bf16.msra.mxu1 %v9923_v15  ;;  %7146 = vmatprep.subr.bf16.mxu0 %v9928_v23  ;;  %v9973_v15 = vld [vmem:[%s14298_s1 + $0x1f04] ss:$16 sps:$4 sm:$0xff]   ;;  %v9968_v23 = vld [vmem:[%s14298_s1 + $0x1d00] ss:$16 sps:$4 sm:$0xff]  }
 0x1eb   : > { %7189 = vmatprep.subr.bf16.mxu1 %v9931_v34  ;;  %v9971_v34 = vld [vmem:[%s14298_s1 + $0x1f00] ss:$16 sps:$4 sm:$0xff]  }
 0x1ed   : > { %7147 = vmatpush2.bf16.msra.mxu0 %v9926_v28  ;;  %v9976_v28 = vld [vmem:[%s14298_s1 + $0xec] ss:$16 sps:$4 sm:$0xff]  }
 0x1ee   : > { %7190 = vmatpush2.bf16.msra.mxu1 %v9929_v31  ;;  %7148 = vmatprep.subr.bf16.mxu0 %v9934_v22  ;;  %v9979_v31 = vld [vmem:[%s14298_s1 + $0x2ec] ss:$16 sps:$4 sm:$0xff]   ;;  %v9974_v22 = vld [vmem:[%s14298_s1 + $0xe8] ss:$16 sps:$4 sm:$0xff]  }
 0x1ef   : > { %7191 = vmatprep.subr.bf16.mxu1 %v9937_v26  ;;  %v9977_v26 = vld [vmem:[%s14298_s1 + $0x2e8] ss:$16 sps:$4 sm:$0xff]  }
 0x1f1   : > { %7149 = vmatpush2.bf16.msra.mxu0 %v9932_v38  ;;  %v12570_v38 = vcombine.low %v12339_v16, %v12342_v17  ;;  %v9980_v16 = vld [vmem:[%s14298_s1 + $0xc8] ss:$16 sps:$4 sm:$0xff]  }
 0x1f2   : > { %7192 = vmatpush2.bf16.msra.mxu1 %v9935_v39  ;;  %7150 = vmatprep.subr.bf16.mxu0 %v9940_v42  ;;  %v12574_v39 = vcombine.low %v12345_v18, %v12348_v19  ;;  %v9982_v42 = vld [vmem:[%s14298_s1 + $0xcc] ss:$16 sps:$4 sm:$0xff]   ;;  %v9983_v17 = vld [vmem:[%s14298_s1 + $0x2c8] ss:$16 sps:$4 sm:$0xff]  }
 0x1f3   : > { %7193 = vmatprep.subr.bf16.mxu1 %v9943_v54  ;;  %14309 = vst [vmem:[#allocation5_spill] sm:$0xff] %v12570_v38  ;;  %v9985_v54 = vld [vmem:[%s14298_s1 + $0x2cc] ss:$16 sps:$4 sm:$0xff]  }
 0x1f4   : > { %14310 = vst [vmem:[#allocation6_spill] sm:$0xff] %v12574_v39  ;;  %v9988_v18 = vld [vmem:[%s14298_s1 + $0xac] ss:$16 sps:$4 sm:$0xff]  }
 0x1f5   : > { %7151 = vmatpush2.bf16.msra.mxu0 %v9938_v6  ;;  %v9991_v19 = vld [vmem:[%s14298_s1 + $0x2ac] ss:$16 sps:$4 sm:$0xff]   ;;  %v9986_v6 = vld [vmem:[%s14298_s1 + $0xa8] ss:$16 sps:$4 sm:$0xff]  }
 0x1f6   : > { %7194 = vmatpush2.bf16.msra.mxu1 %v9941_v7  ;;  %7152 = vmatprep.subr.bf16.mxu0 %v9946_v12  ;;  %v9989_v7 = vld [vmem:[%s14298_s1 + $0x2a8] ss:$16 sps:$4 sm:$0xff]   ;;  %v9994_v12 = vld [vmem:[%s14298_s1 + $0x8c] ss:$16 sps:$4 sm:$0xff]  }
 0x1f7   : > { %7195 = vmatprep.subr.bf16.mxu1 %v9949_v13  ;;  %v9997_v13 = vld [vmem:[%s14298_s1 + $0x28c] ss:$16 sps:$4 sm:$0xff]  }
 0x1f9   : > { %7153 = vmatpush2.bf16.msra.mxu0 %v9944_v58  ;;  %v10000_v58 = vld [vmem:[%s14298_s1 + $0x6c] ss:$16 sps:$4 sm:$0xff]  }
 0x1fa   : > { %7196 = vmatpush2.bf16.msra.mxu1 %v9947_v59  ;;  %7154 = vmatprep.subr.bf16.mxu0 %v9952_v60  ;;  %v10003_v59 = vld [vmem:[%s14298_s1 + $0x26c] ss:$16 sps:$4 sm:$0xff]   ;;  %v9998_v60 = vld [vmem:[%s14298_s1 + $0x68] ss:$16 sps:$4 sm:$0xff]  }
 0x1fb   : > { %7197 = vmatprep.subr.bf16.mxu1 %v9955_v61  ;;  %v10001_v61 = vld [vmem:[%s14298_s1 + $0x268] ss:$16 sps:$4 sm:$0xff]  }
 0x1fd   : > { %7155 = vmatpush2.bf16.msra.mxu0 %v9950_v62  ;;  %v10006_v62 = vld [vmem:[%s14298_s1 + $0x4c] ss:$16 sps:$4 sm:$0xff]  }
 0x1fe   : > { %7198 = vmatpush2.bf16.msra.mxu1 %v9953_v63  ;;  %7156 = vmatprep.subr.bf16.mxu0 %v9958_v0  ;;  %v10009_v63 = vld [vmem:[%s14298_s1 + $0x24c] ss:$16 sps:$4 sm:$0xff]   ;;  %v10004_v0 = vld [vmem:[%s14298_s1 + $0x48] ss:$16 sps:$4 sm:$0xff]  }
 0x1ff   : > { %7199 = vmatprep.subr.bf16.mxu1 %v9961_v1  ;;  %v10007_v1 = vld [vmem:[%s14298_s1 + $0x248] ss:$16 sps:$4 sm:$0xff]  }
 0x201   : > { %7157 = vmatpush2.bf16.msra.mxu0 %v9956_v2  ;;  %v10012_v2 = vld [vmem:[%s14298_s1 + $0x2c] ss:$16 sps:$4 sm:$0xff]  }
 0x202   : > { %7200 = vmatpush2.bf16.msra.mxu1 %v9959_v3  ;;  %7158 = vmatprep.subr.bf16.mxu0 %v9964_v4  ;;  %v10015_v3 = vld [vmem:[%s14298_s1 + $0x22c] ss:$16 sps:$4 sm:$0xff]   ;;  %v10010_v4 = vld [vmem:[%s14298_s1 + $0x28] ss:$16 sps:$4 sm:$0xff]  }
 0x203   : > { %7201 = vmatprep.subr.bf16.mxu1 %v9967_v5  ;;  %v10013_v5 = vld [vmem:[%s14298_s1 + $0x228] ss:$16 sps:$4 sm:$0xff]  }
 0x205   : > { %7159 = vmatpush2.bf16.msra.mxu0 %v9962_v14  ;;  %v10018_v14 = vld [vmem:[%s14298_s1 + $0xc] ss:$16 sps:$4 sm:$0xff]  }
 0x206   : > { %7202 = vmatpush2.bf16.msra.mxu1 %v9965_v46  ;;  %7160 = vmatprep.subr.bf16.mxu0 %v9970_v51  ;;  %v10021_v46 = vld [vmem:[%s14298_s1 + $0x20c] ss:$16 sps:$4 sm:$0xff]   ;;  %v10016_v51 = vld [vmem:[%s14298_s1 + $0x8] ss:$16 sps:$4 sm:$0xff]  }
 0x207   : > { %7203 = vmatprep.subr.bf16.mxu1 %v9973_v15  ;;  %v10019_v15 = vld [vmem:[%s14298_s1 + $0x208] ss:$16 sps:$4 sm:$0xff]  }
 0x209   : > { %7161 = vmatpush2.bf16.msra.mxu0 %v9968_v23  ;;  %v10024_v23 = vld [vmem:[%s14298_s1 + $0x1ec] ss:$16 sps:$4 sm:$0xff]  }
 0x20a   : > { %7204 = vmatpush2.bf16.msra.mxu1 %v9971_v34  ;;  %7216 = vmatprep.subr.bf16.mxu0 %v9976_v28  ;;  %v10027_v34 = vld [vmem:[%s14298_s1 + $0x3ec] ss:$16 sps:$4 sm:$0xff]   ;;  %v10022_v28 = vld [vmem:[%s14298_s1 + $0x1e8] ss:$16 sps:$4 sm:$0xff]  }
 0x20b   : > { %7259 = vmatprep.subr.bf16.mxu1 %v9979_v31  ;;  %v10025_v31 = vld [vmem:[%s14298_s1 + $0x3e8] ss:$16 sps:$4 sm:$0xff]  }
 0x20c   : > { %7163 = vmatmul.mubr.bf16.vlgmr.msra.gmra.mxu0 %v12570_v38 }
 0x20d   : > { %7206 = vmatmul.mubr.bf16.vlgmr.msra.gmra.mxu1 %v12574_v39  ;;  %7217 = vmatpush1.bf16.msra.mxu0 %v9974_v22  ;;  %v10030_v22 = vld [vmem:[%s14298_s1 + $0x1cc] ss:$16 sps:$4 sm:$0xff]  }
 0x20e   : > { %7260 = vmatpush1.bf16.msra.mxu1 %v9977_v26  ;;  %7218 = vmatprep.subr.bf16.mxu0 %v9982_v42  ;;  %v10033_v26 = vld [vmem:[%s14298_s1 + $0x3cc] ss:$16 sps:$4 sm:$0xff]   ;;  %v10028_v42 = vld [vmem:[%s14298_s1 + $0x1c8] ss:$16 sps:$4 sm:$0xff]  }
 0x20f   : > { %7261 = vmatprep.subr.bf16.mxu1 %v9985_v54  ;;  %7248 = vmatprep.mubr.bf16.mxu0 %v10941_v53  ;;  %v9992_v53 = vld [vmem:[%s14298_s1 + $0x88] ss:$16 sps:$4 sm:$0xff]   ;;  %v10216_v39 = vld [vmem:[%s14298_s1 + $0x9ec] ss:$16 sps:$4 sm:$0xff]  }
 0x210   : > { %7291 = vmatprep.mubr.bf16.mxu1 %v10946_v55  ;;  %v9995_v55 = vld [vmem:[%s14298_s1 + $0x288] ss:$16 sps:$4 sm:$0xff]  }
 0x211   : > { %7219 = vmatpush1.bf16.msra.mxu0 %v9980_v16  ;;  %v10031_v54 = vld [vmem:[%s14298_s1 + $0x3c8] ss:$16 sps:$4 sm:$0xff]   ;;  %v10036_v16 = vld [vmem:[%s14298_s1 + $0x1ac] ss:$16 sps:$4 sm:$0xff]  }
 0x212   : > { %7262 = vmatpush1.bf16.msra.mxu1 %v9983_v17  ;;  %7220 = vmatprep.subr.bf16.mxu0 %v9988_v18  ;;  %v10039_v17 = vld [vmem:[%s14298_s1 + $0x3ac] ss:$16 sps:$4 sm:$0xff]   ;;  %v10034_v18 = vld [vmem:[%s14298_s1 + $0x1a8] ss:$16 sps:$4 sm:$0xff]  }
 0x213   : > { %7263 = vmatprep.subr.bf16.mxu1 %v9991_v19  ;;  %v10037_v19 = vld [vmem:[%s14298_s1 + $0x3a8] ss:$16 sps:$4 sm:$0xff]  }
 0x215   : > { %7221 = vmatpush1.bf16.msra.mxu0 %v9986_v6  ;;  %v10042_v6 = vld [vmem:[%s14298_s1 + $0x18c] ss:$16 sps:$4 sm:$0xff]  }
 0x216   : > { %7264 = vmatpush1.bf16.msra.mxu1 %v9989_v7  ;;  %7222 = vmatprep.subr.bf16.mxu0 %v9994_v12  ;;  %v10045_v7 = vld [vmem:[%s14298_s1 + $0x38c] ss:$16 sps:$4 sm:$0xff]   ;;  %v10040_v12 = vld [vmem:[%s14298_s1 + $0x188] ss:$16 sps:$4 sm:$0xff]  }
 0x217   : > { %7265 = vmatprep.subr.bf16.mxu1 %v9997_v13  ;;  %v10043_v13 = vld [vmem:[%s14298_s1 + $0x388] ss:$16 sps:$4 sm:$0xff]  }
 0x219   : > { %7223 = vmatpush1.bf16.msra.mxu0 %v9992_v53  ;;  %v10048_v53 = vld [vmem:[%s14298_s1 + $0x16c] ss:$16 sps:$4 sm:$0xff]  }
 0x21a   : > { %7266 = vmatpush1.bf16.msra.mxu1 %v9995_v55  ;;  %7224 = vmatprep.subr.bf16.mxu0 %v10000_v58  ;;  %v10051_v55 = vld [vmem:[%s14298_s1 + $0x36c] ss:$16 sps:$4 sm:$0xff]   ;;  %v10046_v58 = vld [vmem:[%s14298_s1 + $0x168] ss:$16 sps:$4 sm:$0xff]  }
 0x21b   : > { %7267 = vmatprep.subr.bf16.mxu1 %v10003_v59  ;;  %v10049_v59 = vld [vmem:[%s14298_s1 + $0x368] ss:$16 sps:$4 sm:$0xff]  }
 0x21d   : > { %7225 = vmatpush1.bf16.msra.mxu0 %v9998_v60  ;;  %v10054_v60 = vld [vmem:[%s14298_s1 + $0x14c] ss:$16 sps:$4 sm:$0xff]  }
 0x21e   : > { %7268 = vmatpush1.bf16.msra.mxu1 %v10001_v61  ;;  %7226 = vmatprep.subr.bf16.mxu0 %v10006_v62  ;;  %v10057_v61 = vld [vmem:[%s14298_s1 + $0x34c] ss:$16 sps:$4 sm:$0xff]   ;;  %v10052_v62 = vld [vmem:[%s14298_s1 + $0x148] ss:$16 sps:$4 sm:$0xff]  }
 0x21f   : > { %7269 = vmatprep.subr.bf16.mxu1 %v10009_v63  ;;  %v10055_v63 = vld [vmem:[%s14298_s1 + $0x348] ss:$16 sps:$4 sm:$0xff]  }
 0x221   : > { %7227 = vmatpush1.bf16.msra.mxu0 %v10004_v0  ;;  %v10060_v0 = vld [vmem:[%s14298_s1 + $0x12c] ss:$16 sps:$4 sm:$0xff]  }
 0x222   : > { %7270 = vmatpush1.bf16.msra.mxu1 %v10007_v1  ;;  %7228 = vmatprep.subr.bf16.mxu0 %v10012_v2  ;;  %v10063_v1 = vld [vmem:[%s14298_s1 + $0x32c] ss:$16 sps:$4 sm:$0xff]   ;;  %v10058_v2 = vld [vmem:[%s14298_s1 + $0x128] ss:$16 sps:$4 sm:$0xff]  }
 0x223   : > { %7271 = vmatprep.subr.bf16.mxu1 %v10015_v3  ;;  %v10061_v3 = vld [vmem:[%s14298_s1 + $0x328] ss:$16 sps:$4 sm:$0xff]  }
 0x225   : > { %7229 = vmatpush1.bf16.msra.mxu0 %v10010_v4  ;;  %v10066_v4 = vld [vmem:[%s14298_s1 + $0x10c] ss:$16 sps:$4 sm:$0xff]  }
 0x226   : > { %7272 = vmatpush1.bf16.msra.mxu1 %v10013_v5  ;;  %7230 = vmatprep.subr.bf16.mxu0 %v10018_v14  ;;  %v10069_v5 = vld [vmem:[%s14298_s1 + $0x30c] ss:$16 sps:$4 sm:$0xff]   ;;  %v10064_v14 = vld [vmem:[%s14298_s1 + $0x108] ss:$16 sps:$4 sm:$0xff]  }
 0x227   : > { %7273 = vmatprep.subr.bf16.mxu1 %v10021_v46  ;;  %v10067_v46 = vld [vmem:[%s14298_s1 + $0x308] ss:$16 sps:$4 sm:$0xff]  }
 0x229   : > { %7231 = vmatpush1.bf16.msra.mxu0 %v10016_v51  ;;  %v10072_v51 = vld [vmem:[%s14298_s1 + $0x4ec] ss:$16 sps:$4 sm:$0xff]  }
 0x22a   : > { %7274 = vmatpush1.bf16.msra.mxu1 %v10019_v15  ;;  %7232 = vmatprep.subr.bf16.mxu0 %v10024_v23  ;;  %v10075_v15 = vld [vmem:[%s14298_s1 + $0x6ec] ss:$16 sps:$4 sm:$0xff]   ;;  %v10070_v23 = vld [vmem:[%s14298_s1 + $0x4e8] ss:$16 sps:$4 sm:$0xff]  }
 0x22b   : > { %7275 = vmatprep.subr.bf16.mxu1 %v10027_v34  ;;  %v10073_v34 = vld [vmem:[%s14298_s1 + $0x6e8] ss:$16 sps:$4 sm:$0xff]  }
 0x22d   : > { %7233 = vmatpush2.bf16.msra.mxu0 %v10022_v28  ;;  %v10078_v28 = vld [vmem:[%s14298_s1 + $0x4cc] ss:$16 sps:$4 sm:$0xff]  }
 0x22e   : > { %7276 = vmatpush2.bf16.msra.mxu1 %v10025_v31  ;;  %7234 = vmatprep.subr.bf16.mxu0 %v10030_v22  ;;  %v10081_v31 = vld [vmem:[%s14298_s1 + $0x6cc] ss:$16 sps:$4 sm:$0xff]   ;;  %v10076_v22 = vld [vmem:[%s14298_s1 + $0x4c8] ss:$16 sps:$4 sm:$0xff]  }
 0x22f   : > { %7277 = vmatprep.subr.bf16.mxu1 %v10033_v26  ;;  %v10079_v26 = vld [vmem:[%s14298_s1 + $0x6c8] ss:$16 sps:$4 sm:$0xff]  }
 0x231   : > { %7235 = vmatpush2.bf16.msra.mxu0 %v10028_v42  ;;  %v10084_v42 = vld [vmem:[%s14298_s1 + $0x4ac] ss:$16 sps:$4 sm:$0xff]  }
 0x232   : > { %7278 = vmatpush2.bf16.msra.mxu1 %v10031_v54  ;;  %7236 = vmatprep.subr.bf16.mxu0 %v10036_v16  ;;  %v10087_v54 = vld [vmem:[%s14298_s1 + $0x6ac] ss:$16 sps:$4 sm:$0xff]   ;;  %v10082_v16 = vld [vmem:[%s14298_s1 + $0x4a8] ss:$16 sps:$4 sm:$0xff]  }
 0x233   : > { %7279 = vmatprep.subr.bf16.mxu1 %v10039_v17  ;;  %v10093_v17 = vld [vmem:[%s14298_s1 + $0x68c] ss:$16 sps:$4 sm:$0xff]  }
 0x235   : > { %7237 = vmatpush2.bf16.msra.mxu0 %v10034_v18  ;;  %v10088_v18 = vld [vmem:[%s14298_s1 + $0x488] ss:$16 sps:$4 sm:$0xff]  }
 0x236   : > { %7280 = vmatpush2.bf16.msra.mxu1 %v10037_v19  ;;  %7238 = vmatprep.subr.bf16.mxu0 %v10042_v6  ;;  %v10099_v19 = vld [vmem:[%s14298_s1 + $0x66c] ss:$16 sps:$4 sm:$0xff]   ;;  %v10094_v6 = vld [vmem:[%s14298_s1 + $0x468] ss:$16 sps:$4 sm:$0xff]  }
 0x237   : > { %7281 = vmatprep.subr.bf16.mxu1 %v10045_v7  ;;  %v10097_v7 = vld [vmem:[%s14298_s1 + $0x668] ss:$16 sps:$4 sm:$0xff]  }
 0x239   : > { %7239 = vmatpush2.bf16.msra.mxu0 %v10040_v12  ;;  %v10102_v12 = vld [vmem:[%s14298_s1 + $0x44c] ss:$16 sps:$4 sm:$0xff]  }
 0x23a   : > { %7282 = vmatpush2.bf16.msra.mxu1 %v10043_v13  ;;  %7240 = vmatprep.subr.bf16.mxu0 %v10048_v53  ;;  %v10105_v13 = vld [vmem:[%s14298_s1 + $0x64c] ss:$16 sps:$4 sm:$0xff]   ;;  %v10100_v53 = vld [vmem:[%s14298_s1 + $0x448] ss:$16 sps:$4 sm:$0xff]  }
 0x23b   : > { %7283 = vmatprep.subr.bf16.mxu1 %v10051_v55  ;;  %v10103_v55 = vld [vmem:[%s14298_s1 + $0x648] ss:$16 sps:$4 sm:$0xff]  }
 0x23d   : > { %7241 = vmatpush2.bf16.msra.mxu0 %v10046_v58  ;;  %v10108_v58 = vld [vmem:[%s14298_s1 + $0x42c] ss:$16 sps:$4 sm:$0xff]  }
 0x23e   : > { %7284 = vmatpush2.bf16.msra.mxu1 %v10049_v59  ;;  %7242 = vmatprep.subr.bf16.mxu0 %v10054_v60  ;;  %v10111_v59 = vld [vmem:[%s14298_s1 + $0x62c] ss:$16 sps:$4 sm:$0xff]   ;;  %v10106_v60 = vld [vmem:[%s14298_s1 + $0x428] ss:$16 sps:$4 sm:$0xff]  }
 0x23f   : > { %7285 = vmatprep.subr.bf16.mxu1 %v10057_v61  ;;  %v10109_v61 = vld [vmem:[%s14298_s1 + $0x628] ss:$16 sps:$4 sm:$0xff]  }
 0x241   : > { %7243 = vmatpush2.bf16.msra.mxu0 %v10052_v62  ;;  %v10114_v62 = vld [vmem:[%s14298_s1 + $0x40c] ss:$16 sps:$4 sm:$0xff]  }
 0x242   : > { %7286 = vmatpush2.bf16.msra.mxu1 %v10055_v63  ;;  %7244 = vmatprep.subr.bf16.mxu0 %v10060_v0  ;;  %v10117_v63 = vld [vmem:[%s14298_s1 + $0x60c] ss:$16 sps:$4 sm:$0xff]   ;;  %v10112_v0 = vld [vmem:[%s14298_s1 + $0x408] ss:$16 sps:$4 sm:$0xff]  }
 0x243   : > { %7287 = vmatprep.subr.bf16.mxu1 %v10063_v1  ;;  %v10115_v1 = vld [vmem:[%s14298_s1 + $0x608] ss:$16 sps:$4 sm:$0xff]  }
 0x245   : > { %7245 = vmatpush2.bf16.msra.mxu0 %v10058_v2  ;;  %v10120_v2 = vld [vmem:[%s14298_s1 + $0x5ec] ss:$16 sps:$4 sm:$0xff]  }
 0x246   : > { %7288 = vmatpush2.bf16.msra.mxu1 %v10061_v3  ;;  %7246 = vmatprep.subr.bf16.mxu0 %v10066_v4  ;;  %v10123_v3 = vld [vmem:[%s14298_s1 + $0x7ec] ss:$16 sps:$4 sm:$0xff]   ;;  %v10118_v4 = vld [vmem:[%s14298_s1 + $0x5e8] ss:$16 sps:$4 sm:$0xff]  }
 0x247   : > { %7289 = vmatprep.subr.bf16.mxu1 %v10069_v5  ;;  %v10121_v5 = vld [vmem:[%s14298_s1 + $0x7e8] ss:$16 sps:$4 sm:$0xff]  }
 0x249   : > { %7247 = vmatpush2.bf16.msra.mxu0 %v10064_v14  ;;  %v12872_v14 = vpop.f32.mrf.mxu0 }
 0x24a   : > { %7290 = vmatpush2.bf16.msra.mxu1 %v10067_v46  ;;  %7302 = vmatprep.subr.bf16.mxu0 %v10072_v51  ;;  %v12874_v46 = vpop.f32.mrf.mxu1  ;;  %v10126_v51 = vld [vmem:[%s14298_s1 + $0x5cc] ss:$16 sps:$4 sm:$0xff]  }
 0x24b   : > { %7345 = vmatprep.subr.bf16.mxu1 %v10075_v15  ;;  %v10129_v15 = vld [vmem:[%s14298_s1 + $0x7cc] ss:$16 sps:$4 sm:$0xff]  }
 0x24c   : > { %7249 = vmatmul.mubr.bf16.vlgmr.msra.gmra.mxu0 %v10998_v8  ;;  %v10085_v8 = vld [vmem:[%s14298_s1 + $0x6a8] ss:$16 sps:$4 sm:$0xff]  }
 0x24d   : > { %7292 = vmatmul.mubr.bf16.vlgmr.msra.gmra.mxu1 %v11000_v9  ;;  %7303 = vmatpush1.bf16.msra.mxu0 %v10070_v23  ;;  %v10090_v9 = vld [vmem:[%s14298_s1 + $0x48c] ss:$16 sps:$4 sm:$0xff]   ;;  %v10124_v23 = vld [vmem:[%s14298_s1 + $0x5c8] ss:$16 sps:$4 sm:$0xff]  }
 0x24e   : > { %7346 = vmatpush1.bf16.msra.mxu1 %v10073_v34  ;;  %7304 = vmatprep.subr.bf16.mxu0 %v10078_v28  ;;  %v10127_v34 = vld [vmem:[%s14298_s1 + $0x7c8] ss:$16 sps:$4 sm:$0xff]   ;;  %v12888_v28 = vpop.f32.mrf.mxu0 }
 0x24f   : > { %7347 = vmatprep.subr.bf16.mxu1 %v10081_v31  ;;  %7334 = vmatprep.mubr.bf16.mxu0 %v11099_v41  ;;  %v10091_v41 = vld [vmem:[%s14298_s1 + $0x688] ss:$16 sps:$4 sm:$0xff]   ;;  %v12890_v31 = vpop.f32.mrf.mxu1 }
 0x250   : > { %7377 = vmatprep.mubr.bf16.mxu1 %v11106_v43  ;;  %v10096_v43 = vld [vmem:[%s14298_s1 + $0x46c] ss:$16 sps:$4 sm:$0xff]   ;;  %v6608_v38 = vadd.f32 %v12890_v31, %v12888_v28 }
 0x251   : > { %7305 = vmatpush1.bf16.msra.mxu0 %v10076_v22  ;;  %v10132_v22 = vld [vmem:[%s14298_s1 + $0x5ac] ss:$16 sps:$4 sm:$0xff]  }
 0x252   : > { %7348 = vmatpush1.bf16.msra.mxu1 %v10079_v26  ;;  %7306 = vmatprep.subr.bf16.mxu0 %v10084_v42  ;;  %v10135_v26 = vld [vmem:[%s14298_s1 + $0x7ac] ss:$16 sps:$4 sm:$0xff]   ;;  %v10130_v42 = vld [vmem:[%s14298_s1 + $0x5a8] ss:$16 sps:$4 sm:$0xff]  }
 0x253   : > { %7349 = vmatprep.subr.bf16.mxu1 %v10087_v54  ;;  %v10133_v54 = vld [vmem:[%s14298_s1 + $0x7a8] ss:$16 sps:$4 sm:$0xff]  }
 0x255   : > { %7307 = vmatpush1.bf16.msra.mxu0 %v10082_v16  ;;  %v12904_v16 = vpop.f32.mrf.mxu0 }
 0x256   : > { %7350 = vmatpush1.bf16.msra.mxu1 %v10085_v8  ;;  %7308 = vmatprep.subr.bf16.mxu0 %v10090_v9  ;;  %v12906_v8 = vpop.f32.mrf.mxu1  ;;  %v10138_v9 = vld [vmem:[%s14298_s1 + $0x58c] ss:$16 sps:$4 sm:$0xff]  }
 0x257   : > { %7351 = vmatprep.subr.bf16.mxu1 %v10093_v17  ;;  %v10141_v17 = vld [vmem:[%s14298_s1 + $0x78c] ss:$16 sps:$4 sm:$0xff]   ;;  %v6610_v28 = vadd.f32 %v12906_v8, %v12904_v16 }
 0x258   : > { %v10231_v8 = vld [vmem:[%s14298_s1 + $0xbac] ss:$16 sps:$4 sm:$0xff]  }
 0x259   : > { %7309 = vmatpush1.bf16.msra.mxu0 %v10088_v18  ;;  %v10136_v18 = vld [vmem:[%s14298_s1 + $0x588] ss:$16 sps:$4 sm:$0xff]  }
 0x25a   : > { %7352 = vmatpush1.bf16.msra.mxu1 %v10091_v41  ;;  %7310 = vmatprep.subr.bf16.mxu0 %v10096_v43  ;;  %v10139_v41 = vld [vmem:[%s14298_s1 + $0x788] ss:$16 sps:$4 sm:$0xff]   ;;  %v12920_v43 = vpop.f32.mrf.mxu0 }
 0x25b   : > { %7353 = vmatprep.subr.bf16.mxu1 %v10099_v19  ;;  %v12922_v19 = vpop.f32.mrf.mxu1 }
 0x25d   : > { %7311 = vmatpush1.bf16.msra.mxu0 %v10094_v6  ;;  %v10144_v6 = vld [vmem:[%s14298_s1 + $0x56c] ss:$16 sps:$4 sm:$0xff]  }
 0x25e   : > { %7354 = vmatpush1.bf16.msra.mxu1 %v10097_v7  ;;  %7312 = vmatprep.subr.bf16.mxu0 %v10102_v12  ;;  %v10147_v7 = vld [vmem:[%s14298_s1 + $0x76c] ss:$16 sps:$4 sm:$0xff]   ;;  %v12930_v12 = vpop.f32.mrf.mxu0 }
 0x25f   : > { %7355 = vmatprep.subr.bf16.mxu1 %v10105_v13  ;;  %v12932_v13 = vpop.f32.mrf.mxu1 }
 0x261   : > { %7313 = vmatpush1.bf16.msra.mxu0 %v10100_v53  ;;  %v10142_v53 = vld [vmem:[%s14298_s1 + $0x568] ss:$16 sps:$4 sm:$0xff]  }
 0x262   : > { %7356 = vmatpush1.bf16.msra.mxu1 %v10103_v55  ;;  %7314 = vmatprep.subr.bf16.mxu0 %v10108_v58  ;;  %v10145_v55 = vld [vmem:[%s14298_s1 + $0x768] ss:$16 sps:$4 sm:$0xff]   ;;  %v10150_v58 = vld [vmem:[%s14298_s1 + $0x54c] ss:$16 sps:$4 sm:$0xff]  }
 0x263   : > { %7357 = vmatprep.subr.bf16.mxu1 %v10111_v59  ;;  %v10153_v59 = vld [vmem:[%s14298_s1 + $0x74c] ss:$16 sps:$4 sm:$0xff]  }
 0x265   : > { %7315 = vmatpush1.bf16.msra.mxu0 %v10106_v60  ;;  %v12946_v60 = vpop.f32.mrf.mxu0 }
 0x266   : > { %7358 = vmatpush1.bf16.msra.mxu1 %v10109_v61  ;;  %7316 = vmatprep.subr.bf16.mxu0 %v10114_v62  ;;  %v12948_v61 = vpop.f32.mrf.mxu1  ;;  %v10148_v62 = vld [vmem:[%s14298_s1 + $0x548] ss:$16 sps:$4 sm:$0xff]   ;;  %v6651_v31 = vadd.f32 %v12946_v60, %v6608_v38 }
 0x267   : > { %7359 = vmatprep.subr.bf16.mxu1 %v10117_v63  ;;  %v10151_v63 = vld [vmem:[%s14298_s1 + $0x748] ss:$16 sps:$4 sm:$0xff]  }
 0x269   : > { %7317 = vmatpush1.bf16.msra.mxu0 %v10112_v0  ;;  %v10156_v0 = vld [vmem:[%s14298_s1 + $0x52c] ss:$16 sps:$4 sm:$0xff]  }
 0x26a   : > { %7360 = vmatpush1.bf16.msra.mxu1 %v10115_v1  ;;  %7318 = vmatprep.subr.bf16.mxu0 %v10120_v2  ;;  %v10159_v1 = vld [vmem:[%s14298_s1 + $0x72c] ss:$16 sps:$4 sm:$0xff]   ;;  %v12962_v2 = vpop.f32.mrf.mxu0 }
 0x26b   : > { %7361 = vmatprep.subr.bf16.mxu1 %v10123_v3  ;;  %v12964_v3 = vpop.f32.mrf.mxu1 }
 0x26d   : > { %7319 = vmatpush2.bf16.msra.mxu0 %v10118_v4  ;;  %v10154_v4 = vld [vmem:[%s14298_s1 + $0x528] ss:$16 sps:$4 sm:$0xff]  }
 0x26e   : > { %7362 = vmatpush2.bf16.msra.mxu1 %v10121_v5  ;;  %7320 = vmatprep.subr.bf16.mxu0 %v10126_v51  ;;  %v10157_v5 = vld [vmem:[%s14298_s1 + $0x728] ss:$16 sps:$4 sm:$0xff]   ;;  %v10162_v51 = vld [vmem:[%s14298_s1 + $0x50c] ss:$16 sps:$4 sm:$0xff]  }
 0x26f   : > { %7363 = vmatprep.subr.bf16.mxu1 %v10129_v15  ;;  %v10165_v15 = vld [vmem:[%s14298_s1 + $0x70c] ss:$16 sps:$4 sm:$0xff]  }
 0x271   : > { %7321 = vmatpush2.bf16.msra.mxu0 %v10124_v23  ;;  %v12978_v23 = vpop.f32.mrf.mxu0 }
 0x272   : > { %7364 = vmatpush2.bf16.msra.mxu1 %v10127_v34  ;;  %7322 = vmatprep.subr.bf16.mxu0 %v10132_v22  ;;  %v12980_v34 = vpop.f32.mrf.mxu1  ;;  %v10160_v22 = vld [vmem:[%s14298_s1 + $0x508] ss:$16 sps:$4 sm:$0xff]  }
 0x273   : > { %7365 = vmatprep.subr.bf16.mxu1 %v10135_v26  ;;  %v10163_v26 = vld [vmem:[%s14298_s1 + $0x708] ss:$16 sps:$4 sm:$0xff]  }
 0x275   : > { %7323 = vmatpush2.bf16.msra.mxu0 %v10130_v42  ;;  %v12988_v42 = vpop.f32.mrf.mxu0 }
 0x276   : > { %7366 = vmatpush2.bf16.msra.mxu1 %v10133_v54  ;;  %7324 = vmatprep.subr.bf16.mxu0 %v10138_v9  ;;  %v12990_v54 = vpop.f32.mrf.mxu1  ;;  %v10168_v9 = vld [vmem:[%s14298_s1 + $0x8ec] ss:$16 sps:$4 sm:$0xff]  }
 0x277   : > { %7367 = vmatprep.subr.bf16.mxu1 %v10141_v17  ;;  %v10171_v17 = vld [vmem:[%s14298_s1 + $0xaec] ss:$16 sps:$4 sm:$0xff]  }
 0x279   : > { %7325 = vmatpush2.bf16.msra.mxu0 %v10136_v18  ;;  %v10166_v18 = vld [vmem:[%s14298_s1 + $0x8e8] ss:$16 sps:$4 sm:$0xff]  }
 0x27a   : > { %7368 = vmatpush2.bf16.msra.mxu1 %v10139_v41  ;;  %7326 = vmatprep.subr.bf16.mxu0 %v10144_v6  ;;  %v10169_v41 = vld [vmem:[%s14298_s1 + $0xae8] ss:$16 sps:$4 sm:$0xff]   ;;  %v13004_v6 = vpop.f32.mrf.mxu0 }
 0x27b   : > { %7369 = vmatprep.subr.bf16.mxu1 %v10147_v7  ;;  %v13006_v7 = vpop.f32.mrf.mxu1 }
 0x27d   : > { %7327 = vmatpush2.bf16.msra.mxu0 %v10142_v53  ;;  %v10174_v53 = vld [vmem:[%s14298_s1 + $0x8cc] ss:$16 sps:$4 sm:$0xff]  }
 0x27e   : > { %7370 = vmatpush2.bf16.msra.mxu1 %v10145_v55  ;;  %7328 = vmatprep.subr.bf16.mxu0 %v10150_v58  ;;  %v10177_v55 = vld [vmem:[%s14298_s1 + $0xacc] ss:$16 sps:$4 sm:$0xff]   ;;  %v10172_v58 = vld [vmem:[%s14298_s1 + $0x8c8] ss:$16 sps:$4 sm:$0xff]  }
 0x27f   : > { %7371 = vmatprep.subr.bf16.mxu1 %v10153_v59  ;;  %v10175_v59 = vld [vmem:[%s14298_s1 + $0xac8] ss:$16 sps:$4 sm:$0xff]  }
 0x281   : > { %7329 = vmatpush2.bf16.msra.mxu0 %v10148_v62  ;;  %v13022_v62 = vpop.f32.mrf.mxu0 }
 0x282   : > { %7372 = vmatpush2.bf16.msra.mxu1 %v10151_v63  ;;  %7330 = vmatprep.subr.bf16.mxu0 %v10156_v0  ;;  %v13024_v63 = vpop.f32.mrf.mxu1  ;;  %v10178_v0 = vld [vmem:[%s14298_s1 + $0x8a8] ss:$16 sps:$4 sm:$0xff]  }
 0x283   : > { %7373 = vmatprep.subr.bf16.mxu1 %v10159_v1  ;;  %v10181_v1 = vld [vmem:[%s14298_s1 + $0xaa8] ss:$16 sps:$4 sm:$0xff]  }
 0x285   : > { %7331 = vmatpush2.bf16.msra.mxu0 %v10154_v4  ;;  %v13040_v4 = vpop.f32.mrf.mxu0 }
 0x286   : > { %7374 = vmatpush2.bf16.msra.mxu1 %v10157_v5  ;;  %7332 = vmatprep.subr.bf16.mxu0 %v10162_v51  ;;  %v13042_v5 = vpop.f32.mrf.mxu1 }
 0x287   : > { %7375 = vmatprep.subr.bf16.mxu1 %v10165_v15  ;;  %v13050_v51 = vpop.f32.mrf.mxu0 }
 0x288   : > { %v13052_v15 = vpop.f32.mrf.mxu1 }
 0x289   : > { %7333 = vmatpush2.bf16.msra.mxu0 %v10160_v22  ;;  %v10184_v22 = vld [vmem:[%s14298_s1 + $0x888] ss:$16 sps:$4 sm:$0xff]  }
 0x28a   : > { %7376 = vmatpush2.bf16.msra.mxu1 %v10163_v26  ;;  %7388 = vmatprep.subr.bf16.mxu0 %v10168_v9  ;;  %v10187_v26 = vld [vmem:[%s14298_s1 + $0xa88] ss:$16 sps:$4 sm:$0xff]   ;;  %v10192_v9 = vld [vmem:[%s14298_s1 + $0x86c] ss:$16 sps:$4 sm:$0xff]  }
 0x28b   : > { %7431 = vmatprep.subr.bf16.mxu1 %v10171_v17  ;;  %v10195_v17 = vld [vmem:[%s14298_s1 + $0xa6c] ss:$16 sps:$4 sm:$0xff]  }
 0x28c   : > { %7335 = vmatmul.mubr.bf16.vlgmr.msra.gmra.mxu0 %v11220_v20  ;;  %v10180_v20 = vld [vmem:[%s14298_s1 + $0x8ac] ss:$16 sps:$4 sm:$0xff]  }
 0x28d   : > { %7378 = vmatmul.mubr.bf16.vlgmr.msra.gmra.mxu1 %v11224_v21  ;;  %7389 = vmatpush1.bf16.msra.mxu0 %v10166_v18  ;;  %v10183_v21 = vld [vmem:[%s14298_s1 + $0xaac] ss:$16 sps:$4 sm:$0xff]   ;;  %v13066_v18 = vpop.f32.mrf.mxu0 }
 0x28e   : > { %7432 = vmatpush1.bf16.msra.mxu1 %v10169_v41  ;;  %7390 = vmatprep.subr.bf16.mxu0 %v10174_v53  ;;  %v13068_v41 = vpop.f32.mrf.mxu1  ;;  %v10190_v53 = vld [vmem:[%s14298_s1 + $0x868] ss:$16 sps:$4 sm:$0xff]  }
 0x28f   : > { %7433 = vmatprep.subr.bf16.mxu1 %v10177_v55  ;;  %7420 = vmatprep.mubr.bf16.mxu0 %v11263_v33  ;;  %v10186_v33 = vld [vmem:[%s14298_s1 + $0x88c] ss:$16 sps:$4 sm:$0xff]   ;;  %v10193_v55 = vld [vmem:[%s14298_s1 + $0xa68] ss:$16 sps:$4 sm:$0xff]  }
 0x290   : > { %7463 = vmatprep.mubr.bf16.mxu1 %v11270_v35  ;;  %v10189_v35 = vld [vmem:[%s14298_s1 + $0xa8c] ss:$16 sps:$4 sm:$0xff]  }
 0x291   : > { %7391 = vmatpush1.bf16.msra.mxu0 %v10172_v58  ;;  %v10198_v58 = vld [vmem:[%s14298_s1 + $0x84c] ss:$16 sps:$4 sm:$0xff]  }
 0x292   : > { %7434 = vmatpush1.bf16.msra.mxu1 %v10175_v59  ;;  %7392 = vmatprep.subr.bf16.mxu0 %v10180_v20  ;;  %v10201_v59 = vld [vmem:[%s14298_s1 + $0xa4c] ss:$16 sps:$4 sm:$0xff]   ;;  %v13082_v20 = vpop.f32.mrf.mxu0 }
 0x293   : > { %7435 = vmatprep.subr.bf16.mxu1 %v10183_v21  ;;  %v13084_v21 = vpop.f32.mrf.mxu1 }
 0x295   : > { %7393 = vmatpush1.bf16.msra.mxu0 %v10178_v0  ;;  %v10196_v0 = vld [vmem:[%s14298_s1 + $0x848] ss:$16 sps:$4 sm:$0xff]  }
 0x296   : > { %7436 = vmatpush1.bf16.msra.mxu1 %v10181_v1  ;;  %7394 = vmatprep.subr.bf16.mxu0 %v10186_v33  ;;  %v10199_v1 = vld [vmem:[%s14298_s1 + $0xa48] ss:$16 sps:$4 sm:$0xff]   ;;  %v10204_v33 = vld [vmem:[%s14298_s1 + $0x82c] ss:$16 sps:$4 sm:$0xff]  }
 0x297   : > { %7437 = vmatprep.subr.bf16.mxu1 %v10189_v35  ;;  %v10207_v35 = vld [vmem:[%s14298_s1 + $0xa2c] ss:$16 sps:$4 sm:$0xff]  }
 0x299   : > { %7395 = vmatpush1.bf16.msra.mxu0 %v10184_v22  ;;  %v13098_v22 = vpop.f32.mrf.mxu0 }
 0x29a   : > { %7438 = vmatpush1.bf16.msra.mxu1 %v10187_v26  ;;  %7396 = vmatprep.subr.bf16.mxu0 %v10192_v9  ;;  %v13100_v26 = vpop.f32.mrf.mxu1  ;;  %v10202_v9 = vld [vmem:[%s14298_s1 + $0x828] ss:$16 sps:$4 sm:$0xff]  }
 0x29b   : > { %7439 = vmatprep.subr.bf16.mxu1 %v10195_v17  ;;  %v10205_v17 = vld [vmem:[%s14298_s1 + $0xa28] ss:$16 sps:$4 sm:$0xff]  }
 0x29d   : > { %7397 = vmatpush1.bf16.msra.mxu0 %v10190_v53  ;;  %v13108_v53 = vpop.f32.mrf.mxu0 }
 0x29e   : > { %7440 = vmatpush1.bf16.msra.mxu1 %v10193_v55  ;;  %7398 = vmatprep.subr.bf16.mxu0 %v10198_v58  ;;  %v13110_v55 = vpop.f32.mrf.mxu1  ;;  %v10210_v58 = vld [vmem:[%s14298_s1 + $0x80c] ss:$16 sps:$4 sm:$0xff]  }
 0x29f   : > { %7441 = vmatprep.subr.bf16.mxu1 %v10201_v59  ;;  %v10213_v59 = vld [vmem:[%s14298_s1 + $0xa0c] ss:$16 sps:$4 sm:$0xff]  }
 0x2a1   : > { %7399 = vmatpush1.bf16.msra.mxu0 %v10196_v0  ;;  %v10208_v0 = vld [vmem:[%s14298_s1 + $0x808] ss:$16 sps:$4 sm:$0xff]  }
 0x2a2   : > { %7442 = vmatpush1.bf16.msra.mxu1 %v10199_v1  ;;  %7400 = vmatprep.subr.bf16.mxu0 %v10204_v33  ;;  %v10211_v1 = vld [vmem:[%s14298_s1 + $0xa08] ss:$16 sps:$4 sm:$0xff]   ;;  %v13124_v33 = vpop.f32.mrf.mxu0 }
 0x2a3   : > { %7443 = vmatprep.subr.bf16.mxu1 %v10207_v35  ;;  %v13126_v35 = vpop.f32.mrf.mxu1 }
 0x2a4   : > { %v13145_v27 = vpop.f32.mrf.mxu0 }
 0x2a5   : > { %7401 = vmatpush1.bf16.msra.mxu0 %v10202_v9  ;;  %v10219_v9 = vld [vmem:[%s14298_s1 + $0xbec] ss:$16 sps:$4 sm:$0xff]   ;;  %v13147_v52 = vpop.f32.mrf.mxu1 }
 0x2a6   : > { %7444 = vmatpush1.bf16.msra.mxu1 %v10205_v17  ;;  %7402 = vmatprep.subr.bf16.mxu0 %v10210_v58  ;;  %v6606_v17 = vadd.f32 %v12874_v46, %v12872_v14  ;;  %v10214_v58 = vld [vmem:[%s14298_s1 + $0x9e8] ss:$16 sps:$4 sm:$0xff]   ;;  %v10222_v14 = vld [vmem:[%s14298_s1 + $0x9cc] ss:$16 sps:$4 sm:$0xff]   ;;  %v13168_v16 = vpop.f32.mrf.mxu0 }
 0x2a7   : > { %7445 = vmatprep.subr.bf16.mxu1 %v10213_v59  ;;  %v10217_v59 = vld [vmem:[%s14298_s1 + $0xbe8] ss:$16 sps:$4 sm:$0xff]   ;;  %v10225_v46 = vld [vmem:[%s14298_s1 + $0xbcc] ss:$16 sps:$4 sm:$0xff]   ;;  %v13170_v38 = vpop.f32.mrf.mxu1 }
 0x2a8   : > { %v6649_v32 = vadd.f32 %v12930_v12, %v6606_v17  ;;  %v6612_v12 = vadd.f32 %v12922_v19, %v12920_v43  ;;  %v6694_v43 = vadd.f32 %v12948_v61, %v6651_v31  ;;  %v13181_v60 = vpop.f32.mrf.mxu0  ;;  %v10229_v61 = vld [vmem:[%s14298_s1 + $0xba8] ss:$16 sps:$4 sm:$0xff]  }
 0x2a9   : > { %7403 = vmatpush1.bf16.msra.mxu0 %v10208_v0 }
 0x2aa   : > { %7446 = vmatpush1.bf16.msra.mxu1 %v10211_v1  ;;  %7404 = vmatprep.subr.bf16.mxu0 %v10216_v39  ;;  %v6692_v0 = vadd.f32 %v12932_v13, %v6649_v32  ;;  %v6653_v39 = vadd.f32 %v12962_v2, %v6610_v28  ;;  %v10220_v1 = vld [vmem:[%s14298_s1 + $0x9c8] ss:$16 sps:$4 sm:$0xff]   ;;  %v10228_v32 = vld [vmem:[%s14298_s1 + $0x9ac] ss:$16 sps:$4 sm:$0xff]   ;;  %v6655_v19 = vadd.f32 %v12978_v23, %v6612_v12  ;;  %v13183_v2 = vpop.f32.mrf.mxu1 }
 0x2ab   : > { %7447 = vmatprep.subr.bf16.mxu1 %v10219_v9  ;;  %v10223_v9 = vld [vmem:[%s14298_s1 + $0xbc8] ss:$16 sps:$4 sm:$0xff]   ;;  %v10234_v23 = vld [vmem:[%s14298_s1 + $0x98c] ss:$16 sps:$4 sm:$0xff]  }
 0x2ac   : > { %v6735_v13 = vadd.f32 %v12988_v42, %v6692_v0  ;;  %v6696_v17 = vadd.f32 %v12964_v3, %v6653_v39  ;;  %v10237_v3 = vld [vmem:[%s14298_s1 + $0xb8c] ss:$16 sps:$4 sm:$0xff]   ;;  %v6698_v42 = vadd.f32 %v12980_v34, %v6655_v19  ;;  %v13202_v28 = vpop.f32.mrf.mxu1  ;;  %v10232_v39 = vld [vmem:[%s14298_s1 + $0x988] ss:$16 sps:$4 sm:$0xff]  }
 0x2ad   : > { %7405 = vmatpush2.bf16.msra.mxu0 %v10214_v58  ;;  %v6737_v58 = vadd.f32 %v13004_v6, %v6694_v43  ;;  %v10235_v34 = vld [vmem:[%s14298_s1 + $0xb88] ss:$16 sps:$4 sm:$0xff]  }
 0x2ae   : > { %7448 = vmatpush2.bf16.msra.mxu1 %v10217_v59  ;;  %7406 = vmatprep.subr.bf16.mxu0 %v10222_v14  ;;  %v10226_v59 = vld [vmem:[%s14298_s1 + $0x9a8] ss:$16 sps:$4 sm:$0xff]   ;;  %v6778_v6 = vadd.f32 %v12990_v54, %v6735_v13  ;;  %v6739_v14 = vadd.f32 %v13022_v62, %v6696_v17  ;;  %v6741_v12 = vadd.f32 %v13040_v4, %v6698_v42  ;;  %v10240_v54 = vld [vmem:[%s14298_s1 + $0x96c] ss:$16 sps:$4 sm:$0xff]  }
 0x2af   : > { %7449 = vmatprep.subr.bf16.mxu1 %v10225_v46  ;;  %v6994_v46 = vpop.f32.mrf.mxu0  ;;  %v6780_v31 = vadd.f32 %v13006_v7, %v6737_v58  ;;  %v10243_v7 = vld [vmem:[%s14298_s1 + $0xb6c] ss:$16 sps:$4 sm:$0xff]   ;;  %v10238_v43 = vld [vmem:[%s14298_s1 + $0x968] ss:$16 sps:$4 sm:$0xff]  }
 0x2b0   : > { %v6821_v0 = vadd.f32 %v13050_v51, %v6778_v6  ;;  %v6782_v62 = vadd.f32 %v13024_v63, %v6739_v14  ;;  %v10241_v63 = vld [vmem:[%s14298_s1 + $0xb68] ss:$16 sps:$4 sm:$0xff]  }
 0x2b1   : > { %7407 = vmatpush2.bf16.msra.mxu0 %v10220_v1  ;;  %v6823_v4 = vadd.f32 %v13066_v18, %v6780_v31  ;;  %v6996_v51 = vpop.f32.mrf.mxu0  ;;  %v13221_v1 = vpop.f32.mrf.mxu1 }
 0x2b2   : > { %7450 = vmatpush2.bf16.msra.mxu1 %v10223_v9  ;;  %7408 = vmatprep.subr.bf16.mxu0 %v10228_v32  ;;  %v6784_v9 = vadd.f32 %v13042_v5, %v6741_v12  ;;  %v6864_v32 = vadd.f32 %v13052_v15, %v6821_v0  ;;  %v10246_v5 = vld [vmem:[%s14298_s1 + $0x94c] ss:$16 sps:$4 sm:$0xff]   ;;  %v10250_v12 = vld [vmem:[%s14298_s1 + $0x928] ss:$16 sps:$4 sm:$0xff]  }
 0x2b3   : > { %7451 = vmatprep.subr.bf16.mxu1 %v10231_v8  ;;  %v6825_v8 = vadd.f32 %v13082_v20, %v6782_v62  ;;  %v10249_v15 = vld [vmem:[%s14298_s1 + $0xb4c] ss:$16 sps:$4 sm:$0xff]   ;;  %v6866_v18 = vadd.f32 %v13068_v41, %v6823_v4  ;;  %v6998_v13 = vpop.f32.mrf.mxu0  ;;  %v7041_v17 = vpop.f32.mrf.mxu1  ;;  %v10247_v41 = vld [vmem:[%s14298_s1 + $0xb48] ss:$16 sps:$4 sm:$0xff]  }
 0x2b4   : > { %v6827_v20 = vadd.f32 %v13098_v22, %v6784_v9  ;;  %v6907_v19 = vadd.f32 %v13108_v53, %v6864_v32  ;;  %v10255_v53 = vld [vmem:[%s14298_s1 + $0xb2c] ss:$16 sps:$4 sm:$0xff]   ;;  %v10259_v62 = vld [vmem:[%s14298_s1 + $0xb08] ss:$16 sps:$4 sm:$0xff]  }
 0x2b5   : > { %7409 = vmatpush2.bf16.msra.mxu0 %v10226_v59  ;;  %v6868_v58 = vadd.f32 %v13084_v21, %v6825_v8  ;;  %v6909_v59 = vadd.f32 %v13124_v33, %v6866_v18  ;;  %v7121_v22 = vpop.f32.mrf.mxu1  ;;  %v10252_v21 = vld [vmem:[%s14298_s1 + $0x92c] ss:$16 sps:$4 sm:$0xff]  }
 0x2b6   : > { %7452 = vmatpush2.bf16.msra.mxu1 %v10229_v61  ;;  %7410 = vmatprep.subr.bf16.mxu0 %v10234_v23  ;;  %v10244_v61 = vld [vmem:[%s14298_s1 + $0x948] ss:$16 sps:$4 sm:$0xff]   ;;  %v7078_v23 = vpop.f32.mrf.mxu0  ;;  %v6870_v33 = vadd.f32 %v13100_v26, %v6827_v20 }
 0x2b7   : > { %7453 = vmatprep.subr.bf16.mxu1 %v10237_v3  ;;  %v6950_v3 = vadd.f32 %v13110_v55, %v6907_v19  ;;  %v6911_v42 = vadd.f32 %v13145_v27, %v6868_v58  ;;  %v6952_v6 = vadd.f32 %v13126_v35, %v6909_v59  ;;  %v10253_v26 = vld [vmem:[%s14298_s1 + $0xb28] ss:$16 sps:$4 sm:$0xff]   ;;  %v7123_v55 = vpop.f32.mrf.mxu1  ;;  %v10258_v27 = vld [vmem:[%s14298_s1 + $0x90c] ss:$16 sps:$4 sm:$0xff]  }
 0x2b8   : > { %v6913_v14 = vadd.f32 %v13168_v16, %v6870_v33  ;;  %v7080_v0 = vpop.f32.mrf.mxu0  ;;  %v10261_v35 = vld [vmem:[%s14298_s1 + $0xb0c] ss:$16 sps:$4 sm:$0xff]  }
 0x2b9   : > { %7411 = vmatpush2.bf16.msra.mxu0 %v10232_v39  ;;  %v6993_v31 = vadd.f32 %v13181_v60, %v6950_v3  ;;  %v6954_v16 = vadd.f32 %v13147_v52, %v6911_v42  ;;  %v6995_v60 = vadd.f32 %v6994_v46, %v6952_v6  ;;  %v7125_v9 = vpop.f32.mrf.mxu1  ;;  %v10264_v52 = vld [vmem:[%s14298_s1 + $0xcec] ss:$16 sps:$4 sm:$0xff]  }
 0x2ba   : > { %7454 = vmatpush2.bf16.msra.mxu1 %v10235_v34  ;;  %7412 = vmatprep.subr.bf16.mxu0 %v10240_v54  ;;  %v6956_v39 = vadd.f32 %v13170_v38, %v6913_v14  ;;  %v7082_v4 = vpop.f32.mrf.mxu0  ;;  %v10267_v38 = vld [vmem:[%s14298_s1 + $0xeec] ss:$16 sps:$4 sm:$0xff]  }
 0x2bb   : > { %7455 = vmatprep.subr.bf16.mxu1 %v10243_v7  ;;  %v7036_v34 = vadd.f32 %v13183_v2, %v6993_v31  ;;  %v6997_v54 = vadd.f32 %v6996_v51, %v6954_v16  ;;  %v10256_v7 = vld [vmem:[%s14298_s1 + $0x908] ss:$16 sps:$4 sm:$0xff]   ;;  %v7038_v2 = vadd.f32 %v13202_v28, %v6995_v60  ;;  %v10270_v28 = vld [vmem:[%s14298_s1 + $0xccc] ss:$16 sps:$4 sm:$0xff]  }
 0x2bc   : > { %v6999_v46 = vadd.f32 %v6998_v13, %v6956_v39 }
 0x2bd   : > { %7413 = vmatpush2.bf16.msra.mxu0 %v10238_v43  ;;  %v7079_v51 = vadd.f32 %v7078_v23, %v7036_v34  ;;  %v7040_v32 = vadd.f32 %v13221_v1, %v6997_v54  ;;  %v7081_v8 = vadd.f32 %v7080_v0, %v7038_v2  ;;  %v10262_v43 = vld [vmem:[%s14298_s1 + $0xce8] ss:$16 sps:$4 sm:$0xff]   ;;  %v10273_v1 = vld [vmem:[%s14298_s1 + $0xecc] ss:$16 sps:$4 sm:$0xff]  }
 0x2be   : > { %7456 = vmatpush2.bf16.msra.mxu1 %v10241_v63  ;;  %7414 = vmatprep.subr.bf16.mxu0 %v10246_v5  ;;  %v10265_v63 = vld [vmem:[%s14298_s1 + $0xee8] ss:$16 sps:$4 sm:$0xff]   ;;  %v7084_v5 = vpop.f32.mrf.mxu0  ;;  %v7042_v18 = vadd.f32 %v7041_v17, %v6999_v46 }
 0x2bf   : > { %7457 = vmatprep.subr.bf16.mxu1 %v10249_v15  ;;  %v7127_v15 = vpop.f32.mrf.mxu1  ;;  %v7122_v20 = vadd.f32 %v7121_v22, %v7079_v51  ;;  %v7083_v19 = vadd.f32 %v7082_v4, %v7040_v32  ;;  %v7124_v59 = vadd.f32 %v7123_v55, %v7081_v8  ;;  %v10268_v23 = vld [vmem:[%s14298_s1 + $0xcc8] ss:$16 sps:$4 sm:$0xff]   ;;  %v10285_v55 = vld [vmem:[%s14298_s1 + $0xe8c] ss:$16 sps:$4 sm:$0xff]  }
 0x2c0   : > { %v10271_v17 = vld [vmem:[%s14298_s1 + $0xec8] ss:$16 sps:$4 sm:$0xff]  }
 0x2c1   : > { %7415 = vmatpush2.bf16.msra.mxu0 %v10244_v61  ;;  %v7085_v61 = vadd.f32 %v7084_v5, %v7042_v18  ;;  %v10277_v0 = vld [vmem:[%s14298_s1 + $0xea8] ss:$16 sps:$4 sm:$0xff]   ;;  %v10294_v18 = vld [vmem:[%s14298_s1 + $0xc4c] ss:$16 sps:$4 sm:$0xff]  }
 0x2c2   : > { %7458 = vmatpush2.bf16.msra.mxu1 %v10247_v41  ;;  %7416 = vmatprep.subr.bf16.mxu0 %v10252_v21  ;;  %v10283_v4 = vld [vmem:[%s14298_s1 + $0xe88] ss:$16 sps:$4 sm:$0xff]  }
 0x2c3   : > { %7459 = vmatprep.subr.bf16.mxu1 %v10255_v53  ;;  %v7126_v53 = vadd.f32 %v7125_v9, %v7083_v19  ;;  %v7128_v14 = vadd.f32 %v7127_v15, %v7085_v61  ;;  %v10288_v9 = vld [vmem:[%s14298_s1 + $0xc6c] ss:$16 sps:$4 sm:$0xff]   ;;  %v10286_v15 = vld [vmem:[%s14298_s1 + $0xc68] ss:$16 sps:$4 sm:$0xff]  }
 0x2c5   : > { %7417 = vmatpush2.bf16.msra.mxu0 %v10250_v12 }
 0x2c6   : > { %7460 = vmatpush2.bf16.msra.mxu1 %v10253_v26  ;;  %7418 = vmatprep.subr.bf16.mxu0 %v10258_v27  ;;  %v10274_v26 = vld [vmem:[%s14298_s1 + $0xca8] ss:$16 sps:$4 sm:$0xff]  }
 0x2c7   : > { %7461 = vmatprep.subr.bf16.mxu1 %v10261_v35 }
 0x2c9   : > { %7419 = vmatpush2.bf16.msra.mxu0 %v10256_v7 }
 0x2ca   : > { %7462 = vmatpush2.bf16.msra.mxu1 %v10259_v62  ;;  %7474 = vmatprep.subr.bf16.mxu0 %v10264_v52  ;;  %v10280_v62 = vld [vmem:[%s14298_s1 + $0xc88] ss:$16 sps:$4 sm:$0xff]   ;;  %v10291_v52 = vld [vmem:[%s14298_s1 + $0xe6c] ss:$16 sps:$4 sm:$0xff]  }
 0x2cb   : > { %7517 = vmatprep.subr.bf16.mxu1 %v10267_v38 }
 0x2cc   : > { %v7164_v13 = vpop.f32.mrf.mxu0  ;;  %7421 = vmatmul.mubr.bf16.vlgmr.msra.gmra.mxu0 %v11456_v48  ;;  %v10276_v48 = vld [vmem:[%s14298_s1 + $0xcac] ss:$16 sps:$4 sm:$0xff]  }
 0x2cd   : > { %v7207_v58 = vpop.f32.mrf.mxu1  ;;  %7464 = vmatmul.mubr.bf16.vlgmr.msra.gmra.mxu1 %v11460_v49  ;;  %v7165_v41 = vadd.f32 %v7164_v13, %v7122_v20  ;;  %7475 = vmatpush1.bf16.msra.mxu0 %v10262_v43  ;;  %v10279_v49 = vld [vmem:[%s14298_s1 + $0xeac] ss:$16 sps:$4 sm:$0xff]  }
 0x2ce   : > { %7518 = vmatpush1.bf16.msra.mxu1 %v10265_v63  ;;  %v7166_v22 = vpop.f32.mrf.mxu0  ;;  %7476 = vmatprep.subr.bf16.mxu0 %v10270_v28  ;;  %v10289_v28 = vld [vmem:[%s14298_s1 + $0xe68] ss:$16 sps:$4 sm:$0xff]   ;;  %v10297_v20 = vld [vmem:[%s14298_s1 + $0xe4c] ss:$16 sps:$4 sm:$0xff]  }
 0x2cf   : > { %v7209_v21 = vpop.f32.mrf.mxu1  ;;  %7519 = vmatprep.subr.bf16.mxu1 %v10273_v1  ;;  %v7167_v33 = vadd.f32 %v7166_v22, %v7124_v59  ;;  %7506 = vmatprep.mubr.bf16.mxu0 %v11476_v29  ;;  %v7208_v3 = vadd.f32 %v7207_v58, %v7165_v41  ;;  %v10295_v22 = vld [vmem:[%s14298_s1 + $0xe48] ss:$16 sps:$4 sm:$0xff]  }
 0x2d0   : > { %7549 = vmatprep.mubr.bf16.mxu1 %v11480_v30  ;;  %v7168_v42 = vpop.f32.mrf.mxu0  ;;  %v10282_v30 = vld [vmem:[%s14298_s1 + $0xc8c] ss:$16 sps:$4 sm:$0xff]  }
 0x2d1   : > { %v7211_v6 = vpop.f32.mrf.mxu1  ;;  %v7210_v31 = vadd.f32 %v7209_v21, %v7167_v33  ;;  %v7169_v12 = vadd.f32 %v7168_v42, %v7126_v53  ;;  %7477 = vmatpush1.bf16.msra.mxu0 %v10268_v23  ;;  %v7960_v60 = vmul.f32 %v7208_v3, %v7208_v3 }
 0x2d2   : > { %7520 = vmatpush1.bf16.msra.mxu1 %v10271_v17  ;;  %v7170_v29 = vpop.f32.mrf.mxu0  ;;  %7478 = vmatprep.subr.bf16.mxu0 %v10276_v48  ;;  %v10292_v17 = vld [vmem:[%s14298_s1 + $0xc48] ss:$16 sps:$4 sm:$0xff]   ;;  %v10300_v48 = vld [vmem:[%s14298_s1 + $0xc2c] ss:$16 sps:$4 sm:$0xff]  }
 0x2d3   : > { %7521 = vmatprep.subr.bf16.mxu1 %v10279_v49  ;;  %v9193_v27 = vpack.c.bf16 %v7210_v31, %v7208_v3  ;;  %v7212_v35 = vadd.f32 %v7211_v6, %v7169_v12  ;;  %v7171_v16 = vadd.f32 %v7170_v29, %v7128_v14  ;;  %v7213_v39 = vpop.f32.mrf.mxu1  ;;  %v7961_v32 = vmul.f32 %v7210_v31, %v7210_v31  ;;  %v10303_v49 = vld [vmem:[%s14298_s1 + $0xe2c] ss:$16 sps:$4 sm:$0xff]   ;;  %v10298_v14 = vld [vmem:[%s14298_s1 + $0xc28] ss:$16 sps:$4 sm:$0xff]  }
 0x2d4   : > { %v10309_v29 = vld [vmem:[%s14298_s1 + $0xe0c] ss:$16 sps:$4 sm:$0xff]  }
 0x2d5   : > { %7928 = vst [vmem:[%s13328_s20] sm:$0xff] %v9193_v27  ;;  %v7932_v34 = vadd.f32 %v7212_v35, %v7208_v3  ;;  %v7964_v54 = vmul.f32 %v7212_v35, %v7212_v35  ;;  %v7214_v7 = vadd.f32 %v7213_v39, %v7171_v16  ;;  %7479 = vmatpush1.bf16.msra.mxu0 %v10274_v26  ;;  %v10304_v16 = vld [vmem:[%s14298_s1 + $0xc08] ss:$16 sps:$4 sm:$0xff]  }
 0x2d6   : > { %7522 = vmatpush1.bf16.msra.mxu1 %v10277_v0  ;;  %7480 = vmatprep.subr.bf16.mxu0 %v10282_v30  ;;  %v10306_v0 = vld [vmem:[%s14298_s1 + $0xc0c] ss:$16 sps:$4 sm:$0xff]  }
 0x2d7   : > { %7523 = vmatprep.subr.bf16.mxu1 %v10285_v55  ;;  %v7933_v38 = vrot.slane %v7932_v34, 4  ;;  %v7968_v2 = vadd.f32 %v7964_v54, %v7960_v60  ;;  %v9195_v46 = vpack.c.bf16 %v7214_v7, %v7212_v35  ;;  %v7939_v51 = vadd.f32 %v7214_v7, %v7210_v31  ;;  %v10301_v31 = vld [vmem:[%s14298_s1 + $0xe28] ss:$16 sps:$4 sm:$0xff]   ;;  %v10312_v54 = vld [vmem:[%s14298_s1 + $0xdec] ss:$16 sps:$4 sm:$0xff]  }
 0x2d8   : > { %v7965_v8 = vmul.f32 %v7214_v7, %v7214_v7  ;;  %v10307_v60 = vld [vmem:[%s14298_s1 + $0xe08] ss:$16 sps:$4 sm:$0xff]   ;;  %v10315_v7 = vld [vmem:[%s14298_s1 + $0xfec] ss:$16 sps:$4 sm:$0xff]  }
 0x2d9   : > { %v7934_v43 = vadd.f32 %v7933_v38, %v7932_v34  ;;  %v7969_v63 = vrot.slane %v7968_v2, 4  ;;  %7930 = vst [vmem:[%s13328_s20 + $0x10] sm:$0xff] %v9195_v46  ;;  %v7940_v5 = vrot.slane %v7939_v51, 4  ;;  %7481 = vmatpush1.bf16.msra.mxu0 %v10280_v62  ;;  %v10318_v38 = vld [vmem:[%s14298_s1 + $0xdcc] ss:$16 sps:$4 sm:$0xff]  }
 0x2da   : > { %7524 = vmatpush1.bf16.msra.mxu1 %v10283_v4  ;;  %v7975_v1 = vadd.f32 %v7965_v8, %v7961_v32  ;;  %7482 = vmatprep.subr.bf16.mxu0 %v10288_v9  ;;  %v10310_v9 = vld [vmem:[%s14298_s1 + $0xde8] ss:$16 sps:$4 sm:$0xff]   ;;  %v10324_v32 = vld [vmem:[%s14298_s1 + $0xdac] ss:$16 sps:$4 sm:$0xff]  }
 0x2db   : > { %7525 = vmatprep.subr.bf16.mxu1 %v10291_v52  ;;  %v7935_v19 = vrot.slane %v7934_v43, 2  ;;  %v7970_v13 = vadd.f32 %v7969_v63, %v7968_v2  ;;  %v7941_v58 = vadd.f32 %v7940_v5, %v7939_v51  ;;  %v10313_v52 = vld [vmem:[%s14298_s1 + $0xfe8] ss:$16 sps:$4 sm:$0xff]   ;;  %v10321_v2 = vld [vmem:[%s14298_s1 + $0xfcc] ss:$16 sps:$4 sm:$0xff]  }
 0x2dc   : > { %v7976_v59 = vrot.slane %v7975_v1, 4  ;;  %v10316_v46 = vld [vmem:[%s14298_s1 + $0xdc8] ss:$16 sps:$4 sm:$0xff]   ;;  %v10327_v8 = vld [vmem:[%s14298_s1 + $0xfac] ss:$16 sps:$4 sm:$0xff]  }
 0x2dd   : > { %v7936_v61 = vadd.f32 %v7935_v19, %v7934_v43  ;;  %v7971_v41 = vrot.slane %v7970_v13, 2  ;;  %v7942_v23 = vrot.slane %v7941_v58, 2  ;;  %7483 = vmatpush1.bf16.msra.mxu0 %v10286_v15  ;;  %v10319_v51 = vld [vmem:[%s14298_s1 + $0xfc8] ss:$16 sps:$4 sm:$0xff]   ;;  %v10330_v5 = vld [vmem:[%s14298_s1 + $0xd8c] ss:$16 sps:$4 sm:$0xff]  }
 0x2de   : > { %7526 = vmatpush1.bf16.msra.mxu1 %v10289_v28  ;;  %v7977_v21 = vadd.f32 %v7976_v59, %v7975_v1  ;;  %7484 = vmatprep.subr.bf16.mxu0 %v10294_v18  ;;  %v10322_v43 = vld [vmem:[%s14298_s1 + $0xda8] ss:$16 sps:$4 sm:$0xff]   ;;  %v10333_v15 = vld [vmem:[%s14298_s1 + $0xf8c] ss:$16 sps:$4 sm:$0xff]  }
 0x2df   : > { %7527 = vmatprep.subr.bf16.mxu1 %v10297_v20  ;;  %v7937_v53 = vrot.slane %v7936_v61, 1  ;;  %v7972_v33 = vadd.f32 %v7971_v41, %v7970_v13  ;;  %v7943_v3 = vadd.f32 %v7942_v23, %v7941_v58  ;;  %v10325_v63 = vld [vmem:[%s14298_s1 + $0xfa8] ss:$16 sps:$4 sm:$0xff]   ;;  %v10336_v18 = vld [vmem:[%s14298_s1 + $0xd6c] ss:$16 sps:$4 sm:$0xff]  }
 0x2e0   : > { %v7978_v42 = vrot.slane %v7977_v21, 2  ;;  %v10328_v28 = vld [vmem:[%s14298_s1 + $0xd88] ss:$16 sps:$4 sm:$0xff]   ;;  %v10339_v20 = vld [vmem:[%s14298_s1 + $0xf6c] ss:$16 sps:$4 sm:$0xff]  }
 0x2e1   : > { %v7973_v6 = vrot.slane %v7972_v33, 1  ;;  %7485 = vmatpush1.bf16.msra.mxu0 %v10292_v17  ;;  %v7944_v12 = vrot.slane %v7943_v3, 1  ;;  %v7938_v30 = vadd.f32 %v7937_v53, %v7936_v61  ;;  %v10331_v1 = vld [vmem:[%s14298_s1 + $0xf88] ss:$16 sps:$4 sm:$0xff]   ;;  %v10342_v58 = vld [vmem:[%s14298_s1 + $0xd4c] ss:$16 sps:$4 sm:$0xff]  }
 0x2e2   : > { %7528 = vmatpush1.bf16.msra.mxu1 %v10295_v22  ;;  %v7979_v26 = vadd.f32 %v7978_v42, %v7977_v21  ;;  %7486 = vmatprep.subr.bf16.mxu0 %v10300_v48  ;;  %v10334_v19 = vld [vmem:[%s14298_s1 + $0xd68] ss:$16 sps:$4 sm:$0xff]   ;;  %v10345_v59 = vld [vmem:[%s14298_s1 + $0xf4c] ss:$16 sps:$4 sm:$0xff]  }
 0x2e3   : > { %7529 = vmatprep.subr.bf16.mxu1 %v10303_v49  ;;  %v7974_v55 = vadd.f32 %v7973_v6, %v7972_v33  ;;  %v7945_v39 = vadd.f32 %v7944_v12, %v7943_v3  ;;  %v10337_v13 = vld [vmem:[%s14298_s1 + $0xf68] ss:$16 sps:$4 sm:$0xff]   ;;  %v10348_v23 = vld [vmem:[%s14298_s1 + $0xd2c] ss:$16 sps:$4 sm:$0xff]  }
 0x2e4   : > { %v7980_v27 = vrot.slane %v7979_v26, 1  ;;  %v10340_v61 = vld [vmem:[%s14298_s1 + $0xd48] ss:$16 sps:$4 sm:$0xff]   ;;  %v10351_v17 = vld [vmem:[%s14298_s1 + $0xf2c] ss:$16 sps:$4 sm:$0xff]  }
 0x2e5   : > { %v13387_v35 = vsel %vm7996_vm0, %v7938_v30, %v7974_v55  ;;  %7487 = vmatpush1.bf16.msra.mxu0 %v10298_v14  ;;  %v10343_v41 = vld [vmem:[%s14298_s1 + $0xf48] ss:$16 sps:$4 sm:$0xff]   ;;  %v10354_v48 = vld [vmem:[%s14298_s1 + $0xd0c] ss:$16 sps:$4 sm:$0xff]  }
 0x2e6   : > { %7530 = vmatpush1.bf16.msra.mxu1 %v10301_v31  ;;  %v7981_v34 = vadd.f32 %v7980_v27, %v7979_v26  ;;  %7488 = vmatprep.subr.bf16.mxu0 %v10306_v0  ;;  %v10346_v22 = vld [vmem:[%s14298_s1 + $0xd28] ss:$16 sps:$4 sm:$0xff]   ;;  %v10357_v49 = vld [vmem:[%s14298_s1 + $0xf0c] ss:$16 sps:$4 sm:$0xff]  }
 0x2e7   : > { %7531 = vmatprep.subr.bf16.mxu1 %v10309_v29  ;;  %v10349_v21 = vld [vmem:[%s14298_s1 + $0xf28] ss:$16 sps:$4 sm:$0xff]   ;;  %v10360_v3 = vld [vmem:[%s14298_s1 + $0x10ec] ss:$16 sps:$4 sm:$0xff]  }
 0x2e8   : > { %v13402_v62 = vsel %vm7996_vm0, %v7945_v39, %v7981_v34  ;;  %v10352_v53 = vld [vmem:[%s14298_s1 + $0xd08] ss:$16 sps:$4 sm:$0xff]   ;;  %v10363_v42 = vld [vmem:[%s14298_s1 + $0x12ec] ss:$16 sps:$4 sm:$0xff]  }
 0x2e9   : > { %v8005_v4 = vcombine.low %v13387_v35, %v13402_v62  ;;  %7489 = vmatpush1.bf16.msra.mxu0 %v10304_v16  ;;  %v10355_v33 = vld [vmem:[%s14298_s1 + $0xf08] ss:$16 sps:$4 sm:$0xff]   ;;  %v10366_v31 = vld [vmem:[%s14298_s1 + $0x10cc] ss:$16 sps:$4 sm:$0xff]  }
 0x2ea   : > { %7532 = vmatpush1.bf16.msra.mxu1 %v10307_v60  ;;  %7490 = vmatprep.subr.bf16.mxu0 %v10312_v54  ;;  %v10358_v6 = vld [vmem:[%s14298_s1 + $0x10e8] ss:$16 sps:$4 sm:$0xff]   ;;  %v10369_v12 = vld [vmem:[%s14298_s1 + $0x12cc] ss:$16 sps:$4 sm:$0xff]  }
 0x2eb   : > { %7533 = vmatprep.subr.bf16.mxu1 %v10315_v7  ;;  %v10361_v14 = vld [vmem:[%s14298_s1 + $0x12e8] ss:$16 sps:$4 sm:$0xff]   ;;  %v10372_v29 = vld [vmem:[%s14298_s1 + $0x10ac] ss:$16 sps:$4 sm:$0xff]  }
 0x2ec   : > { %v10364_v26 = vld [vmem:[%s14298_s1 + $0x10c8] ss:$16 sps:$4 sm:$0xff]   ;;  %v10378_v55 = vld [vmem:[%s14298_s1 + $0x108c] ss:$16 sps:$4 sm:$0xff]  }
 0x2ed   : > { %7491 = vmatpush2.bf16.msra.mxu0 %v10310_v9  ;;  %v10367_v0 = vld [vmem:[%s14298_s1 + $0x12c8] ss:$16 sps:$4 sm:$0xff]   ;;  %v10384_v16 = vld [vmem:[%s14298_s1 + $0x106c] ss:$16 sps:$4 sm:$0xff]  }
 0x2ee   : > { %7534 = vmatpush2.bf16.msra.mxu1 %v10313_v52  ;;  %7492 = vmatprep.subr.bf16.mxu0 %v10318_v38  ;;  %v10373_v30 = vld [vmem:[%s14298_s1 + $0x12a8] ss:$16 sps:$4 sm:$0xff]   ;;  %v10387_v60 = vld [vmem:[%s14298_s1 + $0x126c] ss:$16 sps:$4 sm:$0xff]  }
 0x2ef   : > { %7535 = vmatprep.subr.bf16.mxu1 %v10321_v2  ;;  %v10379_v27 = vld [vmem:[%s14298_s1 + $0x1288] ss:$16 sps:$4 sm:$0xff]   ;;  %v10390_v54 = vld [vmem:[%s14298_s1 + $0x104c] ss:$16 sps:$4 sm:$0xff]  }
 0x2f0   : > { %v10382_v39 = vld [vmem:[%s14298_s1 + $0x1068] ss:$16 sps:$4 sm:$0xff]   ;;  %v10393_v7 = vld [vmem:[%s14298_s1 + $0x124c] ss:$16 sps:$4 sm:$0xff]  }
 0x2f1   : > { %7493 = vmatpush2.bf16.msra.mxu0 %v10316_v46  ;;  %v10385_v34 = vld [vmem:[%s14298_s1 + $0x1268] ss:$16 sps:$4 sm:$0xff]   ;;  %v10396_v38 = vld [vmem:[%s14298_s1 + $0x102c] ss:$16 sps:$4 sm:$0xff]  }
 0x2f2   : > { %7536 = vmatpush2.bf16.msra.mxu1 %v10319_v51  ;;  %7494 = vmatprep.subr.bf16.mxu0 %v10324_v32  ;;  %v10388_v9 = vld [vmem:[%s14298_s1 + $0x1048] ss:$16 sps:$4 sm:$0xff]   ;;  %v10399_v2 = vld [vmem:[%s14298_s1 + $0x122c] ss:$16 sps:$4 sm:$0xff]  }
 0x2f3   : > { %7537 = vmatprep.subr.bf16.mxu1 %v10327_v8  ;;  %v10391_v52 = vld [vmem:[%s14298_s1 + $0x1248] ss:$16 sps:$4 sm:$0xff]   ;;  %v10402_v32 = vld [vmem:[%s14298_s1 + $0x100c] ss:$16 sps:$4 sm:$0xff]  }
 0x2f4   : > { %v10394_v46 = vld [vmem:[%s14298_s1 + $0x1028] ss:$16 sps:$4 sm:$0xff]   ;;  %v10405_v8 = vld [vmem:[%s14298_s1 + $0x120c] ss:$16 sps:$4 sm:$0xff]  }
 0x2f5   : > { %7495 = vmatpush2.bf16.msra.mxu0 %v10322_v43  ;;  %v10397_v51 = vld [vmem:[%s14298_s1 + $0x1228] ss:$16 sps:$4 sm:$0xff]  }
 0x2f6   : > { %7538 = vmatpush2.bf16.msra.mxu1 %v10325_v63  ;;  %7496 = vmatprep.subr.bf16.mxu0 %v10330_v5  ;;  %v10400_v43 = vld [vmem:[%s14298_s1 + $0x1008] ss:$16 sps:$4 sm:$0xff]   ;;  %v10408_v5 = vld [vmem:[%s14298_s1 + $0x11ec] ss:$16 sps:$4 sm:$0xff]  }
 0x2f7   : > { %7539 = vmatprep.subr.bf16.mxu1 %v10333_v15  ;;  %v10403_v63 = vld [vmem:[%s14298_s1 + $0x1208] ss:$16 sps:$4 sm:$0xff]   ;;  %v10411_v15 = vld [vmem:[%s14298_s1 + $0x13ec] ss:$16 sps:$4 sm:$0xff]  }
 0x2f9   : > { %7497 = vmatpush2.bf16.msra.mxu0 %v10328_v28  ;;  %v10406_v28 = vld [vmem:[%s14298_s1 + $0x11e8] ss:$16 sps:$4 sm:$0xff]  }
 0x2fa   : > { %7540 = vmatpush2.bf16.msra.mxu1 %v10331_v1  ;;  %7498 = vmatprep.subr.bf16.mxu0 %v10336_v18  ;;  %v10409_v1 = vld [vmem:[%s14298_s1 + $0x13e8] ss:$16 sps:$4 sm:$0xff]   ;;  %v10414_v18 = vld [vmem:[%s14298_s1 + $0x11cc] ss:$16 sps:$4 sm:$0xff]  }
 0x2fb   : > { %7541 = vmatprep.subr.bf16.mxu1 %v10339_v20  ;;  %v10417_v20 = vld [vmem:[%s14298_s1 + $0x13cc] ss:$16 sps:$4 sm:$0xff]  }
 0x2fd   : > { %7499 = vmatpush2.bf16.msra.mxu0 %v10334_v19  ;;  %v10412_v19 = vld [vmem:[%s14298_s1 + $0x11c8] ss:$16 sps:$4 sm:$0xff]  }
 0x2fe   : > { %7542 = vmatpush2.bf16.msra.mxu1 %v10337_v13  ;;  %7500 = vmatprep.subr.bf16.mxu0 %v10342_v58  ;;  %v10415_v13 = vld [vmem:[%s14298_s1 + $0x13c8] ss:$16 sps:$4 sm:$0xff]   ;;  %v10420_v58 = vld [vmem:[%s14298_s1 + $0x11ac] ss:$16 sps:$4 sm:$0xff]  }
 0x2ff   : > { %7543 = vmatprep.subr.bf16.mxu1 %v10345_v59  ;;  %v10423_v59 = vld [vmem:[%s14298_s1 + $0x13ac] ss:$16 sps:$4 sm:$0xff]  }
 0x301   : > { %7501 = vmatpush2.bf16.msra.mxu0 %v10340_v61  ;;  %v10418_v61 = vld [vmem:[%s14298_s1 + $0x11a8] ss:$16 sps:$4 sm:$0xff]  }
 0x302   : > { %7544 = vmatpush2.bf16.msra.mxu1 %v10343_v41  ;;  %7502 = vmatprep.subr.bf16.mxu0 %v10348_v23  ;;  %v10421_v41 = vld [vmem:[%s14298_s1 + $0x13a8] ss:$16 sps:$4 sm:$0xff]   ;;  %v10426_v23 = vld [vmem:[%s14298_s1 + $0x118c] ss:$16 sps:$4 sm:$0xff]  }
 0x303   : > { %7545 = vmatprep.subr.bf16.mxu1 %v10351_v17  ;;  %v10429_v17 = vld [vmem:[%s14298_s1 + $0x138c] ss:$16 sps:$4 sm:$0xff]  }
 0x305   : > { %7503 = vmatpush2.bf16.msra.mxu0 %v10346_v22  ;;  %v10424_v22 = vld [vmem:[%s14298_s1 + $0x1188] ss:$16 sps:$4 sm:$0xff]  }
 0x306   : > { %7546 = vmatpush2.bf16.msra.mxu1 %v10349_v21  ;;  %7504 = vmatprep.subr.bf16.mxu0 %v10354_v48  ;;  %v10427_v21 = vld [vmem:[%s14298_s1 + $0x1388] ss:$16 sps:$4 sm:$0xff]   ;;  %v10432_v48 = vld [vmem:[%s14298_s1 + $0x116c] ss:$16 sps:$4 sm:$0xff]  }
 0x307   : > { %7547 = vmatprep.subr.bf16.mxu1 %v10357_v49  ;;  %v10435_v49 = vld [vmem:[%s14298_s1 + $0x136c] ss:$16 sps:$4 sm:$0xff]  }
 0x309   : > { %7505 = vmatpush2.bf16.msra.mxu0 %v10352_v53  ;;  %v10430_v53 = vld [vmem:[%s14298_s1 + $0x1168] ss:$16 sps:$4 sm:$0xff]  }
 0x30a   : > { %7548 = vmatpush2.bf16.msra.mxu1 %v10355_v33  ;;  %7560 = vmatprep.subr.bf16.mxu0 %v10360_v3  ;;  %v10433_v33 = vld [vmem:[%s14298_s1 + $0x1368] ss:$16 sps:$4 sm:$0xff]   ;;  %v10438_v3 = vld [vmem:[%s14298_s1 + $0x114c] ss:$16 sps:$4 sm:$0xff]  }
 0x30b   : > { %7603 = vmatprep.subr.bf16.mxu1 %v10363_v42  ;;  %v10441_v42 = vld [vmem:[%s14298_s1 + $0x134c] ss:$16 sps:$4 sm:$0xff]  }
 0x30c   : > { %7507 = vmatmul.mubr.bf16.vlgmr.msra.gmra.mxu0 %v11680_v10  ;;  %v10375_v10 = vld [vmem:[%s14298_s1 + $0x12ac] ss:$16 sps:$4 sm:$0xff]  }
 0x30d   : > { %7550 = vmatmul.mubr.bf16.vlgmr.msra.gmra.mxu1 %v11684_v11  ;;  %7561 = vmatpush1.bf16.msra.mxu0 %v10358_v6  ;;  %v10370_v11 = vld [vmem:[%s14298_s1 + $0x10a8] ss:$16 sps:$4 sm:$0xff]  }
 0x30e   : > { %7604 = vmatpush1.bf16.msra.mxu1 %v10361_v14  ;;  %7562 = vmatprep.subr.bf16.mxu0 %v10366_v31  ;;  %v10436_v6 = vld [vmem:[%s14298_s1 + $0x1148] ss:$16 sps:$4 sm:$0xff]   ;;  %v10444_v31 = vld [vmem:[%s14298_s1 + $0x112c] ss:$16 sps:$4 sm:$0xff]  }
 0x30f   : > { %7605 = vmatprep.subr.bf16.mxu1 %v10369_v12  ;;  %7592 = vmatprep.mubr.bf16.mxu0 %v11700_v47  ;;  %v10381_v47 = vld [vmem:[%s14298_s1 + $0x128c] ss:$16 sps:$4 sm:$0xff]   ;;  %v10439_v14 = vld [vmem:[%s14298_s1 + $0x1348] ss:$16 sps:$4 sm:$0xff]  }
 0x310   : > { %7635 = vmatprep.mubr.bf16.mxu1 %v11704_v50  ;;  %v10376_v50 = vld [vmem:[%s14298_s1 + $0x1088] ss:$16 sps:$4 sm:$0xff]   ;;  %v10447_v12 = vld [vmem:[%s14298_s1 + $0x132c] ss:$16 sps:$4 sm:$0xff]  }
 0x311   : > { %7563 = vmatpush1.bf16.msra.mxu0 %v10364_v26  ;;  %v10442_v26 = vld [vmem:[%s14298_s1 + $0x1128] ss:$16 sps:$4 sm:$0xff]  }
 0x312   : > { %7606 = vmatpush1.bf16.msra.mxu1 %v10367_v0  ;;  %7564 = vmatprep.subr.bf16.mxu0 %v10372_v29  ;;  %v10445_v0 = vld [vmem:[%s14298_s1 + $0x1328] ss:$16 sps:$4 sm:$0xff]   ;;  %v10450_v29 = vld [vmem:[%s14298_s1 + $0x110c] ss:$16 sps:$4 sm:$0xff]  }
 0x313   : > { %7607 = vmatprep.subr.bf16.mxu1 %v10375_v10  ;;  %v10453_v10 = vld [vmem:[%s14298_s1 + $0x130c] ss:$16 sps:$4 sm:$0xff]  }
 0x315   : > { %7565 = vmatpush1.bf16.msra.mxu0 %v10370_v11  ;;  %v10448_v11 = vld [vmem:[%s14298_s1 + $0x1108] ss:$16 sps:$4 sm:$0xff]  }
 0x316   : > { %7608 = vmatpush1.bf16.msra.mxu1 %v10373_v30  ;;  %7566 = vmatprep.subr.bf16.mxu0 %v10378_v55  ;;  %v10451_v30 = vld [vmem:[%s14298_s1 + $0x1308] ss:$16 sps:$4 sm:$0xff]   ;;  %v10456_v55 = vld [vmem:[%s14298_s1 + $0x14ec] ss:$16 sps:$4 sm:$0xff]  }
 0x317   : > { %7609 = vmatprep.subr.bf16.mxu1 %v10381_v47  ;;  %v10459_v47 = vld [vmem:[%s14298_s1 + $0x16ec] ss:$16 sps:$4 sm:$0xff]  }
 0x319   : > { %7567 = vmatpush1.bf16.msra.mxu0 %v10376_v50  ;;  %v10454_v50 = vld [vmem:[%s14298_s1 + $0x14e8] ss:$16 sps:$4 sm:$0xff]  }
 0x31a   : > { %7610 = vmatpush1.bf16.msra.mxu1 %v10379_v27  ;;  %7568 = vmatprep.subr.bf16.mxu0 %v10384_v16  ;;  %v10457_v27 = vld [vmem:[%s14298_s1 + $0x16e8] ss:$16 sps:$4 sm:$0xff]   ;;  %v10462_v16 = vld [vmem:[%s14298_s1 + $0x14cc] ss:$16 sps:$4 sm:$0xff]  }
 0x31b   : > { %7611 = vmatprep.subr.bf16.mxu1 %v10387_v60  ;;  %v10465_v60 = vld [vmem:[%s14298_s1 + $0x16cc] ss:$16 sps:$4 sm:$0xff]  }
 0x31d   : > { %7569 = vmatpush1.bf16.msra.mxu0 %v10382_v39  ;;  %v10460_v39 = vld [vmem:[%s14298_s1 + $0x14c8] ss:$16 sps:$4 sm:$0xff]  }
 0x31e   : > { %7612 = vmatpush1.bf16.msra.mxu1 %v10385_v34  ;;  %7570 = vmatprep.subr.bf16.mxu0 %v10390_v54  ;;  %v10463_v34 = vld [vmem:[%s14298_s1 + $0x16c8] ss:$16 sps:$4 sm:$0xff]   ;;  %v10468_v54 = vld [vmem:[%s14298_s1 + $0x14ac] ss:$16 sps:$4 sm:$0xff]  }
 0x31f   : > { %7613 = vmatprep.subr.bf16.mxu1 %v10393_v7  ;;  %v10469_v7 = vld [vmem:[%s14298_s1 + $0x16a8] ss:$16 sps:$4 sm:$0xff]  }
 0x321   : > { %7571 = vmatpush1.bf16.msra.mxu0 %v10388_v9  ;;  %v10474_v9 = vld [vmem:[%s14298_s1 + $0x148c] ss:$16 sps:$4 sm:$0xff]  }
 0x322   : > { %7614 = vmatpush1.bf16.msra.mxu1 %v10391_v52  ;;  %7572 = vmatprep.subr.bf16.mxu0 %v10396_v38  ;;  %v10475_v52 = vld [vmem:[%s14298_s1 + $0x1688] ss:$16 sps:$4 sm:$0xff]   ;;  %v10480_v38 = vld [vmem:[%s14298_s1 + $0x146c] ss:$16 sps:$4 sm:$0xff]  }
 0x323   : > { %7615 = vmatprep.subr.bf16.mxu1 %v10399_v2  ;;  %v10483_v2 = vld [vmem:[%s14298_s1 + $0x166c] ss:$16 sps:$4 sm:$0xff]  }
 0x325   : > { %7573 = vmatpush1.bf16.msra.mxu0 %v10394_v46  ;;  %v10478_v46 = vld [vmem:[%s14298_s1 + $0x1468] ss:$16 sps:$4 sm:$0xff]  }
 0x326   : > { %7616 = vmatpush1.bf16.msra.mxu1 %v10397_v51  ;;  %7574 = vmatprep.subr.bf16.mxu0 %v10402_v32  ;;  %v10481_v51 = vld [vmem:[%s14298_s1 + $0x1668] ss:$16 sps:$4 sm:$0xff]   ;;  %v10486_v32 = vld [vmem:[%s14298_s1 + $0x144c] ss:$16 sps:$4 sm:$0xff]  }
 0x327   : > { %7617 = vmatprep.subr.bf16.mxu1 %v10405_v8  ;;  %v10489_v8 = vld [vmem:[%s14298_s1 + $0x164c] ss:$16 sps:$4 sm:$0xff]  }
 0x329   : > { %7575 = vmatpush1.bf16.msra.mxu0 %v10400_v43  ;;  %v10484_v43 = vld [vmem:[%s14298_s1 + $0x1448] ss:$16 sps:$4 sm:$0xff]  }
 0x32a   : > { %7618 = vmatpush1.bf16.msra.mxu1 %v10403_v63  ;;  %7576 = vmatprep.subr.bf16.mxu0 %v10408_v5  ;;  %v10487_v63 = vld [vmem:[%s14298_s1 + $0x1648] ss:$16 sps:$4 sm:$0xff]   ;;  %v10492_v5 = vld [vmem:[%s14298_s1 + $0x142c] ss:$16 sps:$4 sm:$0xff]  }
 0x32b   : > { %7619 = vmatprep.subr.bf16.mxu1 %v10411_v15  ;;  %v10495_v15 = vld [vmem:[%s14298_s1 + $0x162c] ss:$16 sps:$4 sm:$0xff]  }
 0x32d   : > { %7577 = vmatpush2.bf16.msra.mxu0 %v10406_v28  ;;  %v10490_v28 = vld [vmem:[%s14298_s1 + $0x1428] ss:$16 sps:$4 sm:$0xff]  }
 0x32e   : > { %7620 = vmatpush2.bf16.msra.mxu1 %v10409_v1  ;;  %7578 = vmatprep.subr.bf16.mxu0 %v10414_v18  ;;  %v10493_v1 = vld [vmem:[%s14298_s1 + $0x1628] ss:$16 sps:$4 sm:$0xff]   ;;  %v10498_v18 = vld [vmem:[%s14298_s1 + $0x140c] ss:$16 sps:$4 sm:$0xff]  }
 0x32f   : > { %7621 = vmatprep.subr.bf16.mxu1 %v10417_v20  ;;  %v10501_v20 = vld [vmem:[%s14298_s1 + $0x160c] ss:$16 sps:$4 sm:$0xff]  }
 0x331   : > { %7579 = vmatpush2.bf16.msra.mxu0 %v10412_v19  ;;  %v10496_v19 = vld [vmem:[%s14298_s1 + $0x1408] ss:$16 sps:$4 sm:$0xff]  }
 0x332   : > { %7622 = vmatpush2.bf16.msra.mxu1 %v10415_v13  ;;  %7580 = vmatprep.subr.bf16.mxu0 %v10420_v58  ;;  %v10499_v13 = vld [vmem:[%s14298_s1 + $0x1608] ss:$16 sps:$4 sm:$0xff]   ;;  %v10504_v58 = vld [vmem:[%s14298_s1 + $0x15ec] ss:$16 sps:$4 sm:$0xff]  }
 0x333   : > { %7623 = vmatprep.subr.bf16.mxu1 %v10423_v59  ;;  %v10507_v59 = vld [vmem:[%s14298_s1 + $0x17ec] ss:$16 sps:$4 sm:$0xff]  }
 0x335   : > { %7581 = vmatpush2.bf16.msra.mxu0 %v10418_v61  ;;  %v10502_v61 = vld [vmem:[%s14298_s1 + $0x15e8] ss:$16 sps:$4 sm:$0xff]  }
 0x336   : > { %7624 = vmatpush2.bf16.msra.mxu1 %v10421_v41  ;;  %7582 = vmatprep.subr.bf16.mxu0 %v10426_v23  ;;  %v10505_v41 = vld [vmem:[%s14298_s1 + $0x17e8] ss:$16 sps:$4 sm:$0xff]   ;;  %v10510_v23 = vld [vmem:[%s14298_s1 + $0x15cc] ss:$16 sps:$4 sm:$0xff]  }
 0x337   : > { %7625 = vmatprep.subr.bf16.mxu1 %v10429_v17  ;;  %v10513_v17 = vld [vmem:[%s14298_s1 + $0x17cc] ss:$16 sps:$4 sm:$0xff]  }
 0x339   : > { %7583 = vmatpush2.bf16.msra.mxu0 %v10424_v22  ;;  %v10508_v22 = vld [vmem:[%s14298_s1 + $0x15c8] ss:$16 sps:$4 sm:$0xff]  }
 0x33a   : > { %7626 = vmatpush2.bf16.msra.mxu1 %v10427_v21  ;;  %7584 = vmatprep.subr.bf16.mxu0 %v10432_v48  ;;  %v10511_v21 = vld [vmem:[%s14298_s1 + $0x17c8] ss:$16 sps:$4 sm:$0xff]   ;;  %v10516_v48 = vld [vmem:[%s14298_s1 + $0x15ac] ss:$16 sps:$4 sm:$0xff]  }
 0x33b   : > { %7627 = vmatprep.subr.bf16.mxu1 %v10435_v49  ;;  %v10519_v49 = vld [vmem:[%s14298_s1 + $0x17ac] ss:$16 sps:$4 sm:$0xff]  }
 0x33d   : > { %7585 = vmatpush2.bf16.msra.mxu0 %v10430_v53  ;;  %v10514_v53 = vld [vmem:[%s14298_s1 + $0x15a8] ss:$16 sps:$4 sm:$0xff]  }
 0x33e   : > { %7628 = vmatpush2.bf16.msra.mxu1 %v10433_v33  ;;  %7586 = vmatprep.subr.bf16.mxu0 %v10438_v3  ;;  %v10517_v33 = vld [vmem:[%s14298_s1 + $0x17a8] ss:$16 sps:$4 sm:$0xff]   ;;  %v10522_v3 = vld [vmem:[%s14298_s1 + $0x158c] ss:$16 sps:$4 sm:$0xff]  }
 0x33f   : > { %7629 = vmatprep.subr.bf16.mxu1 %v10441_v42  ;;  %v10525_v42 = vld [vmem:[%s14298_s1 + $0x178c] ss:$16 sps:$4 sm:$0xff]  }
 0x341   : > { %7587 = vmatpush2.bf16.msra.mxu0 %v10436_v6  ;;  %v10520_v6 = vld [vmem:[%s14298_s1 + $0x1588] ss:$16 sps:$4 sm:$0xff]  }
 0x342   : > { %7630 = vmatpush2.bf16.msra.mxu1 %v10439_v14  ;;  %7588 = vmatprep.subr.bf16.mxu0 %v10444_v31  ;;  %v10523_v14 = vld [vmem:[%s14298_s1 + $0x1788] ss:$16 sps:$4 sm:$0xff]   ;;  %v10528_v31 = vld [vmem:[%s14298_s1 + $0x156c] ss:$16 sps:$4 sm:$0xff]  }
 0x343   : > { %7631 = vmatprep.subr.bf16.mxu1 %v10447_v12  ;;  %v10531_v12 = vld [vmem:[%s14298_s1 + $0x176c] ss:$16 sps:$4 sm:$0xff]  }
 0x345   : > { %7589 = vmatpush2.bf16.msra.mxu0 %v10442_v26  ;;  %v10526_v26 = vld [vmem:[%s14298_s1 + $0x1568] ss:$16 sps:$4 sm:$0xff]  }
 0x346   : > { %7632 = vmatpush2.bf16.msra.mxu1 %v10445_v0  ;;  %7590 = vmatprep.subr.bf16.mxu0 %v10450_v29  ;;  %v10529_v0 = vld [vmem:[%s14298_s1 + $0x1768] ss:$16 sps:$4 sm:$0xff]   ;;  %v10534_v29 = vld [vmem:[%s14298_s1 + $0x154c] ss:$16 sps:$4 sm:$0xff]  }
 0x347   : > { %7633 = vmatprep.subr.bf16.mxu1 %v10453_v10  ;;  %v10537_v10 = vld [vmem:[%s14298_s1 + $0x174c] ss:$16 sps:$4 sm:$0xff]  }
 0x349   : > { %7591 = vmatpush2.bf16.msra.mxu0 %v10448_v11  ;;  %v10532_v11 = vld [vmem:[%s14298_s1 + $0x1548] ss:$16 sps:$4 sm:$0xff]  }
 0x34a   : > { %7634 = vmatpush2.bf16.msra.mxu1 %v10451_v30  ;;  %7646 = vmatprep.subr.bf16.mxu0 %v10456_v55  ;;  %v10535_v30 = vld [vmem:[%s14298_s1 + $0x1748] ss:$16 sps:$4 sm:$0xff]   ;;  %v10540_v55 = vld [vmem:[%s14298_s1 + $0x152c] ss:$16 sps:$4 sm:$0xff]  }
 0x34b   : > { %7689 = vmatprep.subr.bf16.mxu1 %v10459_v47  ;;  %v10543_v47 = vld [vmem:[%s14298_s1 + $0x172c] ss:$16 sps:$4 sm:$0xff]  }
 0x34c   : > { %7593 = vmatmul.mubr.bf16.vlgmr.msra.gmra.mxu0 %v11898_v44  ;;  %v10471_v44 = vld [vmem:[%s14298_s1 + $0x16ac] ss:$16 sps:$4 sm:$0xff]  }
 0x34d   : > { %7636 = vmatmul.mubr.bf16.vlgmr.msra.gmra.mxu1 %v11902_v45  ;;  %7647 = vmatpush1.bf16.msra.mxu0 %v10454_v50  ;;  %v10466_v45 = vld [vmem:[%s14298_s1 + $0x14a8] ss:$16 sps:$4 sm:$0xff]  }
 0x34e   : > { %7690 = vmatpush1.bf16.msra.mxu1 %v10457_v27  ;;  %7648 = vmatprep.subr.bf16.mxu0 %v10462_v16  ;;  %v10538_v50 = vld [vmem:[%s14298_s1 + $0x1528] ss:$16 sps:$4 sm:$0xff]   ;;  %v10546_v16 = vld [vmem:[%s14298_s1 + $0x150c] ss:$16 sps:$4 sm:$0xff]  }
 0x34f   : > { %7691 = vmatprep.subr.bf16.mxu1 %v10465_v60  ;;  %7678 = vmatprep.mubr.bf16.mxu0 %v11930_v56  ;;  %v10477_v56 = vld [vmem:[%s14298_s1 + $0x168c] ss:$16 sps:$4 sm:$0xff]   ;;  %v10541_v27 = vld [vmem:[%s14298_s1 + $0x1728] ss:$16 sps:$4 sm:$0xff]  }
 0x350   : > { %7721 = vmatprep.mubr.bf16.mxu1 %v11934_v57  ;;  %v10472_v57 = vld [vmem:[%s14298_s1 + $0x1488] ss:$16 sps:$4 sm:$0xff]   ;;  %v10549_v60 = vld [vmem:[%s14298_s1 + $0x170c] ss:$16 sps:$4 sm:$0xff]  }
 0x351   : > { %7649 = vmatpush1.bf16.msra.mxu0 %v10460_v39  ;;  %v10544_v39 = vld [vmem:[%s14298_s1 + $0x1508] ss:$16 sps:$4 sm:$0xff]  }
 0x352   : > { %7692 = vmatpush1.bf16.msra.mxu1 %v10463_v34  ;;  %7650 = vmatprep.subr.bf16.mxu0 %v10468_v54  ;;  %v10547_v34 = vld [vmem:[%s14298_s1 + $0x1708] ss:$16 sps:$4 sm:$0xff]   ;;  %v10552_v54 = vld [vmem:[%s14298_s1 + $0x18ec] ss:$16 sps:$4 sm:$0xff]  }
 0x353   : > { %7693 = vmatprep.subr.bf16.mxu1 %v10471_v44  ;;  %v10555_v44 = vld [vmem:[%s14298_s1 + $0x1aec] ss:$16 sps:$4 sm:$0xff]  }
 0x355   : > { %7651 = vmatpush1.bf16.msra.mxu0 %v10466_v45  ;;  %v10550_v45 = vld [vmem:[%s14298_s1 + $0x18e8] ss:$16 sps:$4 sm:$0xff]  }
 0x356   : > { %7694 = vmatpush1.bf16.msra.mxu1 %v10469_v7  ;;  %7652 = vmatprep.subr.bf16.mxu0 %v10474_v9  ;;  %v10553_v7 = vld [vmem:[%s14298_s1 + $0x1ae8] ss:$16 sps:$4 sm:$0xff]   ;;  %v10558_v9 = vld [vmem:[%s14298_s1 + $0x18cc] ss:$16 sps:$4 sm:$0xff]  }
 0x357   : > { %7695 = vmatprep.subr.bf16.mxu1 %v10477_v56  ;;  %v10561_v56 = vld [vmem:[%s14298_s1 + $0x1acc] ss:$16 sps:$4 sm:$0xff]  }
 0x359   : > { %7653 = vmatpush1.bf16.msra.mxu0 %v10472_v57  ;;  %v10556_v57 = vld [vmem:[%s14298_s1 + $0x18c8] ss:$16 sps:$4 sm:$0xff]  }
 0x35a   : > { %7696 = vmatpush1.bf16.msra.mxu1 %v10475_v52  ;;  %7654 = vmatprep.subr.bf16.mxu0 %v10480_v38  ;;  %v10559_v52 = vld [vmem:[%s14298_s1 + $0x1ac8] ss:$16 sps:$4 sm:$0xff]   ;;  %v10564_v38 = vld [vmem:[%s14298_s1 + $0x18ac] ss:$16 sps:$4 sm:$0xff]  }
 0x35b   : > { %7697 = vmatprep.subr.bf16.mxu1 %v10483_v2  ;;  %v10565_v2 = vld [vmem:[%s14298_s1 + $0x1aa8] ss:$16 sps:$4 sm:$0xff]  }
 0x35d   : > { %7655 = vmatpush1.bf16.msra.mxu0 %v10478_v46  ;;  %v10570_v46 = vld [vmem:[%s14298_s1 + $0x188c] ss:$16 sps:$4 sm:$0xff]  }
 0x35e   : > { %7698 = vmatpush1.bf16.msra.mxu1 %v10481_v51  ;;  %7656 = vmatprep.subr.bf16.mxu0 %v10486_v32  ;;  %v10571_v51 = vld [vmem:[%s14298_s1 + $0x1a88] ss:$16 sps:$4 sm:$0xff]   ;;  %v10576_v32 = vld [vmem:[%s14298_s1 + $0x186c] ss:$16 sps:$4 sm:$0xff]  }
 0x35f   : > { %7699 = vmatprep.subr.bf16.mxu1 %v10489_v8  ;;  %v10579_v8 = vld [vmem:[%s14298_s1 + $0x1a6c] ss:$16 sps:$4 sm:$0xff]  }
 0x361   : > { %7657 = vmatpush1.bf16.msra.mxu0 %v10484_v43  ;;  %v10574_v43 = vld [vmem:[%s14298_s1 + $0x1868] ss:$16 sps:$4 sm:$0xff]  }
 0x362   : > { %7700 = vmatpush1.bf16.msra.mxu1 %v10487_v63  ;;  %7658 = vmatprep.subr.bf16.mxu0 %v10492_v5  ;;  %v10577_v63 = vld [vmem:[%s14298_s1 + $0x1a68] ss:$16 sps:$4 sm:$0xff]   ;;  %v10582_v5 = vld [vmem:[%s14298_s1 + $0x184c] ss:$16 sps:$4 sm:$0xff]  }
 0x363   : > { %7701 = vmatprep.subr.bf16.mxu1 %v10495_v15  ;;  %v10585_v15 = vld [vmem:[%s14298_s1 + $0x1a4c] ss:$16 sps:$4 sm:$0xff]  }
 0x365   : > { %7659 = vmatpush1.bf16.msra.mxu0 %v10490_v28  ;;  %v10580_v28 = vld [vmem:[%s14298_s1 + $0x1848] ss:$16 sps:$4 sm:$0xff]  }
 0x366   : > { %7702 = vmatpush1.bf16.msra.mxu1 %v10493_v1  ;;  %7660 = vmatprep.subr.bf16.mxu0 %v10498_v18  ;;  %v10583_v1 = vld [vmem:[%s14298_s1 + $0x1a48] ss:$16 sps:$4 sm:$0xff]   ;;  %v10588_v18 = vld [vmem:[%s14298_s1 + $0x182c] ss:$16 sps:$4 sm:$0xff]  }
 0x367   : > { %7703 = vmatprep.subr.bf16.mxu1 %v10501_v20  ;;  %v10591_v20 = vld [vmem:[%s14298_s1 + $0x1a2c] ss:$16 sps:$4 sm:$0xff]  }
 0x369   : > { %7661 = vmatpush1.bf16.msra.mxu0 %v10496_v19  ;;  %v10586_v19 = vld [vmem:[%s14298_s1 + $0x1828] ss:$16 sps:$4 sm:$0xff]  }
 0x36a   : > { %7704 = vmatpush1.bf16.msra.mxu1 %v10499_v13  ;;  %7662 = vmatprep.subr.bf16.mxu0 %v10504_v58  ;;  %v10589_v13 = vld [vmem:[%s14298_s1 + $0x1a28] ss:$16 sps:$4 sm:$0xff]   ;;  %v10594_v58 = vld [vmem:[%s14298_s1 + $0x180c] ss:$16 sps:$4 sm:$0xff]  }
 0x36b   : > { %7705 = vmatprep.subr.bf16.mxu1 %v10507_v59  ;;  %v10597_v59 = vld [vmem:[%s14298_s1 + $0x1a0c] ss:$16 sps:$4 sm:$0xff]  }
 0x36d   : > { %7663 = vmatpush2.bf16.msra.mxu0 %v10502_v61  ;;  %v10592_v61 = vld [vmem:[%s14298_s1 + $0x1808] ss:$16 sps:$4 sm:$0xff]  }
 0x36e   : > { %7706 = vmatpush2.bf16.msra.mxu1 %v10505_v41  ;;  %7664 = vmatprep.subr.bf16.mxu0 %v10510_v23  ;;  %v10595_v41 = vld [vmem:[%s14298_s1 + $0x1a08] ss:$16 sps:$4 sm:$0xff]   ;;  %v10600_v23 = vld [vmem:[%s14298_s1 + $0x19ec] ss:$16 sps:$4 sm:$0xff]  }
 0x36f   : > { %7707 = vmatprep.subr.bf16.mxu1 %v10513_v17  ;;  %v10603_v17 = vld [vmem:[%s14298_s1 + $0x1bec] ss:$16 sps:$4 sm:$0xff]  }
 0x371   : > { %7665 = vmatpush2.bf16.msra.mxu0 %v10508_v22  ;;  %v10598_v22 = vld [vmem:[%s14298_s1 + $0x19e8] ss:$16 sps:$4 sm:$0xff]  }
 0x372   : > { %7708 = vmatpush2.bf16.msra.mxu1 %v10511_v21  ;;  %7666 = vmatprep.subr.bf16.mxu0 %v10516_v48  ;;  %v10601_v21 = vld [vmem:[%s14298_s1 + $0x1be8] ss:$16 sps:$4 sm:$0xff]   ;;  %v10606_v48 = vld [vmem:[%s14298_s1 + $0x19cc] ss:$16 sps:$4 sm:$0xff]  }
 0x373   : > { %7709 = vmatprep.subr.bf16.mxu1 %v10519_v49  ;;  %v10609_v49 = vld [vmem:[%s14298_s1 + $0x1bcc] ss:$16 sps:$4 sm:$0xff]  }
 0x375   : > { %7667 = vmatpush2.bf16.msra.mxu0 %v10514_v53  ;;  %v10604_v53 = vld [vmem:[%s14298_s1 + $0x19c8] ss:$16 sps:$4 sm:$0xff]  }
 0x376   : > { %7710 = vmatpush2.bf16.msra.mxu1 %v10517_v33  ;;  %7668 = vmatprep.subr.bf16.mxu0 %v10522_v3  ;;  %v10607_v33 = vld [vmem:[%s14298_s1 + $0x1bc8] ss:$16 sps:$4 sm:$0xff]   ;;  %v10612_v3 = vld [vmem:[%s14298_s1 + $0x19ac] ss:$16 sps:$4 sm:$0xff]  }
 0x377   : > { %7711 = vmatprep.subr.bf16.mxu1 %v10525_v42  ;;  %v10615_v42 = vld [vmem:[%s14298_s1 + $0x1bac] ss:$16 sps:$4 sm:$0xff]  }
 0x379   : > { %7669 = vmatpush2.bf16.msra.mxu0 %v10520_v6  ;;  %v10610_v6 = vld [vmem:[%s14298_s1 + $0x19a8] ss:$16 sps:$4 sm:$0xff]  }
 0x37a   : > { %7712 = vmatpush2.bf16.msra.mxu1 %v10523_v14  ;;  %7670 = vmatprep.subr.bf16.mxu0 %v10528_v31  ;;  %v10613_v14 = vld [vmem:[%s14298_s1 + $0x1ba8] ss:$16 sps:$4 sm:$0xff]   ;;  %v10618_v31 = vld [vmem:[%s14298_s1 + $0x198c] ss:$16 sps:$4 sm:$0xff]  }
 0x37b   : > { %7713 = vmatprep.subr.bf16.mxu1 %v10531_v12  ;;  %v10621_v12 = vld [vmem:[%s14298_s1 + $0x1b8c] ss:$16 sps:$4 sm:$0xff]  }
 0x37d   : > { %7671 = vmatpush2.bf16.msra.mxu0 %v10526_v26  ;;  %v10616_v26 = vld [vmem:[%s14298_s1 + $0x1988] ss:$16 sps:$4 sm:$0xff]  }
 0x37e   : > { %7714 = vmatpush2.bf16.msra.mxu1 %v10529_v0  ;;  %7672 = vmatprep.subr.bf16.mxu0 %v10534_v29  ;;  %v10619_v0 = vld [vmem:[%s14298_s1 + $0x1b88] ss:$16 sps:$4 sm:$0xff]   ;;  %v10624_v29 = vld [vmem:[%s14298_s1 + $0x196c] ss:$16 sps:$4 sm:$0xff]  }
 0x37f   : > { %7715 = vmatprep.subr.bf16.mxu1 %v10537_v10  ;;  %v10627_v10 = vld [vmem:[%s14298_s1 + $0x1b6c] ss:$16 sps:$4 sm:$0xff]  }
 0x381   : > { %7673 = vmatpush2.bf16.msra.mxu0 %v10532_v11  ;;  %v10622_v11 = vld [vmem:[%s14298_s1 + $0x1968] ss:$16 sps:$4 sm:$0xff]  }
 0x382   : > { %7716 = vmatpush2.bf16.msra.mxu1 %v10535_v30  ;;  %7674 = vmatprep.subr.bf16.mxu0 %v10540_v55  ;;  %v10625_v30 = vld [vmem:[%s14298_s1 + $0x1b68] ss:$16 sps:$4 sm:$0xff]   ;;  %v10630_v55 = vld [vmem:[%s14298_s1 + $0x194c] ss:$16 sps:$4 sm:$0xff]  }
 0x383   : > { %7717 = vmatprep.subr.bf16.mxu1 %v10543_v47  ;;  %v10633_v47 = vld [vmem:[%s14298_s1 + $0x1b4c] ss:$16 sps:$4 sm:$0xff]  }
 0x385   : > { %7675 = vmatpush2.bf16.msra.mxu0 %v10538_v50  ;;  %v10628_v50 = vld [vmem:[%s14298_s1 + $0x1948] ss:$16 sps:$4 sm:$0xff]  }
 0x386   : > { %7718 = vmatpush2.bf16.msra.mxu1 %v10541_v27  ;;  %7676 = vmatprep.subr.bf16.mxu0 %v10546_v16  ;;  %v10631_v27 = vld [vmem:[%s14298_s1 + $0x1b48] ss:$16 sps:$4 sm:$0xff]   ;;  %v10636_v16 = vld [vmem:[%s14298_s1 + $0x192c] ss:$16 sps:$4 sm:$0xff]  }
 0x387   : > { %7719 = vmatprep.subr.bf16.mxu1 %v10549_v60  ;;  %v10639_v60 = vld [vmem:[%s14298_s1 + $0x1b2c] ss:$16 sps:$4 sm:$0xff]  }
 0x389   : > { %7677 = vmatpush2.bf16.msra.mxu0 %v10544_v39  ;;  %v10634_v39 = vld [vmem:[%s14298_s1 + $0x1928] ss:$16 sps:$4 sm:$0xff]  }
 0x38a   : > { %7720 = vmatpush2.bf16.msra.mxu1 %v10547_v34  ;;  %7732 = vmatprep.subr.bf16.mxu0 %v10552_v54  ;;  %v10637_v34 = vld [vmem:[%s14298_s1 + $0x1b28] ss:$16 sps:$4 sm:$0xff]   ;;  %v10642_v54 = vld [vmem:[%s14298_s1 + $0x190c] ss:$16 sps:$4 sm:$0xff]  }
 0x38b   : > { %7775 = vmatprep.subr.bf16.mxu1 %v10555_v44  ;;  %v10645_v44 = vld [vmem:[%s14298_s1 + $0x1b0c] ss:$16 sps:$4 sm:$0xff]  }
 0x38c   : > { %7679 = vmatmul.mubr.bf16.vlgmr.msra.gmra.mxu0 %v12122_v24  ;;  %v10567_v24 = vld [vmem:[%s14298_s1 + $0x1aac] ss:$16 sps:$4 sm:$0xff]  }
 0x38d   : > { %7722 = vmatmul.mubr.bf16.vlgmr.msra.gmra.mxu1 %v12126_v25  ;;  %7733 = vmatpush1.bf16.msra.mxu0 %v10550_v45  ;;  %v10562_v25 = vld [vmem:[%s14298_s1 + $0x18a8] ss:$16 sps:$4 sm:$0xff]  }
 0x38e   : > { %7776 = vmatpush1.bf16.msra.mxu1 %v10553_v7  ;;  %7734 = vmatprep.subr.bf16.mxu0 %v10558_v9  ;;  %v10640_v45 = vld [vmem:[%s14298_s1 + $0x1908] ss:$16 sps:$4 sm:$0xff]   ;;  %v10648_v9 = vld [vmem:[%s14298_s1 + $0x1cec] ss:$16 sps:$4 sm:$0xff]  }
 0x38f   : > { %7777 = vmatprep.subr.bf16.mxu1 %v10561_v56  ;;  %7764 = vmatprep.mubr.bf16.mxu0 %v12154_v36  ;;  %v10573_v36 = vld [vmem:[%s14298_s1 + $0x1a8c] ss:$16 sps:$4 sm:$0xff]   ;;  %v10643_v7 = vld [vmem:[%s14298_s1 + $0x1b08] ss:$16 sps:$4 sm:$0xff]  }
 0x390   : > { %7807 = vmatprep.mubr.bf16.mxu1 %v12158_v37  ;;  %v10568_v37 = vld [vmem:[%s14298_s1 + $0x1888] ss:$16 sps:$4 sm:$0xff]   ;;  %v10651_v56 = vld [vmem:[%s14298_s1 + $0x1eec] ss:$16 sps:$4 sm:$0xff]  }
 0x391   : > { %7735 = vmatpush1.bf16.msra.mxu0 %v10556_v57  ;;  %v10646_v57 = vld [vmem:[%s14298_s1 + $0x1ce8] ss:$16 sps:$4 sm:$0xff]  }
 0x392   : > { %7778 = vmatpush1.bf16.msra.mxu1 %v10559_v52  ;;  %7736 = vmatprep.subr.bf16.mxu0 %v10564_v38  ;;  %v10649_v52 = vld [vmem:[%s14298_s1 + $0x1ee8] ss:$16 sps:$4 sm:$0xff]   ;;  %v10654_v38 = vld [vmem:[%s14298_s1 + $0x1ccc] ss:$16 sps:$4 sm:$0xff]  }
 0x393   : > { %7779 = vmatprep.subr.bf16.mxu1 %v10567_v24  ;;  %v10657_v24 = vld [vmem:[%s14298_s1 + $0x1ecc] ss:$16 sps:$4 sm:$0xff]  }
 0x395   : > { %7737 = vmatpush1.bf16.msra.mxu0 %v10562_v25  ;;  %v14311_v25 = vld [vmem:[#allocation2_spill] sm:$0xff] }
 0x396   : > { %7780 = vmatpush1.bf16.msra.mxu1 %v10565_v2  ;;  %7738 = vmatprep.subr.bf16.mxu0 %v10570_v46  ;;  %v10652_v2 = vld [vmem:[%s14298_s1 + $0x1cc8] ss:$16 sps:$4 sm:$0xff]  }
 0x397   : > { %7781 = vmatprep.subr.bf16.mxu1 %v10573_v36  ;;  %v10655_v46 = vld [vmem:[%s14298_s1 + $0x1ec8] ss:$16 sps:$4 sm:$0xff]   ;;  %v10660_v36 = vld [vmem:[%s14298_s1 + $0x1cac] ss:$16 sps:$4 sm:$0xff]  }
 0x399   : > { %7739 = vmatpush1.bf16.msra.mxu0 %v10568_v37  ;;  %v14312_v37 = vld [vmem:[#allocation3_spill] sm:$0xff] }
 0x39a   : > { %7782 = vmatpush1.bf16.msra.mxu1 %v10571_v51  ;;  %7740 = vmatprep.subr.bf16.mxu0 %v10576_v32  ;;  %v14313_v51 = vld [vmem:[#allocation4_spill] sm:$0xff]  ;;  %v10658_v32 = vld [vmem:[%s14298_s1 + $0x1ca8] ss:$16 sps:$4 sm:$0xff]  }
 0x39b   : > { %7783 = vmatprep.subr.bf16.mxu1 %v10579_v8  ;;  %v10661_v8 = vld [vmem:[%s14298_s1 + $0x1ea8] ss:$16 sps:$4 sm:$0xff]  }
 0x39d   : > { %7741 = vmatpush1.bf16.msra.mxu0 %v10574_v43  ;;  %v10666_v43 = vld [vmem:[%s14298_s1 + $0x1c8c] ss:$16 sps:$4 sm:$0xff]  }
 0x39e   : > { %7784 = vmatpush1.bf16.msra.mxu1 %v10577_v63  ;;  %7742 = vmatprep.subr.bf16.mxu0 %v10582_v5  ;;  %v10669_v63 = vld [vmem:[%s14298_s1 + $0x1e8c] ss:$16 sps:$4 sm:$0xff]   ;;  %v10664_v5 = vld [vmem:[%s14298_s1 + $0x1c88] ss:$16 sps:$4 sm:$0xff]  }
 0x39f   : > { %7785 = vmatprep.subr.bf16.mxu1 %v10585_v15  ;;  %v10667_v15 = vld [vmem:[%s14298_s1 + $0x1e88] ss:$16 sps:$4 sm:$0xff]  }
 0x3a1   : > { %7743 = vmatpush1.bf16.msra.mxu0 %v10580_v28  ;;  %v10672_v28 = vld [vmem:[%s14298_s1 + $0x1c6c] ss:$16 sps:$4 sm:$0xff]  }
 0x3a2   : > { %7786 = vmatpush1.bf16.msra.mxu1 %v10583_v1  ;;  %7744 = vmatprep.subr.bf16.mxu0 %v10588_v18  ;;  %v10675_v1 = vld [vmem:[%s14298_s1 + $0x1e6c] ss:$16 sps:$4 sm:$0xff]   ;;  %v10670_v18 = vld [vmem:[%s14298_s1 + $0x1c68] ss:$16 sps:$4 sm:$0xff]  }
 0x3a3   : > { %7787 = vmatprep.subr.bf16.mxu1 %v10591_v20  ;;  %v10673_v20 = vld [vmem:[%s14298_s1 + $0x1e68] ss:$16 sps:$4 sm:$0xff]  }
 0x3a5   : > { %7745 = vmatpush1.bf16.msra.mxu0 %v10586_v19  ;;  %v10678_v19 = vld [vmem:[%s14298_s1 + $0x1c4c] ss:$16 sps:$4 sm:$0xff]  }
 0x3a6   : > { %7788 = vmatpush1.bf16.msra.mxu1 %v10589_v13  ;;  %7746 = vmatprep.subr.bf16.mxu0 %v10594_v58  ;;  %v10681_v13 = vld [vmem:[%s14298_s1 + $0x1e4c] ss:$16 sps:$4 sm:$0xff]   ;;  %v10676_v58 = vld [vmem:[%s14298_s1 + $0x1c48] ss:$16 sps:$4 sm:$0xff]  }
 0x3a7   : > { %7789 = vmatprep.subr.bf16.mxu1 %v10597_v59  ;;  %v10679_v59 = vld [vmem:[%s14298_s1 + $0x1e48] ss:$16 sps:$4 sm:$0xff]  }
 0x3a9   : > { %7747 = vmatpush1.bf16.msra.mxu0 %v10592_v61  ;;  %v10684_v61 = vld [vmem:[%s14298_s1 + $0x1c2c] ss:$16 sps:$4 sm:$0xff]  }
 0x3aa   : > { %7790 = vmatpush1.bf16.msra.mxu1 %v10595_v41  ;;  %7748 = vmatprep.subr.bf16.mxu0 %v10600_v23  ;;  %v10687_v41 = vld [vmem:[%s14298_s1 + $0x1e2c] ss:$16 sps:$4 sm:$0xff]   ;;  %v10682_v23 = vld [vmem:[%s14298_s1 + $0x1c28] ss:$16 sps:$4 sm:$0xff]  }
 0x3ab   : > { %7791 = vmatprep.subr.bf16.mxu1 %v10603_v17  ;;  %v10685_v17 = vld [vmem:[%s14298_s1 + $0x1e28] ss:$16 sps:$4 sm:$0xff]  }
 0x3ad   : > { %7749 = vmatpush2.bf16.msra.mxu0 %v10598_v22  ;;  %v10690_v22 = vld [vmem:[%s14298_s1 + $0x1c0c] ss:$16 sps:$4 sm:$0xff]  }
 0x3ae   : > { %7792 = vmatpush2.bf16.msra.mxu1 %v10601_v21  ;;  %7750 = vmatprep.subr.bf16.mxu0 %v10606_v48  ;;  %v10693_v21 = vld [vmem:[%s14298_s1 + $0x1e0c] ss:$16 sps:$4 sm:$0xff]   ;;  %v10688_v48 = vld [vmem:[%s14298_s1 + $0x1c08] ss:$16 sps:$4 sm:$0xff]  }
 0x3af   : > { %7793 = vmatprep.subr.bf16.mxu1 %v10609_v49  ;;  %v10691_v49 = vld [vmem:[%s14298_s1 + $0x1e08] ss:$16 sps:$4 sm:$0xff]  }
 0x3b1   : > { %7751 = vmatpush2.bf16.msra.mxu0 %v10604_v53  ;;  %v10696_v53 = vld [vmem:[%s14298_s1 + $0x1dec] ss:$16 sps:$4 sm:$0xff]  }
 0x3b2   : > { %7794 = vmatpush2.bf16.msra.mxu1 %v10607_v33  ;;  %7752 = vmatprep.subr.bf16.mxu0 %v10612_v3  ;;  %v10699_v33 = vld [vmem:[%s14298_s1 + $0x1fec] ss:$16 sps:$4 sm:$0xff]   ;;  %v10694_v3 = vld [vmem:[%s14298_s1 + $0x1de8] ss:$16 sps:$4 sm:$0xff]  }
 0x3b3   : > { %7795 = vmatprep.subr.bf16.mxu1 %v10615_v42  ;;  %v10697_v42 = vld [vmem:[%s14298_s1 + $0x1fe8] ss:$16 sps:$4 sm:$0xff]  }
 0x3b5   : > { %7753 = vmatpush2.bf16.msra.mxu0 %v10610_v6  ;;  %v10702_v6 = vld [vmem:[%s14298_s1 + $0x1dcc] ss:$16 sps:$4 sm:$0xff]  }
 0x3b6   : > { %7796 = vmatpush2.bf16.msra.mxu1 %v10613_v14  ;;  %7754 = vmatprep.subr.bf16.mxu0 %v10618_v31  ;;  %v10705_v14 = vld [vmem:[%s14298_s1 + $0x1fcc] ss:$16 sps:$4 sm:$0xff]   ;;  %v10700_v31 = vld [vmem:[%s14298_s1 + $0x1dc8] ss:$16 sps:$4 sm:$0xff]  }
 0x3b7   : > { %7797 = vmatprep.subr.bf16.mxu1 %v10621_v12  ;;  %v10703_v12 = vld [vmem:[%s14298_s1 + $0x1fc8] ss:$16 sps:$4 sm:$0xff]  }
 0x3b9   : > { %7755 = vmatpush2.bf16.msra.mxu0 %v10616_v26  ;;  %v10708_v26 = vld [vmem:[%s14298_s1 + $0x1dac] ss:$16 sps:$4 sm:$0xff]  }
 0x3ba   : > { %7798 = vmatpush2.bf16.msra.mxu1 %v10619_v0  ;;  %7756 = vmatprep.subr.bf16.mxu0 %v10624_v29  ;;  %v10711_v0 = vld [vmem:[%s14298_s1 + $0x1fac] ss:$16 sps:$4 sm:$0xff]   ;;  %v10706_v29 = vld [vmem:[%s14298_s1 + $0x1da8] ss:$16 sps:$4 sm:$0xff]  }
 0x3bb   : > { %7799 = vmatprep.subr.bf16.mxu1 %v10627_v10  ;;  %v10709_v10 = vld [vmem:[%s14298_s1 + $0x1fa8] ss:$16 sps:$4 sm:$0xff]  }
 0x3bd   : > { %7757 = vmatpush2.bf16.msra.mxu0 %v10622_v11  ;;  %v10714_v11 = vld [vmem:[%s14298_s1 + $0x1d8c] ss:$16 sps:$4 sm:$0xff]  }
 0x3be   : > { %7800 = vmatpush2.bf16.msra.mxu1 %v10625_v30  ;;  %7758 = vmatprep.subr.bf16.mxu0 %v10630_v55  ;;  %v10717_v30 = vld [vmem:[%s14298_s1 + $0x1f8c] ss:$16 sps:$4 sm:$0xff]   ;;  %v10712_v55 = vld [vmem:[%s14298_s1 + $0x1d88] ss:$16 sps:$4 sm:$0xff]  }
 0x3bf   : > { %7801 = vmatprep.subr.bf16.mxu1 %v10633_v47  ;;  %v10715_v47 = vld [vmem:[%s14298_s1 + $0x1f88] ss:$16 sps:$4 sm:$0xff]  }
 0x3c1   : > { %7759 = vmatpush2.bf16.msra.mxu0 %v10628_v50  ;;  %v10720_v50 = vld [vmem:[%s14298_s1 + $0x1d6c] ss:$16 sps:$4 sm:$0xff]  }
 0x3c2   : > { %7802 = vmatpush2.bf16.msra.mxu1 %v10631_v27  ;;  %7760 = vmatprep.subr.bf16.mxu0 %v10636_v16  ;;  %v10723_v27 = vld [vmem:[%s14298_s1 + $0x1f6c] ss:$16 sps:$4 sm:$0xff]   ;;  %v10718_v16 = vld [vmem:[%s14298_s1 + $0x1d68] ss:$16 sps:$4 sm:$0xff]  }
 0x3c3   : > { %7803 = vmatprep.subr.bf16.mxu1 %v10639_v60  ;;  %v10721_v60 = vld [vmem:[%s14298_s1 + $0x1f68] ss:$16 sps:$4 sm:$0xff]  }
 0x3c5   : > { %7761 = vmatpush2.bf16.msra.mxu0 %v10634_v39  ;;  %v10726_v39 = vld [vmem:[%s14298_s1 + $0x1d4c] ss:$16 sps:$4 sm:$0xff]  }
 0x3c6   : > { %7804 = vmatpush2.bf16.msra.mxu1 %v10637_v34  ;;  %7762 = vmatprep.subr.bf16.mxu0 %v10642_v54  ;;  %v10729_v34 = vld [vmem:[%s14298_s1 + $0x1f4c] ss:$16 sps:$4 sm:$0xff]   ;;  %v10724_v54 = vld [vmem:[%s14298_s1 + $0x1d48] ss:$16 sps:$4 sm:$0xff]  }
 0x3c7   : > { %7805 = vmatprep.subr.bf16.mxu1 %v10645_v44  ;;  %v10727_v44 = vld [vmem:[%s14298_s1 + $0x1f48] ss:$16 sps:$4 sm:$0xff]  }
 0x3c9   : > { %7763 = vmatpush2.bf16.msra.mxu0 %v10640_v45  ;;  %v10732_v45 = vld [vmem:[%s14298_s1 + $0x1d2c] ss:$16 sps:$4 sm:$0xff]  }
 0x3ca   : > { %7806 = vmatpush2.bf16.msra.mxu1 %v10643_v7  ;;  %7818 = vmatprep.subr.bf16.mxu0 %v10648_v9  ;;  %v10735_v7 = vld [vmem:[%s14298_s1 + $0x1f2c] ss:$16 sps:$4 sm:$0xff]   ;;  %v10730_v9 = vld [vmem:[%s14298_s1 + $0x1d28] ss:$16 sps:$4 sm:$0xff]  }
 0x3cb   : > { %7861 = vmatprep.subr.bf16.mxu1 %v10651_v56  ;;  %v10733_v56 = vld [vmem:[%s14298_s1 + $0x1f28] ss:$16 sps:$4 sm:$0xff]  }
 0x3cc   : > { %7765 = vmatmul.mubr.bf16.vlgmr.msra.gmra.mxu0 %v12358_v40  ;;  %v10663_v40 = vld [vmem:[%s14298_s1 + $0x1eac] ss:$16 sps:$4 sm:$0xff]  }
 0x3cd   : > { %7808 = vmatmul.mubr.bf16.vlgmr.msra.gmra.mxu1 %v14311_v25  ;;  %7819 = vmatpush1.bf16.msra.mxu0 %v10646_v57  ;;  %v10738_v57 = vld [vmem:[%s14298_s1 + $0x1d0c] ss:$16 sps:$4 sm:$0xff]  }
 0x3ce   : > { %7862 = vmatpush1.bf16.msra.mxu1 %v10649_v52  ;;  %7820 = vmatprep.subr.bf16.mxu0 %v10654_v38  ;;  %v10741_v52 = vld [vmem:[%s14298_s1 + $0x1f0c] ss:$16 sps:$4 sm:$0xff]   ;;  %v10736_v38 = vld [vmem:[%s14298_s1 + $0x1d08] ss:$16 sps:$4 sm:$0xff]  }
 0x3cf   : > { %7863 = vmatprep.subr.bf16.mxu1 %v10657_v24  ;;  %7850 = vmatprep.mubr.bf16.mxu0 %v14312_v37  ;;  %v10739_v24 = vld [vmem:[%s14298_s1 + $0x1f08] ss:$16 sps:$4 sm:$0xff]  }
 0x3d0   : > { %7893 = vmatprep.mubr.bf16.mxu1 %v14313_v51  ;;  %v14314_v25 = vld [vmem:[#allocation5_spill] sm:$0xff] }
 0x3d1   : > { %7821 = vmatpush1.bf16.msra.mxu0 %v10652_v2  ;;  %v14315_v2 = vld [vmem:[#allocation6_spill] sm:$0xff] }
 0x3d2   : > { %7864 = vmatpush1.bf16.msra.mxu1 %v10655_v46  ;;  %7822 = vmatprep.subr.bf16.mxu0 %v10660_v36  ;;  %v7250_v46 = vpop.f32.mrf.mxu0  ;;  %v7293_v36 = vpop.f32.mrf.mxu1 }
 0x3d3   : > { %7865 = vmatprep.subr.bf16.mxu1 %v10663_v40 }
 0x3d4   : > { %v7252_v40 = vpop.f32.mrf.mxu0  ;;  %v7295_v37 = vpop.f32.mrf.mxu1 }
 0x3d5   : > { %7823 = vmatpush1.bf16.msra.mxu0 %v10658_v32 }
 0x3d6   : > { %7866 = vmatpush1.bf16.msra.mxu1 %v10661_v8  ;;  %7824 = vmatprep.subr.bf16.mxu0 %v10666_v43  ;;  %v7254_v51 = vpop.f32.mrf.mxu0  ;;  %v7297_v32 = vpop.f32.mrf.mxu1 }
 0x3d7   : > { %7867 = vmatprep.subr.bf16.mxu1 %v10669_v63 }
 0x3d8   : > { %v7256_v8 = vpop.f32.mrf.mxu0  ;;  %v7299_v43 = vpop.f32.mrf.mxu1 }
 0x3d9   : > { %7825 = vmatpush1.bf16.msra.mxu0 %v10664_v5 }
 0x3da   : > { %7868 = vmatpush1.bf16.msra.mxu1 %v10667_v15  ;;  %7826 = vmatprep.subr.bf16.mxu0 %v10672_v28  ;;  %v7336_v63 = vpop.f32.mrf.mxu0  ;;  %v7379_v5 = vpop.f32.mrf.mxu1 }
 0x3db   : > { %7869 = vmatprep.subr.bf16.mxu1 %v10675_v1 }
 0x3dc   : > { %v7338_v15 = vpop.f32.mrf.mxu0  ;;  %v7381_v28 = vpop.f32.mrf.mxu1 }
 0x3dd   : > { %7827 = vmatpush1.bf16.msra.mxu0 %v10670_v18 }
 0x3de   : > { %7870 = vmatpush1.bf16.msra.mxu1 %v10673_v20  ;;  %7828 = vmatprep.subr.bf16.mxu0 %v10678_v19  ;;  %v7340_v1 = vpop.f32.mrf.mxu0  ;;  %v7383_v18 = vpop.f32.mrf.mxu1 }
 0x3df   : > { %7871 = vmatprep.subr.bf16.mxu1 %v10681_v13 }
 0x3e0   : > { %v7342_v20 = vpop.f32.mrf.mxu0  ;;  %v7385_v19 = vpop.f32.mrf.mxu1 }
 0x3e1   : > { %7829 = vmatpush1.bf16.msra.mxu0 %v10676_v58 }
 0x3e2   : > { %7872 = vmatpush1.bf16.msra.mxu1 %v10679_v59  ;;  %7830 = vmatprep.subr.bf16.mxu0 %v10684_v61  ;;  %v7422_v13 = vpop.f32.mrf.mxu0  ;;  %v7465_v58 = vpop.f32.mrf.mxu1 }
 0x3e3   : > { %7873 = vmatprep.subr.bf16.mxu1 %v10687_v41 }
 0x3e4   : > { %v7424_v59 = vpop.f32.mrf.mxu0  ;;  %v7467_v61 = vpop.f32.mrf.mxu1 }
 0x3e5   : > { %7831 = vmatpush1.bf16.msra.mxu0 %v10682_v23 }
 0x3e6   : > { %7874 = vmatpush1.bf16.msra.mxu1 %v10685_v17  ;;  %7832 = vmatprep.subr.bf16.mxu0 %v10690_v22  ;;  %v7426_v41 = vpop.f32.mrf.mxu0  ;;  %v7469_v23 = vpop.f32.mrf.mxu1 }
 0x3e7   : > { %7875 = vmatprep.subr.bf16.mxu1 %v10693_v21 }
 0x3e8   : > { %v7428_v17 = vpop.f32.mrf.mxu0  ;;  %v7471_v22 = vpop.f32.mrf.mxu1 }
 0x3e9   : > { %7833 = vmatpush1.bf16.msra.mxu0 %v10688_v48 }
 0x3ea   : > { %7876 = vmatpush1.bf16.msra.mxu1 %v10691_v49  ;;  %7834 = vmatprep.subr.bf16.mxu0 %v10696_v53  ;;  %v7508_v21 = vpop.f32.mrf.mxu0  ;;  %v7551_v48 = vpop.f32.mrf.mxu1 }
 0x3eb   : > { %7877 = vmatprep.subr.bf16.mxu1 %v10699_v33 }
 0x3ec   : > { %v7510_v49 = vpop.f32.mrf.mxu0  ;;  %v7553_v53 = vpop.f32.mrf.mxu1 }
 0x3ed   : > { %7835 = vmatpush2.bf16.msra.mxu0 %v10694_v3 }
 0x3ee   : > { %7878 = vmatpush2.bf16.msra.mxu1 %v10697_v42  ;;  %7836 = vmatprep.subr.bf16.mxu0 %v10702_v6  ;;  %v7512_v33 = vpop.f32.mrf.mxu0  ;;  %v7555_v3 = vpop.f32.mrf.mxu1 }
 0x3ef   : > { %7879 = vmatprep.subr.bf16.mxu1 %v10705_v14 }
 0x3f0   : > { %v7514_v42 = vpop.f32.mrf.mxu0  ;;  %v7557_v6 = vpop.f32.mrf.mxu1 }
 0x3f1   : > { %7837 = vmatpush2.bf16.msra.mxu0 %v10700_v31 }
 0x3f2   : > { %7880 = vmatpush2.bf16.msra.mxu1 %v10703_v12  ;;  %7838 = vmatprep.subr.bf16.mxu0 %v10708_v26 }
 0x3f3   : > { %7881 = vmatprep.subr.bf16.mxu1 %v10711_v0  ;;  %v7294_v0 = vadd.f32 %v7293_v36, %v7250_v46 }
 0x3f5   : > { %7839 = vmatpush2.bf16.msra.mxu0 %v10706_v29  ;;  %v7296_v29 = vadd.f32 %v7295_v37, %v7252_v40 }
 0x3f6   : > { %7882 = vmatpush2.bf16.msra.mxu1 %v10709_v10  ;;  %7840 = vmatprep.subr.bf16.mxu0 %v10714_v11  ;;  %v7337_v10 = vadd.f32 %v7336_v63, %v7294_v0 }
 0x3f7   : > { %7883 = vmatprep.subr.bf16.mxu1 %v10717_v30 }
 0x3f9   : > { %7841 = vmatpush2.bf16.msra.mxu0 %v10712_v55  ;;  %v7298_v55 = vadd.f32 %v7297_v32, %v7254_v51 }
 0x3fa   : > { %7884 = vmatpush2.bf16.msra.mxu1 %v10715_v47  ;;  %7842 = vmatprep.subr.bf16.mxu0 %v10720_v50  ;;  %v7339_v47 = vadd.f32 %v7338_v15, %v7296_v29  ;;  %v7300_v50 = vadd.f32 %v7299_v43, %v7256_v8 }
 0x3fb   : > { %7885 = vmatprep.subr.bf16.mxu1 %v10723_v27  ;;  %v7380_v27 = vadd.f32 %v7379_v5, %v7337_v10 }
 0x3fd   : > { %7843 = vmatpush2.bf16.msra.mxu0 %v10718_v16  ;;  %v7341_v16 = vadd.f32 %v7340_v1, %v7298_v55 }
 0x3fe   : > { %7886 = vmatpush2.bf16.msra.mxu1 %v10721_v60  ;;  %7844 = vmatprep.subr.bf16.mxu0 %v10726_v39 }
 0x3ff   : > { %7887 = vmatprep.subr.bf16.mxu1 %v10729_v34  ;;  %v7382_v34 = vadd.f32 %v7381_v28, %v7339_v47 }
 0x401   : > { %7845 = vmatpush2.bf16.msra.mxu0 %v10724_v54  ;;  %v7343_v54 = vadd.f32 %v7342_v20, %v7300_v50 }
 0x402   : > { %7888 = vmatpush2.bf16.msra.mxu1 %v10727_v44  ;;  %7846 = vmatprep.subr.bf16.mxu0 %v10732_v45  ;;  %v7423_v44 = vadd.f32 %v7422_v13, %v7380_v27 }
 0x403   : > { %7889 = vmatprep.subr.bf16.mxu1 %v10735_v7 }
 0x405   : > { %7847 = vmatpush2.bf16.msra.mxu0 %v10730_v9  ;;  %v7384_v9 = vadd.f32 %v7383_v18, %v7341_v16 }
 0x406   : > { %7890 = vmatpush2.bf16.msra.mxu1 %v10733_v56  ;;  %7848 = vmatprep.subr.bf16.mxu0 %v10738_v57  ;;  %v7425_v56 = vadd.f32 %v7424_v59, %v7382_v34  ;;  %v7386_v57 = vadd.f32 %v7385_v19, %v7343_v54 }
 0x407   : > { %7891 = vmatprep.subr.bf16.mxu1 %v10741_v52  ;;  %v7466_v52 = vadd.f32 %v7465_v58, %v7423_v44 }
 0x408   : > { %v7429_v46 = vadd.f32 %v7428_v17, %v7386_v57 }
 0x409   : > { %7849 = vmatpush2.bf16.msra.mxu0 %v10736_v38  ;;  %v7427_v38 = vadd.f32 %v7426_v41, %v7384_v9  ;;  %v7509_v36 = vadd.f32 %v7508_v21, %v7466_v52 }
 0x40a   : > { %7892 = vmatpush2.bf16.msra.mxu1 %v10739_v24  ;;  %v7472_v8 = vadd.f32 %v7471_v22, %v7429_v46 }
 0x40b   : > { %v7470_v40 = vadd.f32 %v7469_v23, %v7427_v38  ;;  %v7552_v43 = vadd.f32 %v7551_v48, %v7509_v36 }
 0x40c   : > { %7851 = vmatmul.mubr.bf16.vlgmr.msra.gmra.mxu0 %v14314_v25  ;;  %v7594_v14 = vpop.f32.mrf.mxu0  ;;  %v7515_v15 = vadd.f32 %v7514_v42, %v7472_v8 }
 0x40d   : > { %7894 = vmatmul.mubr.bf16.vlgmr.msra.gmra.mxu1 %v14315_v2  ;;  %v7637_v31 = vpop.f32.mrf.mxu1  ;;  %v7468_v2 = vadd.f32 %v7467_v61, %v7425_v56  ;;  %v7513_v63 = vadd.f32 %v7512_v33, %v7470_v40  ;;  %v7595_v28 = vadd.f32 %v7594_v14, %v7552_v43 }
 0x40e   : > { %v7596_v12 = vpop.f32.mrf.mxu0  ;;  %v7558_v59 = vadd.f32 %v7557_v6, %v7515_v15 }
 0x40f   : > { %v7639_v26 = vpop.f32.mrf.mxu1  ;;  %v7511_v37 = vadd.f32 %v7510_v49, %v7468_v2  ;;  %v7556_v20 = vadd.f32 %v7555_v3, %v7513_v63  ;;  %v7638_v61 = vadd.f32 %v7637_v31, %v7595_v28 }
 0x410   : > { %v7598_v11 = vpop.f32.mrf.mxu0 }
 0x411   : > { %v7641_v30 = vpop.f32.mrf.mxu1  ;;  %v7554_v5 = vadd.f32 %v7553_v53, %v7511_v37  ;;  %v7599_v41 = vadd.f32 %v7598_v11, %v7556_v20 }
 0x412   : > { %v7600_v60 = vpop.f32.mrf.mxu0 }
 0x413   : > { %v7643_v39 = vpop.f32.mrf.mxu1  ;;  %v7597_v19 = vadd.f32 %v7596_v12, %v7554_v5  ;;  %v7601_v23 = vadd.f32 %v7600_v60, %v7558_v59  ;;  %v7642_v22 = vadd.f32 %v7641_v30, %v7599_v41 }
 0x415   : > { %v7640_v17 = vadd.f32 %v7639_v26, %v7597_v19  ;;  %v7644_v33 = vadd.f32 %v7643_v39, %v7601_v23 }
 0x44c   : > { %v7680_v45 = vpop.f32.mrf.mxu0 }
 0x44d   : > { %v7723_v7 = vpop.f32.mrf.mxu1  ;;  %v7681_v21 = vadd.f32 %v7680_v45, %v7638_v61 }
 0x44e   : > { %v7682_v24 = vpop.f32.mrf.mxu0 }
 0x44f   : > { %v7725_v25 = vpop.f32.mrf.mxu1  ;;  %v7683_v48 = vadd.f32 %v7682_v24, %v7640_v17  ;;  %v7724_v53 = vadd.f32 %v7723_v7, %v7681_v21 }
 0x450   : > { %v7684_v51 = vpop.f32.mrf.mxu0 }
 0x451   : > { %v7727_v32 = vpop.f32.mrf.mxu1  ;;  %v7685_v42 = vadd.f32 %v7684_v51, %v7642_v22  ;;  %v7726_v10 = vadd.f32 %v7725_v25, %v7683_v48  ;;  %v8010_v22 = vlaneseq }
 0x452   : > { %v7686_v1 = vpop.f32.mrf.mxu0 }
 0x453   : > { %v7729_v18 = vpop.f32.mrf.mxu1  ;;  %v7687_v3 = vadd.f32 %v7686_v1, %v7644_v33  ;;  %v7728_v55 = vadd.f32 %v7727_v32, %v7685_v42 }
 0x455   : > { %v7730_v11 = vadd.f32 %v7729_v18, %v7687_v3 }
 0x48c   : > { %v7766_v13 = vpop.f32.mrf.mxu0 }
 0x48d   : > { %v7809_v58 = vpop.f32.mrf.mxu1  ;;  %v7767_v12 = vadd.f32 %v7766_v13, %v7724_v53 }
 0x48e   : > { %v7768_v49 = vpop.f32.mrf.mxu0 }
 0x48f   : > { %v7811_v0 = vpop.f32.mrf.mxu1  ;;  %v7769_v47 = vadd.f32 %v7768_v49, %v7726_v10  ;;  %v7810_v26 = vadd.f32 %v7809_v58, %v7767_v12  ;;  %v10750_v49 = vmov 1983009808   ;;  %v8011_v12 = vshrl.u32 %v8010_v22, 7 }
 0x490   : > { %v7770_v14 = vpop.f32.mrf.mxu0 }
 0x491   : > { %v7813_v29 = vpop.f32.mrf.mxu1  ;;  %v7771_v50 = vadd.f32 %v7770_v14, %v7728_v55  ;;  %v7812_v60 = vadd.f32 %v7811_v0, %v7769_v47  ;;  %v8008_v0 = vunpack.c.l.s4 %v10750_v49 }
 0x492   : > { %v7772_v6 = vpop.f32.mrf.mxu0 }
 0x493   : > { %v7815_v31 = vpop.f32.mrf.mxu1  ;;  %v7773_v30 = vadd.f32 %v7772_v6, %v7730_v11  ;;  %v7814_v44 = vadd.f32 %v7813_v29, %v7771_v50  ;;  %v8009_v3 = vunpack.c.0.s8 %v8008_v0 }
 0x495   : > { %v7816_v56 = vadd.f32 %v7815_v31, %v7773_v30 }
 0x4cc   : > { %v7852_v27 = vpop.f32.mrf.mxu0 }
 0x4cd   : > { %v7895_v16 = vpop.f32.mrf.mxu1  ;;  %v7853_v34 = vadd.f32 %v7852_v27, %v7810_v26  ;;  %v8012_v26 = vsub.s32 %v8009_v3, %v8011_v12 }
 0x4ce   : > { %v7854_v39 = vpop.f32.mrf.mxu0 }
 0x4cf   : > { %v7897_v54 = vpop.f32.mrf.mxu1  ;;  %v7855_v45 = vadd.f32 %v7854_v39, %v7812_v60  ;;  %v7896_v57 = vadd.f32 %v7895_v16, %v7853_v34  ;;  %v8013_v60 = vrot.slane %v8005_v4, %v8012_v26 }
 0x4d0   : > { %v7856_v7 = vpop.f32.mrf.mxu0 }
 0x4d1   : > { %v7899_v9 = vpop.f32.mrf.mxu1  ;;  %v7898_v52 = vadd.f32 %v7897_v54, %v7855_v45  ;;  %v7857_v38 = vadd.f32 %v7856_v7, %v7814_v44  ;;  %v7962_v40 = vmul.f32 %v7896_v57, %v7896_v57 }
 0x4d2   : > { %v7858_v24 = vpop.f32.mrf.mxu0 }
 0x4d3   : > { %v9194_v25 = vpack.c.bf16 %v7898_v52, %v7896_v57  ;;  %v7900_v2 = vadd.f32 %v7899_v9, %v7857_v38  ;;  %v7859_v46 = vadd.f32 %v7858_v24, %v7816_v56  ;;  %v7901_v36 = vpop.f32.mrf.mxu1  ;;  %v7963_v15 = vmul.f32 %v7898_v52, %v7898_v52 }
 0x4d5   : > { %7929 = vst [vmem:[%s13328_s20 + $0x8] sm:$0xff] %v9194_v25  ;;  %v7946_v37 = vadd.f32 %v7900_v2, %v7896_v57  ;;  %v7966_v51 = vmul.f32 %v7900_v2, %v7900_v2  ;;  %v7902_v32 = vadd.f32 %v7901_v36, %v7859_v46 }
 0x4d7   : > { %v7947_v8 = vrot.slane %v7946_v37, 4  ;;  %v7982_v43 = vadd.f32 %v7966_v51, %v7962_v40  ;;  %v9196_v63 = vpack.c.bf16 %v7902_v32, %v7900_v2  ;;  %v7953_v5 = vadd.f32 %v7902_v32, %v7898_v52 }
 0x4d8   : > { %v7967_v28 = vmul.f32 %v7902_v32, %v7902_v32 }
 0x4d9   : > { %v7948_v1 = vadd.f32 %v7947_v8, %v7946_v37  ;;  %v7983_v18 = vrot.slane %v7982_v43, 4  ;;  %7931 = vst [vmem:[%s13328_s20 + $0x18] sm:$0xff] %v9196_v63  ;;  %v7954_v20 = vrot.slane %v7953_v5, 4  ;;  %s9192_s20 = sshll.u32 %s14319_s13, 3 }
 0x4da   : > { %v7989_v19 = vadd.f32 %v7967_v28, %v7963_v15  ;;  %s191_s16 = scalar_lea.vmem %s14300_s3, %s9192_s20 }
 0x4db   : > { %v7949_v13 = vrot.slane %v7948_v1, 2  ;;  %v7984_v58 = vadd.f32 %v7983_v18, %v7982_v43  ;;  %v7955_v59 = vadd.f32 %v7954_v20, %v7953_v5 }
 0x4dc   : > { %v7990_v61 = vrot.slane %v7989_v19, 4 }
 0x4dd   : > { %v7985_v41 = vrot.slane %v7984_v58, 2  ;;  %v7956_v17 = vrot.slane %v7955_v59, 2  ;;  %v7950_v23 = vadd.f32 %v7949_v13, %v7948_v1 }
 0x4de   : > { %v7991_v21 = vadd.f32 %v7990_v61, %v7989_v19 }
 0x4df   : > { %v7986_v48 = vadd.f32 %v7985_v41, %v7984_v58  ;;  %v7957_v33 = vadd.f32 %v7956_v17, %v7955_v59  ;;  %v7951_v14 = vrot.slane %v7950_v23, 1 }
 0x4e0   : > { %v7992_v53 = vrot.slane %v7991_v21, 2 }
 0x4e1   : > { %v7987_v42 = vrot.slane %v7986_v48, 1  ;;  %v7958_v29 = vrot.slane %v7957_v33, 1  ;;  %v7952_v6 = vadd.f32 %v7951_v14, %v7950_v23 }
 0x4e2   : > { %v7993_v10 = vadd.f32 %v7992_v53, %v7991_v21 }
 0x4e3   : > { %v7988_v55 = vadd.f32 %v7987_v42, %v7986_v48  ;;  %v7959_v31 = vadd.f32 %v7958_v29, %v7957_v33 }
 0x4e4   : > { %v7994_v47 = vrot.slane %v7993_v10, 1 }
 0x4e5   : > { %v7999_v50 = vsel %vm7996_vm0, %v7952_v6, %v7988_v55 }
 0x4e6   : > { %v7995_v11 = vadd.f32 %v7994_v47, %v7993_v10 }
 0x4e8   : > { %v8000_v27 = vsel %vm7996_vm0, %v7959_v31, %v7995_v11 }
 0x4e9   : > { %v8006_v16 = vcombine.low %v7999_v50, %v8000_v27 }
 0x4eb   : > { %v8020_v30 = vrot.slane %v8006_v16, %v8012_v26 }
 0x4ed   : > { %v8021_v34 = vcombine.low %v8013_v60, %v8020_v30 }
 0x4ef   : > { %8023 = vst [vmem:[%s191_s16] sm:$0xff] %v8021_v34 }
 0x4f0 PF: > { %s14_s12 = sadd.s32 1, %s10748_s12  }
 0x4f1   : > { %p11_p5 = scmp.ge.s32.totalorder %s14_s12, 4  }
 0x4f3   :  { %13 = sbr.rel (!%p11_p5) target bundleno = 1 (0x1), region = 70 }

</bundles_post_ra>
